<compile_context>
chip_gen: v6e
topology: v6e:2x2x1
jax: 0.10.0
libtpu: 0.0.40
codegen_flags: <defaults>
</compile_context>

<pallas_src>
import functools

import jax
import jax.numpy as jnp
from jax.experimental import pallas as pl
from jax.experimental.pallas import tpu as pltpu


# ----------------------------------------------------------------------------
# Helpers
# ----------------------------------------------------------------------------
def _round_up(x, m):
    return (x + m - 1) // m * m


def _vmem_limit_bytes():
    """Generation-aware VMEM cap (~96 MiB on 128-MiB parts, ~48 MiB on v7x)."""
    cap = 64 * 1024 * 1024
    try:
        cap = int(pltpu.get_tpu_info().vmem_capacity_bytes)
    except Exception:
        pass
    return min(cap * 3 // 4, 96 * 1024 * 1024)


# ----------------------------------------------------------------------------
# Fused DoubleConv kernel: (3x3 conv -> BN(train) -> ReLU) * 2 in one invocation
# ----------------------------------------------------------------------------
def _bn_relu(acc, gamma, beta, eps):
    """Training-mode BatchNorm (single-pass sum / sum-of-squares stats) + ReLU."""
    inv_m = 1.0 / acc.shape[0]                          # static python float
    s1 = jnp.sum(acc, axis=0, keepdims=True)            # (1, C)
    s2 = jnp.sum(acc * acc, axis=0, keepdims=True)      # (1, C)
    mean = s1 * inv_m
    var = s2 * inv_m - mean * mean
    inv = jax.lax.rsqrt(var + eps)                      # EUP slot
    return jnp.maximum((acc - mean) * (inv * gamma) + beta, 0.0)


def _double_conv_kernel(x_ref, w1_ref, g1_ref, be1_ref, w2_ref, g2_ref, be2_ref,
                        o_ref, mid_ref, *, H, W, eps):
    # x_ref  : (N, H+2, W+2, C1)   bf16  spatially pre-padded concat activation
    # w1_ref : (9, C1, Cmid)       bf16  conv1 taps, (dy, dx) row-major
    # w2_ref : (9, Cmid, Cout_p)   bf16  conv2 taps (real Cmid rows, padded Cout cols)
    # g*/be* : (1, C)              f32   BN affine params
    # o_ref  : (N*H*W, Cout_p)     f32   lane-dense output
    # mid_ref: (N, H+2, W+2, Cmid) f32   VMEM scratch (conv1 output, re-padded)
    N, _, _, C1 = x_ref.shape
    Cmid = mid_ref.shape[3]
    Cout_p = o_ref.shape[1]
    M = N * H * W

    # ---- conv1: 9-tap shifted matmul accumulation (no HBM im2col) ----
    acc1 = jnp.zeros((M, Cmid), jnp.float32)
    for dx in range(3):
        xc = x_ref[:, :, dx:dx + W, :]                  # one sublane-shifted load per dx
        for dy in range(3):
            patch = xc[:, dy:dy + H].reshape(M, C1)     # cheap leading-dim slice
            acc1 = acc1 + jnp.dot(patch, w1_ref[dy * 3 + dx],
                                  preferred_element_type=jnp.float32)

    y1 = _bn_relu(acc1, g1_ref[...], be1_ref[...], eps)  # (M, Cmid) f32

    # Re-pad conv1's output spatially inside VMEM so conv2's taps see zero borders.
    mid_ref[...] = jnp.zeros_like(mid_ref)
    mid_ref[:, 1:H + 1, 1:W + 1, :] = y1.reshape(N, H, W, Cmid)

    # ---- conv2: 9-tap shifted matmul over the REAL Cmid channels ----
    acc2 = jnp.zeros((M, Cout_p), jnp.float32)
    for dx in range(3):
        mc = mid_ref[:, :, dx:dx + W, :]
        for dy in range(3):
            patch = mc[:, dy:dy + H].reshape(M, Cmid).astype(jnp.bfloat16)
            acc2 = acc2 + jnp.dot(patch, w2_ref[dy * 3 + dx],
                                  preferred_element_type=jnp.float32)

    o_ref[...] = _bn_relu(acc2, g2_ref[...], be2_ref[...], eps).astype(o_ref.dtype)


# ----------------------------------------------------------------------------
# Wrapper: one pallas_call for the whole DoubleConv
# ----------------------------------------------------------------------------
def double_conv_fused(x_nhwc, params, *, eps=1e-5, out_dtype=jnp.float32):
    N, H, W, C1 = x_nhwc.shape
    w1, w2 = params["w1"], params["w2"]
    kh, kw, cin1, cmid = w1.shape
    _, _, cmid2, cout = w2.shape
    assert (kh, kw) == (3, 3) and cin1 == C1 and cmid2 == cmid
    M = N * H * W
    assert M % 8 == 0, f"N*H*W={M} must be a multiple of 8"

    # Lane-dense output: pad conv2's Cout (only) to a multiple of 128.  Padded
    # gamma/beta are zero so padded channels are exactly 0.  conv2's Cin (=cmid)
    # is deliberately NOT padded.
    cout_p = _round_up(cout, 128)
    pad = cout_p - cout
    w2p = jnp.pad(w2, ((0, 0), (0, 0), (0, 0), (0, pad))) if pad else w2
    g2 = jnp.pad(params["g2"], (0, pad)) if pad else params["g2"]
    be2 = jnp.pad(params["be2"], (0, pad)) if pad else params["be2"]

    # VMEM budget check: everything is resident in a single grid step.
    vmem_limit = _vmem_limit_bytes()
    est = (N * (H + 2) * _round_up(W + 2, 16) * _round_up(C1, 128) * 2        # x (bf16)
           + 9 * C1 * _round_up(cmid, 128) * 2                                # w1
           + 9 * _round_up(cmid, 16) * cout_p * 2                             # w2
           + N * (H + 2) * _round_up(W + 2, 8) * _round_up(cmid, 128) * 4     # mid scratch
           + M * (_round_up(cmid, 128) + 2 * cout_p) * 4)                     # acc1/acc2/out
    if est * 3 // 2 > vmem_limit:
        # TODO(synk): M-tiled two-pass BN variant for large images.
        raise NotImplementedError(
            f"fused DoubleConv needs ~{est} B of VMEM (limit {vmem_limit})")

    # Spatial pre-pad once (3x3 / pad=1); bf16 MXU inputs, f32 accumulation.
    xp = jnp.pad(x_nhwc, ((0, 0), (1, 1), (1, 1), (0, 0))).astype(jnp.bfloat16)
    w1_t = w1.reshape(9, C1, cmid).astype(jnp.bfloat16)
    w2_t = w2p.reshape(9, cmid, cout_p).astype(jnp.bfloat16)

    out = pl.pallas_call(
        functools.partial(_double_conv_kernel, H=H, W=W, eps=eps),
        out_shape=jax.ShapeDtypeStruct((M, cout_p), jnp.float32),
        grid_spec=pltpu.PrefetchScalarGridSpec(
            num_scalar_prefetch=0,
            grid=(1,),
            in_specs=[
                pl.BlockSpec((N, H + 2, W + 2, C1), lambda i: (0, 0, 0, 0)),
                pl.BlockSpec((9, C1, cmid), lambda i: (0, 0, 0)),
                pl.BlockSpec((1, cmid), lambda i: (0, 0)),
                pl.BlockSpec((1, cmid), lambda i: (0, 0)),
                pl.BlockSpec((9, cmid, cout_p), lambda i: (0, 0, 0)),
                pl.BlockSpec((1, cout_p), lambda i: (0, 0)),
                pl.BlockSpec((1, cout_p), lambda i: (0, 0)),
            ],
            out_specs=pl.BlockSpec((M, cout_p), lambda i: (0, 0)),
            scratch_shapes=[pltpu.VMEM((N, H + 2, W + 2, cmid), jnp.float32)],
        ),
        compiler_params=pltpu.CompilerParams(
            dimension_semantics=("arbitrary",),
            vmem_limit_bytes=vmem_limit,
        ),
    )(xp, w1_t,
      params["g1"].reshape(1, cmid).astype(jnp.float32),
      params["be1"].reshape(1, cmid).astype(jnp.float32),
      w2_t,
      g2.reshape(1, cout_p).astype(jnp.float32),
      be2.reshape(1, cout_p).astype(jnp.float32))

    out = out.reshape(N, H, W, cout_p)
    if pad:
        out = out[..., :cout]            # drop lane padding once, at the very end
    return out.astype(out_dtype)


# ----------------------------------------------------------------------------
# Layout glue (plain JAX)
# ----------------------------------------------------------------------------
def upsample2x_bilinear_ac(x_nhwc):
    """Bilinear x2 upsample, align_corners=True (matches nn.Upsample)."""
    N, H, W, C = x_nhwc.shape
    Ho, Wo = 2 * H, 2 * W

    def coords(n_in, n_out):
        if n_in == 1:
            return jnp.zeros((n_out,), jnp.float32)
        return jnp.arange(n_out, dtype=jnp.float32) * (n_in - 1) / (n_out - 1)

    ys, xs = coords(H, Ho), coords(W, Wo)
    y0 = jnp.floor(ys).astype(jnp.int32)
    x0 = jnp.floor(xs).astype(jnp.int32)
    y1 = jnp.minimum(y0 + 1, H - 1)
    x1 = jnp.minimum(x0 + 1, W - 1)
    wy = (ys - y0)[None, :, None, None]
    wx = (xs - x0)[None, None, :, None]

    def g(yy, xx):
        return x_nhwc[:, yy][:, :, xx]

    return (g(y0, x0) * (1 - wy) * (1 - wx) + g(y0, x1) * (1 - wy) * wx
            + g(y1, x0) * wy * (1 - wx) + g(y1, x1) * wy * wx)


def _upsample_concat(x1_nhwc, x2_nhwc):
    """nn.Upsample(x1) -> F.pad to x2's spatial size -> torch.cat([x2, x1], dim=1)."""
    x1 = upsample2x_bilinear_ac(x1_nhwc)
    dy = x2_nhwc.shape[1] - x1.shape[1]
    dx = x2_nhwc.shape[2] - x1.shape[2]
    if dy or dx:
        x1 = jnp.pad(x1, ((0, 0), (dy // 2, dy - dy // 2),
                          (dx // 2, dx - dx // 2), (0, 0)))
    return jnp.concatenate([x2_nhwc, x1], axis=-1)


# ----------------------------------------------------------------------------
# Parameters (deterministic synthetic init; shapes follow the torch module).
# b1/b2 are kept for module fidelity but are mathematically cancelled by
# training-mode BN, so the kernel does not consume them.
# ----------------------------------------------------------------------------
def _conv_params(key, cin, cout, k=3):
    kw_, kb_ = jax.random.split(key)
    bound = 1.0 / jnp.sqrt(float(cin * k * k))
    w = jax.random.uniform(kw_, (k, k, cin, cout), jnp.float32, -bound, bound)
    b = jax.random.uniform(kb_, (cout,), jnp.float32, -bound, bound)
    return w, b


def init_up_params(key, in_channels, out_channels):
    """Up(in_channels, out_channels, bilinear=True): DoubleConv(in, out, in // 2)."""
    mid = in_channels // 2
    k1, k2 = jax.random.split(key)
    w1, b1 = _conv_params(k1, in_channels, mid)
    w2, b2 = _conv_params(k2, mid, out_channels)
    return dict(
        w1=w1, b1=b1, g1=jnp.ones((mid,), jnp.float32),
        be1=jnp.zeros((mid,), jnp.float32),
        w2=w2, b2=b2, g2=jnp.ones((out_channels,), jnp.float32),
        be2=jnp.zeros((out_channels,), jnp.float32))


# ----------------------------------------------------------------------------
# Up.forward (bilinear=True branch)
# ----------------------------------------------------------------------------
def up_forward(x1_nchw, x2_nchw, params):
    x1 = jnp.transpose(x1_nchw, (0, 2, 3, 1))     # NCHW -> NHWC (boundary glue)
    x2 = jnp.transpose(x2_nchw, (0, 2, 3, 1))
    x = _upsample_concat(x1, x2)
    y = double_conv_fused(x, params, out_dtype=jnp.float32)
    return jnp.transpose(y, (0, 3, 1, 2))         # NHWC -> NCHW


# Pure-JAX f32 reference (includes the conv bias, which training-mode BN cancels).
def _conv_bn_relu_ref(x, w, b, g, be, eps=1e-5):
    y = jax.lax.conv_general_dilated(
        x, w, window_strides=(1, 1), padding="SAME",
        dimension_numbers=("NHWC", "HWIO", "NHWC"),
        precision=jax.lax.Precision.HIGHEST) + b
    mean = jnp.mean(y, axis=(0, 1, 2), keepdims=True)
    var = jnp.mean((y - mean) ** 2, axis=(0, 1, 2), keepdims=True)
    return jnp.maximum((y - mean) * jax.lax.rsqrt(var + eps) * g + be, 0.0)


def up_forward_ref(x1_nchw, x2_nchw, params):
    x1 = jnp.transpose(x1_nchw, (0, 2, 3, 1))
    x2 = jnp.transpose(x2_nchw, (0, 2, 3, 1))
    x = _upsample_concat(x1, x2)
    y = _conv_bn_relu_ref(x, params["w1"], params["b1"], params["g1"], params["be1"])
    y = _conv_bn_relu_ref(y, params["w2"], params["b2"], params["g2"], params["be2"])
    return jnp.transpose(y, (0, 3, 1, 2))


# ----------------------------------------------------------------------------
if __name__ == "__main__":
    key = jax.random.PRNGKey(0)
    kp, kx1, kx2 = jax.random.split(key, 3)

    in_channels, out_channels = 128, 64           # Up(128, 64), bilinear=True
    params = init_up_params(kp, in_channels, out_channels)

    # x1: deep feature map, x2: skip connection (both in_channels // 2 channels).
    x1 = jax.random.normal(kx1, (2, in_channels // 2, 8, 8), jnp.float32)
    x2 = jax.random.normal(kx2, (2, in_channels // 2, 16, 16), jnp.float32)

    fwd = jax.jit(up_forward)
    out = jax.block_until_ready(fwd(x1, x2, params))

    assert out.shape == (2, out_channels, 16, 16)
    assert bool(jnp.all(jnp.isfinite(out)))
    assert bool(jnp.all(out >= 0.0))              # ReLU output range

    # Correctness check vs a pure-JAX f32 reference (kernel uses bf16 MXU inputs).
    ref = jax.block_until_ready(jax.jit(up_forward_ref)(x1, x2, params))
    max_err = float(jnp.max(jnp.abs(out - ref)))
    assert max_err < 0.15, f"max abs error vs f32 reference: {max_err}"

    print("KERNEL_OK")
</pallas_src>

<mosaic_0001>
module attributes {stable_mosaic.version = 11 : i64} {
  func.func @_double_conv_kernel(%arg0: i32, %arg1: memref<2x18x18x128xbf16, #tpu.memory_space<vmem>>, %arg2: memref<9x128x64xbf16, #tpu.memory_space<vmem>>, %arg3: memref<1x64xf32, #tpu.memory_space<vmem>>, %arg4: memref<1x64xf32, #tpu.memory_space<vmem>>, %arg5: memref<9x64x128xbf16, #tpu.memory_space<vmem>>, %arg6: memref<1x128xf32, #tpu.memory_space<vmem>>, %arg7: memref<1x128xf32, #tpu.memory_space<vmem>>, %arg8: memref<512x128xf32, #tpu.memory_space<vmem>>, %arg9: memref<2x18x18x64xf32, #tpu.memory_space<vmem>>) attributes {dimension_semantics = [#tpu.dimension_semantics<arbitrary>], iteration_bounds = array<i64: 1>, scalar_prefetch = 0 : i64, scratch_operands = 1 : i64, tpu.core_type = #tpu.core_type<tc>, window_params = [{pipeline_mode = #tpu.pipeline_mode<synchronous>, transform_indices = @transform_0, window_bounds = array<i64: 2, 18, 18, 128>}, {pipeline_mode = #tpu.pipeline_mode<synchronous>, transform_indices = @transform_1, window_bounds = array<i64: 9, 128, 64>}, {pipeline_mode = #tpu.pipeline_mode<synchronous>, transform_indices = @transform_2, window_bounds = array<i64: 1, 64>}, {pipeline_mode = #tpu.pipeline_mode<synchronous>, transform_indices = @transform_3, window_bounds = array<i64: 1, 64>}, {pipeline_mode = #tpu.pipeline_mode<synchronous>, transform_indices = @transform_4, window_bounds = array<i64: 9, 64, 128>}, {pipeline_mode = #tpu.pipeline_mode<synchronous>, transform_indices = @transform_5, window_bounds = array<i64: 1, 128>}, {pipeline_mode = #tpu.pipeline_mode<synchronous>, transform_indices = @transform_6, window_bounds = array<i64: 1, 128>}, {pipeline_mode = #tpu.pipeline_mode<synchronous>, transform_indices = @transform_7, window_bounds = array<i64: 512, 128>}]} {
    %cst = arith.constant 0.000000e+00 : f32
    %0 = vector.broadcast %cst : f32 to vector<512x64xf32>
    %c0 = arith.constant 0 : index
    %c0_0 = arith.constant 0 : index
    %c0_1 = arith.constant 0 : index
    %c0_2 = arith.constant 0 : index
    %1 = vector.load %arg1[%c0, %c0_0, %c0_1, %c0_2] : memref<2x18x18x128xbf16, #tpu.memory_space<vmem>>, vector<2x18x16x128xbf16>
    %2 = vector.extract_strided_slice %1 {offsets = [0, 0, 0, 0], sizes = [2, 16, 16, 128], strides = [1, 1, 1, 1]} : vector<2x18x16x128xbf16> to vector<2x16x16x128xbf16>
    %3 = vector.shape_cast %2 : vector<2x16x16x128xbf16> to vector<512x128xbf16>
    %c0_3 = arith.constant 0 : index
    %c0_4 = arith.constant 0 : index
    %c0_5 = arith.constant 0 : index
    %4 = vector.load %arg2[%c0_3, %c0_4, %c0_5] : memref<9x128x64xbf16, #tpu.memory_space<vmem>>, vector<1x128x64xbf16>
    %5 = vector.shape_cast %4 : vector<1x128x64xbf16> to vector<128x64xbf16>
    %cst_6 = arith.constant dense<0.000000e+00> : vector<512x64xf32>
    %6 = tpu.matmul %3, %5, %cst_6 {dimension_numbers = #tpu.dot_dimension_numbers<[1], [0], [0], [1], [0, 0, 1, 1], [], []>} : vector<512x128xbf16>, vector<128x64xbf16>, vector<512x64xf32> -> vector<512x64xf32>
    %7 = arith.addf %0, %6 : vector<512x64xf32>
    %8 = vector.extract_strided_slice %1 {offsets = [0, 1, 0, 0], sizes = [2, 16, 16, 128], strides = [1, 1, 1, 1]} : vector<2x18x16x128xbf16> to vector<2x16x16x128xbf16>
    %9 = vector.shape_cast %8 : vector<2x16x16x128xbf16> to vector<512x128xbf16>
    %c3 = arith.constant 3 : index
    %c0_7 = arith.constant 0 : index
    %c0_8 = arith.constant 0 : index
    %10 = vector.load %arg2[%c3, %c0_7, %c0_8] : memref<9x128x64xbf16, #tpu.memory_space<vmem>>, vector<1x128x64xbf16>
    %11 = vector.shape_cast %10 : vector<1x128x64xbf16> to vector<128x64xbf16>
    %cst_9 = arith.constant dense<0.000000e+00> : vector<512x64xf32>
    %12 = tpu.matmul %9, %11, %cst_9 {dimension_numbers = #tpu.dot_dimension_numbers<[1], [0], [0], [1], [0, 0, 1, 1], [], []>} : vector<512x128xbf16>, vector<128x64xbf16>, vector<512x64xf32> -> vector<512x64xf32>
    %13 = arith.addf %7, %12 : vector<512x64xf32>
    %14 = vector.extract_strided_slice %1 {offsets = [0, 2, 0, 0], sizes = [2, 16, 16, 128], strides = [1, 1, 1, 1]} : vector<2x18x16x128xbf16> to vector<2x16x16x128xbf16>
    %15 = vector.shape_cast %14 : vector<2x16x16x128xbf16> to vector<512x128xbf16>
    %c6 = arith.constant 6 : index
    %c0_10 = arith.constant 0 : index
    %c0_11 = arith.constant 0 : index
    %16 = vector.load %arg2[%c6, %c0_10, %c0_11] : memref<9x128x64xbf16, #tpu.memory_space<vmem>>, vector<1x128x64xbf16>
    %17 = vector.shape_cast %16 : vector<1x128x64xbf16> to vector<128x64xbf16>
    %cst_12 = arith.constant dense<0.000000e+00> : vector<512x64xf32>
    %18 = tpu.matmul %15, %17, %cst_12 {dimension_numbers = #tpu.dot_dimension_numbers<[1], [0], [0], [1], [0, 0, 1, 1], [], []>} : vector<512x128xbf16>, vector<128x64xbf16>, vector<512x64xf32> -> vector<512x64xf32>
    %19 = arith.addf %13, %18 : vector<512x64xf32>
    %c0_13 = arith.constant 0 : index
    %c0_14 = arith.constant 0 : index
    %c1 = arith.constant 1 : index
    %c0_15 = arith.constant 0 : index
    %20 = vector.load %arg1[%c0_13, %c0_14, %c1, %c0_15] : memref<2x18x18x128xbf16, #tpu.memory_space<vmem>>, vector<2x18x16x128xbf16>
    %21 = vector.extract_strided_slice %20 {offsets = [0, 0, 0, 0], sizes = [2, 16, 16, 128], strides = [1, 1, 1, 1]} : vector<2x18x16x128xbf16> to vector<2x16x16x128xbf16>
    %22 = vector.shape_cast %21 : vector<2x16x16x128xbf16> to vector<512x128xbf16>
    %c1_16 = arith.constant 1 : index
    %c0_17 = arith.constant 0 : index
    %c0_18 = arith.constant 0 : index
    %23 = vector.load %arg2[%c1_16, %c0_17, %c0_18] : memref<9x128x64xbf16, #tpu.memory_space<vmem>>, vector<1x128x64xbf16>
    %24 = vector.shape_cast %23 : vector<1x128x64xbf16> to vector<128x64xbf16>
    %cst_19 = arith.constant dense<0.000000e+00> : vector<512x64xf32>
    %25 = tpu.matmul %22, %24, %cst_19 {dimension_numbers = #tpu.dot_dimension_numbers<[1], [0], [0], [1], [0, 0, 1, 1], [], []>} : vector<512x128xbf16>, vector<128x64xbf16>, vector<512x64xf32> -> vector<512x64xf32>
    %26 = arith.addf %19, %25 : vector<512x64xf32>
    %27 = vector.extract_strided_slice %20 {offsets = [0, 1, 0, 0], sizes = [2, 16, 16, 128], strides = [1, 1, 1, 1]} : vector<2x18x16x128xbf16> to vector<2x16x16x128xbf16>
    %28 = vector.shape_cast %27 : vector<2x16x16x128xbf16> to vector<512x128xbf16>
    %c4 = arith.constant 4 : index
    %c0_20 = arith.constant 0 : index
    %c0_21 = arith.constant 0 : index
    %29 = vector.load %arg2[%c4, %c0_20, %c0_21] : memref<9x128x64xbf16, #tpu.memory_space<vmem>>, vector<1x128x64xbf16>
    %30 = vector.shape_cast %29 : vector<1x128x64xbf16> to vector<128x64xbf16>
    %cst_22 = arith.constant dense<0.000000e+00> : vector<512x64xf32>
    %31 = tpu.matmul %28, %30, %cst_22 {dimension_numbers = #tpu.dot_dimension_numbers<[1], [0], [0], [1], [0, 0, 1, 1], [], []>} : vector<512x128xbf16>, vector<128x64xbf16>, vector<512x64xf32> -> vector<512x64xf32>
    %32 = arith.addf %26, %31 : vector<512x64xf32>
    %33 = vector.extract_strided_slice %20 {offsets = [0, 2, 0, 0], sizes = [2, 16, 16, 128], strides = [1, 1, 1, 1]} : vector<2x18x16x128xbf16> to vector<2x16x16x128xbf16>
    %34 = vector.shape_cast %33 : vector<2x16x16x128xbf16> to vector<512x128xbf16>
    %c7 = arith.constant 7 : index
    %c0_23 = arith.constant 0 : index
    %c0_24 = arith.constant 0 : index
    %35 = vector.load %arg2[%c7, %c0_23, %c0_24] : memref<9x128x64xbf16, #tpu.memory_space<vmem>>, vector<1x128x64xbf16>
    %36 = vector.shape_cast %35 : vector<1x128x64xbf16> to vector<128x64xbf16>
    %cst_25 = arith.constant dense<0.000000e+00> : vector<512x64xf32>
    %37 = tpu.matmul %34, %36, %cst_25 {dimension_numbers = #tpu.dot_dimension_numbers<[1], [0], [0], [1], [0, 0, 1, 1], [], []>} : vector<512x128xbf16>, vector<128x64xbf16>, vector<512x64xf32> -> vector<512x64xf32>
    %38 = arith.addf %32, %37 : vector<512x64xf32>
    %c0_26 = arith.constant 0 : index
    %c0_27 = arith.constant 0 : index
    %c2 = arith.constant 2 : index
    %c0_28 = arith.constant 0 : index
    %39 = vector.load %arg1[%c0_26, %c0_27, %c2, %c0_28] : memref<2x18x18x128xbf16, #tpu.memory_space<vmem>>, vector<2x18x16x128xbf16>
    %40 = vector.extract_strided_slice %39 {offsets = [0, 0, 0, 0], sizes = [2, 16, 16, 128], strides = [1, 1, 1, 1]} : vector<2x18x16x128xbf16> to vector<2x16x16x128xbf16>
    %41 = vector.shape_cast %40 : vector<2x16x16x128xbf16> to vector<512x128xbf16>
    %c2_29 = arith.constant 2 : index
    %c0_30 = arith.constant 0 : index
    %c0_31 = arith.constant 0 : index
    %42 = vector.load %arg2[%c2_29, %c0_30, %c0_31] : memref<9x128x64xbf16, #tpu.memory_space<vmem>>, vector<1x128x64xbf16>
    %43 = vector.shape_cast %42 : vector<1x128x64xbf16> to vector<128x64xbf16>
    %cst_32 = arith.constant dense<0.000000e+00> : vector<512x64xf32>
    %44 = tpu.matmul %41, %43, %cst_32 {dimension_numbers = #tpu.dot_dimension_numbers<[1], [0], [0], [1], [0, 0, 1, 1], [], []>} : vector<512x128xbf16>, vector<128x64xbf16>, vector<512x64xf32> -> vector<512x64xf32>
    %45 = arith.addf %38, %44 : vector<512x64xf32>
    %46 = vector.extract_strided_slice %39 {offsets = [0, 1, 0, 0], sizes = [2, 16, 16, 128], strides = [1, 1, 1, 1]} : vector<2x18x16x128xbf16> to vector<2x16x16x128xbf16>
    %47 = vector.shape_cast %46 : vector<2x16x16x128xbf16> to vector<512x128xbf16>
    %c5 = arith.constant 5 : index
    %c0_33 = arith.constant 0 : index
    %c0_34 = arith.constant 0 : index
    %48 = vector.load %arg2[%c5, %c0_33, %c0_34] : memref<9x128x64xbf16, #tpu.memory_space<vmem>>, vector<1x128x64xbf16>
    %49 = vector.shape_cast %48 : vector<1x128x64xbf16> to vector<128x64xbf16>
    %cst_35 = arith.constant dense<0.000000e+00> : vector<512x64xf32>
    %50 = tpu.matmul %47, %49, %cst_35 {dimension_numbers = #tpu.dot_dimension_numbers<[1], [0], [0], [1], [0, 0, 1, 1], [], []>} : vector<512x128xbf16>, vector<128x64xbf16>, vector<512x64xf32> -> vector<512x64xf32>
    %51 = arith.addf %45, %50 : vector<512x64xf32>
    %52 = vector.extract_strided_slice %39 {offsets = [0, 2, 0, 0], sizes = [2, 16, 16, 128], strides = [1, 1, 1, 1]} : vector<2x18x16x128xbf16> to vector<2x16x16x128xbf16>
    %53 = vector.shape_cast %52 : vector<2x16x16x128xbf16> to vector<512x128xbf16>
    %c8 = arith.constant 8 : index
    %c0_36 = arith.constant 0 : index
    %c0_37 = arith.constant 0 : index
    %54 = vector.load %arg2[%c8, %c0_36, %c0_37] : memref<9x128x64xbf16, #tpu.memory_space<vmem>>, vector<1x128x64xbf16>
    %55 = vector.shape_cast %54 : vector<1x128x64xbf16> to vector<128x64xbf16>
    %cst_38 = arith.constant dense<0.000000e+00> : vector<512x64xf32>
    %56 = tpu.matmul %53, %55, %cst_38 {dimension_numbers = #tpu.dot_dimension_numbers<[1], [0], [0], [1], [0, 0, 1, 1], [], []>} : vector<512x128xbf16>, vector<128x64xbf16>, vector<512x64xf32> -> vector<512x64xf32>
    %57 = arith.addf %51, %56 : vector<512x64xf32>
    %c0_39 = arith.constant 0 : index
    %c0_40 = arith.constant 0 : index
    %58 = vector.load %arg3[%c0_39, %c0_40] : memref<1x64xf32, #tpu.memory_space<vmem>>, vector<1x64xf32>
    %c0_41 = arith.constant 0 : index
    %c0_42 = arith.constant 0 : index
    %59 = vector.load %arg4[%c0_41, %c0_42] : memref<1x64xf32, #tpu.memory_space<vmem>>, vector<1x64xf32>
    %cst_43 = arith.constant dense<0.000000e+00> : vector<64xf32>
    %60 = vector.multi_reduction <add>, %57, %cst_43 [0] : vector<512x64xf32> to vector<64xf32>
    %61 = vector.shape_cast %60 : vector<64xf32> to vector<1x64xf32>
    %62 = arith.mulf %57, %57 : vector<512x64xf32>
    %cst_44 = arith.constant dense<0.000000e+00> : vector<64xf32>
    %63 = vector.multi_reduction <add>, %62, %cst_44 [0] : vector<512x64xf32> to vector<64xf32>
    %64 = vector.shape_cast %63 : vector<64xf32> to vector<1x64xf32>
    %cst_45 = arith.constant 0.001953125 : f32
    %65 = vector.broadcast %cst_45 : f32 to vector<1x64xf32>
    %66 = arith.mulf %61, %65 : vector<1x64xf32>
    %cst_46 = arith.constant 0.001953125 : f32
    %67 = vector.broadcast %cst_46 : f32 to vector<1x64xf32>
    %68 = arith.mulf %64, %67 : vector<1x64xf32>
    %69 = arith.mulf %66, %66 : vector<1x64xf32>
    %70 = arith.subf %68, %69 : vector<1x64xf32>
    %cst_47 = arith.constant 9.99999974E-6 : f32
    %71 = vector.broadcast %cst_47 : f32 to vector<1x64xf32>
    %72 = arith.addf %70, %71 : vector<1x64xf32>
    %73 = math.rsqrt %72 : vector<1x64xf32>
    %74 = vector.broadcast %66 : vector<1x64xf32> to vector<512x64xf32>
    %75 = arith.subf %57, %74 : vector<512x64xf32>
    %76 = arith.mulf %73, %58 : vector<1x64xf32>
    %77 = vector.broadcast %76 : vector<1x64xf32> to vector<512x64xf32>
    %78 = arith.mulf %75, %77 : vector<512x64xf32>
    %79 = vector.broadcast %59 : vector<1x64xf32> to vector<512x64xf32>
    %80 = arith.addf %78, %79 : vector<512x64xf32>
    %cst_48 = arith.constant 0.000000e+00 : f32
    %81 = vector.broadcast %cst_48 : f32 to vector<512x64xf32>
    %82 = arith.maximumf %80, %81 : vector<512x64xf32>
    %cst_49 = arith.constant 0.000000e+00 : f32
    %83 = vector.broadcast %cst_49 : f32 to vector<2x18x18x64xf32>
    %c0_50 = arith.constant 0 : index
    %c0_51 = arith.constant 0 : index
    %c0_52 = arith.constant 0 : index
    %c0_53 = arith.constant 0 : index
    %84 = vector.load %arg9[%c0_50, %c0_51, %c0_52, %c0_53] : memref<2x18x18x64xf32, #tpu.memory_space<vmem>>, vector<2x18x18x64xf32>
    tpu.vector_store %arg9[%c0_50, %c0_51, %c0_52, %c0_53], %83 {strides = array<i32>} : memref<2x18x18x64xf32, #tpu.memory_space<vmem>>, vector<2x18x18x64xf32>,
    %85 = vector.shape_cast %82 : vector<512x64xf32> to vector<2x16x16x64xf32>
    %c0_54 = arith.constant 0 : index
    %c1_55 = arith.constant 1 : index
    %c1_56 = arith.constant 1 : index
    %c0_57 = arith.constant 0 : index
    %86 = vector.load %arg9[%c0_54, %c1_55, %c1_56, %c0_57] : memref<2x18x18x64xf32, #tpu.memory_space<vmem>>, vector<2x16x16x64xf32>
    tpu.vector_store %arg9[%c0_54, %c1_55, %c1_56, %c0_57], %85 {strides = array<i32>} : memref<2x18x18x64xf32, #tpu.memory_space<vmem>>, vector<2x16x16x64xf32>,
    %cst_58 = arith.constant 0.000000e+00 : f32
    %87 = vector.broadcast %cst_58 : f32 to vector<512x128xf32>
    %c0_59 = arith.constant 0 : index
    %c0_60 = arith.constant 0 : index
    %c0_61 = arith.constant 0 : index
    %c0_62 = arith.constant 0 : index
    %88 = vector.load %arg9[%c0_59, %c0_60, %c0_61, %c0_62] : memref<2x18x18x64xf32, #tpu.memory_space<vmem>>, vector<2x18x16x64xf32>
    %89 = vector.extract_strided_slice %88 {offsets = [0, 0, 0, 0], sizes = [2, 16, 16, 64], strides = [1, 1, 1, 1]} : vector<2x18x16x64xf32> to vector<2x16x16x64xf32>
    %90 = vector.shape_cast %89 : vector<2x16x16x64xf32> to vector<512x64xf32>
    %91 = arith.truncf %90 : vector<512x64xf32> to vector<512x64xbf16>
    %c0_63 = arith.constant 0 : index
    %c0_64 = arith.constant 0 : index
    %c0_65 = arith.constant 0 : index
    %92 = vector.load %arg5[%c0_63, %c0_64, %c0_65] : memref<9x64x128xbf16, #tpu.memory_space<vmem>>, vector<1x64x128xbf16>
    %93 = vector.shape_cast %92 : vector<1x64x128xbf16> to vector<64x128xbf16>
    %cst_66 = arith.constant dense<0.000000e+00> : vector<512x128xf32>
    %94 = tpu.matmul %91, %93, %cst_66 {dimension_numbers = #tpu.dot_dimension_numbers<[1], [0], [0], [1], [0, 0, 1, 1], [], []>} : vector<512x64xbf16>, vector<64x128xbf16>, vector<512x128xf32> -> vector<512x128xf32>
    %95 = arith.addf %87, %94 : vector<512x128xf32>
    %96 = vector.extract_strided_slice %88 {offsets = [0, 1, 0, 0], sizes = [2, 16, 16, 64], strides = [1, 1, 1, 1]} : vector<2x18x16x64xf32> to vector<2x16x16x64xf32>
    %97 = vector.shape_cast %96 : vector<2x16x16x64xf32> to vector<512x64xf32>
    %98 = arith.truncf %97 : vector<512x64xf32> to vector<512x64xbf16>
    %c3_67 = arith.constant 3 : index
    %c0_68 = arith.constant 0 : index
    %c0_69 = arith.constant 0 : index
    %99 = vector.load %arg5[%c3_67, %c0_68, %c0_69] : memref<9x64x128xbf16, #tpu.memory_space<vmem>>, vector<1x64x128xbf16>
    %100 = vector.shape_cast %99 : vector<1x64x128xbf16> to vector<64x128xbf16>
    %cst_70 = arith.constant dense<0.000000e+00> : vector<512x128xf32>
    %101 = tpu.matmul %98, %100, %cst_70 {dimension_numbers = #tpu.dot_dimension_numbers<[1], [0], [0], [1], [0, 0, 1, 1], [], []>} : vector<512x64xbf16>, vector<64x128xbf16>, vector<512x128xf32> -> vector<512x128xf32>
    %102 = arith.addf %95, %101 : vector<512x128xf32>
    %103 = vector.extract_strided_slice %88 {offsets = [0, 2, 0, 0], sizes = [2, 16, 16, 64], strides = [1, 1, 1, 1]} : vector<2x18x16x64xf32> to vector<2x16x16x64xf32>
    %104 = vector.shape_cast %103 : vector<2x16x16x64xf32> to vector<512x64xf32>
    %105 = arith.truncf %104 : vector<512x64xf32> to vector<512x64xbf16>
    %c6_71 = arith.constant 6 : index
    %c0_72 = arith.constant 0 : index
    %c0_73 = arith.constant 0 : index
    %106 = vector.load %arg5[%c6_71, %c0_72, %c0_73] : memref<9x64x128xbf16, #tpu.memory_space<vmem>>, vector<1x64x128xbf16>
    %107 = vector.shape_cast %106 : vector<1x64x128xbf16> to vector<64x128xbf16>
    %cst_74 = arith.constant dense<0.000000e+00> : vector<512x128xf32>
    %108 = tpu.matmul %105, %107, %cst_74 {dimension_numbers = #tpu.dot_dimension_numbers<[1], [0], [0], [1], [0, 0, 1, 1], [], []>} : vector<512x64xbf16>, vector<64x128xbf16>, vector<512x128xf32> -> vector<512x128xf32>
    %109 = arith.addf %102, %108 : vector<512x128xf32>
    %c0_75 = arith.constant 0 : index
    %c0_76 = arith.constant 0 : index
    %c1_77 = arith.constant 1 : index
    %c0_78 = arith.constant 0 : index
    %110 = vector.load %arg9[%c0_75, %c0_76, %c1_77, %c0_78] : memref<2x18x18x64xf32, #tpu.memory_space<vmem>>, vector<2x18x16x64xf32>
    %111 = vector.extract_strided_slice %110 {offsets = [0, 0, 0, 0], sizes = [2, 16, 16, 64], strides = [1, 1, 1, 1]} : vector<2x18x16x64xf32> to vector<2x16x16x64xf32>
    %112 = vector.shape_cast %111 : vector<2x16x16x64xf32> to vector<512x64xf32>
    %113 = arith.truncf %112 : vector<512x64xf32> to vector<512x64xbf16>
    %c1_79 = arith.constant 1 : index
    %c0_80 = arith.constant 0 : index
    %c0_81 = arith.constant 0 : index
    %114 = vector.load %arg5[%c1_79, %c0_80, %c0_81] : memref<9x64x128xbf16, #tpu.memory_space<vmem>>, vector<1x64x128xbf16>
    %115 = vector.shape_cast %114 : vector<1x64x128xbf16> to vector<64x128xbf16>
    %cst_82 = arith.constant dense<0.000000e+00> : vector<512x128xf32>
    %116 = tpu.matmul %113, %115, %cst_82 {dimension_numbers = #tpu.dot_dimension_numbers<[1], [0], [0], [1], [0, 0, 1, 1], [], []>} : vector<512x64xbf16>, vector<64x128xbf16>, vector<512x128xf32> -> vector<512x128xf32>
    %117 = arith.addf %109, %116 : vector<512x128xf32>
    %118 = vector.extract_strided_slice %110 {offsets = [0, 1, 0, 0], sizes = [2, 16, 16, 64], strides = [1, 1, 1, 1]} : vector<2x18x16x64xf32> to vector<2x16x16x64xf32>
    %119 = vector.shape_cast %118 : vector<2x16x16x64xf32> to vector<512x64xf32>
    %120 = arith.truncf %119 : vector<512x64xf32> to vector<512x64xbf16>
    %c4_83 = arith.constant 4 : index
    %c0_84 = arith.constant 0 : index
    %c0_85 = arith.constant 0 : index
    %121 = vector.load %arg5[%c4_83, %c0_84, %c0_85] : memref<9x64x128xbf16, #tpu.memory_space<vmem>>, vector<1x64x128xbf16>
    %122 = vector.shape_cast %121 : vector<1x64x128xbf16> to vector<64x128xbf16>
    %cst_86 = arith.constant dense<0.000000e+00> : vector<512x128xf32>
    %123 = tpu.matmul %120, %122, %cst_86 {dimension_numbers = #tpu.dot_dimension_numbers<[1], [0], [0], [1], [0, 0, 1, 1], [], []>} : vector<512x64xbf16>, vector<64x128xbf16>, vector<512x128xf32> -> vector<512x128xf32>
    %124 = arith.addf %117, %123 : vector<512x128xf32>
    %125 = vector.extract_strided_slice %110 {offsets = [0, 2, 0, 0], sizes = [2, 16, 16, 64], strides = [1, 1, 1, 1]} : vector<2x18x16x64xf32> to vector<2x16x16x64xf32>
    %126 = vector.shape_cast %125 : vector<2x16x16x64xf32> to vector<512x64xf32>
    %127 = arith.truncf %126 : vector<512x64xf32> to vector<512x64xbf16>
    %c7_87 = arith.constant 7 : index
    %c0_88 = arith.constant 0 : index
    %c0_89 = arith.constant 0 : index
    %128 = vector.load %arg5[%c7_87, %c0_88, %c0_89] : memref<9x64x128xbf16, #tpu.memory_space<vmem>>, vector<1x64x128xbf16>
    %129 = vector.shape_cast %128 : vector<1x64x128xbf16> to vector<64x128xbf16>
    %cst_90 = arith.constant dense<0.000000e+00> : vector<512x128xf32>
    %130 = tpu.matmul %127, %129, %cst_90 {dimension_numbers = #tpu.dot_dimension_numbers<[1], [0], [0], [1], [0, 0, 1, 1], [], []>} : vector<512x64xbf16>, vector<64x128xbf16>, vector<512x128xf32> -> vector<512x128xf32>
    %131 = arith.addf %124, %130 : vector<512x128xf32>
    %c0_91 = arith.constant 0 : index
    %c0_92 = arith.constant 0 : index
    %c2_93 = arith.constant 2 : index
    %c0_94 = arith.constant 0 : index
    %132 = vector.load %arg9[%c0_91, %c0_92, %c2_93, %c0_94] : memref<2x18x18x64xf32, #tpu.memory_space<vmem>>, vector<2x18x16x64xf32>
    %133 = vector.extract_strided_slice %132 {offsets = [0, 0, 0, 0], sizes = [2, 16, 16, 64], strides = [1, 1, 1, 1]} : vector<2x18x16x64xf32> to vector<2x16x16x64xf32>
    %134 = vector.shape_cast %133 : vector<2x16x16x64xf32> to vector<512x64xf32>
    %135 = arith.truncf %134 : vector<512x64xf32> to vector<512x64xbf16>
    %c2_95 = arith.constant 2 : index
    %c0_96 = arith.constant 0 : index
    %c0_97 = arith.constant 0 : index
    %136 = vector.load %arg5[%c2_95, %c0_96, %c0_97] : memref<9x64x128xbf16, #tpu.memory_space<vmem>>, vector<1x64x128xbf16>
    %137 = vector.shape_cast %136 : vector<1x64x128xbf16> to vector<64x128xbf16>
    %cst_98 = arith.constant dense<0.000000e+00> : vector<512x128xf32>
    %138 = tpu.matmul %135, %137, %cst_98 {dimension_numbers = #tpu.dot_dimension_numbers<[1], [0], [0], [1], [0, 0, 1, 1], [], []>} : vector<512x64xbf16>, vector<64x128xbf16>, vector<512x128xf32> -> vector<512x128xf32>
    %139 = arith.addf %131, %138 : vector<512x128xf32>
    %140 = vector.extract_strided_slice %132 {offsets = [0, 1, 0, 0], sizes = [2, 16, 16, 64], strides = [1, 1, 1, 1]} : vector<2x18x16x64xf32> to vector<2x16x16x64xf32>
    %141 = vector.shape_cast %140 : vector<2x16x16x64xf32> to vector<512x64xf32>
    %142 = arith.truncf %141 : vector<512x64xf32> to vector<512x64xbf16>
    %c5_99 = arith.constant 5 : index
    %c0_100 = arith.constant 0 : index
    %c0_101 = arith.constant 0 : index
    %143 = vector.load %arg5[%c5_99, %c0_100, %c0_101] : memref<9x64x128xbf16, #tpu.memory_space<vmem>>, vector<1x64x128xbf16>
    %144 = vector.shape_cast %143 : vector<1x64x128xbf16> to vector<64x128xbf16>
    %cst_102 = arith.constant dense<0.000000e+00> : vector<512x128xf32>
    %145 = tpu.matmul %142, %144, %cst_102 {dimension_numbers = #tpu.dot_dimension_numbers<[1], [0], [0], [1], [0, 0, 1, 1], [], []>} : vector<512x64xbf16>, vector<64x128xbf16>, vector<512x128xf32> -> vector<512x128xf32>
    %146 = arith.addf %139, %145 : vector<512x128xf32>
    %147 = vector.extract_strided_slice %132 {offsets = [0, 2, 0, 0], sizes = [2, 16, 16, 64], strides = [1, 1, 1, 1]} : vector<2x18x16x64xf32> to vector<2x16x16x64xf32>
    %148 = vector.shape_cast %147 : vector<2x16x16x64xf32> to vector<512x64xf32>
    %149 = arith.truncf %148 : vector<512x64xf32> to vector<512x64xbf16>
    %c8_103 = arith.constant 8 : index
    %c0_104 = arith.constant 0 : index
    %c0_105 = arith.constant 0 : index
    %150 = vector.load %arg5[%c8_103, %c0_104, %c0_105] : memref<9x64x128xbf16, #tpu.memory_space<vmem>>, vector<1x64x128xbf16>
    %151 = vector.shape_cast %150 : vector<1x64x128xbf16> to vector<64x128xbf16>
    %cst_106 = arith.constant dense<0.000000e+00> : vector<512x128xf32>
    %152 = tpu.matmul %149, %151, %cst_106 {dimension_numbers = #tpu.dot_dimension_numbers<[1], [0], [0], [1], [0, 0, 1, 1], [], []>} : vector<512x64xbf16>, vector<64x128xbf16>, vector<512x128xf32> -> vector<512x128xf32>
    %153 = arith.addf %146, %152 : vector<512x128xf32>
    %c0_107 = arith.constant 0 : index
    %c0_108 = arith.constant 0 : index
    %154 = vector.load %arg6[%c0_107, %c0_108] : memref<1x128xf32, #tpu.memory_space<vmem>>, vector<1x128xf32>
    %c0_109 = arith.constant 0 : index
    %c0_110 = arith.constant 0 : index
    %155 = vector.load %arg7[%c0_109, %c0_110] : memref<1x128xf32, #tpu.memory_space<vmem>>, vector<1x128xf32>
    %cst_111 = arith.constant dense<0.000000e+00> : vector<128xf32>
    %156 = vector.multi_reduction <add>, %153, %cst_111 [0] : vector<512x128xf32> to vector<128xf32>
    %157 = vector.shape_cast %156 : vector<128xf32> to vector<1x128xf32>
    %158 = arith.mulf %153, %153 : vector<512x128xf32>
    %cst_112 = arith.constant dense<0.000000e+00> : vector<128xf32>
    %159 = vector.multi_reduction <add>, %158, %cst_112 [0] : vector<512x128xf32> to vector<128xf32>
    %160 = vector.shape_cast %159 : vector<128xf32> to vector<1x128xf32>
    %cst_113 = arith.constant 0.001953125 : f32
    %161 = vector.broadcast %cst_113 : f32 to vector<1x128xf32>
    %162 = arith.mulf %157, %161 : vector<1x128xf32>
    %cst_114 = arith.constant 0.001953125 : f32
    %163 = vector.broadcast %cst_114 : f32 to vector<1x128xf32>
    %164 = arith.mulf %160, %163 : vector<1x128xf32>
    %165 = arith.mulf %162, %162 : vector<1x128xf32>
    %166 = arith.subf %164, %165 : vector<1x128xf32>
    %cst_115 = arith.constant 9.99999974E-6 : f32
    %167 = vector.broadcast %cst_115 : f32 to vector<1x128xf32>
    %168 = arith.addf %166, %167 : vector<1x128xf32>
    %169 = math.rsqrt %168 : vector<1x128xf32>
    %170 = vector.broadcast %162 : vector<1x128xf32> to vector<512x128xf32>
    %171 = arith.subf %153, %170 : vector<512x128xf32>
    %172 = arith.mulf %169, %154 : vector<1x128xf32>
    %173 = vector.broadcast %172 : vector<1x128xf32> to vector<512x128xf32>
    %174 = arith.mulf %171, %173 : vector<512x128xf32>
    %175 = vector.broadcast %155 : vector<1x128xf32> to vector<512x128xf32>
    %176 = arith.addf %174, %175 : vector<512x128xf32>
    %cst_116 = arith.constant 0.000000e+00 : f32
    %177 = vector.broadcast %cst_116 : f32 to vector<512x128xf32>
    %178 = arith.maximumf %176, %177 : vector<512x128xf32>
    %c0_117 = arith.constant 0 : index
    %c0_118 = arith.constant 0 : index
    %179 = vector.load %arg8[%c0_117, %c0_118] : memref<512x128xf32, #tpu.memory_space<vmem>>, vector<512x128xf32>
    tpu.vector_store %arg8[%c0_117, %c0_118], %178 {strides = array<i32>} : memref<512x128xf32, #tpu.memory_space<vmem>>, vector<512x128xf32>,
    return
  }
  func.func @transform_0(%arg0: i32) -> (i32, i32, i32, i32) {
    %c0_i32 = arith.constant 0 : i32
    %c0_i32_0 = arith.constant 0 : i32
    %c0_i32_1 = arith.constant 0 : i32
    %c0_i32_2 = arith.constant 0 : i32
    %c0_i32_3 = arith.constant 0 : i32
    return %c0_i32, %c0_i32_0, %c0_i32_1, %c0_i32_2 : i32, i32, i32, i32
  }
  func.func @transform_1(%arg0: i32) -> (i32, i32, i32) {
    %c0_i32 = arith.constant 0 : i32
    %c0_i32_0 = arith.constant 0 : i32
    %c0_i32_1 = arith.constant 0 : i32
    %c0_i32_2 = arith.constant 0 : i32
    return %c0_i32, %c0_i32_0, %c0_i32_1 : i32, i32, i32
  }
  func.func @transform_2(%arg0: i32) -> (i32, i32) {
    %c0_i32 = arith.constant 0 : i32
    %c0_i32_0 = arith.constant 0 : i32
    %c0_i32_1 = arith.constant 0 : i32
    return %c0_i32, %c0_i32_0 : i32, i32
  }
  func.func @transform_3(%arg0: i32) -> (i32, i32) {
    %c0_i32 = arith.constant 0 : i32
    %c0_i32_0 = arith.constant 0 : i32
    %c0_i32_1 = arith.constant 0 : i32
    return %c0_i32, %c0_i32_0 : i32, i32
  }
  func.func @transform_4(%arg0: i32) -> (i32, i32, i32) {
    %c0_i32 = arith.constant 0 : i32
    %c0_i32_0 = arith.constant 0 : i32
    %c0_i32_1 = arith.constant 0 : i32
    %c0_i32_2 = arith.constant 0 : i32
    return %c0_i32, %c0_i32_0, %c0_i32_1 : i32, i32, i32
  }
  func.func @transform_5(%arg0: i32) -> (i32, i32) {
    %c0_i32 = arith.constant 0 : i32
    %c0_i32_0 = arith.constant 0 : i32
    %c0_i32_1 = arith.constant 0 : i32
    return %c0_i32, %c0_i32_0 : i32, i32
  }
  func.func @transform_6(%arg0: i32) -> (i32, i32) {
    %c0_i32 = arith.constant 0 : i32
    %c0_i32_0 = arith.constant 0 : i32
    %c0_i32_1 = arith.constant 0 : i32
    return %c0_i32, %c0_i32_0 : i32, i32
  }
  func.func @transform_7(%arg0: i32) -> (i32, i32) {
    %c0_i32 = arith.constant 0 : i32
    %c0_i32_0 = arith.constant 0 : i32
    %c0_i32_1 = arith.constant 0 : i32
    return %c0_i32, %c0_i32_0 : i32, i32
  }
}

</mosaic_0001>

<bundles_post_ra>
// kernel: up_forward.1
= control target key start
LH: loop header
LB: loop body
LE: loop exit
PB: predicated region body
PF: predicated region fallthrough
CT: control target
= control target key end

     0   :  { %vm3945_vm0 = vcmask 1042432   ;;  %vm3946_vm1 = vcmask 1046532   ;;  %vm1548_vm3 = vsmask.f32 3328  ;;  %vm1549_vm4 = vsmask.f32 7440  ;;  %s21574_s1 = inlined_call_operand.vmem [shape: bf16[9,128,64], index: 1, kind: input, shape index: {}]   ;;  %s21575_s0 = inlined_call_operand.vmem [shape: bf16[2,18,18,128], index: 0, kind: input, shape index: {}]   ;;  %s21576_s4 = inlined_call_operand.vmem [shape: bf16[9,64,128], index: 4, kind: input, shape index: {}]   ;;  %s21577_s2 = inlined_call_operand.vmem [shape: f32[1,64], index: 2, kind: input, shape index: {}]   ;;  %s21578_s3 = inlined_call_operand.vmem [shape: f32[1,64], index: 3, kind: input, shape index: {}]   ;;  %s21579_s5 = inlined_call_operand.vmem [shape: f32[1,128], index: 5, kind: input, shape index: {}]   ;;  %s21580_s6 = inlined_call_operand.vmem [shape: f32[1,128], index: 6, kind: input, shape index: {}]   ;;  %s21581_s7 = inlined_call_operand.vmem [shape: f32[512,128], index: 7, kind: output, shape index: {}]  }
   0x1   :  { %v13715_v0 = vld [vmem:[%s21574_s1 + $0xf8] sm:$0xff]   ;;  %v13717_v2 = vld [vmem:[%s21574_s1 + $0xf0] sm:$0xff]   ;;  %v13719_v4 = vld [vmem:[%s21574_s1 + $0xe8] sm:$0xff]   ;;  %vm5612_vm6 = vcmask 523264   ;;  %vm6218_vm7 = vcmask 517120  }
   0x2   :  { %v13716_v1 = vld [vmem:[%s21574_s1 + $0x38] sm:$0xff]   ;;  %12346 = vmatprep.subr.bf16.mxu0 %v13715_v0  ;;  %v13718_v3 = vld [vmem:[%s21574_s1 + $0x30] sm:$0xff]   ;;  %v13720_v5 = vld [vmem:[%s21574_s1 + $0x28] sm:$0xff]  }
   0x3   :  { %12426 = vmatprep.subr.bf16.mxu1 %v13716_v1  ;;  %12347 = vmatpush3.bf16.msra.mxu0 %v13715_v0  ;;  %v13721_v6 = vld [vmem:[%s21574_s1 + $0xe0] sm:$0xff]   ;;  %v13723_v8 = vld [vmem:[%s21574_s1 + $0xd8] sm:$0xff]   ;;  %v13725_v10 = vld [vmem:[%s21574_s1 + $0xd0] sm:$0xff]  }
   0x4   :  { %12427 = vmatpush3.bf16.msra.mxu1 %v13716_v1  ;;  %12348 = vmatprep.subr.bf16.mxu0 %v13717_v2  ;;  %v13722_v7 = vld [vmem:[%s21574_s1 + $0x20] sm:$0xff]   ;;  %v13724_v9 = vld [vmem:[%s21574_s1 + $0x18] sm:$0xff]   ;;  %v13726_v11 = vld [vmem:[%s21574_s1 + $0x10] sm:$0xff]  }
   0x5   :  { %12428 = vmatprep.subr.bf16.mxu1 %v13718_v3  ;;  %v13731_v12 = vld [vmem:[%s21575_s0 + $0xc] sm:$0xff]   ;;  %v13732_v13 = vld [vmem:[%s21575_s0] sm:$0xff]   ;;  %v13734_v18 = vld [vmem:[%s21574_s1 + $0x1b8] sm:$0xff]  }
   0x6   :  { %12362 = vmatprep.mubr.bf16.mxu0 %v13731_v12  ;;  %12442 = vmatprep.mubr.bf16.mxu1 %v13732_v13  ;;  %v13727_v14 = vld [vmem:[%s21574_s1 + $0xc8] sm:$0xff]   ;;  %v13729_v16 = vld [vmem:[%s21574_s1 + $0xc0] sm:$0xff]   ;;  %v14059_v19 = vld [vmem:[%s21575_s0 + $0x18] sm:$0xff]  }
   0x7   :  { %12349 = vmatpush3.bf16.msra.mxu0 %v13717_v2  ;;  %v13728_v15 = vld [vmem:[%s21574_s1 + $0x8] sm:$0xff]   ;;  %v13730_v17 = vld [vmem:[%s21574_s1] sm:$0xff]   ;;  %v13739_v21 = vld [vmem:[%s21574_s1 + $0x1b0] sm:$0xff]  }
   0x8   :  { %12429 = vmatpush3.bf16.msra.mxu1 %v13718_v3  ;;  %12350 = vmatprep.subr.bf16.mxu0 %v13719_v4  ;;  %v14064_v20 = vld [vmem:[%s21575_s0 + $0x24] sm:$0xff]   ;;  %v14078_v23 = vld [vmem:[%s21575_s0 + $0x30] sm:$0xff]   ;;  %v14083_v24 = vld [vmem:[%s21575_s0 + $0x3c] sm:$0xff]  }
   0x9   :  { %12430 = vmatprep.subr.bf16.mxu1 %v13720_v5  ;;  %v13744_v22 = vld [vmem:[%s21574_s1 + $0x1a8] sm:$0xff]   ;;  %v13749_v25 = vld [vmem:[%s21574_s1 + $0x1a0] sm:$0xff]   ;;  %v13755_v26 = vld [vmem:[%s21574_s1 + $0x198] sm:$0xff]  }
   0xa   :  { %v14098_v27 = vld [vmem:[%s21575_s0 + $0x48] sm:$0xff]   ;;  %v14103_v28 = vld [vmem:[%s21575_s0 + $0x54] sm:$0xff]   ;;  %v14124_v33 = vld [vmem:[%s21575_s0 + $0x60] sm:$0xff]  }
   0xb   :  { %12351 = vmatpush3.bf16.msra.mxu0 %v13719_v4  ;;  %v13760_v29 = vld [vmem:[%s21574_s1 + $0x190] sm:$0xff]   ;;  %v13766_v30 = vld [vmem:[%s21574_s1 + $0x78] sm:$0xff]   ;;  %v13765_v32 = vld [vmem:[%s21574_s1 + $0x188] sm:$0xff]  }
   0xc   :  { %12431 = vmatpush3.bf16.msra.mxu1 %v13720_v5  ;;  %12352 = vmatprep.subr.bf16.mxu0 %v13721_v6  ;;  %v13767_v31 = vld [vmem:[%s21574_s1 + $0x70] sm:$0xff]   ;;  %v13770_v35 = vld [vmem:[%s21574_s1 + $0x68] sm:$0xff]   ;;  %v13771_v36 = vld [vmem:[%s21574_s1 + $0x60] sm:$0xff]  }
   0xd   :  { %12432 = vmatprep.subr.bf16.mxu1 %v13722_v7  ;;  %v13742_v34 = vld [vmem:[%s21575_s0 + $0x6c] sm:$0xff]   ;;  %v13774_v37 = vld [vmem:[%s21574_s1 + $0x180] sm:$0xff]   ;;  %v13743_v38 = vld [vmem:[%s21575_s0 + $0x78] sm:$0xff]  }
   0xe   :  { %v13745_v39 = vld [vmem:[%s21575_s0 + $0x84] sm:$0xff]   ;;  %v13775_v40 = vld [vmem:[%s21574_s1 + $0x58] sm:$0xff]   ;;  %v13776_v42 = vld [vmem:[%s21574_s1 + $0x50] sm:$0xff]  }
   0xf   :  { %12353 = vmatpush3.bf16.msra.mxu0 %v13721_v6  ;;  %v14153_v41 = vld [vmem:[%s21574_s1 + $0x138] sm:$0xff]   ;;  %v13746_v43 = vld [vmem:[%s21575_s0 + $0x90] sm:$0xff]   ;;  %v13779_v45 = vld [vmem:[%s21574_s1 + $0x48] sm:$0xff]  }
  0x10   :  { %12433 = vmatpush3.bf16.msra.mxu1 %v13722_v7  ;;  %12354 = vmatprep.subr.bf16.mxu0 %v13723_v8  ;;  %v13747_v44 = vld [vmem:[%s21575_s0 + $0x9c] sm:$0xff]   ;;  %v13748_v47 = vld [vmem:[%s21575_s0 + $0xa8] sm:$0xff]   ;;  %v13750_v49 = vld [vmem:[%s21575_s0 + $0xb4] sm:$0xff]  }
  0x11   :  { %12434 = vmatprep.subr.bf16.mxu1 %v13724_v9  ;;  %v13780_v46 = vld [vmem:[%s21574_s1 + $0x40] sm:$0xff]   ;;  %v14177_v48 = vld [vmem:[%s21575_s0 + $0x1c] sm:$0xf]  ;;  %vm14191_vm2 = vmor %vm3945_vm0, %vm3946_vm1 }
  0x12   :  { %v14185_v50 = vld [vmem:[%s21575_s0 + $0x20] sm:$0x1]  ;;  %v21582_v51 = vrot.slane %v14177_v48, 5  ;;  %v13752_v57 = vld [vmem:[%s21575_s0 + $0xe4] sm:$0xff]   ;;  %v13753_v58 = vld [vmem:[%s21575_s0 + $0xd8] sm:$0xff]  }
  0x13   :  { %12355 = vmatpush3.bf16.msra.mxu0 %v13723_v8  ;;  %v3967_v52 = vrot.slane %v14185_v50, 5  ;;  %v13751_v56 = vld [vmem:[%s21575_s0 + $0xc0] sm:$0xff]   ;;  %v13754_v59 = vld [vmem:[%s21575_s0 + $0xf0] sm:$0xff]   ;;  %v13757_v61 = vld [vmem:[%s21575_s0 + $0x108] sm:$0xff]  }
  0x14   :  { %12435 = vmatpush3.bf16.msra.mxu1 %v13724_v9  ;;  %12356 = vmatprep.subr.bf16.mxu0 %v13725_v10  ;;  %v3966_v53 = vrot.slane %v21582_v51, 4  ;;  %v13756_v60 = vld [vmem:[%s21575_s0 + $0xfc] sm:$0xff]   ;;  %v13758_v62 = vld [vmem:[%s21575_s0 + $0x114] sm:$0xff]   ;;  %v13761_v0 = vld [vmem:[%s21575_s0 + $0x12c] sm:$0xff]  }
  0x15   :  { %12436 = vmatprep.subr.bf16.mxu1 %v13726_v11  ;;  %v13759_v63 = vld [vmem:[%s21575_s0 + $0x120] sm:$0xff]   ;;  %v13762_v1 = vld [vmem:[%s21575_s0 + $0x138] sm:$0xff]   ;;  %v1443_v5 = vld [vmem:[%s21575_s0 + $0xc] sm:$0xf] }
  0x16   :  { %v14197_v55 = vsel %vm14191_vm2, %v3966_v53, %v3967_v52  ;;  %v13763_v2 = vld [vmem:[%s21575_s0 + $0x144] sm:$0xff]   ;;  %v1440_v3 = vld [vmem:[%s21575_s0] sm:$0xf]  ;;  %v1444_v6 = vld [vmem:[%s21575_s0 + $0x10] sm:$0xf]  ;;  %v1579_v13 = vshll.u32 %v1443_v5, 16 }
  0x17   :  { %12357 = vmatpush3.bf16.msra.mxu0 %v13725_v10  ;;  %v1441_v4 = vld [vmem:[%s21575_s0 + $0x4] sm:$0xf]  ;;  %v1446_v7 = vld [vmem:[%s21575_s0 + $0x18] sm:$0xf]  ;;  %v1552_v8 = vshrl.u32 %v1440_v3, 16  ;;  %v1555_v9 = vshll.u32 %v1440_v3, 16  ;;  %vm14300_vm5 = vmor %vm1548_vm3, %vm1549_vm4 }
  0x18   :  { %12437 = vmatpush3.bf16.msra.mxu1 %v13726_v11  ;;  %12358 = vmatprep.subr.bf16.mxu0 %v13727_v14  ;;  %v1561_v10 = vshll.u32 %v1441_v4, 16  ;;  %v1565_v11 = vshrl.u32 %v1441_v4, 16  ;;  %v1452_v4 = vld [vmem:[%s21575_s0 + $0x30] sm:$0xf] }
  0x19   :  { %12438 = vmatprep.subr.bf16.mxu1 %v13728_v15 }
  0x1b   :  { %12359 = vmatpush3.bf16.msra.mxu0 %v13727_v14  ;;  %v1585_v14 = vshll.u32 %v1444_v6, 16 }
  0x1c   :  { %12439 = vmatpush3.bf16.msra.mxu1 %v13728_v15  ;;  %12360 = vmatprep.subr.bf16.mxu0 %v13729_v16  ;;  %v1589_v15 = vshrl.u32 %v1444_v6, 16 }
  0x1d   :  { %12440 = vmatprep.subr.bf16.mxu1 %v13730_v17 }
  0x1f   :  { %12361 = vmatpush3.bf16.msra.mxu0 %v13729_v16  ;;  %v1600_v16 = vshrl.u32 %v1446_v7, 16 }
  0x20   :  { %12441 = vmatpush3.bf16.msra.mxu1 %v13730_v17  ;;  %12506 = vmatprep.subr.bf16.mxu0 %v13734_v18  ;;  %v1603_v17 = vshll.u32 %v1446_v7, 16 }
  0x21   :  { %12586 = vmatprep.subr.bf16.mxu1 %v13766_v30 }
  0x22   :  { %12363 = vmatmul.mubr.bf16.vlgmr.msra.gmra.mxu0 %v14059_v19 }
  0x23   :  { %12443 = vmatmul.mubr.bf16.vlgmr.msra.gmra.mxu1 %v13731_v12  ;;  %12507 = vmatpush3.bf16.msra.mxu0 %v13734_v18  ;;  %v1576_v12 = vshrl.u32 %v1443_v5, 16  ;;  %v1609_v18 = vshll.u32 %v14177_v48, 16  ;;  %v14291_v5 = vld [vmem:[%s21574_s1 + $0x1f8] sm:$0xff]  }
  0x24   :  { %12366 = vmatprep.mubr.bf16.mxu0 %v14064_v20  ;;  %12446 = vmatprep.mubr.bf16.mxu1 %v14059_v19 }
  0x25   :  { %12508 = vmatprep.subr.bf16.mxu0 %v13739_v21  ;;  %12587 = vmatpush3.bf16.msra.mxu1 %v13766_v30  ;;  %v14255_v30 = vrot.slane %v1561_v10, 5  ;;  %v1451_v10 = vld [vmem:[%s21575_s0 + $0x2c] sm:$0x1] }
  0x26   :  { %12588 = vmatprep.subr.bf16.mxu1 %v13767_v31 }
  0x27   :  { %12509 = vmatpush3.bf16.msra.mxu0 %v13739_v21  ;;  %v1613_v21 = vshrl.u32 %v14177_v48, 16 }
  0x28   :  { %12510 = vmatprep.subr.bf16.mxu0 %v13744_v22 }
  0x29   :  { %12589 = vmatpush3.bf16.msra.mxu1 %v13767_v31  ;;  %v1567_v31 = vrot.slane %v1565_v11, 4  ;;  %v1453_v11 = vld [vmem:[%s21575_s0 + $0x34] sm:$0xf] }
  0x2a   :  { %12367 = vmatmul.mubr.bf16.gmra.mxu0 %v14078_v23  ;;  %12590 = vmatprep.subr.bf16.mxu1 %v13770_v35 }
  0x2b   :  { %12447 = vmatmul.mubr.bf16.gmra.mxu1 %v14064_v20  ;;  %12370 = vmatprep.mubr.bf16.mxu0 %v14083_v24 }
  0x2c   :  { %12450 = vmatprep.mubr.bf16.mxu1 %v14078_v23  ;;  %12511 = vmatpush3.bf16.msra.mxu0 %v13744_v22  ;;  %v13764_v22 = vld [vmem:[%s21575_s0 + $0x150] sm:$0xff]  }
  0x2d   :  { %12512 = vmatprep.subr.bf16.mxu0 %v13749_v25  ;;  %12591 = vmatpush3.bf16.msra.mxu1 %v13770_v35  ;;  %v1581_v35 = vrot.slane %v1579_v13, 5 }
  0x2e   :  { %12592 = vmatprep.subr.bf16.mxu1 %v13771_v36 }
  0x30   :  { %12513 = vmatpush3.bf16.msra.mxu0 %v13749_v25  ;;  %v13768_v25 = vld [vmem:[%s21575_s0 + $0x15c] sm:$0xff]  }
  0x31   :  { %12514 = vmatprep.subr.bf16.mxu0 %v13755_v26  ;;  %12593 = vmatpush3.bf16.msra.mxu1 %v13771_v36  ;;  %v14260_v36 = vrot.slane %v1585_v14, 5 }
  0x32   :  { %12371 = vmatmul.mubr.bf16.gmra.mxu0 %v14098_v27  ;;  %12594 = vmatprep.subr.bf16.mxu1 %v13775_v40 }
  0x33   :  { %12451 = vmatmul.mubr.bf16.gmra.mxu1 %v14083_v24  ;;  %12374 = vmatprep.mubr.bf16.mxu0 %v14103_v28 }
  0x34   :  { %12454 = vmatprep.mubr.bf16.mxu1 %v14098_v27  ;;  %12515 = vmatpush3.bf16.msra.mxu0 %v13755_v26  ;;  %v1554_v26 = vrot.slane %v1552_v8, 4 }
  0x35   :  { %12516 = vmatprep.subr.bf16.mxu0 %v13760_v29  ;;  %12595 = vmatpush3.bf16.msra.mxu1 %v13775_v40  ;;  %v1605_v40 = vrot.slane %v1603_v17, 5 }
  0x36   :  { %12596 = vmatprep.subr.bf16.mxu1 %v13776_v42 }
  0x38   :  { %12517 = vmatpush3.bf16.msra.mxu0 %v13760_v29  ;;  %v1557_v29 = vrot.slane %v1555_v9, 5 }
  0x39   :  { %12518 = vmatprep.subr.bf16.mxu0 %v13765_v32  ;;  %12597 = vmatpush3.bf16.msra.mxu1 %v13776_v42  ;;  %v14265_v42 = vrot.slane %v1609_v18, 5 }
  0x3a   :  { %12375 = vmatmul.mubr.bf16.gmra.mxu0 %v14124_v33  ;;  %12598 = vmatprep.subr.bf16.mxu1 %v13779_v45 }
  0x3b   :  { %12455 = vmatmul.mubr.bf16.gmra.mxu1 %v14103_v28  ;;  %12378 = vmatprep.mubr.bf16.mxu0 %v13742_v34 }
  0x3c   :  { %12458 = vmatprep.mubr.bf16.mxu1 %v14124_v33  ;;  %12519 = vmatpush3.bf16.msra.mxu0 %v13765_v32  ;;  %v1442_v32 = vld [vmem:[%s21575_s0 + $0x8] sm:$0x1] }
  0x3d   :  { %12520 = vmatprep.subr.bf16.mxu0 %v13774_v37  ;;  %12599 = vmatpush3.bf16.msra.mxu1 %v13779_v45  ;;  %v1558_v45 = vor.u32 %v1557_v29, %v1554_v26  ;;  %v1657_v26 = vshll.u32 %v1453_v11, 16  ;;  %v1661_v29 = vshrl.u32 %v1453_v11, 16 }
  0x3e   :  { %12600 = vmatprep.subr.bf16.mxu1 %v13780_v46 }
  0x40   :  { %12521 = vmatpush3.bf16.msra.mxu0 %v13774_v37  ;;  %v1591_v37 = vrot.slane %v1589_v15, 4 }
  0x41   :  { %12666 = vmatprep.subr.bf16.mxu0 %v14153_v41  ;;  %12601 = vmatpush3.bf16.msra.mxu1 %v13780_v46  ;;  %v1568_v46 = vor.u32 %v1567_v31, %v14255_v30 }
  0x42   :  { %12379 = vmatmul.mubr.bf16.gmra.mxu0 %v13743_v38  ;;  %v1592_v53 = vor.u32 %v1591_v37, %v14260_v36  ;;  %12746 = vmatprep.subr.bf16.mxu1 %v14291_v5 }
  0x43   :  { %12459 = vmatmul.mubr.bf16.gmra.mxu1 %v13742_v34  ;;  %12382 = vmatprep.mubr.bf16.mxu0 %v13745_v39  ;;  %v1578_v34 = vrot.slane %v1576_v12, 4  ;;  %v13891_v12 = vld [vmem:[%s21575_s0 + $0x28] sm:$0xf] }
  0x44   :  { %12462 = vmatprep.mubr.bf16.mxu1 %v13743_v38  ;;  %v1445_v38 = vld [vmem:[%s21575_s0 + $0x14] sm:$0x1]  ;;  %v1593_v7 = vrot.slane %v1592_v53, 4 }
  0x45   :  { %v1582_v52 = vor.u32 %v1581_v35, %v1578_v34  ;;  %v1455_v35 = vld [vmem:[%s21575_s0 + $0x3c] sm:$0xf] }
  0x46   :  { %v1675_v53 = vshll.u32 %v1455_v35, 16 }
  0x47   :  { %v1583_v6 = vrot.slane %v1582_v52, 4  ;;  %v1672_v52 = vshrl.u32 %v1455_v35, 16 }
  0x49   :  { %v1588_v34 = vsel %vm14300_vm5, %v1583_v6, %v14260_v36  ;;  %v1456_v36 = vld [vmem:[%s21575_s0 + $0x40] sm:$0xf] }
  0x4a   :  { %12383 = vmatmul.mubr.bf16.gmra.mxu0 %v13746_v43 }
  0x4b   :  { %12463 = vmatmul.mubr.bf16.gmra.mxu1 %v13745_v39  ;;  %12386 = vmatprep.mubr.bf16.mxu0 %v13747_v44  ;;  %v1602_v39 = vrot.slane %v1600_v16, 4 }
  0x4c   :  { %12466 = vmatprep.mubr.bf16.mxu1 %v13746_v43  ;;  %v1615_v43 = vrot.slane %v1613_v21, 4  ;;  %v1648_v21 = vshrl.u32 %v1452_v4, 16 }
  0x52   :  { %12387 = vmatmul.mubr.bf16.gmra.mxu0 %v13748_v47 }
  0x53   :  { %12467 = vmatmul.mubr.bf16.gmra.mxu1 %v13747_v44  ;;  %12390 = vmatprep.mubr.bf16.mxu0 %v13750_v49  ;;  %v1449_v44 = vld [vmem:[%s21575_s0 + $0x24] sm:$0xf] }
  0x54   :  { %12470 = vmatprep.mubr.bf16.mxu1 %v13748_v47  ;;  %v1571_v47 = vshll.u32 %v1442_v32, 16 }
  0x56   :  { %v1573_v3 = vrot.slane %v1571_v47, 5  ;;  %v14341_v47 = vrot.slane %v1657_v26, 5 }
  0x5a   :  { %12391 = vmatmul.mubr.bf16.gmra.mxu0 %v13751_v56  ;;  %v1595_v56 = vshll.u32 %v1445_v38, 16  ;;  %v1643_v38 = vshll.u32 %v1451_v10, 16  ;;  %v1462_v10 = vld [vmem:[%s21575_s0 + $0x58] sm:$0xf] }
  0x5b   :  { %12471 = vmatmul.mubr.bf16.gmra.mxu1 %v13750_v49  ;;  %12394 = vmatprep.mubr.bf16.mxu0 %v13752_v57  ;;  %v1450_v49 = vld [vmem:[%s21575_s0 + $0x28] sm:$0xf] }
  0x5c   :  { %12474 = vmatprep.mubr.bf16.mxu1 %v13753_v58  ;;  %v13769_v58 = vld [vmem:[%s21575_s0 + $0x168] sm:$0xff]   ;;  %v1597_v8 = vrot.slane %v1595_v56, 5  ;;  %v1681_v56 = vshll.u32 %v1456_v36, 16 }
  0x5e   :  { %v14367_v11 = vrot.slane %v1681_v56, 5 }
  0x62   :  { %12395 = vmatmul.mubr.bf16.gmra.mxu0 %v13754_v59 }
  0x63   :  { %12475 = vmatmul.mubr.bf16.gmra.mxu1 %v13752_v57  ;;  %12398 = vmatprep.mubr.bf16.mxu0 %v13756_v60  ;;  %v1619_v57 = vshll.u32 %v14185_v50, 16  ;;  %v1559_v50 = vrot.slane %v1558_v45, 4 }
  0x64   :  { %12478 = vmatprep.mubr.bf16.mxu1 %v13754_v59  ;;  %v1606_v59 = vor.u32 %v1605_v40, %v1602_v39 }
  0x65   :  { %v1621_v9 = vrot.slane %v1619_v57, 5  ;;  %v1564_v31 = vsel %vm14300_vm5, %v1559_v50, %v14255_v30  ;;  %v1685_v57 = vshrl.u32 %v1456_v36, 16 }
  0x66   :  { %v1607_v13 = vrot.slane %v1606_v59, 4  ;;  %v1459_v59 = vld [vmem:[%s21575_s0 + $0x4c] sm:$0xf] }
  0x68   :  { %v1612_v37 = vsel %vm14300_vm5, %v1607_v13, %v14265_v42  ;;  %v1687_v13 = vrot.slane %v1685_v57, 4 }
  0x6a   :  { %12399 = vmatmul.mubr.bf16.gmra.mxu0 %v13757_v61  ;;  %v1688_v36 = vor.u32 %v1687_v13, %v14367_v11 }
  0x6b   :  { %12479 = vmatmul.mubr.bf16.gmra.mxu1 %v13756_v60  ;;  %12402 = vmatprep.mubr.bf16.mxu0 %v13758_v62  ;;  %v1616_v60 = vor.u32 %v1615_v43, %v14265_v42  ;;  %v1454_v43 = vld [vmem:[%s21575_s0 + $0x38] sm:$0x1]  ;;  %v13773_v42 = vld [vmem:[%s21575_s0 + $0x180] sm:$0xff]  }
  0x6c   :  { %12482 = vmatprep.mubr.bf16.mxu1 %v13757_v61  ;;  %v1624_v61 = vshrl.u32 %v1449_v44, 16 }
  0x6d   :  { %v1617_v14 = vrot.slane %v1616_v60, 4 }
  0x6e   :  { %v1626_v15 = vrot.slane %v1624_v61, 4  ;;  %v1645_v61 = vrot.slane %v1643_v38, 5 }
  0x6f   :  { %v1622_v30 = vsel %vm14300_vm5, %v1617_v14, %v1621_v9  ;;  %v1677_v9 = vrot.slane %v1675_v53, 5 }
  0x70   :  { %v14356_v50 = vcombine.low %v1612_v37, %v1622_v30 }
  0x72   :  { %12403 = vmatmul.mubr.bf16.gmra.mxu0 %v13759_v63 }
  0x73   :  { %12483 = vmatmul.mubr.bf16.gmra.mxu1 %v13758_v62  ;;  %12406 = vmatprep.mubr.bf16.mxu0 %v13761_v0  ;;  %v1627_v62 = vshll.u32 %v1449_v44, 16  ;;  %v1650_v44 = vrot.slane %v1648_v21, 4  ;;  %v1709_v21 = vshrl.u32 %v1459_v59, 16 }
  0x74   :  { %12486 = vmatprep.mubr.bf16.mxu1 %v13759_v63  ;;  %v14283_v63 = vld [vmem:[%s21575_s0 + $0x174] sm:$0xff]  }
  0x75   :  { %v1629_v16 = vrot.slane %v1627_v62, 5  ;;  %v1667_v62 = vshll.u32 %v1454_v43, 16  ;;  %v1465_v43 = vld [vmem:[%s21575_s0 + $0x64] sm:$0xf] }
  0x77   :  { %v1630_v39 = vor.u32 %v1629_v16, %v1626_v15  ;;  %v14369_v16 = vrot.slane %v1667_v62, 5 }
  0x7a   :  { %12407 = vmatmul.mubr.bf16.gmra.mxu0 %v13762_v1 }
  0x7b   :  { %12487 = vmatmul.mubr.bf16.gmra.mxu1 %v13761_v0  ;;  %12410 = vmatprep.mubr.bf16.mxu0 %v13763_v2  ;;  %v1633_v0 = vshll.u32 %v1450_v49, 16 }
  0x7c   :  { %12490 = vmatprep.mubr.bf16.mxu1 %v13762_v1  ;;  %v1637_v1 = vshrl.u32 %v1450_v49, 16  ;;  %v1663_v49 = vrot.slane %v1661_v29, 4 }
  0x7d   :  { %v14305_v17 = vrot.slane %v1633_v0, 5  ;;  %v1461_v0 = vld [vmem:[%s21575_s0 + $0x54] sm:$0xf] }
  0x7e   :  { %v1639_v18 = vrot.slane %v1637_v1, 4  ;;  %v1723_v29 = vshll.u32 %v1461_v0, 16 }
  0x80   :  { %v1640_v40 = vor.u32 %v1639_v18, %v14305_v17  ;;  %v1705_v18 = vshll.u32 %v1459_v59, 16  ;;  %v1725_v53 = vrot.slane %v1723_v29, 5 }
  0x82   :  { %12411 = vmatmul.mubr.bf16.gmra.mxu0 %v13764_v22 }
  0x83   :  { %12491 = vmatmul.mubr.bf16.gmra.mxu1 %v13763_v2  ;;  %12414 = vmatprep.mubr.bf16.mxu0 %v13768_v25  ;;  %v1569_v2 = vrot.slane %v1568_v46, 4  ;;  %v14339_v46 = vld [vmem:[%s21575_s0 + $0x18c] sm:$0xff]  }
  0x84   :  { %12494 = vmatprep.mubr.bf16.mxu1 %v13764_v22  ;;  %v1651_v22 = vshll.u32 %v1452_v4, 16  ;;  %v1457_v4 = vld [vmem:[%s21575_s0 + $0x44] sm:$0x1] }
  0x85   :  { %v1574_v32 = vsel %vm14300_vm5, %v1569_v2, %v1573_v3  ;;  %v1631_v2 = vrot.slane %v1630_v39, 4  ;;  %v1641_v3 = vrot.slane %v1640_v40, 4  ;;  %v1691_v30 = vshll.u32 %v1457_v4, 16 }
  0x86   :  { %v1653_v45 = vrot.slane %v1651_v22, 5  ;;  %v14349_v60 = vcombine.low %v1564_v31, %v1574_v32  ;;  %v1720_v22 = vshrl.u32 %v1461_v0, 16  ;;  %v1729_v31 = vshll.u32 %v1462_v10, 16 }
  0x87   :  { %v1636_v26 = vsel %vm14300_vm5, %v1631_v2, %v14305_v17  ;;  %v1733_v32 = vshrl.u32 %v1462_v10, 16  ;;  %v1646_v35 = vsel %vm14300_vm5, %v1641_v3, %v1645_v61  ;;  %v1464_v17 = vld [vmem:[%s21575_s0 + $0x60] sm:$0xf]  ;;  %v1753_v0 = vshll.u32 %v1465_v43, 16  ;;  %v1467_v3 = vld [vmem:[%s21575_s0 + $0x6c] sm:$0xf] }
  0x88   :  { %v1654_v6 = vor.u32 %v1653_v45, %v1650_v44  ;;  %v14393_v44 = vrot.slane %v1705_v18, 5  ;;  %v1711_v45 = vrot.slane %v1709_v21, 4  ;;  %v14398_v56 = vrot.slane %v1729_v31, 5 }
  0x89   :  { %v1735_v57 = vrot.slane %v1733_v32, 4  ;;  %v1744_v59 = vshrl.u32 %v1464_v17, 16  ;;  %v14403_v61 = vcombine.low %v1636_v26, %v1646_v35  ;;  %v1747_v62 = vshll.u32 %v1464_v17, 16  ;;  %v13782_v32 = vld [vmem:[%s21574_s1 + $0x130] sm:$0xff]  }
  0x8a   :  { %12415 = vmatmul.mubr.bf16.gmra.mxu0 %v13769_v58  ;;  %v1757_v2 = vshrl.u32 %v1465_v43, 16  ;;  %v1712_v10 = vor.u32 %v1711_v45, %v14393_v44  ;;  %v1771_v35 = vshll.u32 %v1467_v3, 16 }
  0x8b   :  { %12495 = vmatmul.mubr.bf16.gmra.mxu1 %v13768_v25  ;;  %12418 = vmatprep.mubr.bf16.mxu0 %v14283_v63  ;;  %v1598_v25 = vsel %vm14300_vm5, %v1593_v7, %v1597_v8  ;;  %v1664_v7 = vor.u32 %v1663_v49, %v14341_v47  ;;  %v1674_v8 = vrot.slane %v1672_v52, 4  ;;  %v1463_v49 = vld [vmem:[%s21575_s0 + $0x5c] sm:$0x1]  ;;  %v1722_v52 = vrot.slane %v1720_v22, 4 }
  0x8c   :  { %12498 = vmatprep.mubr.bf16.mxu1 %v13769_v58  ;;  %v1458_v58 = vld [vmem:[%s21575_s0 + $0x48] sm:$0xf]  ;;  %v14354_v1 = vcombine.low %v1588_v34, %v1598_v25  ;;  %v13778_v34 = vld [vmem:[%s21575_s0 + $0x198] sm:$0xff]   ;;  %v14382_v25 = vrot.slane %v1654_v6, 4  ;;  %v1736_v18 = vor.u32 %v1735_v57, %v14398_v56  ;;  %v1739_v21 = vshll.u32 %v1463_v49, 16 }
  0x8d   :  { %v1696_v14 = vshrl.u32 %v1458_v58, 16  ;;  %v1699_v15 = vshll.u32 %v1458_v58, 16  ;;  %v14384_v37 = vrot.slane %v1664_v7, 4  ;;  %v1678_v38 = vor.u32 %v1677_v9, %v1674_v8  ;;  %v1466_v58 = vld [vmem:[%s21575_s0 + $0x68] sm:$0x1] }
  0x8e   :  { %v1660_v4 = vsel %vm14300_vm5, %v14382_v25, %v14341_v47  ;;  %v14420_v8 = vrot.slane %v1691_v30, 5  ;;  %v1746_v22 = vrot.slane %v1744_v59, 4  ;;  %v1749_v26 = vrot.slane %v1747_v62, 5 }
  0x8f   :  { %v1698_v39 = vrot.slane %v1696_v14, 4  ;;  %v1701_v40 = vrot.slane %v1699_v15, 5  ;;  %v1670_v6 = vsel %vm14300_vm5, %v14384_v37, %v14369_v16  ;;  %v14418_v7 = vrot.slane %v1678_v38, 4  ;;  %v1470_v14 = vld [vmem:[%s21575_s0 + $0x78] sm:$0xf]  ;;  %v13791_v16 = vld [vmem:[%s21574_s1 + $0x1e8] sm:$0xff]  }
  0x90   :  { %v1726_v15 = vor.u32 %v1725_v53, %v1722_v52  ;;  %v1759_v29 = vrot.slane %v1757_v2, 4  ;;  %v1763_v31 = vshll.u32 %v1466_v58, 16  ;;  %v1795_v43 = vshll.u32 %v1470_v14, 16  ;;  %v1473_v53 = vld [vmem:[%s21575_s0 + $0x84] sm:$0xf]  ;;  %v14463_v58 = vld [vmem:[%s21574_s1 + $0x128] sm:$0xff]  }
  0x91   :  { %v1702_v9 = vor.u32 %v1701_v40, %v1698_v39  ;;  %v1469_v39 = vld [vmem:[%s21575_s0 + $0x74] sm:$0x1]  ;;  %v1792_v40 = vshrl.u32 %v1470_v14, 16  ;;  %v14458_v57 = vrot.slane %v1736_v18, 4  ;;  %v1750_v59 = vor.u32 %v1749_v26, %v1746_v22  ;;  %v1474_v2 = vld [vmem:[%s21575_s0 + $0x88] sm:$0xf] }
  0x92   :  { %12419 = vmatmul.mubr.bf16.gmra.mxu0 %v13773_v42  ;;  %v14450_v45 = vrot.slane %v1726_v15, 4  ;;  %v1472_v14 = vld [vmem:[%s21575_s0 + $0x80] sm:$0x1]  ;;  %v1787_v15 = vshll.u32 %v1469_v39, 16  ;;  %v1816_v22 = vshrl.u32 %v1473_v53, 16 }
  0x93   :  { %12499 = vmatmul.mubr.bf16.gmra.mxu1 %v14283_v63  ;;  %12422 = vmatprep.mubr.bf16.mxu0 %v14339_v46  ;;  %v1460_v63 = vld [vmem:[%s21575_s0 + $0x50] sm:$0x1]  ;;  %v14443_v38 = vrot.slane %v1702_v9, 4  ;;  %v1794_v18 = vrot.slane %v1792_v40, 4  ;;  %v14519_v47 = vrot.slane %v1750_v59, 4  ;;  %v13784_v40 = vld [vmem:[%s21574_s1 + $0x120] sm:$0xff]  }
  0x94   :  { %12502 = vmatprep.mubr.bf16.mxu1 %v13773_v42  ;;  %v1715_v42 = vshll.u32 %v1460_v63, 16  ;;  %v14438_v63 = vrot.slane %v1753_v0, 5  ;;  %v14466_v0 = vrot.slane %v1763_v31, 5  ;;  %v1825_v31 = vshll.u32 %v1474_v2, 16 }
  0x96   :  { %v14429_v13 = vrot.slane %v1715_v42, 5  ;;  %v14452_v42 = vrot.slane %v1739_v21, 5  ;;  %v1760_v62 = vor.u32 %v1759_v29, %v14438_v63  ;;  %v1797_v21 = vrot.slane %v1795_v43, 5 }
  0x97   :  { %v1819_v29 = vshll.u32 %v1473_v53, 16  ;;  %v14533_v39 = vrot.slane %v1825_v31, 5 }
  0x98   :  { %v14521_v25 = vrot.slane %v1760_v62, 4  ;;  %v1479_v62 = vld [vmem:[%s21575_s0 + $0x9c] sm:$0xf] }
  0x9a   :  { %12423 = vmatmul.mubr.bf16.gmra.mxu0 %v13778_v34  ;;  %v1768_v34 = vshrl.u32 %v1467_v3, 16 }
  0x9b   :  { %12503 = vmatmul.mubr.bf16.gmra.mxu1 %v14339_v46  ;;  %12522 = vmatprep.mubr.bf16.mxu0 %v14059_v19  ;;  %v1468_v46 = vld [vmem:[%s21575_s0 + $0x70] sm:$0xf]  ;;  %v14426_v19 = vrot.slane %v1688_v36, 4  ;;  %v14445_v36 = vrot.slane %v1712_v10, 4 }
  0x9c   :  { %12602 = vmatprep.mubr.bf16.mxu1 %v14349_v60  ;;  %v1471_v60 = vld [vmem:[%s21575_s0 + $0x7c] sm:$0xf]  ;;  %v1777_v30 = vshll.u32 %v1468_v46, 16  ;;  %v1781_v17 = vshrl.u32 %v1468_v46, 16  ;;  %v1770_v3 = vrot.slane %v1768_v34, 4  ;;  %v1773_v46 = vrot.slane %v1771_v35, 5 }
  0x9d   :  { %v1801_v49 = vshll.u32 %v1471_v60, 16  ;;  %v1805_v52 = vshrl.u32 %v1471_v60, 16  ;;  %v14506_v34 = vcombine.low %v1660_v4, %v1670_v6  ;;  %v1684_v35 = vsel %vm14300_vm5, %v14418_v7, %v14367_v11 }
  0x9e   :  { %v14476_v9 = vrot.slane %v1777_v30, 5  ;;  %v1783_v10 = vrot.slane %v1781_v17, 4  ;;  %v1829_v30 = vshrl.u32 %v1474_v2, 16  ;;  %v1774_v37 = vor.u32 %v1773_v46, %v1770_v3  ;;  %v13792_v2 = vld [vmem:[%s21574_s1 + $0x1e0] sm:$0xff]  }
  0x9f   :  { %v14488_v60 = vrot.slane %v1801_v49, 5  ;;  %v1807_v26 = vrot.slane %v1805_v52, 4  ;;  %v14525_v11 = vrot.slane %v1787_v15, 5  ;;  %v1798_v6 = vor.u32 %v1797_v21, %v1794_v18 }
  0xa0   :  { %v1784_v4 = vor.u32 %v1783_v10, %v14476_v9  ;;  %v1811_v7 = vshll.u32 %v1472_v14, 16  ;;  %v1821_v17 = vrot.slane %v1819_v29, 5  ;;  %v1831_v52 = vrot.slane %v1829_v30, 4  ;;  %v1480_v10 = vld [vmem:[%s21575_s0 + $0xa0] sm:$0xf] }
  0xa1   :  { %v14560_v3 = vrot.slane %v1774_v37, 4  ;;  %v14585_v14 = vrot.slane %v1798_v6, 4  ;;  %v1877_v37 = vshrl.u32 %v1480_v10, 16  ;;  %v14618_v6 = vld [vmem:[%s21575_s0 + $0xb4] sm:$0xf] }
  0xa2   :  { %12523 = vmatmul.mubr.bf16.vlgmr.msra.gmra.mxu0 %v14064_v20  ;;  %v13790_v20 = vld [vmem:[%s21574_s1 + $0x1f0] sm:$0xff]   ;;  %v14562_v46 = vrot.slane %v1784_v4, 4 }
  0xa3   :  { %12667 = vmatpush3.bf16.msra.mxu0 %v14153_v41  ;;  %12603 = vmatmul.mubr.bf16.vlgmr.msra.gmra.mxu1 %v14354_v1  ;;  %v14486_v41 = vld [vmem:[%s21575_s0 + $0x90] sm:$0xf] }
  0xa4   :  { %12526 = vmatprep.mubr.bf16.mxu0 %v14078_v23  ;;  %12606 = vmatprep.mubr.bf16.mxu1 %v14356_v50  ;;  %v14493_v23 = vld [vmem:[%s21575_s0 + $0x94] sm:$0xf]  ;;  %v1840_v43 = vshrl.u32 %v14486_v41, 16  ;;  %v1843_v53 = vshll.u32 %v14486_v41, 16  ;;  %v1483_v41 = vld [vmem:[%s21575_s0 + $0xac] sm:$0xf] }
  0xa5   :  { %12668 = vmatprep.subr.bf16.mxu0 %v13782_v32  ;;  %12747 = vmatpush3.bf16.msra.mxu1 %v14291_v5  ;;  %v1694_v5 = vsel %vm14300_vm5, %v14426_v19, %v14420_v8  ;;  %v1475_v8 = vld [vmem:[%s21575_s0 + $0x8c] sm:$0x1]  ;;  %v14530_v19 = vrot.slane %v1816_v22, 4  ;;  %v1849_v59 = vshll.u32 %v14493_v23, 16 }
  0xa6   :  { %12748 = vmatprep.subr.bf16.mxu1 %v13790_v20  ;;  %v14540_v49 = vcombine.low %v1684_v35, %v1694_v5  ;;  %v1835_v21 = vshll.u32 %v1475_v8, 16  ;;  %v1867_v35 = vshll.u32 %v1479_v62, 16  ;;  %v13787_v5 = vld [vmem:[%s21574_s1 + $0x110] sm:$0xff]   ;;  %v1766_v8 = vsel %vm14300_vm5, %v14521_v25, %v14466_v0 }
  0xa7   :  { %12669 = vmatpush3.bf16.msra.mxu0 %v13782_v32  ;;  %v1808_v32 = vor.u32 %v1807_v26, %v14488_v60  ;;  %v1822_v18 = vor.u32 %v1821_v17, %v14530_v19  ;;  %v14599_v22 = vrot.slane %v1849_v59, 5  ;;  %v13794_v26 = vld [vmem:[%s21574_s1 + $0x1d8] sm:$0xff]   ;;  %v13795_v0 = vld [vmem:[%s21574_s1 + $0x1d0] sm:$0xff]   ;;  %v1901_v59 = vshrl.u32 %v1483_v41, 16 }
  0xa8   :  { %12670 = vmatprep.subr.bf16.mxu0 %v14463_v58  ;;  %v14628_v19 = vrot.slane %v1835_v21, 5  ;;  %v1486_v17 = vld [vmem:[%s21575_s0 + $0xb8] sm:$0xf]  ;;  %v1915_v21 = vshll.u32 %v14618_v6, 16 }
  0xa9   :  { %12749 = vmatpush3.bf16.msra.mxu1 %v13790_v20  ;;  %v1718_v20 = vsel %vm14300_vm5, %v14445_v36, %v14429_v13  ;;  %v1742_v13 = vsel %vm14300_vm5, %v14458_v57, %v14452_v42  ;;  %v1853_v36 = vshrl.u32 %v14493_v23, 16  ;;  %v14587_v15 = vrot.slane %v1808_v32, 4 }
  0xaa   :  { %12527 = vmatmul.mubr.bf16.gmra.mxu0 %v14083_v24  ;;  %12750 = vmatprep.subr.bf16.mxu1 %v13791_v16  ;;  %v1708_v24 = vsel %vm14300_vm5, %v14443_v38, %v14393_v44  ;;  %v1732_v44 = vsel %vm14300_vm5, %v14450_v45, %v14398_v56  ;;  %v14582_v38 = vrot.slane %v1811_v7, 5  ;;  %v14593_v56 = vld [vmem:[%s21575_s0 + $0x98] sm:$0x1]  ;;  %v1832_v42 = vor.u32 %v1831_v52, %v14533_v39 }
  0xab   :  { %12607 = vmatmul.mubr.bf16.gmra.mxu1 %v14403_v61  ;;  %12530 = vmatprep.mubr.bf16.mxu0 %v14098_v27  ;;  %v14570_v27 = vld [vmem:[%s21575_s0 + $0xa8] sm:$0xf]  ;;  %v13786_v45 = vld [vmem:[%s21574_s1 + $0x118] sm:$0xff]   ;;  %v1842_v57 = vrot.slane %v1840_v43, 4  ;;  %v14607_v29 = vcombine.low %v1708_v24, %v1718_v20  ;;  %v14609_v31 = vcombine.low %v1732_v44, %v1742_v13  ;;  %v1864_v23 = vshrl.u32 %v1479_v62, 16 }
  0xac   :  { %12610 = vmatprep.mubr.bf16.mxu1 %v14506_v34  ;;  %12671 = vmatpush3.bf16.msra.mxu0 %v14463_v58  ;;  %v1845_v58 = vrot.slane %v1843_v53, 5  ;;  %v1855_v30 = vrot.slane %v1853_v36, 4  ;;  %v1888_v4 = vshrl.u32 %v14570_v27, 16  ;;  %v1756_v7 = vsel %vm14300_vm5, %v14519_v47, %v14438_v63 }
  0xad   :  { %12672 = vmatprep.subr.bf16.mxu0 %v13784_v40  ;;  %12751 = vmatpush3.bf16.msra.mxu1 %v13791_v16  ;;  %v1873_v16 = vshll.u32 %v1480_v10, 16  ;;  %v1891_v32 = vshll.u32 %v14570_v27, 16  ;;  %v14637_v63 = vrot.slane %v1832_v42, 4  ;;  %v1859_v43 = vshll.u32 %v14593_v56, 16 }
  0xae   :  { %12752 = vmatprep.subr.bf16.mxu1 %v13792_v2  ;;  %v1846_v47 = vor.u32 %v1845_v58, %v1842_v57  ;;  %v1866_v25 = vrot.slane %v1864_v23, 4  ;;  %v1869_v52 = vrot.slane %v1867_v35, 5  ;;  %v1897_v53 = vshll.u32 %v1483_v41, 16  ;;  %v1487_v35 = vld [vmem:[%s21575_s0 + $0xbc] sm:$0x1] }
  0xaf   :  { %v1856_v62 = vor.u32 %v1855_v30, %v14599_v22  ;;  %v1879_v24 = vrot.slane %v1877_v37, 4  ;;  %v1890_v20 = vrot.slane %v1888_v4, 4  ;;  %v14655_v10 = vcombine.low %v1756_v7, %v1766_v8  ;;  %v13798_v7 = vld [vmem:[%s21574_s1 + $0x1c0] sm:$0xff]   ;;  %v13864_v8 = vld [vmem:[%s21575_s0 + $0x78] sm:$0xff]  }
  0xb0   :  { %12673 = vmatpush3.bf16.msra.mxu0 %v13784_v40  ;;  %v14635_v40 = vrot.slane %v1822_v18, 4  ;;  %v1780_v27 = vsel %vm14300_vm5, %v14560_v3, %v14476_v9  ;;  %v1893_v44 = vrot.slane %v1891_v32, 5  ;;  %v1912_v13 = vshrl.u32 %v14618_v6, 16  ;;  %v1484_v18 = vld [vmem:[%s21575_s0 + $0xb0] sm:$0x1]  ;;  %v13797_v3 = vld [vmem:[%s21574_s1 + $0x1c8] sm:$0xff]  }
  0xb1   :  { %12674 = vmatprep.subr.bf16.mxu0 %v13786_v45  ;;  %12753 = vmatpush3.bf16.msra.mxu1 %v13792_v2  ;;  %v14650_v2 = vrot.slane %v1873_v16, 5  ;;  %v1790_v36 = vsel %vm14300_vm5, %v14562_v46, %v14525_v11  ;;  %v1921_v56 = vshll.u32 %v1486_v17, 16  ;;  %v1494_v9 = vld [vmem:[%s21575_s0 + $0xd8] sm:$0xf]  ;;  %v14676_v42 = vrot.slane %v1846_v47, 4 }
  0xb2   :  { %12531 = vmatmul.mubr.bf16.gmra.mxu0 %v14103_v28  ;;  %12754 = vmatprep.subr.bf16.mxu1 %v13794_v26  ;;  %v1481_v28 = vld [vmem:[%s21575_s0 + $0xa4] sm:$0x1]  ;;  %v14678_v11 = vrot.slane %v1859_v43, 5  ;;  %v14680_v46 = vrot.slane %v1897_v53, 5  ;;  %v1903_v57 = vrot.slane %v1901_v59, 4  ;;  %v1804_v58 = vsel %vm14300_vm5, %v14585_v14, %v14488_v60 }
  0xb3   :  { %12611 = vmatmul.mubr.bf16.gmra.mxu1 %v14540_v49  ;;  %12534 = vmatprep.mubr.bf16.mxu0 %v14124_v33  ;;  %v13788_v33 = vld [vmem:[%s21574_s1 + $0x108] sm:$0xff]   ;;  %v14686_v41 = vrot.slane %v1856_v62, 4  ;;  %v1883_v23 = vshll.u32 %v1481_v28, 16  ;;  %v1814_v30 = vsel %vm14300_vm5, %v14587_v15, %v14582_v38  ;;  %v1880_v16 = vor.u32 %v1879_v24, %v14650_v2  ;;  %v1495_v60 = vld [vmem:[%s21575_s0 + $0xdc] sm:$0xf]  ;;  %v13793_v14 = vld [vmem:[%s21574_s1 + $0x100] sm:$0xff]  }
  0xb4   :  { %12614 = vmatprep.mubr.bf16.mxu1 %v14607_v29  ;;  %12675 = vmatpush3.bf16.msra.mxu0 %v13786_v45  ;;  %v1925_v45 = vshrl.u32 %v1486_v17, 16  ;;  %v1894_v37 = vor.u32 %v1893_v44, %v1890_v20  ;;  %v1914_v4 = vrot.slane %v1912_v13, 4  ;;  %v1917_v38 = vrot.slane %v1915_v21, 5  ;;  %v1496_v53 = vld [vmem:[%s21575_s0 + $0xe0] sm:$0x1] }
  0xb5   :  { %12676 = vmatprep.subr.bf16.mxu0 %v13787_v5  ;;  %12755 = vmatpush3.bf16.msra.mxu1 %v13794_v26  ;;  %v1870_v26 = vor.u32 %v1869_v52, %v1866_v25  ;;  %v14705_v15 = vrot.slane %v1921_v56, 5  ;;  %v1904_v32 = vor.u32 %v1903_v57, %v14680_v46  ;;  %v1907_v17 = vshll.u32 %v1484_v18, 16 }
  0xb6   :  { %12756 = vmatprep.subr.bf16.mxu1 %v13795_v0  ;;  %v1927_v6 = vrot.slane %v1925_v45, 4  ;;  %v1936_v47 = vshrl.u32 %v1494_v9, 16  ;;  %v1939_v43 = vshll.u32 %v1494_v9, 16  ;;  %v14718_v28 = vcombine.low %v1804_v58, %v1814_v30  ;;  %v1498_v45 = vld [vmem:[%s21575_s0 + $0xe8] sm:$0xf]  ;;  %v13866_v30 = vld [vmem:[%s21575_s0 + $0x90] sm:$0xff]  }
  0xb7   :  { %v1871_v25 = vrot.slane %v1870_v26, 4  ;;  %v1885_v52 = vrot.slane %v1883_v23, 5  ;;  %v1828_v59 = vsel %vm14300_vm5, %v14635_v40, %v14533_v39  ;;  %v1881_v62 = vrot.slane %v1880_v16, 4  ;;  %v1500_v26 = vld [vmem:[%s21575_s0 + $0xf0] sm:$0xf] }
  0xb8   :  { %12677 = vmatpush3.bf16.msra.mxu0 %v13787_v5  ;;  %v13863_v5 = vld [vmem:[%s21575_s0 + $0x6c] sm:$0xff]   ;;  %v1895_v24 = vrot.slane %v1894_v37, 4  ;;  %v1931_v20 = vshll.u32 %v1487_v35, 16  ;;  %v1918_v44 = vor.u32 %v1917_v38, %v1914_v4  ;;  %v1928_v13 = vor.u32 %v1927_v6, %v14705_v15  ;;  %v1503_v6 = vld [vmem:[%s21575_s0 + $0xfc] sm:$0xf] }
  0xb9   :  { %12678 = vmatprep.subr.bf16.mxu0 %v13788_v33  ;;  %12757 = vmatpush3.bf16.msra.mxu1 %v13795_v0  ;;  %v14716_v0 = vcombine.low %v1780_v27, %v1790_v36  ;;  %v13799_v27 = vld [vmem:[%s21574_s1 + $0xb8] sm:$0xff]   ;;  %v1945_v36 = vshll.u32 %v1495_v60, 16  ;;  %v1949_v18 = vshrl.u32 %v1495_v60, 16  ;;  %v1905_v39 = vrot.slane %v1904_v32, 4 }
  0xba   :  { %12535 = vmatmul.mubr.bf16.gmra.mxu0 %v13863_v5  ;;  %12758 = vmatprep.subr.bf16.mxu1 %v13797_v3  ;;  %v1909_v40 = vrot.slane %v1907_v17, 5  ;;  %v1938_v21 = vrot.slane %v1936_v47, 4  ;;  %v1941_v56 = vrot.slane %v1939_v43, 5  ;;  %v1838_v9 = vsel %vm14300_vm5, %v14637_v63, %v14628_v19  ;;  %v1504_v47 = vld [vmem:[%s21575_s0 + $0x100] sm:$0xf] }
  0xbb   :  { %12615 = vmatmul.mubr.bf16.gmra.mxu1 %v14609_v31  ;;  %12538 = vmatprep.mubr.bf16.mxu0 %v13864_v8  ;;  %v1862_v57 = vsel %vm14300_vm5, %v14686_v41, %v14678_v11  ;;  %v1876_v58 = vsel %vm14300_vm5, %v1871_v25, %v14650_v2  ;;  %v1886_v19 = vsel %vm14300_vm5, %v1881_v62, %v1885_v52  ;;  %v14760_v63 = vrot.slane %v1931_v20, 5  ;;  %v1501_v11 = vld [vmem:[%s21575_s0 + $0xf4] sm:$0xf]  ;;  %v13865_v2 = vld [vmem:[%s21575_s0 + $0x84] sm:$0xff]   ;;  %v1507_v62 = vld [vmem:[%s21575_s0 + $0x10c] sm:$0xf] }
  0xbc   :  { %12618 = vmatprep.mubr.bf16.mxu1 %v14655_v10  ;;  %12679 = vmatpush3.bf16.msra.mxu0 %v13788_v33  ;;  %v1497_v33 = vld [vmem:[%s21575_s0 + $0xe4] sm:$0xf]  ;;  %v14768_v41 = vrot.slane %v1918_v44, 4  ;;  %v14770_v23 = vrot.slane %v1928_v13, 4  ;;  %v14772_v35 = vrot.slane %v1945_v36, 5  ;;  %v1910_v16 = vsel %vm14300_vm5, %v1905_v39, %v1909_v40 }
  0xbd   :  { %12680 = vmatprep.subr.bf16.mxu0 %v13793_v14  ;;  %12759 = vmatpush3.bf16.msra.mxu1 %v13797_v3  ;;  %v1852_v3 = vsel %vm14300_vm5, %v14676_v42, %v14599_v22  ;;  %v1900_v22 = vsel %vm14300_vm5, %v1895_v24, %v14680_v46  ;;  %v1955_v42 = vshll.u32 %v1496_v53, 16  ;;  %v1951_v46 = vrot.slane %v1949_v18, 4  ;;  %v1499_v39 = vld [vmem:[%s21575_s0 + $0xec] sm:$0x1] }
  0xbe   :  { %12760 = vmatprep.subr.bf16.mxu1 %v13798_v7  ;;  %v1942_v37 = vor.u32 %v1941_v56, %v1938_v21  ;;  %v1960_v4 = vshrl.u32 %v1497_v33, 16  ;;  %v1963_v60 = vshll.u32 %v1497_v33, 16  ;;  %v1969_v5 = vshll.u32 %v1498_v45, 16 }
  0xbf   :  { %v1973_v38 = vshrl.u32 %v1498_v45, 16  ;;  %v1984_v8 = vshrl.u32 %v1500_v26, 16  ;;  %v1987_v32 = vshll.u32 %v1500_v26, 16  ;;  %v1993_v17 = vshll.u32 %v1501_v11, 16  ;;  %v13867_v45 = vld [vmem:[%s21575_s0 + $0x9c] sm:$0xff]  }
  0xc0   :  { %12681 = vmatpush3.bf16.msra.mxu0 %v13793_v14  ;;  %v14781_v14 = vcombine.low %v1828_v59, %v1838_v9  ;;  %v14791_v43 = vcombine.low %v1876_v58, %v1886_v19  ;;  %v14793_v25 = vcombine.low %v1900_v22, %v1910_v16  ;;  %v14795_v52 = vrot.slane %v1955_v42, 5  ;;  %v1506_v59 = vld [vmem:[%s21575_s0 + $0x108] sm:$0xf]  ;;  %v1502_v9 = vld [vmem:[%s21575_s0 + $0xf8] sm:$0x1] }
  0xc1   :  { %12761 = vmatpush3.bf16.msra.mxu1 %v13798_v7  ;;  %12826 = vmatprep.subr.bf16.mxu0 %v13799_v27  ;;  %v14786_v7 = vcombine.low %v1852_v3, %v1862_v57  ;;  %v1997_v53 = vshrl.u32 %v1501_v11, 16  ;;  %v1924_v24 = vsel %vm14300_vm5, %v14768_v41, %v14705_v15  ;;  %v14807_v20 = vrot.slane %v1942_v37, 4  ;;  %v13868_v19 = vld [vmem:[%s21575_s0 + $0xa8] sm:$0xff]  }
  0xc2   :  { %12539 = vmatmul.mubr.bf16.gmra.mxu0 %v13865_v2  ;;  %v1962_v27 = vrot.slane %v1960_v4, 4  ;;  %v1965_v44 = vrot.slane %v1963_v60, 5  ;;  %v1934_v13 = vsel %vm14300_vm5, %v14770_v23, %v14760_v63  ;;  %v1952_v36 = vor.u32 %v1951_v46, %v14772_v35 }
  0xc3   :  { %12619 = vmatmul.mubr.bf16.gmra.mxu1 %v14716_v0  ;;  %12542 = vmatprep.mubr.bf16.mxu0 %v13866_v30  ;;  %v14814_v18 = vrot.slane %v1969_v5, 5  ;;  %v1975_v33 = vrot.slane %v1973_v38, 4  ;;  %v1986_v40 = vrot.slane %v1984_v8, 4  ;;  %v1989_v15 = vrot.slane %v1987_v32, 5  ;;  %v1505_v5 = vld [vmem:[%s21575_s0 + $0x104] sm:$0x1] }
  0xc4   :  { %12622 = vmatprep.mubr.bf16.mxu1 %v14718_v28  ;;  %v14819_v21 = vrot.slane %v1993_v17, 5  ;;  %v2008_v56 = vshrl.u32 %v1503_v6, 16  ;;  %v1999_v3 = vrot.slane %v1997_v53, 4  ;;  %v2011_v57 = vshll.u32 %v1503_v6, 16  ;;  %v1508_v32 = vld [vmem:[%s21575_s0 + $0x110] sm:$0x1] }
  0xc5   :  { %v2017_v58 = vshll.u32 %v1504_v47, 16  ;;  %v2021_v26 = vshrl.u32 %v1504_v47, 16  ;;  %v2032_v22 = vshrl.u32 %v1506_v59, 16  ;;  %v2035_v63 = vshll.u32 %v1506_v59, 16 }
  0xc6   :  { %v2041_v42 = vshll.u32 %v1507_v62, 16  ;;  %v2045_v11 = vshrl.u32 %v1507_v62, 16  ;;  %v1953_v2 = vrot.slane %v1952_v36, 4  ;;  %v1966_v41 = vor.u32 %v1965_v44, %v1962_v27 }
  0xc7   :  { %v1976_v23 = vor.u32 %v1975_v33, %v14814_v18  ;;  %v1979_v46 = vshll.u32 %v1499_v39, 16  ;;  %v1948_v30 = vsel %vm14300_vm5, %v14807_v20, %v14772_v35  ;;  %v1990_v16 = vor.u32 %v1989_v15, %v1986_v40  ;;  %v1509_v40 = vld [vmem:[%s21575_s0 + $0x114] sm:$0xf] }
  0xc8   :  { %v2003_v37 = vshll.u32 %v1502_v9, 16  ;;  %v2010_v4 = vrot.slane %v2008_v56, 4  ;;  %v2000_v60 = vor.u32 %v1999_v3, %v14819_v21  ;;  %v2013_v38 = vrot.slane %v2011_v57, 5  ;;  %v13869_v15 = vld [vmem:[%s21575_s0 + $0xb4] sm:$0xff]  }
  0xc9   :  { %v14841_v6 = vrot.slane %v2017_v58, 5  ;;  %v2023_v8 = vrot.slane %v2021_v26, 4  ;;  %v2034_v17 = vrot.slane %v2032_v22, 4  ;;  %v2037_v47 = vrot.slane %v2035_v63, 5 }
  0xca   :  { %12543 = vmatmul.mubr.bf16.gmra.mxu0 %v13867_v45  ;;  %v14846_v35 = vrot.slane %v2041_v42, 5  ;;  %v2047_v53 = vrot.slane %v2045_v11, 4  ;;  %v1958_v59 = vsel %vm14300_vm5, %v1953_v2, %v14795_v52  ;;  %v1967_v62 = vrot.slane %v1966_v41, 4  ;;  %v1512_v42 = vld [vmem:[%s21575_s0 + $0x120] sm:$0xf] }
  0xcb   :  { %12623 = vmatmul.mubr.bf16.gmra.mxu1 %v14781_v14  ;;  %12546 = vmatprep.mubr.bf16.mxu0 %v13868_v19  ;;  %v1977_v20 = vrot.slane %v1976_v23, 4  ;;  %v1981_v27 = vrot.slane %v1979_v46, 5  ;;  %v14851_v44 = vcombine.low %v1924_v24, %v1934_v13  ;;  %v1991_v36 = vrot.slane %v1990_v16, 4  ;;  %v1510_v24 = vld [vmem:[%s21575_s0 + $0x118] sm:$0xf]  ;;  %v13870_v13 = vld [vmem:[%s21575_s0 + $0xc0] sm:$0xff]  }
  0xcc   :  { %12626 = vmatprep.mubr.bf16.mxu1 %v14786_v7  ;;  %v2005_v33 = vrot.slane %v2003_v37, 5  ;;  %v2027_v39 = vshll.u32 %v1505_v5, 16  ;;  %v2001_v56 = vrot.slane %v2000_v60, 4  ;;  %v2014_v45 = vor.u32 %v2013_v38, %v2010_v4  ;;  %v13785_v46 = vld [vmem:[%s21575_s0 + $0xcc] sm:$0xff]  }
  0xcd   :  { %v2024_v52 = vor.u32 %v2023_v8, %v14841_v6  ;;  %v2051_v9 = vshll.u32 %v1508_v32, 16  ;;  %v11052_v3 = vcombine.low %v1948_v30, %v1958_v59  ;;  %v2038_v57 = vor.u32 %v2037_v47, %v2034_v17  ;;  %v1511_v8 = vld [vmem:[%s21575_s0 + $0x11c] sm:$0x1] }
  0xce   :  { %v2048_v58 = vor.u32 %v2047_v53, %v14846_v35  ;;  %v1972_v26 = vsel %vm14300_vm5, %v1967_v62, %v14814_v18  ;;  %v1982_v19 = vsel %vm14300_vm5, %v1977_v20, %v1981_v27  ;;  %v2056_v22 = vshrl.u32 %v1509_v40, 16  ;;  %v1513_v18 = vld [vmem:[%s21575_s0 + $0x124] sm:$0xf] }
  0xcf   :  { %v2059_v63 = vshll.u32 %v1509_v40, 16  ;;  %v1996_v11 = vsel %vm14300_vm5, %v1991_v36, %v14819_v21  ;;  %v2029_v2 = vrot.slane %v2027_v39, 5  ;;  %v2065_v41 = vshll.u32 %v1510_v24, 16  ;;  %v1514_v39 = vld [vmem:[%s21575_s0 + $0x128] sm:$0x1] }
  0xd0   :  { %v2069_v23 = vshrl.u32 %v1510_v24, 16  ;;  %v2006_v30 = vsel %vm14300_vm5, %v2001_v56, %v2005_v33  ;;  %v2015_v16 = vrot.slane %v2014_v45, 4  ;;  %v2025_v37 = vrot.slane %v2024_v52, 4  ;;  %v1515_v40 = vld [vmem:[%s21575_s0 + $0x12c] sm:$0xf] }
  0xd1   :  { %v2053_v4 = vrot.slane %v2051_v9, 5  ;;  %v2039_v60 = vrot.slane %v2038_v57, 4  ;;  %v2049_v5 = vrot.slane %v2048_v58, 4  ;;  %v2080_v21 = vshrl.u32 %v1512_v42, 16  ;;  %v1518_v24 = vld [vmem:[%s21575_s0 + $0x138] sm:$0xf] }
  0xd2   :  { %12547 = vmatmul.mubr.bf16.gmra.mxu0 %v13869_v15  ;;  %v2083_v38 = vshll.u32 %v1512_v42, 16  ;;  %v2058_v32 = vrot.slane %v2056_v22, 4  ;;  %v2061_v17 = vrot.slane %v2059_v63, 5  ;;  %v2089_v47 = vshll.u32 %v1513_v18, 16  ;;  %v1516_v15 = vld [vmem:[%s21575_s0 + $0x130] sm:$0xf] }
  0xd3   :  { %12627 = vmatmul.mubr.bf16.gmra.mxu1 %v14791_v43  ;;  %12550 = vmatprep.mubr.bf16.mxu0 %v13870_v13  ;;  %v2093_v53 = vshrl.u32 %v1513_v18, 16  ;;  %v14891_v59 = vrot.slane %v2065_v41, 5  ;;  %v2071_v62 = vrot.slane %v2069_v23, 4  ;;  %v14893_v20 = vcombine.low %v1972_v26, %v1982_v19  ;;  %v1519_v19 = vld [vmem:[%s21575_s0 + $0x13c] sm:$0xf] }
  0xd4   :  { %12630 = vmatprep.mubr.bf16.mxu1 %v14793_v25  ;;  %v14895_v27 = vcombine.low %v1996_v11, %v2006_v30  ;;  %v2020_v36 = vsel %vm14300_vm5, %v2015_v16, %v14841_v6  ;;  %v2030_v33 = vsel %vm14300_vm5, %v2025_v37, %v2029_v2  ;;  %v13871_v6 = vld [vmem:[%s21575_s0 + $0xf0] sm:$0xff]   ;;  %v2044_v56 = vsel %vm14300_vm5, %v2039_v60, %v14846_v35 }
  0xd5   :  { %v2075_v45 = vshll.u32 %v1511_v8, 16  ;;  %v2082_v52 = vrot.slane %v2080_v21, 4  ;;  %v2085_v9 = vrot.slane %v2083_v38, 5  ;;  %v2054_v13 = vsel %vm14300_vm5, %v2049_v5, %v2053_v4  ;;  %v1517_v5 = vld [vmem:[%s21575_s0 + $0x134] sm:$0x1] }
  0xd6   :  { %v2062_v57 = vor.u32 %v2061_v17, %v2058_v32  ;;  %v14923_v58 = vrot.slane %v2089_v47, 5  ;;  %v2095_v26 = vrot.slane %v2093_v53, 4  ;;  %v2072_v35 = vor.u32 %v2071_v62, %v14891_v59  ;;  %v1521_v17 = vld [vmem:[%s21575_s0 + $0x144] sm:$0xf]  ;;  %v13872_v53 = vld [vmem:[%s21575_s0 + $0xfc] sm:$0xff]  }
  0xd7   :  { %v2099_v22 = vshll.u32 %v1514_v39, 16  ;;  %v2104_v63 = vshrl.u32 %v1515_v40, 16  ;;  %v2107_v42 = vshll.u32 %v1515_v40, 16  ;;  %v2113_v11 = vshll.u32 %v1516_v15, 16  ;;  %v1522_v40 = vld [vmem:[%s21575_s0 + $0x148] sm:$0xf] }
  0xd8   :  { %v2117_v2 = vshrl.u32 %v1516_v15, 16  ;;  %v2128_v41 = vshrl.u32 %v1518_v24, 16  ;;  %v14929_v23 = vcombine.low %v2020_v36, %v2030_v33  ;;  %v2086_v18 = vor.u32 %v2085_v9, %v2082_v52 }
  0xd9   :  { %v2141_v30 = vshrl.u32 %v1519_v19, 16  ;;  %v14931_v16 = vcombine.low %v2044_v56, %v2054_v13  ;;  %v14933_v37 = vrot.slane %v2062_v57, 4  ;;  %v14935_v4 = vrot.slane %v2075_v45, 5 }
  0xda   :  { %12551 = vmatmul.mubr.bf16.gmra.mxu0 %v13785_v46  ;;  %v2137_v46 = vshll.u32 %v1519_v19, 16  ;;  %v2096_v60 = vor.u32 %v2095_v26, %v14923_v58  ;;  %v14941_v21 = vrot.slane %v2072_v35, 4  ;;  %v14943_v38 = vrot.slane %v2099_v22, 5  ;;  %v1520_v26 = vld [vmem:[%s21575_s0 + $0x140] sm:$0x1] }
  0xdb   :  { %12631 = vmatmul.mubr.bf16.gmra.mxu1 %v14851_v44  ;;  %12554 = vmatprep.mubr.bf16.mxu0 %v13871_v6  ;;  %v2106_v8 = vrot.slane %v2104_v63, 4  ;;  %v2109_v32 = vrot.slane %v2107_v42, 5  ;;  %v14951_v62 = vrot.slane %v2113_v11, 5  ;;  %v2119_v36 = vrot.slane %v2117_v2, 4  ;;  %v13873_v6 = vld [vmem:[%s21575_s0 + $0x108] sm:$0xff]  }
  0xdc   :  { %12634 = vmatprep.mubr.bf16.mxu1 %v11052_v3  ;;  %v2131_v3 = vshll.u32 %v1518_v24, 16  ;;  %v2130_v33 = vrot.slane %v2128_v41, 4  ;;  %v2087_v56 = vrot.slane %v2086_v18, 4  ;;  %v2123_v45 = vshll.u32 %v1517_v5, 16 }
  0xdd   :  { %v14960_v52 = vrot.slane %v2137_v46, 5  ;;  %v2143_v9 = vrot.slane %v2141_v30, 4  ;;  %v2097_v57 = vrot.slane %v2096_v60, 4  ;;  %v2152_v19 = vshrl.u32 %v1521_v17, 16  ;;  %v1524_v60 = vld [vmem:[%s21575_s0 + $0x150] sm:$0xf] }
  0xde   :  { %v2133_v39 = vrot.slane %v2131_v3, 5  ;;  %v2155_v35 = vshll.u32 %v1521_v17, 16  ;;  %v2068_v63 = vsel %vm14300_vm5, %v14933_v37, %v14891_v59  ;;  %v2078_v42 = vsel %vm14300_vm5, %v14941_v21, %v14935_v4 }
  0xdf   :  { %v2161_v11 = vshll.u32 %v1522_v40, 16  ;;  %v2165_v2 = vshrl.u32 %v1522_v40, 16  ;;  %v2110_v18 = vor.u32 %v2109_v32, %v2106_v8  ;;  %v2120_v46 = vor.u32 %v2119_v36, %v14951_v62  ;;  %v1525_v36 = vld [vmem:[%s21575_s0 + $0x154] sm:$0xf] }
  0xe0   :  { %v2134_v30 = vor.u32 %v2133_v39, %v2130_v33  ;;  %v2092_v59 = vsel %vm14300_vm5, %v2087_v56, %v14923_v58  ;;  %v14985_v37 = vrot.slane %v2123_v45, 5  ;;  %v2144_v4 = vor.u32 %v2143_v9, %v14960_v52  ;;  %v1523_v58 = vld [vmem:[%s21575_s0 + $0x14c] sm:$0x1] }
  0xe1   :  { %v2147_v21 = vshll.u32 %v1520_v26, 16  ;;  %v2102_v32 = vsel %vm14300_vm5, %v2097_v57, %v14943_v38  ;;  %v14999_v39 = vrot.slane %v2161_v11, 5  ;;  %v2167_v40 = vrot.slane %v2165_v2, 4  ;;  %v13874_v38 = vld [vmem:[%s21575_s0 + $0x114] sm:$0xff]  }
  0xe2   :  { %v12364_v47 = vpop.f32.mrf.mxu0  ;;  %12555 = vmatmul.mubr.bf16.gmra.mxu0 %v13872_v53  ;;  %v2157_v53 = vrot.slane %v2155_v35, 5  ;;  %v15006_v9 = vrot.slane %v2110_v18, 4  ;;  %v15010_v57 = vrot.slane %v2134_v30, 4  ;;  %v15016_v35 = vcombine.low %v2068_v63, %v2078_v42 }
  0xe3   :  { %v12444_v15 = vpop.f32.mrf.mxu1  ;;  %12635 = vmatmul.mubr.bf16.gmra.mxu1 %v14893_v20  ;;  %12558 = vmatprep.mubr.bf16.mxu0 %v13873_v6  ;;  %v2179_v6 = vshll.u32 %v1524_v60, 16  ;;  %v15020_v11 = vrot.slane %v2147_v21, 5  ;;  %v2185_v2 = vshll.u32 %v1525_v36, 16  ;;  %v2171_v30 = vshll.u32 %v1523_v58, 16 }
  0xe4   :  { %v14962_v24 = vadd.f32 %v12444_v15, %v12364_v47  ;;  %v406_v13 = vpop.f32.mrf.mxu0  ;;  %12638 = vmatprep.mubr.bf16.mxu1 %v14895_v27  ;;  %v2154_v47 = vrot.slane %v2152_v19, 4  ;;  %v2176_v15 = vshrl.u32 %v1524_v60, 16  ;;  %v13875_v19 = vld [vmem:[%s21575_s0 + $0x120] sm:$0xff]   ;;  %v2189_v60 = vshrl.u32 %v1525_v36, 16  ;;  %v1526_v36 = vld [vmem:[%s21575_s0 + $0x158] sm:$0x1] }
  0xe5   :  { %v755_v22 = vpop.f32.mrf.mxu1 }
  0xe6   :  { %v14976_v41 = vadd.f32 %v755_v22, %v406_v13  ;;  %v12365_v3 = vpop.f32.mrf.mxu0  ;;  %v15008_v13 = vrot.slane %v2120_v46, 4  ;;  %v15018_v22 = vrot.slane %v2144_v4, 4  ;;  %v15025_v46 = vcombine.low %v2092_v59, %v2102_v32 }
  0xe7   :  { %v12445_v5 = vpop.f32.mrf.mxu1  ;;  %v2158_v42 = vor.u32 %v2157_v53, %v2154_v47  ;;  %v2168_v4 = vor.u32 %v2167_v40, %v14999_v39  ;;  %v2178_v21 = vrot.slane %v2176_v15, 4  ;;  %v2116_v32 = vsel %vm14300_vm5, %v15006_v9, %v14951_v62 }
  0xe8   :  { %v14988_v17 = vadd.f32 %v12445_v5, %v12365_v3  ;;  %v409_v8 = vpop.f32.mrf.mxu0  ;;  %21699 = vst [vmem:[#allocation3_spill] sm:$0xff] %v15025_v46  ;;  %v1527_v5 = vld [vmem:[%s21575_s0 + $0x15c] sm:$0xf]  ;;  %v2126_v47 = vsel %vm14300_vm5, %v15008_v13, %v14985_v37  ;;  %v2140_v53 = vsel %vm14300_vm5, %v15010_v57, %v14960_v52  ;;  %v2150_v62 = vsel %vm14300_vm5, %v15018_v22, %v15020_v11  ;;  %v1530_v37 = vld [vmem:[%s21575_s0 + $0x168] sm:$0xf] }
  0xe9   :  { %v758_v33 = vpop.f32.mrf.mxu1  ;;  %v15055_v40 = vrot.slane %v2185_v2, 5  ;;  %v2200_v15 = vshrl.u32 %v1527_v5, 16  ;;  %v2191_v9 = vrot.slane %v2189_v60, 4  ;;  %v2159_v22 = vrot.slane %v2158_v42, 4 }
  0xea   :  { %v15001_v56 = vadd.f32 %v758_v33, %v409_v8  ;;  %v12368_v45 = vpop.f32.mrf.mxu0  ;;  %12559 = vmatmul.mubr.bf16.gmra.mxu0 %v13874_v38  ;;  %v2181_v8 = vrot.slane %v2179_v6, 5  ;;  %v1528_v33 = vld [vmem:[%s21575_s0 + $0x160] sm:$0xf]  ;;  %v2203_v6 = vshll.u32 %v1527_v5, 16  ;;  %v2169_v11 = vrot.slane %v2168_v4, 4 }
  0xeb   :  { %v12448_v26 = vpop.f32.mrf.mxu1  ;;  %12639 = vmatmul.mubr.bf16.gmra.mxu1 %v14929_v23  ;;  %12562 = vmatprep.mubr.bf16.mxu0 %v13875_v19  ;;  %v2209_v13 = vshll.u32 %v1528_v33, 16  ;;  %v2213_v57 = vshrl.u32 %v1528_v33, 16  ;;  %v2173_v2 = vrot.slane %v2171_v30, 5  ;;  %v2195_v60 = vshll.u32 %v1526_v36, 16  ;;  %v1529_v33 = vld [vmem:[%s21575_s0 + $0x164] sm:$0x1] }
  0xec   :  { %v15022_v3 = vadd.f32 %v12448_v26, %v12368_v45  ;;  %v422_v18 = vpop.f32.mrf.mxu0  ;;  %12642 = vmatprep.mubr.bf16.mxu1 %v14931_v16  ;;  %v1531_v26 = vld [vmem:[%s21575_s0 + $0x16c] sm:$0xf]  ;;  %v2227_v51 = vshll.u32 %v1530_v37, 16  ;;  %v13877_v30 = vld [vmem:[%s21575_s0 + $0x138] sm:$0xff]   ;;  %v2202_v42 = vrot.slane %v2200_v15, 4  ;;  %v2205_v4 = vrot.slane %v2203_v6, 5 }
  0xed   :  { %v771_v63 = vpop.f32.mrf.mxu1  ;;  %v2164_v15 = vsel %vm14300_vm5, %v2159_v22, %v14999_v39 }
  0xee   :  { %v15034_v45 = vadd.f32 %v771_v63, %v422_v18  ;;  %v12369_v59 = vpop.f32.mrf.mxu0  ;;  %v2182_v18 = vor.u32 %v2181_v8, %v2178_v21  ;;  %v2233_v21 = vshll.u32 %v1531_v26, 16  ;;  %v2237_v8 = vshrl.u32 %v1531_v26, 16 }
  0xef   :  { %v12449_v58 = vpop.f32.mrf.mxu1  ;;  %v2219_v26 = vshll.u32 %v1529_v33, 16  ;;  %v2206_v33 = vor.u32 %v2205_v4, %v2202_v42  ;;  %v13878_v42 = vld [vmem:[%s21575_s0 + $0x144] sm:$0xff]  }
  0xf0   :  { %21700 = vst [vmem:[#allocation4_spill] sm:$0xff] %v15034_v45  ;;  %v15060_v38 = vadd.f32 %v12449_v58, %v12369_v59  ;;  %v425_v52 = vpop.f32.mrf.mxu0  ;;  %v13876_v59 = vld [vmem:[%s21575_s0 + $0x12c] sm:$0xff]   ;;  %v2224_v58 = vshrl.u32 %v1530_v37, 16  ;;  %v15081_v37 = vrot.slane %v2209_v13, 5  ;;  %v15083_v45 = vcombine.low %v2116_v32, %v2126_v47 }
  0xf1   :  { %v774_v19 = vpop.f32.mrf.mxu1  ;;  %v15088_v6 = vrot.slane %v2182_v18, 4  ;;  %v2229_v32 = vrot.slane %v2227_v51, 5  ;;  %v15099_v39 = vrot.slane %v2233_v21, 5  ;;  %v2239_v22 = vrot.slane %v2237_v8, 4  ;;  %v1533_v18 = vld [vmem:[%s21575_s0 + $0x174] sm:$0xf] }
  0xf2   :  { %21701 = vst [vmem:[#allocation5_spill] sm:$0xff] %v15060_v38  ;;  %v15065_v5 = vadd.f32 %v774_v19, %v425_v52  ;;  %v12372_v63 = vpop.f32.mrf.mxu0  ;;  %12563 = vmatmul.mubr.bf16.gmra.mxu0 %v13876_v59  ;;  %v2192_v19 = vor.u32 %v2191_v9, %v15055_v40  ;;  %v2215_v59 = vrot.slane %v2213_v57, 4  ;;  %21704 = vst [vmem:[#allocation8_spill] sm:$0xff] %v15083_v45  ;;  %v1532_v9 = vld [vmem:[%s21575_s0 + $0x170] sm:$0x1]  ;;  %v2226_v13 = vrot.slane %v2224_v58, 4 }
  0xf3   :  { %v12452_v38 = vpop.f32.mrf.mxu1  ;;  %12643 = vmatmul.mubr.bf16.gmra.mxu1 %v15016_v35  ;;  %12566 = vmatprep.mubr.bf16.mxu0 %v13877_v30  ;;  %v2174_v30 = vsel %vm14300_vm5, %v2169_v11, %v2173_v2  ;;  %v15097_v57 = vcombine.low %v2140_v53, %v2150_v62  ;;  %v1534_v51 = vld [vmem:[%s21575_s0 + $0x178] sm:$0xf]  ;;  %v15116_v58 = vrot.slane %v2219_v26, 5  ;;  %v13879_v26 = vld [vmem:[%s21575_s0 + $0x150] sm:$0xff]  }
  0xf4   :  { %21702 = vst [vmem:[#allocation6_spill] sm:$0xff] %v15065_v5  ;;  %v15077_v52 = vadd.f32 %v12452_v38, %v12372_v63  ;;  %v438_v36 = vpop.f32.mrf.mxu0  ;;  %12646 = vmatprep.mubr.bf16.mxu1 %v15025_v46  ;;  %v2193_v2 = vrot.slane %v2192_v19, 4  ;;  %v15110_v62 = vcombine.low %v2164_v15, %v2174_v30  ;;  %v2230_v4 = vor.u32 %v2229_v32, %v2226_v13  ;;  %v1536_v15 = vld [vmem:[%s21575_s0 + $0x180] sm:$0xf] }
  0xf5   :  { %v787_v5 = vpop.f32.mrf.mxu1  ;;  %21706 = vst [vmem:[#allocation10_spill] sm:$0xff] %v15097_v57  ;;  %v2243_v19 = vshll.u32 %v1532_v9, 16  ;;  %v2251_v30 = vshll.u32 %v1533_v18, 16  ;;  %v2257_v9 = vshll.u32 %v1534_v51, 16  ;;  %v2261_v13 = vshrl.u32 %v1534_v51, 16 }
  0xf6   :  { %21703 = vst [vmem:[#allocation7_spill] sm:$0xff] %v15077_v52  ;;  %v15090_v38 = vadd.f32 %v787_v5, %v438_v36  ;;  %v12373_v63 = vpop.f32.mrf.mxu0  ;;  %v2197_v52 = vrot.slane %v2195_v60, 5  ;;  %v2216_v36 = vor.u32 %v2215_v59, %v15081_v37  ;;  %v2188_v60 = vsel %vm14300_vm5, %v15088_v6, %v15055_v40  ;;  %v1537_v40 = vld [vmem:[%s21575_s0 + $0x184] sm:$0xf] }
  0xf7   :  { %v12453_v47 = vpop.f32.mrf.mxu1  ;;  %v2248_v59 = vshrl.u32 %v1533_v18, 16  ;;  %v2231_v18 = vrot.slane %v2230_v4, 4  ;;  %v2245_v51 = vrot.slane %v2243_v19, 5  ;;  %v1539_v4 = vld [vmem:[%s21575_s0 + $0x18c] sm:$0xf] }
  0xf8   :  { %21705 = vst [vmem:[#allocation9_spill] sm:$0xff] %v15090_v38  ;;  %v15104_v5 = vadd.f32 %v12453_v47, %v12373_v63  ;;  %v441_v11 = vpop.f32.mrf.mxu0  ;;  %v2240_v63 = vor.u32 %v2239_v22, %v15099_v39  ;;  %v2275_v38 = vshll.u32 %v1536_v15, 16 }
  0xf9   :  { %v790_v53 = vpop.f32.mrf.mxu1 }
  0xfa   :  { %21707 = vst [vmem:[#allocation11_spill] sm:$0xff] %v15104_v5  ;;  %v15118_v21 = vadd.f32 %v790_v53, %v441_v11  ;;  %v12376_v8 = vpop.f32.mrf.mxu0  ;;  %12567 = vmatmul.mubr.bf16.gmra.mxu0 %v13878_v42  ;;  %v2198_v11 = vsel %vm14300_vm5, %v2193_v2, %v2197_v52  ;;  %v2207_v53 = vrot.slane %v2206_v33, 4  ;;  %v2217_v42 = vrot.slane %v2216_v36, 4 }
  0xfb   :  { %v12456_v6 = vpop.f32.mrf.mxu1  ;;  %12647 = vmatmul.mubr.bf16.gmra.mxu1 %v15083_v45  ;;  %12570 = vmatprep.mubr.bf16.mxu0 %v13879_v26  ;;  %v2272_v5 = vshrl.u32 %v1536_v15, 16  ;;  %v2281_v45 = vshll.u32 %v1537_v40, 16  ;;  %v2285_v26 = vshrl.u32 %v1537_v40, 16  ;;  %v2253_v52 = vrot.slane %v2251_v30, 5 }
  0xfc   :  { %21708 = vst [vmem:[#allocation12_spill] sm:$0xff] %v15118_v21  ;;  %v15134_v32 = vadd.f32 %v12456_v6, %v12376_v8  ;;  %v454_v47 = vpop.f32.mrf.mxu0  ;;  %12650 = vmatprep.mubr.bf16.mxu1 %v15097_v57  ;;  %v2250_v8 = vrot.slane %v2248_v59, 4  ;;  %v1535_v57 = vld [vmem:[%s21575_s0 + $0x17c] sm:$0x1]  ;;  %v15144_v2 = vrot.slane %v2257_v9, 5  ;;  %v2263_v33 = vrot.slane %v2261_v13, 4 }
  0xfd   :  { %v803_v21 = vpop.f32.mrf.mxu1  ;;  %v15148_v40 = vcombine.low %v2188_v60, %v2198_v11  ;;  %v2274_v59 = vrot.slane %v2272_v5, 4  ;;  %v15156_v30 = vrot.slane %v2281_v45, 5  ;;  %v2287_v9 = vrot.slane %v2285_v26, 4  ;;  %v1540_v13 = vld [vmem:[%s21575_s0 + $0x190] sm:$0xf]  ;;  %v13881_v26 = vld [vmem:[%s21575_s0 + $0x168] sm:$0xff]  }
  0xfe   :  { %21709 = vst [vmem:[#allocation13_spill] sm:$0xff] %v15134_v32  ;;  %v15139_v46 = vadd.f32 %v803_v21, %v454_v47  ;;  %v12377_v22 = vpop.f32.mrf.mxu0  ;;  %v2241_v32 = vrot.slane %v2240_v63, 4  ;;  %v2212_v21 = vsel %vm14300_vm5, %v2207_v53, %v15081_v37  ;;  %v2277_v63 = vrot.slane %v2275_v38, 5  ;;  %v13880_v37 = vld [vmem:[%s21575_s0 + $0x15c] sm:$0xff]   ;;  %v1538_v11 = vld [vmem:[%s21575_s0 + $0x188] sm:$0x1] }
  0xff   :  { %v12457_v6 = vpop.f32.mrf.mxu1  ;;  %v2222_v5 = vsel %vm14300_vm5, %v2217_v42, %v15116_v58  ;;  %v2236_v45 = vsel %vm14300_vm5, %v2231_v18, %v15099_v39  ;;  %v2267_v38 = vshll.u32 %v1535_v57, 16  ;;  %v2254_v42 = vor.u32 %v2253_v52, %v2250_v8  ;;  %v15185_v57 = vld [vmem:[%s21574_s1 + $0x178] sm:$0xff]  }
 0x100   :  { %21710 = vst [vmem:[#allocation14_spill] sm:$0xff] %v15139_v46  ;;  %v15146_v36 = vadd.f32 %v12457_v6, %v12377_v22  ;;  %v457_v15 = vpop.f32.mrf.mxu0  ;;  %v2246_v58 = vsel %vm14300_vm5, %v2241_v32, %v2245_v51  ;;  %v2264_v22 = vor.u32 %v2263_v33, %v15144_v2  ;;  %v2296_v39 = vshrl.u32 %v1539_v4, 16  ;;  %12906 = vmatprep.subr.bf16.mxu1 %v15185_v57 }
 0x101   :  { %v806_v19 = vpop.f32.mrf.mxu1  ;;  %v2288_v32 = vor.u32 %v2287_v9, %v15156_v30  ;;  %v2291_v51 = vshll.u32 %v1538_v11, 16  ;;  %v15194_v33 = vcombine.low %v2212_v21, %v2222_v5 }
 0x102   :  { %21711 = vst [vmem:[#allocation15_spill] sm:$0xff] %v15146_v36  ;;  %v15161_v60 = vadd.f32 %v806_v19, %v457_v15  ;;  %v12380_v47 = vpop.f32.mrf.mxu0  ;;  %12571 = vmatmul.mubr.bf16.gmra.mxu0 %v13880_v37  ;;  %v2299_v15 = vshll.u32 %v1539_v4, 16  ;;  %v2305_v19 = vshll.u32 %v1540_v13, 16  ;;  %v2309_v37 = vshrl.u32 %v1540_v13, 16 }
 0x103   :  { %v12460_v53 = vpop.f32.mrf.mxu1  ;;  %12651 = vmatmul.mubr.bf16.gmra.mxu1 %v15110_v62  ;;  %12574 = vmatprep.mubr.bf16.mxu0 %v13881_v26  ;;  %v2255_v36 = vrot.slane %v2254_v42, 4  ;;  %v2265_v4 = vrot.slane %v2264_v22, 4  ;;  %v2298_v46 = vrot.slane %v2296_v39, 4  ;;  %v2289_v5 = vrot.slane %v2288_v32, 4  ;;  %v13883_v22 = vld [vmem:[%s21575_s0 + $0x180] sm:$0xff]  }
 0x104   :  { %21712 = vst [vmem:[#allocation16_spill] sm:$0xff] %v15161_v60  ;;  %v15187_v18 = vadd.f32 %v12460_v53, %v12380_v47  ;;  %v470_v6 = vpop.f32.mrf.mxu0  ;;  %12654 = vmatprep.mubr.bf16.mxu1 %v15148_v40  ;;  %v2278_v60 = vor.u32 %v2277_v63, %v2274_v59  ;;  %v2269_v47 = vrot.slane %v2267_v38, 5  ;;  %v1541_v63 = vld [vmem:[%s21575_s0 + $0x194] sm:$0x1]  ;;  %v2301_v9 = vrot.slane %v2299_v15, 5 }
 0x105   :  { %v819_v26 = vpop.f32.mrf.mxu1  ;;  %v2307_v11 = vrot.slane %v2305_v19, 5  ;;  %v2293_v38 = vrot.slane %v2291_v51, 5  ;;  %v2315_v39 = vshll.u32 %v1541_v63, 16 }
 0x106   :  { %21713 = vst [vmem:[#allocation17_spill] sm:$0xff] %v15187_v18  ;;  %v15192_v8 = vadd.f32 %v819_v26, %v470_v6  ;;  %v12381_v52 = vpop.f32.mrf.mxu0  ;;  %v15196_v18 = vcombine.low %v2236_v45, %v2246_v58  ;;  %v2311_v6 = vrot.slane %v2309_v37, 4  ;;  %v2279_v21 = vrot.slane %v2278_v60, 4  ;;  %v13882_v58 = vld [vmem:[%s21575_s0 + $0x174] sm:$0xff]  }
 0x107   :  { %v12461_v53 = vpop.f32.mrf.mxu1  ;;  %v2260_v60 = vsel %vm14300_vm5, %v2255_v36, %v15144_v2  ;;  %v2270_v37 = vsel %vm14300_vm5, %v2265_v4, %v2269_v47  ;;  %v2302_v32 = vor.u32 %v2301_v9, %v2298_v46 }
 0x108   :  { %21714 = vst [vmem:[#allocation18_spill] sm:$0xff] %v15192_v8  ;;  %v15198_v13 = vadd.f32 %v12461_v53, %v12381_v52  ;;  %v473_v59 = vpop.f32.mrf.mxu0  ;;  %v2312_v51 = vor.u32 %v2311_v6, %v2307_v11  ;;  %v2284_v53 = vsel %vm14300_vm5, %v2279_v21, %v15156_v30  ;;  %v13884_v21 = vld [vmem:[%s21575_s0 + $0x18c] sm:$0xff]  }
 0x109   :  { %v822_v26 = vpop.f32.mrf.mxu1  ;;  %v2303_v4 = vrot.slane %v2302_v32, 4 }
 0x10a   :  { %v15203_v8 = vadd.f32 %v822_v26, %v473_v59  ;;  %v12384_v45 = vpop.f32.mrf.mxu0  ;;  %12575 = vmatmul.mubr.bf16.gmra.mxu0 %v13882_v58  ;;  %v2294_v59 = vsel %vm14300_vm5, %v2289_v5, %v2293_v38  ;;  %v15227_v26 = vcombine.low %v2260_v60, %v2270_v37  ;;  %v2313_v9 = vrot.slane %v2312_v51, 4  ;;  %v13885_v38 = vld [vmem:[%s21575_s0 + $0x198] sm:$0xff]  }
 0x10b   :  { %v12464_v42 = vpop.f32.mrf.mxu1  ;;  %12655 = vmatmul.mubr.bf16.gmra.mxu1 %v15194_v33  ;;  %12578 = vmatprep.mubr.bf16.mxu0 %v13883_v22  ;;  %v15231_v46 = vcombine.low %v2284_v53, %v2294_v59 }
 0x10c   :  { %v15215_v15 = vadd.f32 %v12464_v42, %v12384_v45  ;;  %v486_v19 = vpop.f32.mrf.mxu0  ;;  %12658 = vmatprep.mubr.bf16.mxu1 %v15196_v18  ;;  %v2317_v45 = vrot.slane %v2315_v39, 5  ;;  %v2308_v39 = vsel %vm14300_vm5, %v2303_v4, %v2307_v11  ;;  %v13886_v11 = vld [vmem:[%s21575_s0 + $0x10] sm:$0xf] }
 0x10d   :  { %v835_v52 = vpop.f32.mrf.mxu1 }
 0x10e   :  { %v15225_v2 = vadd.f32 %v835_v52, %v486_v19  ;;  %v12385_v36 = vpop.f32.mrf.mxu0  ;;  %v2318_v19 = vsel %vm14300_vm5, %v2313_v9, %v2317_v45  ;;  %v13796_v52 = vld [vmem:[%s21575_s0 + $0x1a4] sm:$0xff]   ;;  %v3957_v45 = vrot.slane %v13886_v11, 5 }
 0x10f   :  { %v12465_v63 = vpop.f32.mrf.mxu1  ;;  %v15254_v59 = vcombine.low %v2308_v39, %v2318_v19  ;;  %v3814_v39 = vld [vmem:[%s21575_s0 + $0xc] sm:$0xe] }
 0x110   :  { %v15229_v58 = vadd.f32 %v12465_v63, %v12385_v36  ;;  %v489_v47 = vpop.f32.mrf.mxu0 }
 0x111   :  { %v838_v6 = vpop.f32.mrf.mxu1 }
 0x112   :  { %v15233_v42 = vadd.f32 %v838_v6, %v489_v47  ;;  %v12388_v30 = vpop.f32.mrf.mxu0  ;;  %12579 = vmatmul.mubr.bf16.gmra.mxu0 %v13884_v21 }
 0x113   :  { %v12468_v5 = vpop.f32.mrf.mxu1  ;;  %12659 = vmatmul.mubr.bf16.gmra.mxu1 %v15227_v26  ;;  %12582 = vmatprep.mubr.bf16.mxu0 %v13885_v38 }
 0x114   :  { %v15242_v22 = vadd.f32 %v12468_v5, %v12388_v30  ;;  %v502_v60 = vpop.f32.mrf.mxu0  ;;  %12662 = vmatprep.mubr.bf16.mxu1 %v15231_v46  ;;  %v13887_v30 = vld [vmem:[%s21575_s0 + $0x14] sm:$0x1] }
 0x115   :  { %v851_v37 = vpop.f32.mrf.mxu1  ;;  %v3960_v21 = vrot.slane %v13887_v30, 5  ;;  %v13800_v30 = vld [vmem:[%s21574_s1 + $0xb0] sm:$0xff]  }
 0x116   :  { %v15249_v32 = vadd.f32 %v851_v37, %v502_v60  ;;  %v12389_v51 = vpop.f32.mrf.mxu0 }
 0x117   :  { %v12469_v53 = vpop.f32.mrf.mxu1 }
 0x118   :  { %v15256_v36 = vadd.f32 %v12469_v53, %v12389_v51  ;;  %v505_v63 = vpop.f32.mrf.mxu0  ;;  %v11129_v51 = vrot.slane %v3814_v39, 9  ;;  %v3815_v53 = vld [vmem:[%s21575_s0 + $0x18] sm:$0xe] }
 0x119   :  { %v854_v47 = vpop.f32.mrf.mxu1 }
 0x11a   :  { %v15261_v4 = vadd.f32 %v854_v47, %v505_v63  ;;  %v12392_v9 = vpop.f32.mrf.mxu0  ;;  %12583 = vmatmul.mubr.bf16.gmra.mxu0 %v13796_v52  ;;  %v3958_v11 = vsel %vm14191_vm2, %v11129_v51, %v3957_v45  ;;  %v21716_v51 = vrot.slane %v14177_v48, 5 }
 0x11b   :  { %v12472_v6 = vpop.f32.mrf.mxu1  ;;  %12663 = vmatmul.mubr.bf16.gmra.mxu1 %v15254_v59  ;;  %12682 = vmatprep.mubr.bf16.mxu0 %v14354_v1  ;;  %v3959_v1 = vrot.slane %v3957_v45, 4  ;;  %v13807_v45 = vld [vmem:[%s21574_s1 + $0x170] sm:$0xff]  }
 0x11c   :  { %v15268_v5 = vadd.f32 %v12472_v6, %v12392_v9  ;;  %v518_v38 = vpop.f32.mrf.mxu0  ;;  %12762 = vmatprep.mubr.bf16.mxu1 %v14356_v50 }
 0x11d   :  { %v867_v60 = vpop.f32.mrf.mxu1  ;;  %v3961_v9 = vsel %vm14191_vm2, %v3959_v1, %v3960_v21  ;;  %v13888_v21 = vld [vmem:[%s21574_s1 + $0xb8] sm:$0xff]  }
 0x11e   :  { %v15274_v19 = vadd.f32 %v867_v60, %v518_v38  ;;  %v12393_v37 = vpop.f32.mrf.mxu0  ;;  %v15288_v38 = vcombine.low %v3958_v11, %v3961_v9  ;;  %v11130_v60 = vrot.slane %v3815_v53, 9  ;;  %v13801_v53 = vld [vmem:[%s21574_s1 + $0xa8] sm:$0xff]  }
 0x11f   :  { %v12473_v52 = vpop.f32.mrf.mxu1 }
 0x120   :  { %21715 = vst [vmem:[#allocation19_spill] sm:$0xff] %v15274_v19  ;;  %v15279_v63 = vadd.f32 %v12473_v52, %v12393_v37  ;;  %v521_v47 = vpop.f32.mrf.mxu0  ;;  %v3965_v1 = vsel %vm14191_vm2, %v11130_v60, %v21716_v51 }
 0x121   :  { %v870_v6 = vpop.f32.mrf.mxu1 }
 0x122   :  { %v15290_v39 = vadd.f32 %v870_v6, %v521_v47  ;;  %v12396_v19 = vpop.f32.mrf.mxu0  ;;  %12683 = vmatmul.mubr.bf16.vlgmr.msra.gmra.mxu0 %v14356_v50  ;;  %v15312_v47 = vcombine.low %v3965_v1, %v14197_v55 }
 0x123   :  { %v12476_v37 = vpop.f32.mrf.mxu1  ;;  %12827 = vmatpush3.bf16.msra.mxu0 %v13888_v21  ;;  %12763 = vmatmul.mubr.bf16.vlgmr.msra.gmra.mxu1 %v14403_v61 }
 0x124   :  { %v15304_v52 = vadd.f32 %v12476_v37, %v12396_v19  ;;  %v534_v50 = vpop.f32.mrf.mxu0  ;;  %12686 = vmatprep.mubr.bf16.mxu0 %v14403_v61  ;;  %12766 = vmatprep.mubr.bf16.mxu1 %v14506_v34  ;;  %21717 = vst [vmem:[#allocation20_spill] sm:$0xff] %v15312_v47  ;;  %v13808_v61 = vld [vmem:[%s21574_s1 + $0x168] sm:$0xff]   ;;  %v13802_v37 = vld [vmem:[%s21574_s1 + $0xa0] sm:$0xff]  }
 0x125   :  { %v883_v11 = vpop.f32.mrf.mxu1  ;;  %12828 = vmatprep.subr.bf16.mxu0 %v13800_v30  ;;  %12907 = vmatpush3.bf16.msra.mxu1 %v15185_v57 }
 0x126   :  { %v15315_v48 = vadd.f32 %v883_v11, %v534_v50  ;;  %v12397_v19 = vpop.f32.mrf.mxu0  ;;  %12908 = vmatprep.subr.bf16.mxu1 %v13807_v45 }
 0x127   :  { %v12477_v9 = vpop.f32.mrf.mxu1  ;;  %12829 = vmatpush3.bf16.msra.mxu0 %v13800_v30  ;;  %v13809_v30 = vld [vmem:[%s21574_s1 + $0x160] sm:$0xff]  }
 0x128   :  { %21718 = vst [vmem:[#allocation21_spill] sm:$0xff] %v15315_v48  ;;  %v15320_v6 = vadd.f32 %v12477_v9, %v12397_v19  ;;  %v537_v60 = vpop.f32.mrf.mxu0  ;;  %12830 = vmatprep.subr.bf16.mxu0 %v13801_v53 }
 0x129   :  { %v886_v55 = vpop.f32.mrf.mxu1  ;;  %12909 = vmatpush3.bf16.msra.mxu1 %v13807_v45 }
 0x12a   :  { %21719 = vst [vmem:[#allocation22_spill] sm:$0xff] %v15320_v6  ;;  %v15325_v57 = vadd.f32 %v886_v55, %v537_v60  ;;  %v12400_v21 = vpop.f32.mrf.mxu0  ;;  %12687 = vmatmul.mubr.bf16.gmra.mxu0 %v14506_v34  ;;  %12910 = vmatprep.subr.bf16.mxu1 %v13808_v61  ;;  %v13803_v34 = vld [vmem:[%s21574_s1 + $0x98] sm:$0xff]  }
 0x12b   :  { %v12480_v51 = vpop.f32.mrf.mxu1  ;;  %12767 = vmatmul.mubr.bf16.gmra.mxu1 %v14540_v49  ;;  %12690 = vmatprep.mubr.bf16.mxu0 %v14540_v49  ;;  %v13811_v49 = vld [vmem:[%s21574_s1 + $0x158] sm:$0xff]  }
 0x12c   :  { %21720 = vst [vmem:[#allocation23_spill] sm:$0xff] %v15325_v57  ;;  %v15333_v1 = vadd.f32 %v12480_v51, %v12400_v21  ;;  %v550_v50 = vpop.f32.mrf.mxu0  ;;  %12770 = vmatprep.mubr.bf16.mxu1 %v14607_v29  ;;  %12831 = vmatpush3.bf16.msra.mxu0 %v13801_v53  ;;  %v13804_v21 = vld [vmem:[%s21574_s1 + $0x90] sm:$0xff]  }
 0x12d   :  { %v899_v45 = vpop.f32.mrf.mxu1  ;;  %12832 = vmatprep.subr.bf16.mxu0 %v13802_v37  ;;  %12911 = vmatpush3.bf16.msra.mxu1 %v13808_v61 }
 0x12e   :  { %21721 = vst [vmem:[#allocation24_spill] sm:$0xff] %v15333_v1  ;;  %v15339_v11 = vadd.f32 %v899_v45, %v550_v50  ;;  %v12401_v19 = vpop.f32.mrf.mxu0  ;;  %12912 = vmatprep.subr.bf16.mxu1 %v13809_v30  ;;  %v13812_v50 = vld [vmem:[%s21574_s1 + $0x150] sm:$0xff]  }
 0x12f   :  { %v12481_v9 = vpop.f32.mrf.mxu1 }
 0x130   :  { %21722 = vst [vmem:[#allocation25_spill] sm:$0xff] %v15339_v11  ;;  %v15344_v60 = vadd.f32 %v12481_v9, %v12401_v19  ;;  %v553_v55 = vpop.f32.mrf.mxu0  ;;  %12833 = vmatpush3.bf16.msra.mxu0 %v13802_v37 }
 0x131   :  { %v902_v53 = vpop.f32.mrf.mxu1  ;;  %12834 = vmatprep.subr.bf16.mxu0 %v13803_v34  ;;  %12913 = vmatpush3.bf16.msra.mxu1 %v13809_v30 }
 0x132   :  { %21723 = vst [vmem:[#allocation26_spill] sm:$0xff] %v15344_v60  ;;  %v15349_v61 = vadd.f32 %v902_v53, %v553_v55  ;;  %v12404_v51 = vpop.f32.mrf.mxu0  ;;  %12691 = vmatmul.mubr.bf16.gmra.mxu0 %v14607_v29  ;;  %12914 = vmatprep.subr.bf16.mxu1 %v13811_v49  ;;  %v13805_v29 = vld [vmem:[%s21574_s1 + $0x88] sm:$0xff]  }
 0x133   :  { %v12484_v45 = vpop.f32.mrf.mxu1  ;;  %12771 = vmatmul.mubr.bf16.gmra.mxu1 %v14609_v31  ;;  %12694 = vmatprep.mubr.bf16.mxu0 %v14609_v31  ;;  %v13813_v31 = vld [vmem:[%s21574_s1 + $0x148] sm:$0xff]  }
 0x134   :  { %21724 = vst [vmem:[#allocation27_spill] sm:$0xff] %v15349_v61  ;;  %v15357_v37 = vadd.f32 %v12484_v45, %v12404_v51  ;;  %v566_v19 = vpop.f32.mrf.mxu0  ;;  %12774 = vmatprep.mubr.bf16.mxu1 %v14655_v10  ;;  %12835 = vmatpush3.bf16.msra.mxu0 %v13803_v34  ;;  %v15393_v61 = vld [vmem:[%s21574_s1 + $0x238] sm:$0xff]  }
 0x135   :  { %v915_v30 = vpop.f32.mrf.mxu1  ;;  %12836 = vmatprep.subr.bf16.mxu0 %v13804_v21  ;;  %12915 = vmatpush3.bf16.msra.mxu1 %v13811_v49  ;;  %21730 = vst [vmem:[#allocation33_spill] sm:$0xff] %v15393_v61 }
 0x136   :  { %21725 = vst [vmem:[#allocation28_spill] sm:$0xff] %v15357_v37  ;;  %v15363_v9 = vadd.f32 %v915_v30, %v566_v19  ;;  %v12405_v55 = vpop.f32.mrf.mxu0  ;;  %12916 = vmatprep.subr.bf16.mxu1 %v13812_v50  ;;  %v13810_v37 = vld [vmem:[%s21574_s1 + $0x80] sm:$0xff]  }
 0x137   :  { %v12485_v53 = vpop.f32.mrf.mxu1  ;;  %v1488_v30 = vld [vmem:[%s21575_s0 + $0xc0] sm:$0xf] }
 0x138   :  { %21726 = vst [vmem:[#allocation29_spill] sm:$0xff] %v15363_v9  ;;  %v15368_v51 = vadd.f32 %v12485_v53, %v12405_v55  ;;  %v569_v45 = vpop.f32.mrf.mxu0  ;;  %12837 = vmatpush3.bf16.msra.mxu0 %v13804_v21  ;;  %v1489_v21 = vld [vmem:[%s21575_s0 + $0xc4] sm:$0xf] }
 0x139   :  { %v918_v34 = vpop.f32.mrf.mxu1  ;;  %12838 = vmatprep.subr.bf16.mxu0 %v13805_v29  ;;  %12917 = vmatpush3.bf16.msra.mxu1 %v13812_v50  ;;  %v13814_v55 = vld [vmem:[%s21574_s1 + $0x140] sm:$0xff]   ;;  %v2879_v9 = vshrl.u32 %v1489_v21, 16 }
 0x13a   :  { %21727 = vst [vmem:[#allocation30_spill] sm:$0xff] %v15368_v51  ;;  %v15373_v49 = vadd.f32 %v918_v34, %v569_v45  ;;  %v12408_v19 = vpop.f32.mrf.mxu0  ;;  %12695 = vmatmul.mubr.bf16.gmra.mxu0 %v14655_v10  ;;  %12918 = vmatprep.subr.bf16.mxu1 %v13813_v31  ;;  %v2866_v34 = vshrl.u32 %v1488_v30, 16  ;;  %v2875_v51 = vshll.u32 %v1489_v21, 16 }
 0x13b   :  { %v12488_v53 = vpop.f32.mrf.mxu1  ;;  %12775 = vmatmul.mubr.bf16.gmra.mxu1 %v14716_v0  ;;  %12698 = vmatprep.mubr.bf16.mxu0 %v14716_v0  ;;  %v2881_v1 = vrot.slane %v2879_v9, 4 }
 0x13c   :  { %21728 = vst [vmem:[#allocation31_spill] sm:$0xff] %v15373_v49  ;;  %v15387_v50 = vadd.f32 %v12488_v53, %v12408_v19  ;;  %v582_v10 = vpop.f32.mrf.mxu0  ;;  %12778 = vmatprep.mubr.bf16.mxu1 %v14718_v28  ;;  %12839 = vmatpush3.bf16.msra.mxu0 %v13805_v29  ;;  %v2869_v49 = vshll.u32 %v1488_v30, 16  ;;  %v1491_v30 = vld [vmem:[%s21575_s0 + $0xcc] sm:$0xf]  ;;  %v2877_v11 = vrot.slane %v2875_v51, 5 }
 0x13d   :  { %v931_v45 = vpop.f32.mrf.mxu1  ;;  %12840 = vmatprep.subr.bf16.mxu0 %v13810_v37  ;;  %12919 = vmatpush3.bf16.msra.mxu1 %v13813_v31  ;;  %v2868_v31 = vrot.slane %v2866_v34, 4  ;;  %v3340_v9 = vshrl.u32 %v1491_v30, 16 }
 0x13e   :  { %21729 = vst [vmem:[#allocation32_spill] sm:$0xff] %v15387_v50  ;;  %v15395_v60 = vadd.f32 %v931_v45, %v582_v10  ;;  %v12409_v0 = vpop.f32.mrf.mxu0  ;;  %12920 = vmatprep.subr.bf16.mxu1 %v13814_v55  ;;  %v2871_v50 = vrot.slane %v2869_v49, 5  ;;  %v1492_v10 = vld [vmem:[%s21575_s0 + $0xd0] sm:$0xf] }
 0x13f   :  { %v12489_v19 = vpop.f32.mrf.mxu1  ;;  %v3342_v48 = vrot.slane %v3340_v9, 4 }
 0x140   :  { %21731 = vst [vmem:[#allocation34_spill] sm:$0xff] %v15395_v60  ;;  %v15397_v53 = vadd.f32 %v12489_v19, %v12409_v0  ;;  %v585_v29 = vpop.f32.mrf.mxu0  ;;  %12841 = vmatpush3.bf16.msra.mxu0 %v13810_v37  ;;  %v1490_v37 = vld [vmem:[%s21575_s0 + $0xc8] sm:$0x1]  ;;  %v3349_v19 = vshll.u32 %v1492_v10, 16 }
 0x141   :  { %v934_v21 = vpop.f32.mrf.mxu1  ;;  %12921 = vmatpush3.bf16.msra.mxu1 %v13814_v55  ;;  %12986 = vmatprep.subr.bf16.mxu0 %v15393_v61  ;;  %v3343_v55 = vshll.u32 %v1491_v30, 16 }
 0x142   :  { %21732 = vst [vmem:[#allocation35_spill] sm:$0xff] %v15397_v53  ;;  %v15406_v45 = vadd.f32 %v934_v21, %v585_v29  ;;  %v12412_v0 = vpop.f32.mrf.mxu0  ;;  %12699 = vmatmul.mubr.bf16.gmra.mxu0 %v14718_v28  ;;  %v3353_v29 = vshrl.u32 %v1492_v10, 16  ;;  %v2872_v28 = vor.u32 %v2871_v50, %v2868_v31  ;;  %v2885_v53 = vshll.u32 %v1490_v37, 16 }
 0x143   :  { %v12492_v34 = vpop.f32.mrf.mxu1  ;;  %12779 = vmatmul.mubr.bf16.gmra.mxu1 %v14781_v14  ;;  %12702 = vmatprep.mubr.bf16.mxu0 %v14781_v14  ;;  %v3351_v30 = vrot.slane %v3349_v19, 5 }
 0x144   :  { %21733 = vst [vmem:[#allocation36_spill] sm:$0xff] %v15406_v45  ;;  %v15414_v51 = vadd.f32 %v12492_v34, %v12412_v0  ;;  %v598_v49 = vpop.f32.mrf.mxu0  ;;  %12782 = vmatprep.mubr.bf16.mxu1 %v14786_v7  ;;  %v2882_v45 = vor.u32 %v2881_v1, %v2877_v11  ;;  %v1493_v0 = vld [vmem:[%s21575_s0 + $0xd4] sm:$0x1]  ;;  %v3345_v34 = vrot.slane %v3343_v55, 5  ;;  %v2873_v61 = vrot.slane %v2872_v28, 4 }
 0x145   :  { %v947_v21 = vpop.f32.mrf.mxu1  ;;  %v2887_v1 = vrot.slane %v2885_v53, 5 }
 0x146   :  { %21734 = vst [vmem:[#allocation37_spill] sm:$0xff] %v15414_v51  ;;  %v15417_v60 = vadd.f32 %v947_v21, %v598_v49  ;;  %v12413_v57 = vpop.f32.mrf.mxu0  ;;  %v3355_v51 = vrot.slane %v3353_v29, 4  ;;  %v2883_v50 = vrot.slane %v2882_v45, 4  ;;  %v3346_v55 = vor.u32 %v3345_v34, %v3342_v48 }
 0x147   :  { %v12493_v6 = vpop.f32.mrf.mxu1  ;;  %v2878_v53 = vsel %vm14300_vm5, %v2873_v61, %v2877_v11 }
 0x148   :  { %v15419_v47 = vadd.f32 %v12493_v6, %v12413_v57  ;;  %v601_v14 = vpop.f32.mrf.mxu0  ;;  %v3359_v6 = vshll.u32 %v1493_v0, 16  ;;  %v3356_v19 = vor.u32 %v3355_v51, %v3351_v30 }
 0x149   :  { %v950_v10 = vpop.f32.mrf.mxu1 }
 0x14a   :  { %v15424_v31 = vadd.f32 %v950_v10, %v601_v14  ;;  %v12416_v37 = vpop.f32.mrf.mxu0  ;;  %12703 = vmatmul.mubr.bf16.gmra.mxu0 %v14786_v7  ;;  %v2888_v7 = vsel %vm14300_vm5, %v2883_v50, %v2887_v1 }
 0x14b   :  { %v12496_v9 = vpop.f32.mrf.mxu1  ;;  %12783 = vmatmul.mubr.bf16.gmra.mxu1 %v14791_v43  ;;  %12706 = vmatprep.mubr.bf16.mxu0 %v14791_v43  ;;  %v3361_v43 = vrot.slane %v3359_v6, 5  ;;  %v11092_v10 = vcombine.low %v2878_v53, %v2888_v7 }
 0x14c   :  { %v15429_v57 = vadd.f32 %v12496_v9, %v12416_v37  ;;  %v614_v49 = vpop.f32.mrf.mxu0  ;;  %12786 = vmatprep.mubr.bf16.mxu1 %v14793_v25  ;;  %v3347_v37 = vrot.slane %v3346_v55, 4  ;;  %v3357_v9 = vrot.slane %v3356_v19, 4 }
 0x14d   :  { %v963_v45 = vpop.f32.mrf.mxu1 }
 0x14e   :  { %v15436_v29 = vadd.f32 %v963_v45, %v614_v49  ;;  %v12417_v21 = vpop.f32.mrf.mxu0  ;;  %v3352_v1 = vsel %vm14300_vm5, %v3347_v37, %v3351_v30  ;;  %v3362_v6 = vsel %vm14300_vm5, %v3357_v9, %v3361_v43 }
 0x14f   :  { %v12497_v28 = vpop.f32.mrf.mxu1  ;;  %v11118_v45 = vcombine.low %v3352_v1, %v3362_v6 }
 0x150   :  { %v15438_v14 = vadd.f32 %v12497_v28, %v12417_v21  ;;  %v617_v0 = vpop.f32.mrf.mxu0 }
 0x151   :  { %v966_v48 = vpop.f32.mrf.mxu1 }
 0x152   :  { %v15440_v51 = vadd.f32 %v966_v48, %v617_v0  ;;  %v12420_v34 = vpop.f32.mrf.mxu0  ;;  %12707 = vmatmul.mubr.bf16.gmra.mxu0 %v14793_v25 }
 0x153   :  { %v12500_v11 = vpop.f32.mrf.mxu1  ;;  %12787 = vmatmul.mubr.bf16.gmra.mxu1 %v14851_v44  ;;  %12710 = vmatprep.mubr.bf16.mxu0 %v14851_v44 }
 0x154   :  { %v15445_v61 = vadd.f32 %v12500_v11, %v12420_v34  ;;  %v630_v50 = vpop.f32.mrf.mxu0  ;;  %12790 = vmatprep.mubr.bf16.mxu1 %v11092_v10 }
 0x155   :  { %v979_v49 = vpop.f32.mrf.mxu1 }
 0x156   :  { %v15451_v55 = vadd.f32 %v979_v49, %v630_v50  ;;  %v12421_v19 = vpop.f32.mrf.mxu0 }
 0x157   :  { %v12501_v25 = vpop.f32.mrf.mxu1 }
 0x158   :  { %v15453_v53 = vadd.f32 %v12501_v25, %v12421_v19  ;;  %v633_v7 = vpop.f32.mrf.mxu0 }
 0x159   :  { %v982_v44 = vpop.f32.mrf.mxu1 }
 0x15a   :  { %v15455_v21 = vadd.f32 %v982_v44, %v633_v7  ;;  %v12424_v28 = vpop.f32.mrf.mxu0  ;;  %12711 = vmatmul.mubr.bf16.gmra.mxu0 %v11092_v10 }
 0x15b   :  { %v12504_v0 = vpop.f32.mrf.mxu1  ;;  %12791 = vmatmul.mubr.bf16.gmra.mxu1 %v11118_v45  ;;  %12714 = vmatprep.mubr.bf16.mxu0 %v14893_v20 }
 0x15c   :  { %v15458_v30 = vadd.f32 %v12504_v0, %v12424_v28  ;;  %v646_v43 = vpop.f32.mrf.mxu0  ;;  %12794 = vmatprep.mubr.bf16.mxu1 %v14895_v27 }
 0x15d   :  { %v995_v37 = vpop.f32.mrf.mxu1 }
 0x15e   :  { %v15461_v9 = vadd.f32 %v995_v37, %v646_v43  ;;  %v12425_v48 = vpop.f32.mrf.mxu0 }
 0x15f   :  { %v12505_v34 = vpop.f32.mrf.mxu1 }
 0x160   :  { %v15463_v11 = vadd.f32 %v12505_v34, %v12425_v48  ;;  %v649_v50 = vpop.f32.mrf.mxu0 }
 0x161   :  { %v998_v1 = vpop.f32.mrf.mxu1 }
 0x162   :  { %v15465_v6 = vadd.f32 %v998_v1, %v649_v50  ;;  %v12524_v10 = vpop.f32.mrf.mxu0  ;;  %12715 = vmatmul.mubr.bf16.gmra.mxu0 %v14895_v27  ;;  %v21737_v1 = vld [vmem:[#allocation3_spill] sm:$0xff] }
 0x163   :  { %v1378_v20 = vadd.f32 %v12524_v10, %v14962_v24  ;;  %v12604_v49 = vpop.f32.mrf.mxu1  ;;  %12795 = vmatmul.mubr.bf16.gmra.mxu1 %v14929_v23  ;;  %12718 = vmatprep.mubr.bf16.mxu0 %v14929_v23  ;;  %v21738_v10 = vld [vmem:[#allocation4_spill] sm:$0xff] }
 0x164   :  { %v1121_v19 = vpop.f32.mrf.mxu0  ;;  %12798 = vmatprep.mubr.bf16.mxu1 %v14931_v16 }
 0x165   :  { %v1376_v25 = vadd.f32 %v1121_v19, %v14976_v41  ;;  %v15473_v45 = vadd.f32 %v12604_v49, %v1378_v20  ;;  %v2546_v7 = vpop.f32.mrf.mxu1 }
 0x166   :  { %v12525_v44 = vpop.f32.mrf.mxu0 }
 0x167   :  { %v1379_v28 = vadd.f32 %v12525_v44, %v14988_v17  ;;  %v15476_v0 = vadd.f32 %v2546_v7, %v1376_v25  ;;  %v12605_v27 = vpop.f32.mrf.mxu1  ;;  %v21740_v25 = vld [vmem:[#allocation5_spill] sm:$0xff] }
 0x168   :  { %v1124_v24 = vpop.f32.mrf.mxu0 }
 0x169   :  { %v1377_v43 = vadd.f32 %v1124_v24, %v15001_v56  ;;  %v15479_v37 = vadd.f32 %v12605_v27, %v1379_v28  ;;  %v2549_v23 = vpop.f32.mrf.mxu1  ;;  %v21742_v28 = vld [vmem:[#allocation6_spill] sm:$0xff] }
 0x16a   :  { %v12528_v48 = vpop.f32.mrf.mxu0  ;;  %12719 = vmatmul.mubr.bf16.gmra.mxu0 %v14931_v16 }
 0x16b   :  { %21735 = vst [vmem:[#allocation38_spill] sm:$0xff] %v15479_v37  ;;  %v1382_v41 = vadd.f32 %v12528_v48, %v15022_v3  ;;  %v15483_v34 = vadd.f32 %v2549_v23, %v1377_v43  ;;  %v12608_v50 = vpop.f32.mrf.mxu1  ;;  %12799 = vmatmul.mubr.bf16.gmra.mxu1 %v15016_v35  ;;  %12722 = vmatprep.mubr.bf16.mxu0 %v15016_v35  ;;  %v21744_v23 = vld [vmem:[#allocation7_spill] sm:$0xff] }
 0x16c   :  { %v1137_v17 = vpop.f32.mrf.mxu0  ;;  %12802 = vmatprep.mubr.bf16.mxu1 %v21737_v1 }
 0x16d   :  { %21736 = vst [vmem:[#allocation39_spill] sm:$0xff] %v15483_v34  ;;  %v1380_v56 = vadd.f32 %v1137_v17, %v21738_v10  ;;  %v15489_v20 = vadd.f32 %v12608_v50, %v1382_v41  ;;  %v2562_v49 = vpop.f32.mrf.mxu1  ;;  %v21746_v17 = vld [vmem:[#allocation8_spill] sm:$0xff] }
 0x16e   :  { %v12529_v19 = vpop.f32.mrf.mxu0 }
 0x16f   :  { %21739 = vst [vmem:[#allocation3_spill] sm:$0xff] %v15489_v20  ;;  %v1383_v16 = vadd.f32 %v12529_v19, %v21740_v25  ;;  %v15492_v7 = vadd.f32 %v2562_v49, %v1380_v56  ;;  %v12609_v3 = vpop.f32.mrf.mxu1  ;;  %v21747_v56 = vld [vmem:[#allocation10_spill] sm:$0xff]  ;;  %v21748_v49 = vld [vmem:[#allocation9_spill] sm:$0xff] }
 0x170   :  { %v1140_v44 = vpop.f32.mrf.mxu0 }
 0x171   :  { %21741 = vst [vmem:[#allocation4_spill] sm:$0xff] %v15492_v7  ;;  %v1381_v27 = vadd.f32 %v1140_v44, %v21742_v28  ;;  %v15495_v24 = vadd.f32 %v12609_v3, %v1383_v16  ;;  %v2565_v35 = vpop.f32.mrf.mxu1  ;;  %v21750_v44 = vld [vmem:[#allocation11_spill] sm:$0xff] }
 0x172   :  { %v12532_v43 = vpop.f32.mrf.mxu0  ;;  %12723 = vmatmul.mubr.bf16.gmra.mxu0 %v21737_v1 }
 0x173   :  { %21743 = vst [vmem:[#allocation5_spill] sm:$0xff] %v15495_v24  ;;  %v1386_v48 = vadd.f32 %v12532_v43, %v21744_v23  ;;  %v15499_v41 = vadd.f32 %v2565_v35, %v1381_v27  ;;  %v12612_v50 = vpop.f32.mrf.mxu1  ;;  %12803 = vmatmul.mubr.bf16.gmra.mxu1 %v21746_v17  ;;  %12726 = vmatprep.mubr.bf16.mxu0 %v21746_v17  ;;  %v1542_v43 = vld [vmem:[%s21575_s0 + $0x198] sm:$0xf]  ;;  %v21752_v23 = vld [vmem:[#allocation12_spill] sm:$0xff] }
 0x174   :  { %v1153_v10 = vpop.f32.mrf.mxu0  ;;  %12806 = vmatprep.mubr.bf16.mxu1 %v21747_v56 }
 0x175   :  { %21745 = vst [vmem:[#allocation6_spill] sm:$0xff] %v15499_v41  ;;  %v1384_v19 = vadd.f32 %v1153_v10, %v21748_v49  ;;  %v15505_v25 = vadd.f32 %v12612_v50, %v1386_v48  ;;  %v2578_v16 = vpop.f32.mrf.mxu1  ;;  %v1543_v48 = vld [vmem:[%s21575_s0 + $0x19c] sm:$0xf]  ;;  %v21754_v10 = vld [vmem:[#allocation13_spill] sm:$0xff] }
 0x176   :  { %v12533_v3 = vpop.f32.mrf.mxu0 }
 0x177   :  { %21749 = vst [vmem:[#allocation7_spill] sm:$0xff] %v15505_v25  ;;  %v1387_v1 = vadd.f32 %v12533_v3, %v21750_v44  ;;  %v15508_v28 = vadd.f32 %v2578_v16, %v1384_v19  ;;  %v12613_v27 = vpop.f32.mrf.mxu1  ;;  %v2890_v3 = vshrl.u32 %v1542_v43, 16  ;;  %v2893_v44 = vshll.u32 %v1542_v43, 16  ;;  %v1545_v43 = vld [vmem:[%s21575_s0 + $0x1a4] sm:$0xf] }
 0x178   :  { %v1156_v35 = vpop.f32.mrf.mxu0 }
 0x179   :  { %21751 = vst [vmem:[#allocation8_spill] sm:$0xff] %v15508_v28  ;;  %v1385_v17 = vadd.f32 %v1156_v35, %v21752_v23  ;;  %v15514_v41 = vadd.f32 %v12613_v27, %v1387_v1  ;;  %v2581_v24 = vpop.f32.mrf.mxu1  ;;  %v2899_v27 = vshll.u32 %v1543_v48, 16  ;;  %v2903_v35 = vshrl.u32 %v1543_v48, 16  ;;  %v21756_v23 = vld [vmem:[#allocation14_spill] sm:$0xff] }
 0x17a   :  { %v12536_v50 = vpop.f32.mrf.mxu0  ;;  %12727 = vmatmul.mubr.bf16.gmra.mxu0 %v21747_v56  ;;  %v2892_v25 = vrot.slane %v2890_v3, 4  ;;  %v1546_v3 = vld [vmem:[%s21575_s0 + $0x1a8] sm:$0xf] }
 0x17b   :  { %21753 = vst [vmem:[#allocation10_spill] sm:$0xff] %v15514_v41  ;;  %v1390_v49 = vadd.f32 %v12536_v50, %v21754_v10  ;;  %v15521_v19 = vadd.f32 %v2581_v24, %v1385_v17  ;;  %v12616_v16 = vpop.f32.mrf.mxu1  ;;  %12807 = vmatmul.mubr.bf16.gmra.mxu1 %v15110_v62  ;;  %12730 = vmatprep.mubr.bf16.mxu0 %v15110_v62  ;;  %v21758_v24 = vld [vmem:[#allocation15_spill] sm:$0xff]  ;;  %v2895_v62 = vrot.slane %v2893_v44, 5  ;;  %v15535_v20 = vrot.slane %v2899_v27, 5  ;;  %v21762_v27 = vld [vmem:[#allocation17_spill] sm:$0xff] }
 0x17c   :  { %v1169_v1 = vpop.f32.mrf.mxu0  ;;  %12810 = vmatprep.mubr.bf16.mxu1 %v15148_v40  ;;  %v2905_v48 = vrot.slane %v2903_v35, 4 }
 0x17d   :  { %21755 = vst [vmem:[#allocation9_spill] sm:$0xff] %v15521_v19  ;;  %v1388_v41 = vadd.f32 %v1169_v1, %v21756_v23  ;;  %v15527_v28 = vadd.f32 %v12616_v16, %v1390_v49  ;;  %v2594_v56 = vpop.f32.mrf.mxu1  ;;  %v21760_v1 = vld [vmem:[#allocation16_spill] sm:$0xff] }
 0x17e   :  { %v12537_v50 = vpop.f32.mrf.mxu0 }
 0x17f   :  { %21757 = vst [vmem:[#allocation11_spill] sm:$0xff] %v15527_v28  ;;  %v1391_v17 = vadd.f32 %v12537_v50, %v21758_v24  ;;  %v15530_v10 = vadd.f32 %v2594_v56, %v1388_v41  ;;  %v12617_v19 = vpop.f32.mrf.mxu1  ;;  %v1544_v41 = vld [vmem:[%s21575_s0 + $0x1a0] sm:$0x1]  ;;  %v3364_v56 = vshrl.u32 %v1545_v43, 16  ;;  %v3367_v24 = vshll.u32 %v1545_v43, 16  ;;  %v21764_v28 = vld [vmem:[#allocation18_spill] sm:$0xff] }
 0x180   :  { %v1172_v7 = vpop.f32.mrf.mxu0  ;;  %v1547_v43 = vld [vmem:[%s21575_s0 + $0x1ac] sm:$0x1] }
 0x181   :  { %21759 = vst [vmem:[#allocation12_spill] sm:$0xff] %v15530_v10  ;;  %v1389_v49 = vadd.f32 %v1172_v7, %v21760_v1  ;;  %v15538_v16 = vadd.f32 %v12617_v19, %v1391_v17  ;;  %v2597_v23 = vpop.f32.mrf.mxu1  ;;  %v2896_v19 = vor.u32 %v2895_v62, %v2892_v25  ;;  %v2906_v1 = vor.u32 %v2905_v48, %v15535_v20 }
 0x182   :  { %v12540_v44 = vpop.f32.mrf.mxu0  ;;  %12731 = vmatmul.mubr.bf16.gmra.mxu0 %v15148_v40  ;;  %v3373_v10 = vshll.u32 %v1546_v3, 16  ;;  %v3377_v40 = vshrl.u32 %v1546_v3, 16  ;;  %v3369_v48 = vrot.slane %v3367_v24, 5 }
 0x183   :  { %21761 = vst [vmem:[#allocation13_spill] sm:$0xff] %v15538_v16  ;;  %v1394_v50 = vadd.f32 %v12540_v44, %v21762_v27  ;;  %v15548_v35 = vadd.f32 %v2597_v23, %v1389_v49  ;;  %v12620_v7 = vpop.f32.mrf.mxu1  ;;  %12811 = vmatmul.mubr.bf16.gmra.mxu1 %v15194_v33  ;;  %12734 = vmatprep.mubr.bf16.mxu0 %v15194_v33  ;;  %v2909_v16 = vshll.u32 %v1544_v41, 16  ;;  %v3366_v27 = vrot.slane %v3364_v56, 4 }
 0x184   :  { %v1185_v17 = vpop.f32.mrf.mxu0  ;;  %12814 = vmatprep.mubr.bf16.mxu1 %v15196_v18  ;;  %v2897_v62 = vrot.slane %v2896_v19, 4  ;;  %v2907_v3 = vrot.slane %v2906_v1, 4  ;;  %v3383_v19 = vshll.u32 %v1547_v43, 16 }
 0x185   :  { %21763 = vst [vmem:[#allocation14_spill] sm:$0xff] %v15548_v35  ;;  %v1392_v34 = vadd.f32 %v1185_v17, %v21764_v28  ;;  %v15555_v44 = vadd.f32 %v12620_v7, %v1394_v50  ;;  %v2610_v49 = vpop.f32.mrf.mxu1  ;;  %v2911_v37 = vrot.slane %v2909_v16, 5  ;;  %v15563_v28 = vrot.slane %v3373_v10, 5 }
 0x186   :  { %v12541_v23 = vpop.f32.mrf.mxu0  ;;  %v3379_v50 = vrot.slane %v3377_v40, 4  ;;  %v3370_v10 = vor.u32 %v3369_v48, %v3366_v27  ;;  %v3813_v27 = vld [vmem:[%s21575_s0] sm:$0xe] }
 0x187   :  { %v1395_v35 = vadd.f32 %v12541_v23, %v15198_v13  ;;  %v15558_v33 = vadd.f32 %v2610_v49, %v1392_v34  ;;  %v12621_v25 = vpop.f32.mrf.mxu1 }
 0x188   :  { %v1188_v41 = vpop.f32.mrf.mxu0 }
 0x189   :  { %v1393_v7 = vadd.f32 %v1188_v41, %v15203_v8  ;;  %v15566_v56 = vadd.f32 %v12621_v25, %v1395_v35  ;;  %v2613_v13 = vpop.f32.mrf.mxu1  ;;  %v2902_v8 = vsel %vm14300_vm5, %v2897_v62, %v15535_v20  ;;  %v13889_v35 = vld [vmem:[%s21575_s0 + $0x4] sm:$0xf]  ;;  %v3385_v25 = vrot.slane %v3383_v19, 5 }
 0x18a   :  { %v12544_v34 = vpop.f32.mrf.mxu0  ;;  %12735 = vmatmul.mubr.bf16.gmra.mxu0 %v15196_v18  ;;  %v2912_v18 = vsel %vm14300_vm5, %v2907_v3, %v2911_v37  ;;  %v3950_v1 = vrot.slane %v13889_v35, 5  ;;  %v3371_v41 = vrot.slane %v3370_v10, 4 }
 0x18b   :  { %v1398_v17 = vadd.f32 %v12544_v34, %v15215_v15  ;;  %v15570_v49 = vadd.f32 %v2613_v13, %v1393_v7  ;;  %v12624_v24 = vpop.f32.mrf.mxu1  ;;  %12815 = vmatmul.mubr.bf16.gmra.mxu1 %v15227_v26  ;;  %12738 = vmatprep.mubr.bf16.mxu0 %v15227_v26  ;;  %v3380_v15 = vor.u32 %v3379_v50, %v15563_v28  ;;  %v11128_v7 = vrot.slane %v3813_v27, 9  ;;  %v13890_v13 = vld [vmem:[%s21575_s0 + $0x8] sm:$0x1] }
 0x18c   :  { %v1201_v16 = vpop.f32.mrf.mxu0  ;;  %12818 = vmatprep.mubr.bf16.mxu1 %v15231_v46  ;;  %v11093_v48 = vcombine.low %v2902_v8, %v2912_v18  ;;  %v3953_v34 = vrot.slane %v13890_v13, 5 }
 0x18d   :  { %v1396_v26 = vadd.f32 %v1201_v16, %v15225_v2  ;;  %v15585_v40 = vadd.f32 %v12624_v24, %v1398_v17  ;;  %v2626_v23 = vpop.f32.mrf.mxu1  ;;  %v3381_v50 = vrot.slane %v3380_v15, 4  ;;  %v3952_v2 = vrot.slane %v3950_v1, 4 }
 0x18e   :  { %v12545_v20 = vpop.f32.mrf.mxu0 }
 0x18f   :  { %v1399_v37 = vadd.f32 %v12545_v20, %v15229_v58  ;;  %v15591_v62 = vadd.f32 %v2626_v23, %v1396_v26  ;;  %v12625_v43 = vpop.f32.mrf.mxu1  ;;  %v3386_v15 = vsel %vm14300_vm5, %v3381_v50, %v3385_v25  ;;  %v3816_v23 = vld [vmem:[%s21575_s0 + $0x24] sm:$0xe] }
 0x190   :  { %v1204_v3 = vpop.f32.mrf.mxu0 }
 0x191   :  { %v1397_v17 = vadd.f32 %v1204_v3, %v15233_v42  ;;  %v15597_v24 = vadd.f32 %v12625_v43, %v1399_v37  ;;  %v2629_v19 = vpop.f32.mrf.mxu1  ;;  %v3376_v42 = vsel %vm14300_vm5, %v3371_v41, %v15563_v28  ;;  %v3971_v28 = vrot.slane %v13891_v12, 5  ;;  %v13892_v3 = vld [vmem:[%s21575_s0 + $0x2c] sm:$0x1] }
 0x192   :  { %v12548_v58 = vpop.f32.mrf.mxu0  ;;  %12739 = vmatmul.mubr.bf16.gmra.mxu0 %v15231_v46  ;;  %v3951_v46 = vsel %vm14191_vm2, %v11128_v7, %v3950_v1  ;;  %v11119_v37 = vcombine.low %v3376_v42, %v3386_v15  ;;  %v11131_v41 = vrot.slane %v3816_v23, 9  ;;  %v3974_v50 = vrot.slane %v13892_v3, 5  ;;  %v21765_v42 = vld [vmem:[#allocation19_spill] sm:$0xff] }
 0x193   :  { %v1402_v16 = vadd.f32 %v12548_v58, %v15242_v22  ;;  %v15601_v10 = vadd.f32 %v2629_v19, %v1397_v17  ;;  %v12628_v8 = vpop.f32.mrf.mxu1  ;;  %12819 = vmatmul.mubr.bf16.gmra.mxu1 %v15254_v59  ;;  %12742 = vmatprep.mubr.bf16.mxu0 %v15254_v59  ;;  %v3954_v22 = vsel %vm14191_vm2, %v3952_v2, %v3953_v34  ;;  %v3973_v34 = vrot.slane %v3971_v28, 4 }
 0x194   :  { %v1217_v18 = vpop.f32.mrf.mxu0  ;;  %12822 = vmatprep.mubr.bf16.mxu1 %v11093_v48 }
 0x195   :  { %v1400_v35 = vadd.f32 %v1217_v18, %v15249_v32  ;;  %v15615_v26 = vadd.f32 %v12628_v8, %v1402_v16  ;;  %v2642_v59 = vpop.f32.mrf.mxu1  ;;  %v11176_v32 = vcombine.low %v3951_v46, %v3954_v22  ;;  %v3972_v8 = vsel %vm14191_vm2, %v11131_v41, %v3971_v28  ;;  %v3817_v22 = vld [vmem:[%s21575_s0 + $0x30] sm:$0xe]  ;;  %v13895_v28 = vld [vmem:[%s21575_s0 + $0x38] sm:$0x1] }
 0x196   :  { %v12549_v27 = vpop.f32.mrf.mxu0  ;;  %v3975_v46 = vsel %vm14191_vm2, %v3973_v34, %v3974_v50  ;;  %v11132_v41 = vrot.slane %v3817_v22, 9  ;;  %v13897_v22 = vld [vmem:[%s21575_s0 + $0x4c] sm:$0xf] }
 0x197   :  { %v1403_v1 = vadd.f32 %v12549_v27, %v15256_v36  ;;  %v15624_v20 = vadd.f32 %v2642_v59, %v1400_v35  ;;  %v12629_v25 = vpop.f32.mrf.mxu1  ;;  %v3818_v35 = vld [vmem:[%s21575_s0 + $0x3c] sm:$0xe]  ;;  %v13894_v59 = vld [vmem:[%s21575_s0 + $0x40] sm:$0xf]  ;;  %v3981_v27 = vrot.slane %v13895_v28, 5 }
 0x198   :  { %v1220_v43 = vpop.f32.mrf.mxu0  ;;  %v3985_v23 = vrot.slane %v13894_v59, 5  ;;  %v11133_v50 = vrot.slane %v3818_v35, 9  ;;  %v3992_v35 = vrot.slane %v13897_v22, 5  ;;  %v13817_v59 = vld [vmem:[%s21574_s1 + $0x228] sm:$0xff]  }
 0x199   :  { %v1401_v7 = vadd.f32 %v1220_v43, %v15261_v4  ;;  %v15630_v2 = vadd.f32 %v12629_v25, %v1403_v1  ;;  %v2645_v13 = vpop.f32.mrf.mxu1  ;;  %v13893_v4 = vld [vmem:[%s21575_s0 + $0x34] sm:$0xf]  ;;  %v15661_v43 = vcombine.low %v3972_v8, %v3975_v46 }
 0x19a   :  { %v12552_v17 = vpop.f32.mrf.mxu0  ;;  %12743 = vmatmul.mubr.bf16.gmra.mxu0 %v11093_v48  ;;  %v3978_v18 = vrot.slane %v13893_v4, 5 }
 0x19b   :  { %v1406_v36 = vadd.f32 %v12552_v17, %v15268_v5  ;;  %v15633_v19 = vadd.f32 %v2645_v13, %v1401_v7  ;;  %v12632_v58 = vpop.f32.mrf.mxu1  ;;  %12823 = vmatmul.mubr.bf16.gmra.mxu1 %v11119_v37  ;;  %12842 = vmatprep.mubr.bf16.mxu0 %v11176_v32  ;;  %21766 = vst [vmem:[#allocation15_spill] sm:$0xff] %v15661_v43  ;;  %v13896_v7 = vld [vmem:[%s21575_s0 + $0x44] sm:$0x1] }
 0x19c   :  { %v1233_v16 = vpop.f32.mrf.mxu0  ;;  %12922 = vmatprep.mubr.bf16.mxu1 %v15288_v38  ;;  %v3980_v3 = vrot.slane %v3978_v18, 4  ;;  %v3988_v13 = vrot.slane %v13896_v7, 5  ;;  %v3979_v46 = vsel %vm14191_vm2, %v11132_v41, %v3978_v18 }
 0x19d   :  { %v1404_v48 = vadd.f32 %v1233_v16, %v21765_v42  ;;  %v15642_v15 = vadd.f32 %v12632_v58, %v1406_v36  ;;  %v2658_v5 = vpop.f32.mrf.mxu1  ;;  %v13816_v58 = vld [vmem:[%s21574_s1 + $0x230] sm:$0xff]  }
 0x19e   :  { %v12553_v12 = vpop.f32.mrf.mxu0  ;;  %v21767_v42 = vld [vmem:[#allocation33_spill] sm:$0xff] }
 0x19f   :  { %v1407_v1 = vadd.f32 %v12553_v12, %v15279_v63  ;;  %v15659_v25 = vadd.f32 %v2658_v5, %v1404_v48  ;;  %v12633_v37 = vpop.f32.mrf.mxu1  ;;  %v3987_v63 = vrot.slane %v3985_v23, 4  ;;  %v21768_v5 = vld [vmem:[#allocation20_spill] sm:$0xff]  ;;  %v21769_v12 = vld [vmem:[#allocation21_spill] sm:$0xff] }
 0x1a0   :  { %v1236_v32 = vpop.f32.mrf.mxu0 }
 0x1a1   :  { %v1405_v34 = vadd.f32 %v1236_v32, %v15290_v39  ;;  %v15667_v17 = vadd.f32 %v12633_v37, %v1407_v1  ;;  %v2661_v36 = vpop.f32.mrf.mxu1  ;;  %v3820_v37 = vld [vmem:[%s21575_s0 + $0x54] sm:$0xe]  ;;  %v13898_v32 = vld [vmem:[%s21575_s0 + $0x58] sm:$0xf] }
 0x1a2   :  { %v12556_v16 = vpop.f32.mrf.mxu0  ;;  %12843 = vmatmul.mubr.bf16.vlgmr.msra.gmra.mxu0 %v15288_v38  ;;  %v3982_v38 = vsel %vm14191_vm2, %v3980_v3, %v3981_v27  ;;  %v3989_v27 = vsel %vm14191_vm2, %v3987_v63, %v3988_v13  ;;  %v3999_v41 = vrot.slane %v13898_v32, 5  ;;  %v21771_v13 = vld [vmem:[#allocation22_spill] sm:$0xff]  ;;  %v11135_v22 = vrot.slane %v3820_v37, 9 }
 0x1a3   :  { %v1410_v8 = vadd.f32 %v12556_v16, %v15304_v52  ;;  %v15674_v4 = vadd.f32 %v2661_v36, %v1405_v34  ;;  %12987 = vmatpush3.bf16.msra.mxu0 %v21767_v42  ;;  %v12636_v48 = vpop.f32.mrf.mxu1  ;;  %12923 = vmatmul.mubr.bf16.vlgmr.msra.gmra.mxu1 %v21768_v5  ;;  %v3986_v52 = vsel %vm14191_vm2, %v11133_v50, %v3985_v23  ;;  %v3819_v23 = vld [vmem:[%s21575_s0 + $0x48] sm:$0xe]  ;;  %v13899_v50 = vld [vmem:[%s21575_s0 + $0x50] sm:$0x1] }
 0x1a4   :  { %v1249_v39 = vpop.f32.mrf.mxu0  ;;  %12846 = vmatprep.mubr.bf16.mxu0 %v21768_v5  ;;  %12926 = vmatprep.mubr.bf16.mxu1 %v15661_v43  ;;  %v3995_v7 = vrot.slane %v13899_v50, 5  ;;  %v15712_v16 = vcombine.low %v3979_v46, %v3982_v38  ;;  %v15714_v42 = vcombine.low %v3986_v52, %v3989_v27  ;;  %v21775_v50 = vld [vmem:[#allocation23_spill] sm:$0xff]  ;;  %v4001_v46 = vrot.slane %v3999_v41, 4  ;;  %v21777_v52 = vld [vmem:[#allocation24_spill] sm:$0xff] }
 0x1a5   :  { %v1408_v28 = vadd.f32 %v1249_v39, %v21769_v12  ;;  %v15693_v1 = vadd.f32 %v12636_v48, %v1410_v8  ;;  %v2674_v18 = vpop.f32.mrf.mxu1  ;;  %12988 = vmatprep.subr.bf16.mxu0 %v13816_v58  ;;  %v11134_v48 = vrot.slane %v3819_v23, 9  ;;  %v3994_v39 = vrot.slane %v3992_v35, 4  ;;  %v13900_v12 = vld [vmem:[%s21575_s0 + $0x5c] sm:$0x1] }
 0x1a6   :  { %v12557_v3 = vpop.f32.mrf.mxu0  ;;  %21773 = vst [vmem:[#allocation18_spill] sm:$0xff] %v15712_v16  ;;  %21774 = vst [vmem:[#allocation19_spill] sm:$0xff] %v15714_v42  ;;  %v4002_v32 = vrot.slane %v13900_v12, 5  ;;  %v13901_v12 = vld [vmem:[%s21575_s0 + $0x64] sm:$0xf] }
 0x1a7   :  { %21770 = vst [vmem:[#allocation16_spill] sm:$0xff] %v15693_v1  ;;  %v1411_v34 = vadd.f32 %v12557_v3, %v21771_v13  ;;  %v15710_v36 = vadd.f32 %v2674_v18, %v1408_v28  ;;  %v12637_v63 = vpop.f32.mrf.mxu1  ;;  %12989 = vmatpush3.bf16.msra.mxu0 %v13816_v58  ;;  %v13818_v58 = vld [vmem:[%s21574_s1 + $0x220] sm:$0xff]  }
 0x1a8   :  { %v1252_v8 = vpop.f32.mrf.mxu0  ;;  %12990 = vmatprep.subr.bf16.mxu0 %v13817_v59 }
 0x1a9   :  { %21772 = vst [vmem:[#allocation17_spill] sm:$0xff] %v15710_v36  ;;  %v1409_v3 = vadd.f32 %v1252_v8, %v21775_v50  ;;  %v15720_v28 = vadd.f32 %v12637_v63, %v1411_v34  ;;  %v2677_v18 = vpop.f32.mrf.mxu1  ;;  %v3993_v34 = vsel %vm14191_vm2, %v11134_v48, %v3992_v35  ;;  %v3996_v63 = vsel %vm14191_vm2, %v3994_v39, %v3995_v7  ;;  %v3821_v7 = vld [vmem:[%s21575_s0 + $0x60] sm:$0xe]  ;;  %v13819_v39 = vld [vmem:[%s21574_s1 + $0x218] sm:$0xff]  }
 0x1aa   :  { %v12560_v38 = vpop.f32.mrf.mxu0  ;;  %12847 = vmatmul.mubr.bf16.gmra.mxu0 %v15661_v43  ;;  %v4000_v8 = vsel %vm14191_vm2, %v11135_v22, %v3999_v41  ;;  %v4006_v50 = vrot.slane %v13901_v12, 5  ;;  %v4003_v35 = vsel %vm14191_vm2, %v4001_v46, %v4002_v32  ;;  %v3822_v41 = vld [vmem:[%s21575_s0 + $0x6c] sm:$0xe]  ;;  %v13903_v32 = vld [vmem:[%s21575_s0 + $0x68] sm:$0x1] }
 0x1ab   :  { %21776 = vst [vmem:[#allocation33_spill] sm:$0xff] %v15720_v28  ;;  %v1414_v27 = vadd.f32 %v12560_v38, %v21777_v52  ;;  %v15727_v23 = vadd.f32 %v2677_v18, %v1409_v3  ;;  %v12640_v37 = vpop.f32.mrf.mxu1  ;;  %12927 = vmatmul.mubr.bf16.gmra.mxu1 %v15712_v16  ;;  %12850 = vmatprep.mubr.bf16.mxu0 %v15712_v16  ;;  %v21779_v3 = vld [vmem:[#allocation25_spill] sm:$0xff]  ;;  %v4009_v46 = vrot.slane %v13903_v32, 5  ;;  %v11137_v36 = vrot.slane %v3822_v41, 9  ;;  %v21784_v32 = vld [vmem:[#allocation27_spill] sm:$0xff] }
 0x1ac   :  { %v1265_v13 = vpop.f32.mrf.mxu0  ;;  %12930 = vmatprep.mubr.bf16.mxu1 %v15714_v42  ;;  %12991 = vmatpush3.bf16.msra.mxu0 %v13817_v59  ;;  %v13902_v59 = vld [vmem:[%s21575_s0 + $0x70] sm:$0xf]  ;;  %v4008_v28 = vrot.slane %v4006_v50, 4  ;;  %v13904_v16 = vld [vmem:[%s21575_s0 + $0x74] sm:$0x1] }
 0x1ad   :  { %21778 = vst [vmem:[#allocation20_spill] sm:$0xff] %v15727_v23  ;;  %v1412_v18 = vadd.f32 %v1265_v13, %v21779_v3  ;;  %v15742_v38 = vadd.f32 %v12640_v37, %v1414_v27  ;;  %v2690_v52 = vpop.f32.mrf.mxu1  ;;  %v4013_v48 = vrot.slane %v13902_v59, 5  ;;  %12992 = vmatprep.subr.bf16.mxu0 %v13818_v58  ;;  %v21781_v27 = vld [vmem:[#allocation26_spill] sm:$0xff]  ;;  %v15764_v3 = vcombine.low %v3993_v34, %v3996_v63  ;;  %v13820_v34 = vld [vmem:[%s21574_s1 + $0x210] sm:$0xff]  }
 0x1ae   :  { %v12561_v22 = vpop.f32.mrf.mxu0  ;;  %v15766_v59 = vcombine.low %v4000_v8, %v4003_v35  ;;  %v11136_v23 = vrot.slane %v3821_v7, 9  ;;  %v4016_v1 = vrot.slane %v13904_v16, 5  ;;  %v4010_v41 = vsel %vm14191_vm2, %v4008_v28, %v4009_v46  ;;  %v3823_v28 = vld [vmem:[%s21575_s0 + $0x78] sm:$0xe] }
 0x1af   :  { %21780 = vst [vmem:[#allocation21_spill] sm:$0xff] %v15742_v38  ;;  %v1415_v37 = vadd.f32 %v12561_v22, %v21781_v27  ;;  %v15762_v13 = vadd.f32 %v2690_v52, %v1412_v18  ;;  %v12641_v12 = vpop.f32.mrf.mxu1  ;;  %21783 = vst [vmem:[#allocation23_spill] sm:$0xff] %v15764_v3  ;;  %v4015_v52 = vrot.slane %v4013_v48, 4  ;;  %v4014_v27 = vsel %vm14191_vm2, %v11137_v36, %v4013_v48  ;;  %v3824_v36 = vld [vmem:[%s21575_s0 + $0x84] sm:$0xe] }
 0x1b0   :  { %v1268_v38 = vpop.f32.mrf.mxu0  ;;  %12993 = vmatpush3.bf16.msra.mxu0 %v13818_v58  ;;  %v21786_v58 = vld [vmem:[#allocation28_spill] sm:$0xff] }
 0x1b1   :  { %21782 = vst [vmem:[#allocation22_spill] sm:$0xff] %v15762_v13  ;;  %v1413_v43 = vadd.f32 %v1268_v38, %v21784_v32  ;;  %v15772_v22 = vadd.f32 %v12641_v12, %v1415_v37  ;;  %v2693_v18 = vpop.f32.mrf.mxu1  ;;  %12994 = vmatprep.subr.bf16.mxu0 %v13819_v39  ;;  %v4007_v38 = vsel %vm14191_vm2, %v11136_v23, %v4006_v50  ;;  %v21788_v12 = vld [vmem:[#allocation29_spill] sm:$0xff]  ;;  %v13906_v50 = vld [vmem:[%s21575_s0 + $0x88] sm:$0xf]  ;;  %v13908_v13 = vld [vmem:[%s21575_s0 + $0x8c] sm:$0x1] }
 0x1b2   :  { %v12564_v63 = vpop.f32.mrf.mxu0  ;;  %12851 = vmatmul.mubr.bf16.gmra.mxu0 %v15714_v42  ;;  %v4017_v23 = vsel %vm14191_vm2, %v4015_v52, %v4016_v1  ;;  %v4027_v48 = vrot.slane %v13906_v50, 5  ;;  %v13907_v1 = vld [vmem:[%s21575_s0 + $0x80] sm:$0x1] }
 0x1b3   :  { %21785 = vst [vmem:[#allocation24_spill] sm:$0xff] %v15772_v22  ;;  %v1418_v8 = vadd.f32 %v12564_v63, %v21786_v58  ;;  %v15779_v35 = vadd.f32 %v2693_v18, %v1413_v43  ;;  %v12644_v7 = vpop.f32.mrf.mxu1  ;;  %12931 = vmatmul.mubr.bf16.gmra.mxu1 %v15764_v3  ;;  %12854 = vmatprep.mubr.bf16.mxu0 %v15764_v3  ;;  %v13905_v43 = vld [vmem:[%s21575_s0 + $0x7c] sm:$0xf]  ;;  %v4023_v52 = vrot.slane %v13907_v1, 5  ;;  %v11139_v22 = vrot.slane %v3824_v36, 9  ;;  %v21793_v1 = vld [vmem:[#allocation31_spill] sm:$0xff] }
 0x1b4   :  { %v1281_v16 = vpop.f32.mrf.mxu0  ;;  %12934 = vmatprep.mubr.bf16.mxu1 %v15766_v59  ;;  %v4020_v37 = vrot.slane %v13905_v43, 5  ;;  %12995 = vmatpush3.bf16.msra.mxu0 %v13819_v39  ;;  %v13821_v39 = vld [vmem:[%s21574_s1 + $0x208] sm:$0xff]   ;;  %v21790_v58 = vld [vmem:[#allocation30_spill] sm:$0xff]  ;;  %v15816_v43 = vcombine.low %v4007_v38, %v4010_v41  ;;  %v15818_v50 = vcombine.low %v4014_v27, %v4017_v23  ;;  %v4030_v3 = vrot.slane %v13908_v13, 5  ;;  %v13822_v38 = vld [vmem:[%s21574_s1 + $0x200] sm:$0xff]  }
 0x1b5   :  { %21787 = vst [vmem:[#allocation25_spill] sm:$0xff] %v15779_v35  ;;  %v1416_v32 = vadd.f32 %v1281_v16, %v21788_v12  ;;  %v15794_v18 = vadd.f32 %v12644_v7, %v1418_v8  ;;  %v2706_v63 = vpop.f32.mrf.mxu1  ;;  %12996 = vmatprep.subr.bf16.mxu0 %v13820_v34 }
 0x1b6   :  { %v12565_v46 = vpop.f32.mrf.mxu0  ;;  %21792 = vst [vmem:[#allocation28_spill] sm:$0xff] %v15816_v43  ;;  %v4022_v35 = vrot.slane %v4020_v37, 4 }
 0x1b7   :  { %21789 = vst [vmem:[#allocation26_spill] sm:$0xff] %v15794_v18  ;;  %v1419_v8 = vadd.f32 %v12565_v46, %v21790_v58  ;;  %v15814_v7 = vadd.f32 %v2706_v63, %v1416_v32  ;;  %v12645_v16 = vpop.f32.mrf.mxu1  ;;  %v11138_v18 = vrot.slane %v3823_v28, 9  ;;  %v4029_v63 = vrot.slane %v4027_v48, 4 }
 0x1b8   :  { %v1284_v12 = vpop.f32.mrf.mxu0  ;;  %12997 = vmatpush3.bf16.msra.mxu0 %v13820_v34  ;;  %v21795_v34 = vld [vmem:[#allocation32_spill] sm:$0xff]  ;;  %v4024_v58 = vsel %vm14191_vm2, %v4022_v35, %v4023_v52  ;;  %v3825_v35 = vld [vmem:[%s21575_s0 + $0x90] sm:$0xe]  ;;  %v13911_v52 = vld [vmem:[%s21575_s0 + $0x98] sm:$0x1] }
 0x1b9   :  { %21791 = vst [vmem:[#allocation27_spill] sm:$0xff] %v15814_v7  ;;  %v1417_v42 = vadd.f32 %v1284_v12, %v21793_v1  ;;  %v15824_v46 = vadd.f32 %v12645_v16, %v1419_v8  ;;  %v2709_v32 = vpop.f32.mrf.mxu1  ;;  %12998 = vmatprep.subr.bf16.mxu0 %v13821_v39  ;;  %v4021_v36 = vsel %vm14191_vm2, %v11138_v18, %v4020_v37  ;;  %v21797_v12 = vld [vmem:[#allocation34_spill] sm:$0xff]  ;;  %v21802_v7 = vld [vmem:[#allocation36_spill] sm:$0xff] }
 0x1ba   :  { %v12568_v41 = vpop.f32.mrf.mxu0  ;;  %12855 = vmatmul.mubr.bf16.gmra.mxu0 %v15766_v59  ;;  %v4028_v8 = vsel %vm14191_vm2, %v11139_v22, %v4027_v48  ;;  %v4031_v37 = vsel %vm14191_vm2, %v4029_v63, %v4030_v3  ;;  %v13910_v22 = vld [vmem:[%s21575_s0 + $0xa0] sm:$0xf]  ;;  %v4037_v3 = vrot.slane %v13911_v52, 5 }
 0x1bb   :  { %21794 = vst [vmem:[#allocation29_spill] sm:$0xff] %v15824_v46  ;;  %v1422_v27 = vadd.f32 %v12568_v41, %v21795_v34  ;;  %v15831_v23 = vadd.f32 %v2709_v32, %v1417_v42  ;;  %v12648_v28 = vpop.f32.mrf.mxu1  ;;  %12935 = vmatmul.mubr.bf16.gmra.mxu1 %v15816_v43  ;;  %12858 = vmatprep.mubr.bf16.mxu0 %v15816_v43  ;;  %v13909_v42 = vld [vmem:[%s21575_s0 + $0x94] sm:$0xf]  ;;  %v4041_v18 = vrot.slane %v13910_v22, 5  ;;  %v21799_v63 = vld [vmem:[#allocation35_spill] sm:$0xff] }
 0x1bc   :  { %v1297_v13 = vpop.f32.mrf.mxu0  ;;  %12938 = vmatprep.mubr.bf16.mxu1 %v15818_v50  ;;  %v4034_v16 = vrot.slane %v13909_v42, 5  ;;  %12999 = vmatpush3.bf16.msra.mxu0 %v13821_v39  ;;  %v3826_v39 = vld [vmem:[%s21575_s0 + $0x9c] sm:$0xe]  ;;  %v13912_v42 = vld [vmem:[%s21575_s0 + $0xa4] sm:$0x1] }
 0x1bd   :  { %21796 = vst [vmem:[#allocation30_spill] sm:$0xff] %v15831_v23  ;;  %v1420_v1 = vadd.f32 %v1297_v13, %v21797_v12  ;;  %v15846_v32 = vadd.f32 %v12648_v28, %v1422_v27  ;;  %v2722_v41 = vpop.f32.mrf.mxu1  ;;  %13000 = vmatprep.subr.bf16.mxu0 %v13822_v38  ;;  %v15865_v13 = vcombine.low %v4021_v36, %v4024_v58  ;;  %v4044_v12 = vrot.slane %v13912_v42, 5  ;;  %v13913_v58 = vld [vmem:[%s21575_s0 + $0xac] sm:$0xf]  ;;  %v13915_v42 = vld [vmem:[%s21575_s0 + $0xb0] sm:$0x1] }
 0x1be   :  { %v12569_v48 = vpop.f32.mrf.mxu0  ;;  %v11140_v23 = vrot.slane %v3825_v35, 9  ;;  %v4036_v46 = vrot.slane %v4034_v16, 4 }
 0x1bf   :  { %21798 = vst [vmem:[#allocation31_spill] sm:$0xff] %v15846_v32  ;;  %v1423_v34 = vadd.f32 %v12569_v48, %v21799_v63  ;;  %v15863_v27 = vadd.f32 %v2722_v41, %v1420_v1  ;;  %v12649_v28 = vpop.f32.mrf.mxu1  ;;  %21801 = vst [vmem:[#allocation34_spill] sm:$0xff] %v15865_v13  ;;  %v15870_v32 = vcombine.low %v4028_v8, %v4031_v37  ;;  %v11141_v41 = vrot.slane %v3826_v39, 9  ;;  %v21804_v8 = vld [vmem:[#allocation37_spill] sm:$0xff] }
 0x1c0   :  { %v1300_v22 = vpop.f32.mrf.mxu0  ;;  %13001 = vmatpush3.bf16.msra.mxu0 %v13822_v38  ;;  %v4043_v48 = vrot.slane %v4041_v18, 4  ;;  %v4048_v63 = vrot.slane %v13913_v58, 5  ;;  %v3828_v39 = vld [vmem:[%s21575_s0 + $0xb4] sm:$0xe] }
 0x1c1   :  { %21800 = vst [vmem:[#allocation32_spill] sm:$0xff] %v15863_v27  ;;  %v1421_v52 = vadd.f32 %v1300_v22, %v21802_v7  ;;  %v15873_v43 = vadd.f32 %v12649_v28, %v1423_v34  ;;  %v2725_v1 = vpop.f32.mrf.mxu1  ;;  %v3827_v7 = vld [vmem:[%s21575_s0 + $0xa8] sm:$0xe]  ;;  %v13914_v34 = vld [vmem:[%s21575_s0 + $0xb8] sm:$0xf]  ;;  %v4051_v22 = vrot.slane %v13915_v42, 5 }
 0x1c2   :  { %v12572_v36 = vpop.f32.mrf.mxu0  ;;  %12859 = vmatmul.mubr.bf16.gmra.mxu0 %v15818_v50  ;;  %v4055_v28 = vrot.slane %v13914_v34, 5  ;;  %v4042_v34 = vsel %vm14191_vm2, %v11141_v41, %v4041_v18  ;;  %v4045_v42 = vsel %vm14191_vm2, %v4043_v48, %v4044_v12 }
 0x1c3   :  { %21803 = vst [vmem:[#allocation35_spill] sm:$0xff] %v15873_v43  ;;  %v1426_v37 = vadd.f32 %v12572_v36, %v21804_v8  ;;  %v15880_v35 = vadd.f32 %v2725_v1, %v1421_v52  ;;  %v12652_v38 = vpop.f32.mrf.mxu1  ;;  %12939 = vmatmul.mubr.bf16.gmra.mxu1 %v15865_v13  ;;  %12862 = vmatprep.mubr.bf16.mxu0 %v15865_v13  ;;  %v13916_v43 = vld [vmem:[%s21575_s0 + $0xbc] sm:$0x1]  ;;  %v4050_v13 = vrot.slane %v4048_v63, 4 }
 0x1c4   :  { %v1313_v52 = vpop.f32.mrf.mxu0  ;;  %12942 = vmatprep.mubr.bf16.mxu1 %v15870_v32  ;;  %v4035_v1 = vsel %vm14191_vm2, %v11140_v23, %v4034_v16  ;;  %v4038_v36 = vsel %vm14191_vm2, %v4036_v46, %v4037_v3  ;;  %v4058_v27 = vrot.slane %v13916_v43, 5  ;;  %v11142_v16 = vrot.slane %v3827_v7, 9 }
 0x1c5   :  { %21805 = vst [vmem:[#allocation36_spill] sm:$0xff] %v15880_v35  ;;  %v1424_v58 = vadd.f32 %v1313_v52, %v15417_v60  ;;  %v15902_v8 = vadd.f32 %v12652_v38, %v1426_v37  ;;  %v2738_v35 = vpop.f32.mrf.mxu1  ;;  %v11143_v46 = vrot.slane %v3828_v39, 9  ;;  %v15914_v38 = vcombine.low %v4035_v1, %v4038_v36 }
 0x1c6   :  { %v12573_v23 = vpop.f32.mrf.mxu0  ;;  %v4057_v18 = vrot.slane %v4055_v28, 4  ;;  %v15916_v52 = vcombine.low %v4042_v34, %v4045_v42  ;;  %v3831_v42 = vld [vmem:[%s21575_s0 + $0xd8] sm:$0xe] }
 0x1c7   :  { %21806 = vst [vmem:[#allocation37_spill] sm:$0xff] %v15902_v8  ;;  %v1427_v60 = vadd.f32 %v12573_v23, %v15419_v47  ;;  %v15912_v3 = vadd.f32 %v2738_v35, %v1424_v58  ;;  %v12653_v37 = vpop.f32.mrf.mxu1  ;;  %v4049_v47 = vsel %vm14191_vm2, %v11142_v16, %v4048_v63  ;;  %v4052_v35 = vsel %vm14191_vm2, %v4050_v13, %v4051_v22  ;;  %v3829_v63 = vld [vmem:[%s21575_s0 + $0xc0] sm:$0xe]  ;;  %v13917_v13 = vld [vmem:[%s21575_s0 + $0xc4] sm:$0xf] }
 0x1c8   :  { %v1316_v41 = vpop.f32.mrf.mxu0  ;;  %v4056_v7 = vsel %vm14191_vm2, %v11143_v46, %v4055_v28  ;;  %v4059_v36 = vsel %vm14191_vm2, %v4057_v18, %v4058_v27  ;;  %v4726_v28 = vrot.slane %v13917_v13, 5  ;;  %v13918_v22 = vld [vmem:[%s21575_s0 + $0xdc] sm:$0xf]  ;;  %v3832_v23 = vld [vmem:[%s21575_s0 + $0xe4] sm:$0xe]  ;;  %v11216_v18 = vrot.slane %v3829_v63, 9 }
 0x1c9   :  { %v1425_v12 = vadd.f32 %v1316_v41, %v15424_v31  ;;  %v15919_v48 = vadd.f32 %v12653_v37, %v1427_v60  ;;  %v2741_v43 = vpop.f32.mrf.mxu1  ;;  %v4062_v58 = vrot.slane %v13918_v22, 5  ;;  %v13919_v16 = vld [vmem:[%s21575_s0 + $0xe8] sm:$0xf]  ;;  %v15957_v37 = vcombine.low %v4049_v47, %v4052_v35  ;;  %v13921_v47 = vld [vmem:[%s21575_s0 + $0xe0] sm:$0x1] }
 0x1ca   :  { %v12576_v8 = vpop.f32.mrf.mxu0  ;;  %12863 = vmatmul.mubr.bf16.gmra.mxu0 %v15870_v32  ;;  %v4069_v46 = vrot.slane %v13919_v16, 5  ;;  %v11144_v22 = vrot.slane %v3831_v42, 9  ;;  %v4065_v35 = vrot.slane %v13921_v47, 5  ;;  %v4727_v42 = vsel %vm14191_vm2, %v11216_v18, %v4726_v28  ;;  %v13923_v18 = vld [vmem:[%s21575_s0 + $0xf4] sm:$0xf] }
 0x1cb   :  { %v1430_v39 = vadd.f32 %v12576_v8, %v15429_v57  ;;  %v15929_v1 = vadd.f32 %v2741_v43, %v1425_v12  ;;  %v12656_v31 = vpop.f32.mrf.mxu1  ;;  %12943 = vmatmul.mubr.bf16.gmra.mxu1 %v15914_v38  ;;  %12866 = vmatprep.mubr.bf16.mxu0 %v15914_v38  ;;  %21807 = vst [vmem:[#allocation40_spill] sm:$0xff] %v15957_v37  ;;  %v4064_v16 = vrot.slane %v4062_v58, 4 }
 0x1cc   :  { %v1329_v57 = vpop.f32.mrf.mxu0  ;;  %12946 = vmatprep.mubr.bf16.mxu1 %v15916_v52 }
 0x1cd   :  { %v1428_v8 = vadd.f32 %v1329_v57, %v15436_v29  ;;  %v15946_v27 = vadd.f32 %v12656_v31, %v1430_v39  ;;  %v2754_v34 = vpop.f32.mrf.mxu1  ;;  %v15959_v29 = vcombine.low %v4056_v7, %v4059_v36  ;;  %v4728_v39 = vrot.slane %v4726_v28, 4  ;;  %v13920_v31 = vld [vmem:[%s21575_s0 + $0xc8] sm:$0x1] }
 0x1ce   :  { %v12577_v60 = vpop.f32.mrf.mxu0  ;;  %v4729_v13 = vrot.slane %v13920_v31, 5  ;;  %v11145_v7 = vrot.slane %v3832_v23, 9  ;;  %v4066_v28 = vsel %vm14191_vm2, %v4064_v16, %v4065_v35 }
 0x1cf   :  { %v1431_v41 = vadd.f32 %v12577_v60, %v15438_v14  ;;  %v15962_v12 = vadd.f32 %v2754_v34, %v1428_v8  ;;  %v12657_v43 = vpop.f32.mrf.mxu1  ;;  %v13922_v14 = vld [vmem:[%s21575_s0 + $0xec] sm:$0x1]  ;;  %v4071_v60 = vrot.slane %v4069_v46, 4 }
 0x1d0   :  { %v1332_v57 = vpop.f32.mrf.mxu0  ;;  %v4072_v36 = vrot.slane %v13922_v14, 5 }
 0x1d1   :  { %21808 = vst [vmem:[#allocation41_spill] sm:$0xff] %v15962_v12  ;;  %v1429_v63 = vadd.f32 %v1332_v57, %v15440_v51  ;;  %v15974_v8 = vadd.f32 %v12657_v43, %v1431_v41  ;;  %v2757_v34 = vpop.f32.mrf.mxu1  ;;  %v4730_v51 = vsel %vm14191_vm2, %v4728_v39, %v4729_v13  ;;  %v4063_v43 = vsel %vm14191_vm2, %v11144_v22, %v4062_v58  ;;  %v3833_v58 = vld [vmem:[%s21575_s0 + $0xf0] sm:$0xe]  ;;  %v13924_v22 = vld [vmem:[%s21575_s0 + $0x100] sm:$0xf] }
 0x1d2   :  { %v12580_v31 = vpop.f32.mrf.mxu0  ;;  %12867 = vmatmul.mubr.bf16.gmra.mxu0 %v15916_v52  ;;  %v4076_v57 = vrot.slane %v13923_v18, 5  ;;  %v4083_v16 = vrot.slane %v13924_v22, 5  ;;  %v11146_v18 = vrot.slane %v3833_v58, 9  ;;  %v13926_v22 = vld [vmem:[%s21575_s0 + $0x104] sm:$0x1] }
 0x1d3   :  { %21809 = vst [vmem:[#allocation42_spill] sm:$0xff] %v15974_v8  ;;  %v1434_v47 = vadd.f32 %v12580_v31, %v15445_v61  ;;  %v15980_v23 = vadd.f32 %v2757_v34, %v1429_v63  ;;  %v12660_v12 = vpop.f32.mrf.mxu1  ;;  %12947 = vmatmul.mubr.bf16.gmra.mxu1 %v15957_v37  ;;  %12870 = vmatprep.mubr.bf16.mxu0 %v15957_v37  ;;  %v4086_v8 = vrot.slane %v13926_v22, 5 }
 0x1d4   :  { %v1345_v41 = vpop.f32.mrf.mxu0  ;;  %12950 = vmatprep.mubr.bf16.mxu1 %v15959_v29  ;;  %v4070_v61 = vsel %vm14191_vm2, %v11145_v7, %v4069_v46  ;;  %v4073_v63 = vsel %vm14191_vm2, %v4071_v60, %v4072_v36  ;;  %v3834_v46 = vld [vmem:[%s21575_s0 + $0xfc] sm:$0xe]  ;;  %v16016_v60 = vcombine.low %v4727_v42, %v4730_v51  ;;  %v11192_v31 = vcombine.low %v4063_v43, %v4066_v28 }
 0x1d5   :  { %21810 = vst [vmem:[#allocation43_spill] sm:$0xff] %v15980_v23  ;;  %v1432_v14 = vadd.f32 %v1345_v41, %v15451_v55  ;;  %v15997_v39 = vadd.f32 %v12660_v12, %v1434_v47  ;;  %v2770_v13 = vpop.f32.mrf.mxu1  ;;  %v13925_v55 = vld [vmem:[%s21575_s0 + $0xf8] sm:$0x1]  ;;  %v11193_v41 = vcombine.low %v4070_v61, %v4073_v63  ;;  %v11147_v23 = vrot.slane %v3834_v46, 9 }
 0x1d6   :  { %v4079_v12 = vrot.slane %v13925_v55, 5  ;;  %v12581_v35 = vpop.f32.mrf.mxu0 }
 0x1d7   :  { %21811 = vst [vmem:[#allocation44_spill] sm:$0xff] %v15997_v39  ;;  %v1435_v7 = vadd.f32 %v12581_v35, %v15453_v53  ;;  %v16014_v36 = vadd.f32 %v2770_v13, %v1432_v14  ;;  %v12661_v34 = vpop.f32.mrf.mxu1  ;;  %v4078_v39 = vrot.slane %v4076_v57, 4  ;;  %v4085_v14 = vrot.slane %v4083_v16, 4 }
 0x1d8   :  { %v1348_v47 = vpop.f32.mrf.mxu0  ;;  %v4084_v63 = vsel %vm14191_vm2, %v11147_v23, %v4083_v16  ;;  %v3836_v23 = vld [vmem:[%s21575_s0 + $0x114] sm:$0xe] }
 0x1d9   :  { %v1433_v55 = vadd.f32 %v1348_v47, %v15455_v21  ;;  %v16022_v37 = vadd.f32 %v12661_v34, %v1435_v7  ;;  %v2773_v53 = vpop.f32.mrf.mxu1  ;;  %v4077_v21 = vsel %vm14191_vm2, %v11146_v18, %v4076_v57  ;;  %v4080_v61 = vsel %vm14191_vm2, %v4078_v39, %v4079_v12  ;;  %v3835_v57 = vld [vmem:[%s21575_s0 + $0x108] sm:$0xe]  ;;  %v13928_v39 = vld [vmem:[%s21575_s0 + $0x118] sm:$0xf]  ;;  %v13929_v12 = vld [vmem:[%s21575_s0 + $0x110] sm:$0x1] }
 0x1da   :  { %v12584_v13 = vpop.f32.mrf.mxu0  ;;  %12871 = vmatmul.mubr.bf16.gmra.mxu0 %v15959_v29  ;;  %v4087_v34 = vsel %vm14191_vm2, %v4085_v14, %v4086_v8  ;;  %v4097_v16 = vrot.slane %v13928_v39, 5  ;;  %v16058_v22 = vcombine.low %v4077_v21, %v4080_v61  ;;  %v11148_v14 = vrot.slane %v3835_v57, 9 }
 0x1db   :  { %v1438_v42 = vadd.f32 %v12584_v13, %v15458_v30  ;;  %v16026_v51 = vadd.f32 %v2773_v53, %v1433_v55  ;;  %v12664_v43 = vpop.f32.mrf.mxu1  ;;  %12951 = vmatmul.mubr.bf16.gmra.mxu1 %v16016_v60  ;;  %12874 = vmatprep.mubr.bf16.mxu0 %v11192_v31  ;;  %v13927_v30 = vld [vmem:[%s21575_s0 + $0x10c] sm:$0xf]  ;;  %v4093_v31 = vrot.slane %v13929_v12, 5  ;;  %v16060_v53 = vcombine.low %v4084_v63, %v4087_v34 }
 0x1dc   :  { %v1361_v28 = vpop.f32.mrf.mxu0  ;;  %12954 = vmatprep.mubr.bf16.mxu1 %v11193_v41  ;;  %v4090_v58 = vrot.slane %v13927_v30, 5 }
 0x1dd   :  { %v1436_v46 = vadd.f32 %v1361_v28, %v15461_v9  ;;  %v16039_v35 = vadd.f32 %v12664_v43, %v1438_v42  ;;  %v2786_v7 = vpop.f32.mrf.mxu1  ;;  %21812 = vst [vmem:[#allocation45_spill] sm:$0xff] %v16060_v53  ;;  %v11149_v42 = vrot.slane %v3836_v23, 9  ;;  %v13930_v43 = vld [vmem:[%s21575_s0 + $0x11c] sm:$0x1] }
 0x1de   :  { %v12585_v9 = vpop.f32.mrf.mxu0  ;;  %v4092_v13 = vrot.slane %v4090_v58, 4  ;;  %v4100_v28 = vrot.slane %v13930_v43, 5 }
 0x1df   :  { %v1439_v8 = vadd.f32 %v12585_v9, %v15463_v11  ;;  %v16056_v47 = vadd.f32 %v2786_v7, %v1436_v46  ;;  %v12665_v18 = vpop.f32.mrf.mxu1  ;;  %v4099_v46 = vrot.slane %v4097_v16, 4 }
 0x1e0   :  { %v1364_v55 = vpop.f32.mrf.mxu0  ;;  %v4094_v57 = vsel %vm14191_vm2, %v4092_v13, %v4093_v31  ;;  %v13932_v31 = vld [vmem:[%s21575_s0 + $0x130] sm:$0xf] }
 0x1e1   :  { %v1437_v30 = vadd.f32 %v1364_v55, %v15465_v6  ;;  %v16066_v39 = vadd.f32 %v12665_v18, %v1439_v8  ;;  %v2789_v11 = vpop.f32.mrf.mxu1  ;;  %v4091_v6 = vsel %vm14191_vm2, %v11148_v14, %v4090_v58  ;;  %v4101_v18 = vsel %vm14191_vm2, %v4099_v46, %v4100_v28  ;;  %v3837_v58 = vld [vmem:[%s21575_s0 + $0x120] sm:$0xe]  ;;  %v13933_v14 = vld [vmem:[%s21575_s0 + $0x128] sm:$0x1] }
 0x1e2   :  { %v12684_v7 = vpop.f32.mrf.mxu0  ;;  %12875 = vmatmul.mubr.bf16.gmra.mxu0 %v11193_v41  ;;  %v4098_v41 = vsel %vm14191_vm2, %v11149_v42, %v4097_v16  ;;  %v3838_v16 = vld [vmem:[%s21575_s0 + $0x12c] sm:$0xe]  ;;  %v4111_v55 = vrot.slane %v13932_v31, 5  ;;  %v4107_v13 = vrot.slane %v13933_v14, 5  ;;  %v21816_v42 = vld [vmem:[#allocation38_spill] sm:$0xff] }
 0x1e3   :  { %21813 = vst [vmem:[#allocation46_spill] sm:$0xff] %v16066_v39  ;;  %v16068_v21 = vadd.f32 %v2789_v11, %v1437_v30  ;;  %v3277_v61 = vadd.f32 %v12684_v7, %v15473_v45  ;;  %v12764_v63 = vpop.f32.mrf.mxu1  ;;  %12955 = vmatmul.mubr.bf16.gmra.mxu1 %v16058_v22  ;;  %12878 = vmatprep.mubr.bf16.mxu0 %v16058_v22  ;;  %v13931_v45 = vld [vmem:[%s21575_s0 + $0x124] sm:$0xf] }
 0x1e4   :  { %v3020_v34 = vpop.f32.mrf.mxu0  ;;  %12958 = vmatprep.mubr.bf16.mxu1 %v16060_v53  ;;  %v4104_v23 = vrot.slane %v13931_v45, 5  ;;  %v16103_v11 = vcombine.low %v4091_v6, %v4094_v57  ;;  %v16105_v7 = vcombine.low %v4098_v41, %v4101_v18  ;;  %v13934_v45 = vld [vmem:[%s21575_s0 + $0x134] sm:$0x1]  ;;  %v21822_v6 = vld [vmem:[#allocation3_spill] sm:$0xff] }
 0x1e5   :  { %21814 = vst [vmem:[#allocation47_spill] sm:$0xff] %v16068_v21  ;;  %v3275_v9 = vadd.f32 %v3020_v34, %v15476_v0  ;;  %v16084_v12 = vadd.f32 %v12764_v63, %v3277_v61  ;;  %v3494_v8 = vpop.f32.mrf.mxu1  ;;  %v11150_v61 = vrot.slane %v3837_v58, 9  ;;  %v11151_v34 = vrot.slane %v3838_v16, 9 }
 0x1e6   :  { %v12685_v0 = vpop.f32.mrf.mxu0  ;;  %21818 = vst [vmem:[#allocation49_spill] sm:$0xff] %v16103_v11  ;;  %21819 = vst [vmem:[#allocation50_spill] sm:$0xff] %v16105_v7  ;;  %v4106_v63 = vrot.slane %v4104_v23, 4  ;;  %v4114_v31 = vrot.slane %v13934_v45, 5 }
 0x1e7   :  { %21815 = vst [vmem:[#allocation48_spill] sm:$0xff] %v16084_v12  ;;  %v3278_v43 = vadd.f32 %v12685_v0, %v21816_v42  ;;  %v16101_v28 = vadd.f32 %v3494_v8, %v3275_v9  ;;  %v12765_v30 = vpop.f32.mrf.mxu1  ;;  %v21820_v12 = vld [vmem:[#allocation39_spill] sm:$0xff]  ;;  %v4113_v8 = vrot.slane %v4111_v55, 4  ;;  %v4112_v42 = vsel %vm14191_vm2, %v11151_v34, %v4111_v55 }
 0x1e8   :  { %v3023_v46 = vpop.f32.mrf.mxu0  ;;  %v4108_v16 = vsel %vm14191_vm2, %v4106_v63, %v4107_v13  ;;  %v3840_v55 = vld [vmem:[%s21575_s0 + $0x144] sm:$0xe]  ;;  %v13936_v13 = vld [vmem:[%s21575_s0 + $0x148] sm:$0xf]  ;;  %v13937_v34 = vld [vmem:[%s21575_s0 + $0x140] sm:$0x1] }
 0x1e9   :  { %21817 = vst [vmem:[#allocation38_spill] sm:$0xff] %v16101_v28  ;;  %v3276_v14 = vadd.f32 %v3023_v46, %v21820_v12  ;;  %v16111_v21 = vadd.f32 %v12765_v30, %v3278_v43  ;;  %v3497_v9 = vpop.f32.mrf.mxu1  ;;  %v4105_v12 = vsel %vm14191_vm2, %v11150_v61, %v4104_v23  ;;  %v13935_v43 = vld [vmem:[%s21575_s0 + $0x13c] sm:$0xf]  ;;  %v21824_v46 = vld [vmem:[#allocation4_spill] sm:$0xff]  ;;  %v3839_v23 = vld [vmem:[%s21575_s0 + $0x138] sm:$0xe] }
 0x1ea   :  { %v12688_v0 = vpop.f32.mrf.mxu0  ;;  %12879 = vmatmul.mubr.bf16.gmra.mxu0 %v16060_v53  ;;  %v4118_v30 = vrot.slane %v13935_v43, 5  ;;  %v4125_v61 = vrot.slane %v13936_v13, 5  ;;  %v21830_v13 = vld [vmem:[#allocation6_spill] sm:$0xff] }
 0x1eb   :  { %21821 = vst [vmem:[#allocation39_spill] sm:$0xff] %v16111_v21  ;;  %v3281_v57 = vadd.f32 %v12688_v0, %v21822_v6  ;;  %v16115_v41 = vadd.f32 %v3497_v9, %v3276_v14  ;;  %v12768_v18 = vpop.f32.mrf.mxu1  ;;  %12959 = vmatmul.mubr.bf16.gmra.mxu1 %v16103_v11  ;;  %12882 = vmatprep.mubr.bf16.mxu0 %v16103_v11  ;;  %v4121_v6 = vrot.slane %v13937_v34, 5  ;;  %v11153_v21 = vrot.slane %v3840_v55, 9 }
 0x1ec   :  { %v3036_v58 = vpop.f32.mrf.mxu0  ;;  %12962 = vmatprep.mubr.bf16.mxu1 %v16105_v7  ;;  %v4115_v0 = vsel %vm14191_vm2, %v4113_v8, %v4114_v31  ;;  %v21826_v31 = vld [vmem:[#allocation5_spill] sm:$0xff]  ;;  %v4127_v39 = vrot.slane %v4125_v61, 4 }
 0x1ed   :  { %21823 = vst [vmem:[#allocation3_spill] sm:$0xff] %v16115_v41  ;;  %v3279_v45 = vadd.f32 %v3036_v58, %v21824_v46  ;;  %v16130_v14 = vadd.f32 %v12768_v18, %v3281_v57  ;;  %v3510_v9 = vpop.f32.mrf.mxu1  ;;  %v16149_v58 = vcombine.low %v4105_v12, %v4108_v16  ;;  %v16151_v46 = vcombine.low %v4112_v42, %v4115_v0  ;;  %v21832_v12 = vld [vmem:[#allocation7_spill] sm:$0xff] }
 0x1ee   :  { %v12689_v63 = vpop.f32.mrf.mxu0  ;;  %v4120_v41 = vrot.slane %v4118_v30, 4 }
 0x1ef   :  { %21825 = vst [vmem:[#allocation4_spill] sm:$0xff] %v16130_v14  ;;  %v3282_v8 = vadd.f32 %v12689_v63, %v21826_v31  ;;  %v16147_v57 = vadd.f32 %v3510_v9, %v3279_v45  ;;  %v12769_v18 = vpop.f32.mrf.mxu1  ;;  %21828 = vst [vmem:[#allocation51_spill] sm:$0xff] %v16149_v58  ;;  %v11152_v14 = vrot.slane %v3839_v23, 9  ;;  %v13938_v45 = vld [vmem:[%s21575_s0 + $0x14c] sm:$0x1]  ;;  %v4126_v31 = vsel %vm14191_vm2, %v11153_v21, %v4125_v61 }
 0x1f0   :  { %v3039_v43 = vpop.f32.mrf.mxu0  ;;  %21829 = vst [vmem:[#allocation52_spill] sm:$0xff] %v16151_v46  ;;  %v4128_v9 = vrot.slane %v13938_v45, 5  ;;  %v4122_v34 = vsel %vm14191_vm2, %v4120_v41, %v4121_v6  ;;  %v3841_v41 = vld [vmem:[%s21575_s0 + $0x150] sm:$0xe]  ;;  %v3842_v21 = vld [vmem:[%s21575_s0 + $0x15c] sm:$0xe] }
 0x1f1   :  { %21827 = vst [vmem:[#allocation5_spill] sm:$0xff] %v16147_v57  ;;  %v3280_v28 = vadd.f32 %v3039_v43, %v21830_v13  ;;  %v16154_v11 = vadd.f32 %v12769_v18, %v3282_v8  ;;  %v3513_v53 = vpop.f32.mrf.mxu1  ;;  %v4119_v55 = vsel %vm14191_vm2, %v11152_v14, %v4118_v30  ;;  %v21834_v8 = vld [vmem:[#allocation8_spill] sm:$0xff]  ;;  %v13940_v30 = vld [vmem:[%s21575_s0 + $0x160] sm:$0xf]  ;;  %v13941_v6 = vld [vmem:[%s21575_s0 + $0x158] sm:$0x1] }
 0x1f2   :  { %v12692_v63 = vpop.f32.mrf.mxu0  ;;  %12883 = vmatmul.mubr.bf16.gmra.mxu0 %v16105_v7  ;;  %v4129_v45 = vsel %vm14191_vm2, %v4127_v39, %v4128_v9  ;;  %v4139_v14 = vrot.slane %v13940_v30, 5  ;;  %v21836_v39 = vld [vmem:[#allocation10_spill] sm:$0xff]  ;;  %v21839_v30 = vld [vmem:[#allocation9_spill] sm:$0xff] }
 0x1f3   :  { %21831 = vst [vmem:[#allocation6_spill] sm:$0xff] %v16154_v11  ;;  %v3285_v16 = vadd.f32 %v12692_v63, %v21832_v12  ;;  %v16161_v42 = vadd.f32 %v3513_v53, %v3280_v28  ;;  %v12772_v0 = vpop.f32.mrf.mxu1  ;;  %12963 = vmatmul.mubr.bf16.gmra.mxu1 %v16149_v58  ;;  %12886 = vmatprep.mubr.bf16.mxu0 %v16149_v58  ;;  %v13939_v53 = vld [vmem:[%s21575_s0 + $0x154] sm:$0xf]  ;;  %v4135_v63 = vrot.slane %v13941_v6, 5 }
 0x1f4   :  { %v3052_v23 = vpop.f32.mrf.mxu0  ;;  %12966 = vmatprep.mubr.bf16.mxu1 %v16151_v46  ;;  %v4132_v28 = vrot.slane %v13939_v53, 5  ;;  %v16197_v53 = vcombine.low %v4126_v31, %v4129_v45  ;;  %v4141_v7 = vrot.slane %v4139_v14, 4 }
 0x1f5   :  { %21833 = vst [vmem:[#allocation7_spill] sm:$0xff] %v16161_v42  ;;  %v3283_v18 = vadd.f32 %v3052_v23, %v21834_v8  ;;  %v16176_v43 = vadd.f32 %v12772_v0, %v3285_v16  ;;  %v3526_v13 = vpop.f32.mrf.mxu1  ;;  %v16195_v0 = vcombine.low %v4119_v55, %v4122_v34  ;;  %v11154_v8 = vrot.slane %v3841_v41, 9  ;;  %v21841_v55 = vld [vmem:[#allocation11_spill] sm:$0xff] }
 0x1f6   :  { %v12693_v61 = vpop.f32.mrf.mxu0  ;;  %v11155_v42 = vrot.slane %v3842_v21, 9 }
 0x1f7   :  { %21835 = vst [vmem:[#allocation8_spill] sm:$0xff] %v16176_v43  ;;  %v3286_v9 = vadd.f32 %v12693_v61, %v21836_v39  ;;  %v16193_v12 = vadd.f32 %v3526_v13, %v3283_v18  ;;  %v12773_v16 = vpop.f32.mrf.mxu1  ;;  %21838 = vst [vmem:[#allocation53_spill] sm:$0xff] %v16195_v0  ;;  %v4134_v43 = vrot.slane %v4132_v28, 4  ;;  %v13942_v18 = vld [vmem:[%s21575_s0 + $0x164] sm:$0x1]  ;;  %v4133_v21 = vsel %vm14191_vm2, %v11154_v8, %v4132_v28 }
 0x1f8   :  { %v3055_v23 = vpop.f32.mrf.mxu0  ;;  %v4142_v13 = vrot.slane %v13942_v18, 5  ;;  %v4140_v39 = vsel %vm14191_vm2, %v11155_v42, %v4139_v14  ;;  %v3843_v28 = vld [vmem:[%s21575_s0 + $0x168] sm:$0xe]  ;;  %v3844_v42 = vld [vmem:[%s21575_s0 + $0x174] sm:$0xe] }
 0x1f9   :  { %21837 = vst [vmem:[#allocation10_spill] sm:$0xff] %v16193_v12  ;;  %v3284_v11 = vadd.f32 %v3055_v23, %v21839_v30  ;;  %v16200_v57 = vadd.f32 %v12773_v16, %v3286_v9  ;;  %v3529_v58 = vpop.f32.mrf.mxu1  ;;  %v4136_v6 = vsel %vm14191_vm2, %v4134_v43, %v4135_v63  ;;  %v21843_v9 = vld [vmem:[#allocation12_spill] sm:$0xff]  ;;  %v13944_v43 = vld [vmem:[%s21575_s0 + $0x178] sm:$0xf]  ;;  %v13945_v8 = vld [vmem:[%s21575_s0 + $0x170] sm:$0x1] }
 0x1fa   :  { %v12696_v61 = vpop.f32.mrf.mxu0  ;;  %12887 = vmatmul.mubr.bf16.gmra.mxu0 %v16151_v46  ;;  %v4143_v18 = vsel %vm14191_vm2, %v4141_v7, %v4142_v13  ;;  %v4153_v14 = vrot.slane %v13944_v43, 5  ;;  %v21845_v7 = vld [vmem:[#allocation13_spill] sm:$0xff]  ;;  %v21846_v43 = vld [vmem:[#allocation14_spill] sm:$0xff] }
 0x1fb   :  { %21840 = vst [vmem:[#allocation9_spill] sm:$0xff] %v16200_v57  ;;  %v3289_v34 = vadd.f32 %v12696_v61, %v21841_v55  ;;  %v16207_v31 = vadd.f32 %v3529_v58, %v3284_v11  ;;  %v12776_v45 = vpop.f32.mrf.mxu1  ;;  %12967 = vmatmul.mubr.bf16.gmra.mxu1 %v16195_v0  ;;  %12890 = vmatprep.mubr.bf16.mxu0 %v16195_v0  ;;  %v13943_v11 = vld [vmem:[%s21575_s0 + $0x16c] sm:$0xf]  ;;  %v4149_v61 = vrot.slane %v13945_v8, 5 }
 0x1fc   :  { %v3068_v41 = vpop.f32.mrf.mxu0  ;;  %12970 = vmatprep.mubr.bf16.mxu1 %v16197_v53  ;;  %v4146_v58 = vrot.slane %v13943_v11, 5  ;;  %v16243_v11 = vcombine.low %v4140_v39, %v4143_v18  ;;  %v4155_v46 = vrot.slane %v4153_v14, 4 }
 0x1fd   :  { %21842 = vst [vmem:[#allocation11_spill] sm:$0xff] %v16207_v31  ;;  %v3287_v16 = vadd.f32 %v3068_v41, %v21843_v9  ;;  %v16222_v23 = vadd.f32 %v12776_v45, %v3289_v34  ;;  %v3542_v30 = vpop.f32.mrf.mxu1  ;;  %v16241_v45 = vcombine.low %v4133_v21, %v4136_v6  ;;  %v11156_v9 = vrot.slane %v3843_v28, 9 }
 0x1fe   :  { %v12697_v63 = vpop.f32.mrf.mxu0  ;;  %v11157_v31 = vrot.slane %v3844_v42, 9 }
 0x1ff   :  { %21844 = vst [vmem:[#allocation12_spill] sm:$0xff] %v16222_v23  ;;  %v3290_v13 = vadd.f32 %v12697_v63, %v21845_v7  ;;  %v16239_v55 = vadd.f32 %v3542_v30, %v3287_v16  ;;  %v12777_v34 = vpop.f32.mrf.mxu1  ;;  %v4148_v23 = vrot.slane %v4146_v58, 4  ;;  %v13946_v16 = vld [vmem:[%s21575_s0 + $0x17c] sm:$0x1]  ;;  %v4147_v28 = vsel %vm14191_vm2, %v11156_v9, %v4146_v58  ;;  %v3845_v58 = vld [vmem:[%s21575_s0 + $0x180] sm:$0xe] }
 0x200   :  { %v3071_v41 = vpop.f32.mrf.mxu0  ;;  %v4156_v30 = vrot.slane %v13946_v16, 5  ;;  %v4154_v8 = vsel %vm14191_vm2, %v11157_v31, %v4153_v14  ;;  %v3846_v31 = vld [vmem:[%s21575_s0 + $0x18c] sm:$0xe] }
 0x201   :  { %v3288_v57 = vadd.f32 %v3071_v41, %v21846_v43  ;;  %v16246_v12 = vadd.f32 %v12777_v34, %v3290_v13  ;;  %v3545_v0 = vpop.f32.mrf.mxu1  ;;  %v4150_v42 = vsel %vm14191_vm2, %v4148_v23, %v4149_v61  ;;  %v13948_v23 = vld [vmem:[%s21575_s0 + $0x190] sm:$0xf]  ;;  %v13949_v61 = vld [vmem:[%s21575_s0 + $0x188] sm:$0x1] }
 0x202   :  { %v12700_v63 = vpop.f32.mrf.mxu0  ;;  %12891 = vmatmul.mubr.bf16.gmra.mxu0 %v16197_v53  ;;  %v4157_v34 = vsel %vm14191_vm2, %v4155_v46, %v4156_v30  ;;  %v4167_v14 = vrot.slane %v13948_v23, 5  ;;  %v4163_v41 = vrot.slane %v13949_v61, 5  ;;  %v16287_v16 = vcombine.low %v4147_v28, %v4150_v42 }
 0x203   :  { %v3293_v21 = vadd.f32 %v12700_v63, %v15555_v44  ;;  %v16253_v6 = vadd.f32 %v3545_v0, %v3288_v57  ;;  %v12780_v39 = vpop.f32.mrf.mxu1  ;;  %12971 = vmatmul.mubr.bf16.gmra.mxu1 %v16241_v45  ;;  %12894 = vmatprep.mubr.bf16.mxu0 %v16241_v45  ;;  %v13947_v44 = vld [vmem:[%s21575_s0 + $0x184] sm:$0xf]  ;;  %v16289_v63 = vcombine.low %v4154_v8, %v4157_v34 }
 0x204   :  { %v3084_v18 = vpop.f32.mrf.mxu0  ;;  %12974 = vmatprep.mubr.bf16.mxu1 %v16243_v11  ;;  %v4160_v57 = vrot.slane %v13947_v44, 5  ;;  %v4169_v61 = vrot.slane %v4167_v14, 4 }
 0x205   :  { %v3291_v0 = vadd.f32 %v3084_v18, %v15558_v33  ;;  %v16268_v7 = vadd.f32 %v12780_v39, %v3293_v21  ;;  %v3558_v13 = vpop.f32.mrf.mxu1  ;;  %v11158_v21 = vrot.slane %v3845_v58, 9  ;;  %v11159_v18 = vrot.slane %v3846_v31, 9  ;;  %v13951_v58 = vld [vmem:[%s21575_s0 + $0x19c] sm:$0xf] }
 0x206   :  { %v12701_v33 = vpop.f32.mrf.mxu0  ;;  %v4162_v39 = vrot.slane %v4160_v57, 4  ;;  %v4733_v31 = vrot.slane %v13951_v58, 5 }
 0x207   :  { %21847 = vst [vmem:[#allocation13_spill] sm:$0xff] %v16268_v7  ;;  %v3294_v46 = vadd.f32 %v12701_v33, %v15566_v56  ;;  %v16285_v9 = vadd.f32 %v3558_v13, %v3291_v0  ;;  %v12781_v43 = vpop.f32.mrf.mxu1  ;;  %v13950_v56 = vld [vmem:[%s21575_s0 + $0x194] sm:$0x1]  ;;  %v4161_v13 = vsel %vm14191_vm2, %v11158_v21, %v4160_v57  ;;  %v3847_v57 = vld [vmem:[%s21575_s0 + $0x198] sm:$0xe] }
 0x208   :  { %v3087_v30 = vpop.f32.mrf.mxu0  ;;  %v4170_v28 = vrot.slane %v13950_v56, 5  ;;  %v4164_v34 = vsel %vm14191_vm2, %v4162_v39, %v4163_v41 }
 0x209   :  { %v16292_v44 = vadd.f32 %v3087_v30, %v15570_v49  ;;  %v16294_v23 = vadd.f32 %v12781_v43, %v3294_v46  ;;  %v16296_v7 = vpop.f32.mrf.mxu1  ;;  %v4168_v43 = vsel %vm14191_vm2, %v11159_v18, %v4167_v14  ;;  %v4735_v14 = vrot.slane %v4733_v31, 4  ;;  %v13952_v18 = vld [vmem:[%s21575_s0 + $0x1a0] sm:$0x1] }
 0x20a   :  { %21849 = vst [vmem:[#allocation54_spill] sm:$0xff] %v16296_v7  ;;  %v12704_v42 = vpop.f32.mrf.mxu0  ;;  %12895 = vmatmul.mubr.bf16.gmra.mxu0 %v16243_v11  ;;  %v4171_v30 = vsel %vm14191_vm2, %v4169_v61, %v4170_v28  ;;  %v4736_v61 = vrot.slane %v13952_v18, 5  ;;  %v21876_v7 = vld [vmem:[#allocation30_spill] sm:$0xff] }
 0x20b   :  { %21848 = vst [vmem:[#allocation14_spill] sm:$0xff] %v16292_v44  ;;  %v3297_v8 = vadd.f32 %v12704_v42, %v15585_v40  ;;  %v12784_v0 = vpop.f32.mrf.mxu1  ;;  %12975 = vmatmul.mubr.bf16.gmra.mxu1 %v16287_v16  ;;  %12898 = vmatprep.mubr.bf16.mxu0 %v16287_v16 }
 0x20c   :  { %v3100_v49 = vpop.f32.mrf.mxu0  ;;  %12978 = vmatprep.mubr.bf16.mxu1 %v16289_v63 }
 0x20d   :  { %v3295_v40 = vadd.f32 %v3100_v49, %v15591_v62  ;;  %v16314_v33 = vadd.f32 %v12784_v0, %v3297_v8  ;;  %v3574_v46 = vpop.f32.mrf.mxu1  ;;  %v16326_v62 = vcombine.low %v4161_v13, %v4164_v34  ;;  %v16328_v8 = vcombine.low %v4168_v43, %v4171_v30 }
 0x20e   :  { %v12705_v41 = vpop.f32.mrf.mxu0  ;;  %v11217_v0 = vrot.slane %v3847_v57, 9 }
 0x20f   :  { %v3298_v21 = vadd.f32 %v12705_v41, %v15597_v24  ;;  %v16324_v39 = vadd.f32 %v3574_v46, %v3295_v40  ;;  %v12785_v56 = vpop.f32.mrf.mxu1  ;;  %v4737_v46 = vsel %vm14191_vm2, %v4735_v14, %v4736_v61 }
 0x210   :  { %v3103_v42 = vpop.f32.mrf.mxu0 }
 0x211   :  { %v16334_v28 = vadd.f32 %v3103_v42, %v15601_v10  ;;  %v16336_v49 = vadd.f32 %v12785_v56, %v3298_v21  ;;  %v16338_v24 = vpop.f32.mrf.mxu1  ;;  %v4734_v10 = vsel %vm14191_vm2, %v11217_v0, %v4733_v31 }
 0x212   :  { %21851 = vst [vmem:[#allocation56_spill] sm:$0xff] %v16338_v24  ;;  %v12708_v58 = vpop.f32.mrf.mxu0  ;;  %12899 = vmatmul.mubr.bf16.gmra.mxu0 %v16289_v63  ;;  %v16355_v42 = vcombine.low %v4734_v10, %v4737_v46  ;;  %v21869_v24 = vld [vmem:[#allocation25_spill] sm:$0xff] }
 0x213   :  { %21850 = vst [vmem:[#allocation55_spill] sm:$0xff] %v16334_v28  ;;  %v3301_v13 = vadd.f32 %v12708_v58, %v15615_v26  ;;  %v12788_v34 = vpop.f32.mrf.mxu1  ;;  %12979 = vmatmul.mubr.bf16.gmra.mxu1 %v16326_v62  ;;  %12902 = vmatprep.mubr.bf16.mxu0 %v16326_v62 }
 0x214   :  { %v3116_v40 = vpop.f32.mrf.mxu0  ;;  %12982 = vmatprep.mubr.bf16.mxu1 %v16328_v8 }
 0x215   :  { %v3299_v43 = vadd.f32 %v3116_v40, %v15624_v20  ;;  %v16350_v30 = vadd.f32 %v12788_v34, %v3301_v13  ;;  %v3590_v57 = vpop.f32.mrf.mxu1 }
 0x216   :  { %v12709_v26 = vpop.f32.mrf.mxu0 }
 0x217   :  { %v3302_v41 = vadd.f32 %v12709_v26, %v15630_v2  ;;  %v16353_v21 = vadd.f32 %v3590_v57, %v3299_v43  ;;  %v12789_v56 = vpop.f32.mrf.mxu1 }
 0x218   :  { %v3119_v18 = vpop.f32.mrf.mxu0 }
 0x219   :  { %v16358_v58 = vadd.f32 %v3119_v18, %v15633_v19  ;;  %v16360_v31 = vadd.f32 %v12789_v56, %v3302_v41  ;;  %v16362_v0 = vpop.f32.mrf.mxu1  ;;  %v21856_v56 = vld [vmem:[#allocation15_spill] sm:$0xff] }
 0x21a   :  { %21853 = vst [vmem:[#allocation58_spill] sm:$0xff] %v16362_v0  ;;  %v12712_v20 = vpop.f32.mrf.mxu0  ;;  %12903 = vmatmul.mubr.bf16.gmra.mxu0 %v16328_v8  ;;  %v21864_v0 = vld [vmem:[#allocation19_spill] sm:$0xff] }
 0x21b   :  { %21852 = vst [vmem:[#allocation57_spill] sm:$0xff] %v16358_v58  ;;  %v3305_v14 = vadd.f32 %v12712_v20, %v15642_v15  ;;  %v12792_v61 = vpop.f32.mrf.mxu1  ;;  %12983 = vmatmul.mubr.bf16.gmra.mxu1 %v16355_v42  ;;  %13002 = vmatprep.mubr.bf16.mxu0 %v21768_v5 }
 0x21c   :  { %v3132_v2 = vpop.f32.mrf.mxu0 }
 0x21d   :  { %v3303_v13 = vadd.f32 %v3132_v2, %v15659_v25  ;;  %v16369_v34 = vadd.f32 %v12792_v61, %v3305_v14  ;;  %v3606_v19 = vpop.f32.mrf.mxu1  ;;  %v21857_v25 = vld [vmem:[#allocation16_spill] sm:$0xff]  ;;  %v21858_v14 = vld [vmem:[#allocation18_spill] sm:$0xff]  ;;  %v21859_v61 = vld [vmem:[#allocation17_spill] sm:$0xff] }
 0x21e   :  { %v12713_v40 = vpop.f32.mrf.mxu0 }
 0x21f   :  { %v3306_v10 = vadd.f32 %v12713_v40, %v15667_v17  ;;  %v16372_v46 = vadd.f32 %v3606_v19, %v3303_v13  ;;  %v12793_v43 = vpop.f32.mrf.mxu1  ;;  %v21860_v40 = vld [vmem:[#allocation33_spill] sm:$0xff] }
 0x220   :  { %v3135_v57 = vpop.f32.mrf.mxu0 }
 0x221   :  { %v16375_v15 = vadd.f32 %v3135_v57, %v15674_v4  ;;  %v16377_v26 = vadd.f32 %v12793_v43, %v3306_v10  ;;  %v16379_v41 = vpop.f32.mrf.mxu1 }
 0x222   :  { %21855 = vst [vmem:[#allocation60_spill] sm:$0xff] %v16379_v41  ;;  %v12716_v5 = vpop.f32.mrf.mxu0  ;;  %13003 = vmatmul.mubr.bf16.vlgmr.msra.gmra.mxu0 %v21856_v56 }
 0x223   :  { %21854 = vst [vmem:[#allocation59_spill] sm:$0xff] %v16375_v15  ;;  %v3309_v18 = vadd.f32 %v12716_v5, %v21857_v25  ;;  %v12796_v20 = vpop.f32.mrf.mxu1  ;;  %13006 = vmatprep.mubr.bf16.mxu0 %v21858_v14  ;;  %v21861_v15 = vld [vmem:[#allocation20_spill] sm:$0xff] }
 0x224   :  { %v3148_v17 = vpop.f32.mrf.mxu0 }
 0x225   :  { %v3307_v2 = vadd.f32 %v3148_v17, %v21859_v61  ;;  %v16385_v13 = vadd.f32 %v12796_v20, %v3309_v18  ;;  %v3622_v19 = vpop.f32.mrf.mxu1  ;;  %v21865_v18 = vld [vmem:[#allocation21_spill] sm:$0xff]  ;;  %v21866_v61 = vld [vmem:[#allocation23_spill] sm:$0xff] }
 0x226   :  { %v12717_v4 = vpop.f32.mrf.mxu0 }
 0x227   :  { %v3310_v10 = vadd.f32 %v12717_v4, %v21860_v40  ;;  %v16388_v43 = vadd.f32 %v3622_v19, %v3307_v2  ;;  %v12797_v57 = vpop.f32.mrf.mxu1  ;;  %v21867_v2 = vld [vmem:[#allocation22_spill] sm:$0xff] }
 0x228   :  { %v3151_v41 = vpop.f32.mrf.mxu0 }
 0x229   :  { %v16391_v56 = vadd.f32 %v3151_v41, %v21861_v15  ;;  %v16393_v5 = vadd.f32 %v12797_v57, %v3310_v10  ;;  %v16395_v25 = vpop.f32.mrf.mxu1  ;;  %v21868_v41 = vld [vmem:[#allocation24_spill] sm:$0xff] }
 0x22a   :  { %21863 = vst [vmem:[#allocation16_spill] sm:$0xff] %v16395_v25  ;;  %v12720_v14 = vpop.f32.mrf.mxu0  ;;  %13007 = vmatmul.mubr.bf16.gmra.mxu0 %v21864_v0 }
 0x22b   :  { %21862 = vst [vmem:[#allocation15_spill] sm:$0xff] %v16391_v56  ;;  %v3313_v20 = vadd.f32 %v12720_v14, %v21865_v18  ;;  %v12800_v17 = vpop.f32.mrf.mxu1  ;;  %13010 = vmatprep.mubr.bf16.mxu0 %v21866_v61 }
 0x22c   :  { %v3164_v4 = vpop.f32.mrf.mxu0 }
 0x22d   :  { %v3311_v19 = vadd.f32 %v3164_v4, %v21867_v2  ;;  %v16401_v40 = vadd.f32 %v12800_v17, %v3313_v20  ;;  %v3638_v58 = vpop.f32.mrf.mxu1  ;;  %v21872_v20 = vld [vmem:[#allocation26_spill] sm:$0xff]  ;;  %v21873_v2 = vld [vmem:[#allocation28_spill] sm:$0xff] }
 0x22e   :  { %v12721_v15 = vpop.f32.mrf.mxu0 }
 0x22f   :  { %v3314_v10 = vadd.f32 %v12721_v15, %v21868_v41  ;;  %v16404_v57 = vadd.f32 %v3638_v58, %v3311_v19  ;;  %v12801_v25 = vpop.f32.mrf.mxu1  ;;  %v21874_v58 = vld [vmem:[#allocation27_spill] sm:$0xff] }
 0x230   :  { %v3167_v56 = vpop.f32.mrf.mxu0 }
 0x231   :  { %v16407_v0 = vadd.f32 %v3167_v56, %v21869_v24  ;;  %v16409_v14 = vadd.f32 %v12801_v25, %v3314_v10  ;;  %v16411_v18 = vpop.f32.mrf.mxu1  ;;  %v21875_v56 = vld [vmem:[#allocation29_spill] sm:$0xff] }
 0x232   :  { %21871 = vst [vmem:[#allocation17_spill] sm:$0xff] %v16411_v18  ;;  %v12724_v61 = vpop.f32.mrf.mxu0  ;;  %13011 = vmatmul.mubr.bf16.gmra.mxu0 %v15766_v59 }
 0x233   :  { %21870 = vst [vmem:[#allocation18_spill] sm:$0xff] %v16407_v0  ;;  %v3317_v17 = vadd.f32 %v12724_v61, %v21872_v20  ;;  %v12804_v4 = vpop.f32.mrf.mxu1  ;;  %13014 = vmatprep.mubr.bf16.mxu0 %v21873_v2 }
 0x234   :  { %v3180_v15 = vpop.f32.mrf.mxu0 }
 0x235   :  { %v3315_v19 = vadd.f32 %v3180_v15, %v21874_v58  ;;  %v16417_v41 = vadd.f32 %v12804_v4, %v3317_v17  ;;  %v3654_v28 = vpop.f32.mrf.mxu1  ;;  %v21880_v17 = vld [vmem:[#allocation31_spill] sm:$0xff]  ;;  %v21881_v58 = vld [vmem:[#allocation34_spill] sm:$0xff] }
 0x236   :  { %v12725_v24 = vpop.f32.mrf.mxu0 }
 0x237   :  { %v3318_v25 = vadd.f32 %v12725_v24, %v21875_v56  ;;  %v16420_v10 = vadd.f32 %v3654_v28, %v3315_v19  ;;  %v12805_v18 = vpop.f32.mrf.mxu1  ;;  %v21882_v28 = vld [vmem:[#allocation32_spill] sm:$0xff] }
 0x238   :  { %v3183_v0 = vpop.f32.mrf.mxu0 }
 0x239   :  { %v16423_v59 = vadd.f32 %v3183_v0, %v21876_v7  ;;  %v16425_v61 = vadd.f32 %v12805_v18, %v3318_v25  ;;  %v16427_v20 = vpop.f32.mrf.mxu1  ;;  %v21883_v0 = vld [vmem:[#allocation35_spill] sm:$0xff] }
 0x23a   :  { %21879 = vst [vmem:[#allocation19_spill] sm:$0xff] %v16427_v20  ;;  %v12728_v2 = vpop.f32.mrf.mxu0  ;;  %13015 = vmatmul.mubr.bf16.gmra.mxu0 %v15818_v50 }
 0x23b   :  { %21877 = vst [vmem:[#allocation33_spill] sm:$0xff] %v16423_v59  ;;  %21878 = vst [vmem:[#allocation20_spill] sm:$0xff] %v16425_v61  ;;  %v3321_v4 = vadd.f32 %v12728_v2, %v21880_v17  ;;  %v12808_v15 = vpop.f32.mrf.mxu1  ;;  %13018 = vmatprep.mubr.bf16.mxu0 %v21881_v58  ;;  %v21884_v61 = vld [vmem:[#allocation36_spill] sm:$0xff] }
 0x23c   :  { %v3196_v24 = vpop.f32.mrf.mxu0 }
 0x23d   :  { %v3319_v19 = vadd.f32 %v3196_v24, %v21882_v28  ;;  %v16433_v56 = vadd.f32 %v12808_v15, %v3321_v4  ;;  %v3670_v44 = vpop.f32.mrf.mxu1  ;;  %v21887_v4 = vld [vmem:[#allocation37_spill] sm:$0xff] }
 0x23e   :  { %v12729_v7 = vpop.f32.mrf.mxu0 }
 0x23f   :  { %v3322_v18 = vadd.f32 %v12729_v7, %v21883_v0  ;;  %v16436_v25 = vadd.f32 %v3670_v44, %v3319_v19  ;;  %v12809_v20 = vpop.f32.mrf.mxu1 }
 0x240   :  { %v3199_v59 = vpop.f32.mrf.mxu0 }
 0x241   :  { %v16439_v50 = vadd.f32 %v3199_v59, %v21884_v61  ;;  %v16441_v2 = vadd.f32 %v12809_v20, %v3322_v18  ;;  %v16443_v17 = vpop.f32.mrf.mxu1 }
 0x242   :  { %21886 = vst [vmem:[#allocation23_spill] sm:$0xff] %v16443_v17  ;;  %v12732_v58 = vpop.f32.mrf.mxu0  ;;  %13019 = vmatmul.mubr.bf16.gmra.mxu0 %v15870_v32  ;;  %v13954_v17 = vld [vmem:[%s21575_s0 + $0xd4] sm:$0x1] }
 0x243   :  { %21885 = vst [vmem:[#allocation21_spill] sm:$0xff] %v16439_v50  ;;  %v3325_v15 = vadd.f32 %v12732_v58, %v21887_v4  ;;  %v12812_v24 = vpop.f32.mrf.mxu1  ;;  %13022 = vmatprep.mubr.bf16.mxu0 %v15914_v38  ;;  %v5175_v50 = vrot.slane %v13954_v17, 5 }
 0x244   :  { %v3212_v28 = vpop.f32.mrf.mxu0 }
 0x245   :  { %v3323_v44 = vadd.f32 %v3212_v28, %v15912_v3  ;;  %v16449_v19 = vadd.f32 %v12812_v24, %v3325_v15  ;;  %v3686_v7 = vpop.f32.mrf.mxu1  ;;  %v21892_v24 = vld [vmem:[#allocation40_spill] sm:$0xff] }
 0x246   :  { %v12733_v59 = vpop.f32.mrf.mxu0 }
 0x247   :  { %v3326_v61 = vadd.f32 %v12733_v59, %v15919_v48  ;;  %v16452_v20 = vadd.f32 %v3686_v7, %v3323_v44  ;;  %v12813_v0 = vpop.f32.mrf.mxu1  ;;  %v3830_v48 = vld [vmem:[%s21575_s0 + $0xcc] sm:$0xe]  ;;  %v21893_v7 = vld [vmem:[#allocation41_spill] sm:$0xff] }
 0x248   :  { %v3215_v18 = vpop.f32.mrf.mxu0 }
 0x249   :  { %21888 = vst [vmem:[#allocation22_spill] sm:$0xff] %v16452_v20  ;;  %v16455_v32 = vadd.f32 %v3215_v18, %v15929_v1  ;;  %v16457_v58 = vadd.f32 %v12813_v0, %v3326_v61  ;;  %v16459_v4 = vpop.f32.mrf.mxu1  ;;  %v13953_v1 = vld [vmem:[%s21575_s0 + $0xd0] sm:$0xf]  ;;  %v21894_v18 = vld [vmem:[#allocation42_spill] sm:$0xff] }
 0x24a   :  { %21891 = vst [vmem:[#allocation26_spill] sm:$0xff] %v16459_v4  ;;  %v12736_v38 = vpop.f32.mrf.mxu0  ;;  %13023 = vmatmul.mubr.bf16.gmra.mxu0 %v15916_v52  ;;  %v5172_v28 = vrot.slane %v13953_v1, 5 }
 0x24b   :  { %21889 = vst [vmem:[#allocation24_spill] sm:$0xff] %v16455_v32  ;;  %21890 = vst [vmem:[#allocation25_spill] sm:$0xff] %v16457_v58  ;;  %v3329_v3 = vadd.f32 %v12736_v38, %v15946_v27  ;;  %v12816_v15 = vpop.f32.mrf.mxu1  ;;  %13026 = vmatprep.mubr.bf16.mxu0 %v21892_v24  ;;  %v11244_v27 = vrot.slane %v3830_v48, 9  ;;  %v21895_v58 = vld [vmem:[#allocation43_spill] sm:$0xff] }
 0x24c   :  { %v3228_v44 = vpop.f32.mrf.mxu0  ;;  %v5174_v32 = vrot.slane %v5172_v28, 4 }
 0x24d   :  { %v3327_v59 = vadd.f32 %v3228_v44, %v21893_v7  ;;  %v16471_v61 = vadd.f32 %v12816_v15, %v3329_v3  ;;  %v3702_v52 = vpop.f32.mrf.mxu1  ;;  %v21898_v44 = vld [vmem:[#allocation44_spill] sm:$0xff] }
 0x24e   :  { %v12737_v0 = vpop.f32.mrf.mxu0  ;;  %v5176_v17 = vsel %vm14191_vm2, %v5174_v32, %v5175_v50 }
 0x24f   :  { %v3330_v38 = vadd.f32 %v12737_v0, %v21894_v18  ;;  %v16474_v24 = vadd.f32 %v3702_v52, %v3327_v59  ;;  %v12817_v4 = vpop.f32.mrf.mxu1  ;;  %v5173_v52 = vsel %vm14191_vm2, %v11244_v27, %v5172_v28 }
 0x250   :  { %v3231_v1 = vpop.f32.mrf.mxu0 }
 0x251   :  { %v16480_v20 = vadd.f32 %v3231_v1, %v21895_v58  ;;  %v16482_v3 = vadd.f32 %v12817_v4, %v3330_v38  ;;  %v16484_v15 = vpop.f32.mrf.mxu1  ;;  %v11262_v1 = vcombine.low %v5173_v52, %v5176_v17 }
 0x252   :  { %21897 = vst [vmem:[#allocation27_spill] sm:$0xff] %v16484_v15  ;;  %v12740_v48 = vpop.f32.mrf.mxu0  ;;  %13027 = vmatmul.mubr.bf16.gmra.mxu0 %v15959_v29 }
 0x253   :  { %21896 = vst [vmem:[#allocation28_spill] sm:$0xff] %v16480_v20  ;;  %v3333_v7 = vadd.f32 %v12740_v48, %v21898_v44  ;;  %v12820_v59 = vpop.f32.mrf.mxu1  ;;  %13030 = vmatprep.mubr.bf16.mxu0 %v16016_v60 }
 0x254   :  { %v3244_v58 = vpop.f32.mrf.mxu0 }
 0x255   :  { %v3331_v4 = vadd.f32 %v3244_v58, %v16014_v36  ;;  %v16494_v0 = vadd.f32 %v12820_v59, %v3333_v7  ;;  %v3718_v18 = vpop.f32.mrf.mxu1 }
 0x256   :  { %v12741_v38 = vpop.f32.mrf.mxu0 }
 0x257   :  { %v3334_v29 = vadd.f32 %v12741_v38, %v16022_v37  ;;  %v16497_v48 = vadd.f32 %v3718_v18, %v3331_v4  ;;  %v12821_v44 = vpop.f32.mrf.mxu1 }
 0x258   :  { %v3247_v60 = vpop.f32.mrf.mxu0 }
 0x259   :  { %v16500_v15 = vadd.f32 %v3247_v60, %v16026_v51  ;;  %v16502_v28 = vadd.f32 %v12821_v44, %v3334_v29  ;;  %v16504_v50 = vpop.f32.mrf.mxu1  ;;  %v21901_v51 = vld [vmem:[#allocation46_spill] sm:$0xff]  ;;  %v21902_v29 = vld [vmem:[#allocation47_spill] sm:$0xff]  ;;  %v21905_v60 = vld [vmem:[#allocation45_spill] sm:$0xff] }
 0x25a   :  { %21900 = vst [vmem:[#allocation30_spill] sm:$0xff] %v16504_v50  ;;  %v12744_v32 = vpop.f32.mrf.mxu0  ;;  %13031 = vmatmul.mubr.bf16.gmra.mxu0 %v11262_v1 }
 0x25b   :  { %21899 = vst [vmem:[#allocation29_spill] sm:$0xff] %v16500_v15  ;;  %v3337_v36 = vadd.f32 %v12744_v32, %v16039_v35  ;;  %v12824_v27 = vpop.f32.mrf.mxu1  ;;  %13034 = vmatprep.mubr.bf16.mxu0 %v16058_v22  ;;  %v21923_v15 = vld [vmem:[#allocation7_spill] sm:$0xff] }
 0x25c   :  { %v3260_v7 = vpop.f32.mrf.mxu0 }
 0x25d   :  { %v3335_v37 = vadd.f32 %v3260_v7, %v16056_v47  ;;  %v16509_v59 = vadd.f32 %v12824_v27, %v3337_v36  ;;  %v3734_v52 = vpop.f32.mrf.mxu1  ;;  %v21906_v47 = vld [vmem:[#allocation48_spill] sm:$0xff]  ;;  %v21907_v27 = vld [vmem:[#allocation49_spill] sm:$0xff] }
 0x25e   :  { %v12745_v17 = vpop.f32.mrf.mxu0 }
 0x25f   :  { %v3338_v58 = vadd.f32 %v12745_v17, %v21901_v51  ;;  %v16512_v4 = vadd.f32 %v3734_v52, %v3335_v37  ;;  %v12825_v18 = vpop.f32.mrf.mxu1  ;;  %v21908_v37 = vld [vmem:[#allocation38_spill] sm:$0xff] }
 0x260   :  { %v3263_v38 = vpop.f32.mrf.mxu0 }
 0x261   :  { %v16515_v1 = vadd.f32 %v3263_v38, %v21902_v29  ;;  %v16517_v35 = vadd.f32 %v12825_v18, %v3338_v58  ;;  %v16519_v44 = vpop.f32.mrf.mxu1  ;;  %v21909_v58 = vld [vmem:[#allocation39_spill] sm:$0xff] }
 0x262   :  { %21904 = vst [vmem:[#allocation34_spill] sm:$0xff] %v16519_v44  ;;  %v12844_v22 = vpop.f32.mrf.mxu0  ;;  %13035 = vmatmul.mubr.bf16.gmra.mxu0 %v21905_v60  ;;  %v21911_v60 = vld [vmem:[#allocation3_spill] sm:$0xff] }
 0x263   :  { %21903 = vst [vmem:[#allocation31_spill] sm:$0xff] %v16515_v1  ;;  %v16523_v32 = vadd.f32 %v12844_v22, %v21906_v47  ;;  %v16525_v36 = vpop.f32.mrf.mxu1  ;;  %13038 = vmatprep.mubr.bf16.mxu0 %v21907_v27  ;;  %v13958_v22 = vmov 0.0   ;;  %v21917_v44 = vld [vmem:[#allocation51_spill] sm:$0xff] }
 0x264   :  { %v4399_v7 = vpop.f32.mrf.mxu0  ;;  %6223 = vst.msk [vmem:[#allocation2 + $0x30] sm:$0xff] %vm5612_vm6, %v13958_v22  ;;  %6224 = vst.msk [vmem:[#allocation2 + $0x38] sm:$0xff] %vm5612_vm6, %v13958_v22 }
 0x265   :  { %v16529_v52 = vadd.f32 %v4399_v7, %v21908_v37  ;;  %v16531_v17 = vpop.f32.mrf.mxu1  ;;  %6216 = vst.msk [vmem:[#allocation2] sm:$0xff] %vm5612_vm6, %v13958_v22  ;;  %6217 = vst.msk [vmem:[#allocation2 + $0x8] sm:$0xff] %vm5612_vm6, %v13958_v22  ;;  %v21913_v7 = vld [vmem:[#allocation50_spill] sm:$0xff]  ;;  %v21914_v37 = vld [vmem:[#allocation4_spill] sm:$0xff] }
 0x266   :  { %v12845_v51 = vpop.f32.mrf.mxu0  ;;  %6220 = vst.msk [vmem:[#allocation2 + $0x18] sm:$0xff] %vm5612_vm6, %v13958_v22  ;;  %6221 = vst.msk [vmem:[#allocation2 + $0x20] sm:$0xff] %vm5612_vm6, %v13958_v22 }
 0x267   :  { %v16534_v18 = vadd.f32 %v12845_v51, %v21909_v58  ;;  %v16536_v38 = vpop.f32.mrf.mxu1  ;;  %6226 = vst.msk [vmem:[#allocation2 + $0x48] sm:$0xff] %vm5612_vm6, %v13958_v22  ;;  %6227 = vst.msk [vmem:[#allocation2 + $0x50] sm:$0xff] %vm5612_vm6, %v13958_v22 }
 0x268   :  { %21910 = vst [vmem:[#allocation32_spill] sm:$0xff] %v16536_v38  ;;  %v16538_v29 = vpop.f32.mrf.mxu0  ;;  %6229 = vst.msk [vmem:[#allocation2 + $0x60] sm:$0xff] %vm5612_vm6, %v13958_v22  ;;  %v21927_v38 = vld [vmem:[#allocation8_spill] sm:$0xff] }
 0x269   :  { %6230 = vst.msk [vmem:[#allocation2 + $0x68] sm:$0xff] %vm5612_vm6, %v13958_v22  ;;  %6232 = vst.msk [vmem:[#allocation2 + $0x78] sm:$0xff] %vm5612_vm6, %v13958_v22  ;;  %v16686_v47 = vadd.f32 %v16538_v29, %v21911_v60  ;;  %v16692_v58 = vpop.f32.mrf.mxu1 }
 0x26a   :  { %6233 = vst.msk [vmem:[#allocation2 + $0x80] sm:$0xff] %vm5612_vm6, %v13958_v22  ;;  %6235 = vst.msk [vmem:[#allocation2 + $0x90] sm:$0xff] %vm5612_vm6, %v13958_v22  ;;  %v12848_v27 = vpop.f32.mrf.mxu0  ;;  %13039 = vmatmul.mubr.bf16.gmra.mxu0 %v21913_v7  ;;  %v21921_v7 = vld [vmem:[#allocation6_spill] sm:$0xff] }
 0x26b   :  { %6236 = vst.msk [vmem:[#allocation2 + $0x98] sm:$0xff] %vm5612_vm6, %v13958_v22  ;;  %6238 = vst.msk [vmem:[#allocation2 + $0xa8] sm:$0xff] %vm5612_vm6, %v13958_v22  ;;  %v16690_v51 = vadd.f32 %v12848_v27, %v21914_v37  ;;  %13042 = vmatprep.mubr.bf16.mxu0 %v21917_v44  ;;  %v21918_v44 = vld [vmem:[#allocation5_spill] sm:$0xff]  ;;  %v16770_v27 = vpop.f32.mrf.mxu1 }
 0x26c   :  { %6239 = vst.msk [vmem:[#allocation2 + $0xb0] sm:$0xff] %vm5612_vm6, %v13958_v22  ;;  %6241 = vst.msk [vmem:[#allocation2 + $0xc0] sm:$0xff] %vm5612_vm6, %v13958_v22  ;;  %v4415_v1 = vpop.f32.mrf.mxu0 }
 0x26d   :  { %6242 = vst.msk [vmem:[#allocation2 + $0xc8] sm:$0xff] %vm5612_vm6, %v13958_v22  ;;  %6244 = vst.msk [vmem:[#allocation2 + $0xd8] sm:$0xff] %vm5612_vm6, %v13958_v22  ;;  %v16768_v29 = vadd.f32 %v4415_v1, %v21918_v44  ;;  %v21928_v1 = vld [vmem:[#allocation53_spill] sm:$0xff] }
 0x26e   :  { %6245 = vst.msk [vmem:[#allocation2 + $0xe0] sm:$0xff] %vm5612_vm6, %v13958_v22  ;;  %6247 = vst.msk [vmem:[#allocation2 + $0xf0] sm:$0xff] %vm5612_vm6, %v13958_v22  ;;  %v12849_v60 = vpop.f32.mrf.mxu0 }
 0x26f   :  { %6248 = vst.msk [vmem:[#allocation2 + $0xf8] sm:$0xff] %vm5612_vm6, %v13958_v22  ;;  %6250 = vst.msk [vmem:[#allocation2 + $0x108] sm:$0xff] %vm5612_vm6, %v13958_v22  ;;  %v16773_v37 = vadd.f32 %v12849_v60, %v21921_v7 }
 0x270   :  { %6251 = vst.msk [vmem:[#allocation2 + $0x110] sm:$0xff] %vm5612_vm6, %v13958_v22  ;;  %6253 = vst.msk [vmem:[#allocation2 + $0x120] sm:$0xff] %vm5612_vm6, %v13958_v22  ;;  %v4418_v50 = vpop.f32.mrf.mxu0 }
 0x271   :  { %6254 = vst.msk [vmem:[#allocation2 + $0x128] sm:$0xff] %vm5612_vm6, %v13958_v22  ;;  %6256 = vst.msk [vmem:[#allocation2 + $0x138] sm:$0xff] %vm5612_vm6, %v13958_v22  ;;  %v16776_v20 = vadd.f32 %v4418_v50, %v21923_v15 }
 0x272   :  { %6257 = vst.msk [vmem:[#allocation2 + $0x140] sm:$0xff] %vm5612_vm6, %v13958_v22  ;;  %6259 = vst.msk [vmem:[#allocation2 + $0x150] sm:$0xff] %vm5612_vm6, %v13958_v22 }
 0x273   :  { %6260 = vst.msk [vmem:[#allocation2 + $0x158] sm:$0xff] %vm5612_vm6, %v13958_v22  ;;  %6262 = vst.msk [vmem:[#allocation2 + $0x168] sm:$0xff] %vm5612_vm6, %v13958_v22 }
 0x274   :  { %6263 = vst.msk [vmem:[#allocation2 + $0x170] sm:$0xff] %vm5612_vm6, %v13958_v22  ;;  %6265 = vst.msk [vmem:[#allocation2 + $0x180] sm:$0xff] %vm5612_vm6, %v13958_v22 }
 0x275   :  { %6266 = vst.msk [vmem:[#allocation2 + $0x188] sm:$0xff] %vm5612_vm6, %v13958_v22  ;;  %6268 = vst.msk [vmem:[#allocation2 + $0x198] sm:$0xff] %vm5612_vm6, %v13958_v22 }
 0x276   :  { %6269 = vst.msk [vmem:[#allocation2 + $0x1a0] sm:$0xff] %vm5612_vm6, %v13958_v22  ;;  %6271 = vst.msk [vmem:[#allocation2 + $0x1b0] sm:$0xff] %vm5612_vm6, %v13958_v22 }
 0x277   :  { %6272 = vst.msk [vmem:[#allocation2 + $0x1b8] sm:$0xff] %vm5612_vm6, %v13958_v22  ;;  %6274 = vst.msk [vmem:[#allocation2 + $0x1c8] sm:$0xff] %vm5612_vm6, %v13958_v22 }
 0x278   :  { %6275 = vst.msk [vmem:[#allocation2 + $0x1d0] sm:$0xff] %vm5612_vm6, %v13958_v22  ;;  %6277 = vst.msk [vmem:[#allocation2 + $0x1e0] sm:$0xff] %vm5612_vm6, %v13958_v22 }
 0x279   :  { %6278 = vst.msk [vmem:[#allocation2 + $0x1e8] sm:$0xff] %vm5612_vm6, %v13958_v22  ;;  %6280 = vst.msk [vmem:[#allocation2 + $0x1f8] sm:$0xff] %vm5612_vm6, %v13958_v22 }
 0x27a   :  { %6281 = vst.msk [vmem:[#allocation2 + $0x200] sm:$0xff] %vm5612_vm6, %v13958_v22  ;;  %6283 = vst.msk [vmem:[#allocation2 + $0x210] sm:$0xff] %vm5612_vm6, %v13958_v22 }
 0x27b   :  { %6284 = vst.msk [vmem:[#allocation2 + $0x218] sm:$0xff] %vm5612_vm6, %v13958_v22  ;;  %6286 = vst.msk [vmem:[#allocation2 + $0x228] sm:$0xff] %vm5612_vm6, %v13958_v22 }
 0x27c   :  { %6287 = vst.msk [vmem:[#allocation2 + $0x230] sm:$0xff] %vm5612_vm6, %v13958_v22  ;;  %6289 = vst.msk [vmem:[#allocation2 + $0x240] sm:$0xff] %vm5612_vm6, %v13958_v22 }
 0x27d   :  { %6290 = vst.msk [vmem:[#allocation2 + $0x248] sm:$0xff] %vm5612_vm6, %v13958_v22  ;;  %6292 = vst.msk [vmem:[#allocation2 + $0x258] sm:$0xff] %vm5612_vm6, %v13958_v22 }
 0x27e   :  { %6293 = vst.msk [vmem:[#allocation2 + $0x260] sm:$0xff] %vm5612_vm6, %v13958_v22  ;;  %6295 = vst.msk [vmem:[#allocation2 + $0x270] sm:$0xff] %vm5612_vm6, %v13958_v22 }
 0x27f   :  { %6296 = vst.msk [vmem:[#allocation2 + $0x278] sm:$0xff] %vm5612_vm6, %v13958_v22  ;;  %6298 = vst.msk [vmem:[#allocation2 + $0x288] sm:$0xff] %vm5612_vm6, %v13958_v22 }
 0x280   :  { %6299 = vst.msk [vmem:[#allocation2 + $0x290] sm:$0xff] %vm5612_vm6, %v13958_v22  ;;  %6301 = vst.msk [vmem:[#allocation2 + $0x2a0] sm:$0xff] %vm5612_vm6, %v13958_v22 }
 0x281   :  { %6302 = vst.msk [vmem:[#allocation2 + $0x2a8] sm:$0xff] %vm5612_vm6, %v13958_v22  ;;  %6304 = vst.msk [vmem:[#allocation2 + $0x2b8] sm:$0xff] %vm5612_vm6, %v13958_v22 }
 0x282   :  { %6305 = vst.msk [vmem:[#allocation2 + $0x2c0] sm:$0xff] %vm5612_vm6, %v13958_v22  ;;  %6307 = vst.msk [vmem:[#allocation2 + $0x2d0] sm:$0xff] %vm5612_vm6, %v13958_v22 }
 0x283   :  { %6308 = vst.msk [vmem:[#allocation2 + $0x2d8] sm:$0xff] %vm5612_vm6, %v13958_v22  ;;  %6310 = vst.msk [vmem:[#allocation2 + $0x2e8] sm:$0xff] %vm5612_vm6, %v13958_v22 }
 0x284   :  { %6311 = vst.msk [vmem:[#allocation2 + $0x2f0] sm:$0xff] %vm5612_vm6, %v13958_v22  ;;  %6313 = vst.msk [vmem:[#allocation2 + $0x300] sm:$0xff] %vm5612_vm6, %v13958_v22 }
 0x285   :  { %6314 = vst.msk [vmem:[#allocation2 + $0x308] sm:$0xff] %vm5612_vm6, %v13958_v22  ;;  %6316 = vst.msk [vmem:[#allocation2 + $0x318] sm:$0xff] %vm5612_vm6, %v13958_v22 }
 0x286   :  { %6317 = vst.msk [vmem:[#allocation2 + $0x320] sm:$0xff] %vm5612_vm6, %v13958_v22  ;;  %6319 = vst.msk [vmem:[#allocation2 + $0x330] sm:$0xff] %vm5612_vm6, %v13958_v22 }
 0x287   :  { %6320 = vst.msk [vmem:[#allocation2 + $0x338] sm:$0xff] %vm5612_vm6, %v13958_v22  ;;  %6322 = vst.msk [vmem:[#allocation2 + $0x348] sm:$0xff] %vm5612_vm6, %v13958_v22 }
 0x288   :  { %6323 = vst.msk [vmem:[#allocation2 + $0x350] sm:$0xff] %vm5612_vm6, %v13958_v22  ;;  %21912 = vst [vmem:[#allocation35_spill] sm:$0xff] %v16686_v47  ;;  %v16779_v47 = vpop.f32.mrf.mxu1 }
 0x289   :  { %21915 = vst [vmem:[#allocation36_spill] sm:$0xff] %v16690_v51  ;;  %21916 = vst [vmem:[#allocation37_spill] sm:$0xff] %v16692_v58  ;;  %v12852_v51 = vpop.f32.mrf.mxu0  ;;  %v21925_v58 = vld [vmem:[#allocation52_spill] sm:$0xff] }
 0x28a   :  { %6225 = vst.msk [vmem:[#allocation2 + $0x40] sm:$0x3] %vm6218_vm7, %v13958_v22  ;;  %6219 = vst.msk [vmem:[#allocation2 + $0x10] sm:$0x3] %vm6218_vm7, %v13958_v22  ;;  %13043 = vmatmul.mubr.bf16.gmra.mxu0 %v21925_v58  ;;  %v16788_v7 = vpop.f32.mrf.mxu1 }
 0x28b   :  { %6222 = vst.msk [vmem:[#allocation2 + $0x28] sm:$0x3] %vm6218_vm7, %v13958_v22  ;;  %6228 = vst.msk [vmem:[#allocation2 + $0x58] sm:$0x3] %vm6218_vm7, %v13958_v22  ;;  %13046 = vmatprep.mubr.bf16.mxu0 %v21928_v1  ;;  %v4431_v44 = vpop.f32.mrf.mxu0 }
 0x28c   :  { %6231 = vst.msk [vmem:[#allocation2 + $0x70] sm:$0x3] %vm6218_vm7, %v13958_v22  ;;  %6234 = vst.msk [vmem:[#allocation2 + $0x88] sm:$0x3] %vm6218_vm7, %v13958_v22 }
 0x28d   :  { %6237 = vst.msk [vmem:[#allocation2 + $0xa0] sm:$0x3] %vm6218_vm7, %v13958_v22  ;;  %6240 = vst.msk [vmem:[#allocation2 + $0xb8] sm:$0x3] %vm6218_vm7, %v13958_v22  ;;  %v12853_v60 = vpop.f32.mrf.mxu0 }
 0x28e   :  { %6243 = vst.msk [vmem:[#allocation2 + $0xd0] sm:$0x3] %vm6218_vm7, %v13958_v22  ;;  %6246 = vst.msk [vmem:[#allocation2 + $0xe8] sm:$0x3] %vm6218_vm7, %v13958_v22 }
 0x28f   :  { %6249 = vst.msk [vmem:[#allocation2 + $0x100] sm:$0x3] %vm6218_vm7, %v13958_v22  ;;  %6252 = vst.msk [vmem:[#allocation2 + $0x118] sm:$0x3] %vm6218_vm7, %v13958_v22  ;;  %v4434_v50 = vpop.f32.mrf.mxu0 }
 0x290   :  { %6255 = vst.msk [vmem:[#allocation2 + $0x130] sm:$0x3] %vm6218_vm7, %v13958_v22  ;;  %6258 = vst.msk [vmem:[#allocation2 + $0x148] sm:$0x3] %vm6218_vm7, %v13958_v22 }
 0x291   :  { %6261 = vst.msk [vmem:[#allocation2 + $0x160] sm:$0x3] %vm6218_vm7, %v13958_v22  ;;  %6264 = vst.msk [vmem:[#allocation2 + $0x178] sm:$0x3] %vm6218_vm7, %v13958_v22 }
 0x292   :  { %6267 = vst.msk [vmem:[#allocation2 + $0x190] sm:$0x3] %vm6218_vm7, %v13958_v22  ;;  %6270 = vst.msk [vmem:[#allocation2 + $0x1a8] sm:$0x3] %vm6218_vm7, %v13958_v22  ;;  %13047 = vmatmul.mubr.bf16.gmra.mxu0 %v16197_v53 }
 0x293   :  { %6273 = vst.msk [vmem:[#allocation2 + $0x1c0] sm:$0x3] %vm6218_vm7, %v13958_v22  ;;  %6276 = vst.msk [vmem:[#allocation2 + $0x1d8] sm:$0x3] %vm6218_vm7, %v13958_v22  ;;  %13050 = vmatprep.mubr.bf16.mxu0 %v16241_v45  ;;  %v21935_v45 = vld [vmem:[#allocation13_spill] sm:$0xff] }
 0x294   :  { %6279 = vst.msk [vmem:[#allocation2 + $0x1f0] sm:$0x3] %vm6218_vm7, %v13958_v22  ;;  %6282 = vst.msk [vmem:[#allocation2 + $0x208] sm:$0x3] %vm6218_vm7, %v13958_v22 }
 0x295   :  { %6285 = vst.msk [vmem:[#allocation2 + $0x220] sm:$0x3] %vm6218_vm7, %v13958_v22  ;;  %6288 = vst.msk [vmem:[#allocation2 + $0x238] sm:$0x3] %vm6218_vm7, %v13958_v22 }
 0x296   :  { %6291 = vst.msk [vmem:[#allocation2 + $0x250] sm:$0x3] %vm6218_vm7, %v13958_v22  ;;  %6294 = vst.msk [vmem:[#allocation2 + $0x268] sm:$0x3] %vm6218_vm7, %v13958_v22 }
 0x297   :  { %6297 = vst.msk [vmem:[#allocation2 + $0x280] sm:$0x3] %vm6218_vm7, %v13958_v22  ;;  %6300 = vst.msk [vmem:[#allocation2 + $0x298] sm:$0x3] %vm6218_vm7, %v13958_v22 }
 0x298   :  { %6303 = vst.msk [vmem:[#allocation2 + $0x2b0] sm:$0x3] %vm6218_vm7, %v13958_v22  ;;  %6306 = vst.msk [vmem:[#allocation2 + $0x2c8] sm:$0x3] %vm6218_vm7, %v13958_v22 }
 0x299   :  { %6309 = vst.msk [vmem:[#allocation2 + $0x2e0] sm:$0x3] %vm6218_vm7, %v13958_v22  ;;  %6312 = vst.msk [vmem:[#allocation2 + $0x2f8] sm:$0x3] %vm6218_vm7, %v13958_v22 }
 0x29a   :  { %6315 = vst.msk [vmem:[#allocation2 + $0x310] sm:$0x3] %vm6218_vm7, %v13958_v22  ;;  %6318 = vst.msk [vmem:[#allocation2 + $0x328] sm:$0x3] %vm6218_vm7, %v13958_v22  ;;  %13051 = vmatmul.mubr.bf16.gmra.mxu0 %v16243_v11 }
 0x29b   :  { %6321 = vst.msk [vmem:[#allocation2 + $0x340] sm:$0x3] %vm6218_vm7, %v13958_v22  ;;  %6324 = vst.msk [vmem:[#allocation2 + $0x358] sm:$0x3] %vm6218_vm7, %v13958_v22  ;;  %v16782_v22 = vadd.f32 %v12852_v51, %v21927_v38  ;;  %v16797_v38 = vpop.f32.mrf.mxu1  ;;  %v21933_v51 = vld [vmem:[#allocation12_spill] sm:$0xff]  ;;  %13054 = vmatprep.mubr.bf16.mxu0 %v16287_v16 }
 0x29c   :  { %21919 = vst [vmem:[#allocation40_spill] sm:$0xff] %v16768_v29  ;;  %21920 = vst [vmem:[#allocation41_spill] sm:$0xff] %v16770_v27  ;;  %v21929_v29 = vld [vmem:[#allocation10_spill] sm:$0xff] }
 0x29d   :  { %21922 = vst [vmem:[#allocation42_spill] sm:$0xff] %v16773_v37  ;;  %21924 = vst [vmem:[#allocation43_spill] sm:$0xff] %v16776_v20  ;;  %v16786_v27 = vadd.f32 %v4431_v44, %v21929_v29  ;;  %v21930_v37 = vld [vmem:[#allocation9_spill] sm:$0xff]  ;;  %v21931_v20 = vld [vmem:[#allocation11_spill] sm:$0xff] }
 0x29e   :  { %21926 = vst [vmem:[#allocation44_spill] sm:$0xff] %v16779_v47  ;;  %v16791_v15 = vadd.f32 %v12853_v60, %v21930_v37  ;;  %v16794_v58 = vadd.f32 %v4434_v50, %v21931_v20  ;;  %v12856_v47 = vpop.f32.mrf.mxu0  ;;  %v16806_v60 = vpop.f32.mrf.mxu1 }
 0x29f   :  { %v16800_v1 = vadd.f32 %v12856_v47, %v21933_v51 }
 0x2a0   :  { %21932 = vst [vmem:[#allocation46_spill] sm:$0xff] %v16794_v58  ;;  %v4447_v29 = vpop.f32.mrf.mxu0  ;;  %v16815_v47 = vpop.f32.mrf.mxu1 }
 0x2a1   :  { %v16804_v44 = vadd.f32 %v4447_v29, %v16239_v55 }
 0x2a2   :  { %v12857_v37 = vpop.f32.mrf.mxu0  ;;  %13055 = vmatmul.mubr.bf16.gmra.mxu0 %v16289_v63 }
 0x2a3   :  { %v16809_v20 = vadd.f32 %v12857_v37, %v16246_v12  ;;  %v16824_v37 = vpop.f32.mrf.mxu1  ;;  %13058 = vmatprep.mubr.bf16.mxu0 %v16326_v62 }
 0x2a4   :  { %v4450_v50 = vpop.f32.mrf.mxu0 }
 0x2a5   :  { %v16812_v53 = vadd.f32 %v4450_v50, %v16253_v6 }
 0x2a6   :  { %v12860_v58 = vpop.f32.mrf.mxu0 }
 0x2a7   :  { %21934 = vst [vmem:[#allocation47_spill] sm:$0xff] %v16812_v53  ;;  %v16818_v51 = vadd.f32 %v12860_v58, %v21935_v45  ;;  %v16832_v53 = vpop.f32.mrf.mxu1 }
 0x2a8   :  { %v4463_v55 = vpop.f32.mrf.mxu0 }
 0x2a9   :  { %21936 = vst [vmem:[#allocation45_spill] sm:$0xff] %v16818_v51  ;;  %v16822_v29 = vadd.f32 %v4463_v55, %v16285_v9  ;;  %v13955_v9 = vld [vmem:[%s21575_s0 + $0x1a8] sm:$0xf] }
 0x2aa   :  { %v12861_v12 = vpop.f32.mrf.mxu0  ;;  %v5179_v16 = vrot.slane %v13955_v9, 5  ;;  %v13956_v9 = vld [vmem:[%s21575_s0 + $0x1ac] sm:$0x1]  ;;  %13059 = vmatmul.mubr.bf16.gmra.mxu0 %v16328_v8 }
 0x2ab   :  { %v16827_v6 = vadd.f32 %v12861_v12, %v16294_v23  ;;  %v3848_v23 = vld [vmem:[%s21575_s0 + $0x1a4] sm:$0xe]  ;;  %v16847_v12 = vpop.f32.mrf.mxu1  ;;  %13062 = vmatprep.mubr.bf16.mxu0 %v16355_v42 }
 0x2ac   :  { %v16829_v50 = vpop.f32.mrf.mxu0  ;;  %v11245_v62 = vrot.slane %v3848_v23, 9 }
 0x2ad   :  { %21937 = vst [vmem:[#allocation48_spill] sm:$0xff] %v16827_v6 }
 0x2ae   :  { %v12864_v11 = vpop.f32.mrf.mxu0 }
 0x2af   :  { %v16835_v58 = vadd.f32 %v12864_v11, %v16314_v33  ;;  %v5181_v11 = vrot.slane %v5179_v16, 4 }
 0x2b0   :  { %v4479_v45 = vpop.f32.mrf.mxu0 }
 0x2b1   :  { %21938 = vst [vmem:[#allocation49_spill] sm:$0xff] %v16835_v58  ;;  %v16845_v55 = vadd.f32 %v4479_v45, %v16324_v39  ;;  %v5182_v58 = vrot.slane %v13956_v9, 5  ;;  %v16858_v39 = vpop.f32.mrf.mxu1 }
 0x2b2   :  { %v12865_v63 = vpop.f32.mrf.mxu0 }
 0x2b3   :  { %21939 = vst [vmem:[#allocation38_spill] sm:$0xff] %v16845_v55  ;;  %v16850_v33 = vadd.f32 %v12865_v63, %v16336_v49  ;;  %v5180_v49 = vsel %vm14191_vm2, %v11245_v62, %v5179_v16  ;;  %v5183_v23 = vsel %vm14191_vm2, %v5181_v11, %v5182_v58  ;;  %v16871_v8 = vpop.f32.mrf.mxu1 }
 0x2b4   :  { %v16855_v6 = vpop.f32.mrf.mxu0 }
 0x2b5   :  { %21940 = vst [vmem:[#allocation39_spill] sm:$0xff] %v16850_v33  ;;  %21941 = vst [vmem:[#allocation3_spill] sm:$0xff] %v16855_v6  ;;  %v11263_v6 = vcombine.low %v5180_v49, %v5183_v23 }
 0x2b6   :  { %v12868_v51 = vpop.f32.mrf.mxu0 }
 0x2b7   :  { %v16861_v45 = vadd.f32 %v12868_v51, %v16350_v30  ;;  %13063 = vmatmul.mubr.bf16.gmra.mxu0 %v11263_v6  ;;  %v16878_v51 = vpop.f32.mrf.mxu1 }
 0x2b8   :  { %v4495_v63 = vpop.f32.mrf.mxu0 }
 0x2b9   :  { %v16869_v9 = vadd.f32 %v4495_v63, %v16353_v21  ;;  %v16886_v62 = vpop.f32.mrf.mxu1 }
 0x2ba   :  { %v12869_v33 = vpop.f32.mrf.mxu0 }
 0x2bb   :  { %v16874_v55 = vadd.f32 %v12869_v33, %v16360_v31  ;;  %v16893_v49 = vpop.f32.mrf.mxu1 }
 0x2bc   :  { %v16876_v30 = vpop.f32.mrf.mxu0 }
 0x2bd   :  { %v16901_v63 = vpop.f32.mrf.mxu1 }
 0x2be   :  { %v12872_v42 = vpop.f32.mrf.mxu0 }
 0x2bf   :  { %v16881_v54 = vadd.f32 %v12872_v42, %v16369_v34 }
 0x2c0   :  { %v4511_v58 = vpop.f32.mrf.mxu0 }
 0x2c1   :  { %v16884_v21 = vadd.f32 %v4511_v58, %v16372_v46  ;;  %v13823_v58 = vld [vmem:[%s21576_s4 + $0x78] sm:$0xff]  }
 0x2c2   :  { %v12873_v16 = vpop.f32.mrf.mxu0  ;;  %13066 = vmatprep.subr.bf16.mxu1 %v13823_v58 }
 0x2c3   :  { %v16889_v11 = vadd.f32 %v12873_v16, %v16377_v26  ;;  %13067 = vmatpush3.bf16.msra.mxu1 %v13823_v58 }
 0x2c4   :  { %v16891_v31 = vpop.f32.mrf.mxu0 }
 0x2c5   :  { %21942 = vst [vmem:[#allocation50_spill] sm:$0xff] %v16889_v11  ;;  %v16911_v11 = vpop.f32.mrf.mxu1 }
 0x2c6   :  { %v12876_v33 = vpop.f32.mrf.mxu0 }
 0x2c7   :  { %v16896_v6 = vadd.f32 %v12876_v33, %v16385_v13 }
 0x2c8   :  { %v4527_v34 = vpop.f32.mrf.mxu0 }
 0x2c9   :  { %21943 = vst [vmem:[#allocation4_spill] sm:$0xff] %v16896_v6  ;;  %v16899_v23 = vadd.f32 %v4527_v34, %v16388_v43  ;;  %v16919_v34 = vpop.f32.mrf.mxu1 }
 0x2ca   :  { %v12877_v46 = vpop.f32.mrf.mxu0 }
 0x2cb   :  { %21944 = vst [vmem:[#allocation51_spill] sm:$0xff] %v16899_v23  ;;  %v16904_v42 = vadd.f32 %v12877_v46, %v16393_v5 }
 0x2cc   :  { %v16906_v26 = vpop.f32.mrf.mxu0 }
 0x2cd   :  { %21945 = vst [vmem:[#allocation5_spill] sm:$0xff] %v16904_v42  ;;  %21946 = vst [vmem:[#allocation6_spill] sm:$0xff] %v16906_v26  ;;  %v16926_v26 = vpop.f32.mrf.mxu1 }
 0x2ce   :  { %v12880_v16 = vpop.f32.mrf.mxu0 }
 0x2cf   :  { %v16914_v13 = vadd.f32 %v12880_v16, %v16401_v40 }
 0x2d0   :  { %v4543_v43 = vpop.f32.mrf.mxu0 }
 0x2d1   :  { %21947 = vst [vmem:[#allocation7_spill] sm:$0xff] %v16914_v13  ;;  %v16917_v33 = vadd.f32 %v4543_v43, %v16404_v57  ;;  %v16934_v43 = vpop.f32.mrf.mxu1  ;;  %v21953_v13 = vld [vmem:[#allocation20_spill] sm:$0xff] }
 0x2d2   :  { %v12881_v5 = vpop.f32.mrf.mxu0 }
 0x2d3   :  { %21948 = vst [vmem:[#allocation52_spill] sm:$0xff] %v16917_v33  ;;  %v16922_v46 = vadd.f32 %v12881_v5, %v16409_v14 }
 0x2d4   :  { %v16924_v42 = vpop.f32.mrf.mxu0 }
 0x2d5   :  { %21949 = vst [vmem:[#allocation8_spill] sm:$0xff] %v16922_v46  ;;  %21950 = vst [vmem:[#allocation53_spill] sm:$0xff] %v16924_v42  ;;  %v16941_v46 = vpop.f32.mrf.mxu1 }
 0x2d6   :  { %v12884_v6 = vpop.f32.mrf.mxu0 }
 0x2d7   :  { %v16929_v40 = vadd.f32 %v12884_v6, %v16417_v41 }
 0x2d8   :  { %v4559_v16 = vpop.f32.mrf.mxu0 }
 0x2d9   :  { %21951 = vst [vmem:[#allocation10_spill] sm:$0xff] %v16929_v40  ;;  %v16932_v58 = vadd.f32 %v4559_v16, %v16420_v10  ;;  %v16949_v16 = vpop.f32.mrf.mxu1 }
 0x2da   :  { %v12885_v57 = vpop.f32.mrf.mxu0 }
 0x2db   :  { %21952 = vst [vmem:[#allocation9_spill] sm:$0xff] %v16932_v58  ;;  %v16937_v33 = vadd.f32 %v12885_v57, %v21953_v13 }
 0x2dc   :  { %v16939_v14 = vpop.f32.mrf.mxu0 }
 0x2dd   :  { %21954 = vst [vmem:[#allocation11_spill] sm:$0xff] %v16937_v33  ;;  %21955 = vst [vmem:[#allocation12_spill] sm:$0xff] %v16939_v14  ;;  %v16956_v33 = vpop.f32.mrf.mxu1 }
 0x2de   :  { %v12888_v5 = vpop.f32.mrf.mxu0 }
 0x2df   :  { %v16944_v42 = vadd.f32 %v12888_v5, %v16433_v56  ;;  %v21961_v5 = vld [vmem:[#allocation22_spill] sm:$0xff] }
 0x2e0   :  { %v4575_v41 = vpop.f32.mrf.mxu0 }
 0x2e1   :  { %21956 = vst [vmem:[#allocation13_spill] sm:$0xff] %v16944_v42  ;;  %v16947_v6 = vadd.f32 %v4575_v41, %v16436_v25  ;;  %v16964_v41 = vpop.f32.mrf.mxu1 }
 0x2e2   :  { %v12889_v10 = vpop.f32.mrf.mxu0 }
 0x2e3   :  { %21957 = vst [vmem:[#allocation20_spill] sm:$0xff] %v16947_v6  ;;  %v16952_v40 = vadd.f32 %v12889_v10, %v16441_v2  ;;  %v21963_v6 = vld [vmem:[#allocation25_spill] sm:$0xff] }
 0x2e4   :  { %v16954_v13 = vpop.f32.mrf.mxu0  ;;  %v13824_v10 = vld [vmem:[%s21576_s4 + $0x70] sm:$0xff]  }
 0x2e5   :  { %21958 = vst [vmem:[#allocation61_spill] sm:$0xff] %v16952_v40  ;;  %21959 = vst [vmem:[#allocation62_spill] sm:$0xff] %v16954_v13  ;;  %13068 = vmatprep.subr.bf16.mxu1 %v13824_v10 }
 0x2e6   :  { %v12892_v57 = vpop.f32.mrf.mxu0  ;;  %13069 = vmatpush3.bf16.msra.mxu1 %v13824_v10 }
 0x2e7   :  { %v16959_v14 = vadd.f32 %v12892_v57, %v16449_v19  ;;  %v16974_v19 = vpop.f32.mrf.mxu1 }
 0x2e8   :  { %v4591_v56 = vpop.f32.mrf.mxu0 }
 0x2e9   :  { %21960 = vst [vmem:[#allocation63_spill] sm:$0xff] %v16959_v14  ;;  %v16962_v42 = vadd.f32 %v4591_v56, %v21961_v5 }
 0x2ea   :  { %v12893_v25 = vpop.f32.mrf.mxu0 }
 0x2eb   :  { %21962 = vst [vmem:[#allocation22_spill] sm:$0xff] %v16962_v42  ;;  %v16967_v58 = vadd.f32 %v12893_v25, %v21963_v6  ;;  %v16982_v25 = vpop.f32.mrf.mxu1 }
 0x2ec   :  { %v16969_v2 = vpop.f32.mrf.mxu0 }
 0x2ed   :  { %21964 = vst [vmem:[#allocation25_spill] sm:$0xff] %v16967_v58  ;;  %21965 = vst [vmem:[#allocation64_spill] sm:$0xff] %v16969_v2  ;;  %v16989_v14 = vpop.f32.mrf.mxu1 }
 0x2ee   :  { %v12896_v40 = vpop.f32.mrf.mxu0 }
 0x2ef   :  { %v16977_v57 = vadd.f32 %v12896_v40, %v16471_v61  ;;  %v16997_v10 = vpop.f32.mrf.mxu1 }
 0x2f0   :  { %v4607_v56 = vpop.f32.mrf.mxu0 }
 0x2f1   :  { %21966 = vst [vmem:[#allocation65_spill] sm:$0xff] %v16977_v57  ;;  %v16980_v5 = vadd.f32 %v4607_v56, %v16474_v24 }
 0x2f2   :  { %v12897_v6 = vpop.f32.mrf.mxu0 }
 0x2f3   :  { %21967 = vst [vmem:[#allocation66_spill] sm:$0xff] %v16980_v5  ;;  %v16985_v58 = vadd.f32 %v12897_v6, %v16482_v3 }
 0x2f4   :  { %v16987_v2 = vpop.f32.mrf.mxu0 }
 0x2f5   :  { %21968 = vst [vmem:[#allocation67_spill] sm:$0xff] %v16985_v58  ;;  %21969 = vst [vmem:[#allocation68_spill] sm:$0xff] %v16987_v2  ;;  %v17004_v58 = vpop.f32.mrf.mxu1 }
 0x2f6   :  { %v12900_v42 = vpop.f32.mrf.mxu0  ;;  %21974 = vst [vmem:[#allocation73_spill] sm:$0xff] %v17004_v58 }
 0x2f7   :  { %v16992_v13 = vadd.f32 %v12900_v42, %v16494_v0 }
 0x2f8   :  { %v4623_v61 = vpop.f32.mrf.mxu0 }
 0x2f9   :  { %21970 = vst [vmem:[#allocation69_spill] sm:$0xff] %v16992_v13  ;;  %v16995_v40 = vadd.f32 %v4623_v61, %v16497_v48  ;;  %v17012_v61 = vpop.f32.mrf.mxu1 }
 0x2fa   :  { %v12901_v24 = vpop.f32.mrf.mxu0  ;;  %21977 = vst [vmem:[#allocation76_spill] sm:$0xff] %v17012_v61  ;;  %v21993_v61 = vld [vmem:[#allocation42_spill] sm:$0xff] }
 0x2fb   :  { %21971 = vst [vmem:[#allocation70_spill] sm:$0xff] %v16995_v40  ;;  %v17000_v56 = vadd.f32 %v12901_v24, %v16502_v28 }
 0x2fc   :  { %v17002_v3 = vpop.f32.mrf.mxu0 }
 0x2fd   :  { %21972 = vst [vmem:[#allocation71_spill] sm:$0xff] %v17000_v56  ;;  %21973 = vst [vmem:[#allocation72_spill] sm:$0xff] %v17002_v3  ;;  %v5100_v56 = vadd.f32 %v16531_v17, %v16529_v52  ;;  %v17021_v3 = vpop.f32.mrf.mxu1 }
 0x2fe   :  { %v12904_v6 = vpop.f32.mrf.mxu0  ;;  %21980 = vst [vmem:[#allocation79_spill] sm:$0xff] %v17021_v3  ;;  %v21994_v3 = vld [vmem:[#allocation43_spill] sm:$0xff] }
 0x2ff   :  { %v17007_v57 = vadd.f32 %v12904_v6, %v16509_v59  ;;  %v5102_v6 = vadd.f32 %v16525_v36, %v16523_v32  ;;  %v21988_v36 = vld [vmem:[#allocation40_spill] sm:$0xff] }
 0x300   :  { %v4639_v0 = vpop.f32.mrf.mxu0 }
 0x301   :  { %21975 = vst [vmem:[#allocation74_spill] sm:$0xff] %v17007_v57  ;;  %v17010_v42 = vadd.f32 %v4639_v0, %v16512_v4  ;;  %v21982_v57 = vld [vmem:[#allocation32_spill] sm:$0xff] }
 0x302   :  { %v12905_v48 = vpop.f32.mrf.mxu0 }
 0x303   :  { %21976 = vst [vmem:[#allocation75_spill] sm:$0xff] %v17010_v42  ;;  %v17015_v13 = vadd.f32 %v12905_v48, %v16517_v35  ;;  %v5103_v42 = vadd.f32 %v21982_v57, %v16534_v18  ;;  %v21983_v35 = vld [vmem:[#allocation35_spill] sm:$0xff]  ;;  %v21984_v48 = vld [vmem:[#allocation37_spill] sm:$0xff] }
 0x304   :  { %v17017_v28 = vpop.f32.mrf.mxu0 }
 0x305   :  { %21978 = vst [vmem:[#allocation77_spill] sm:$0xff] %v17015_v13  ;;  %21979 = vst [vmem:[#allocation78_spill] sm:$0xff] %v17017_v28  ;;  %v5101_v13 = vadd.f32 %v21984_v48, %v21983_v35  ;;  %v17031_v28 = vpop.f32.mrf.mxu1 }
 0x306   :  { %v13004_v24 = vpop.f32.mrf.mxu0  ;;  %21985 = vst [vmem:[#allocation32_spill] sm:$0xff] %v17031_v28 }
 0x307   :  { %v17033_v40 = vadd.f32 %v13004_v24, %v5102_v6  ;;  %v17043_v18 = vpop.f32.mrf.mxu1 }
 0x308   :  { %v5291_v59 = vpop.f32.mrf.mxu0  ;;  %21990 = vst [vmem:[#allocation40_spill] sm:$0xff] %v17043_v18 }
 0x309   :  { %v17025_v4 = vadd.f32 %v5291_v59, %v5100_v56  ;;  %21986 = vst [vmem:[#allocation35_spill] sm:$0xff] %v17033_v40  ;;  %v21989_v56 = vld [vmem:[#allocation44_spill] sm:$0xff]  ;;  %v5748_v57 = vmul.f32 %v17033_v40, %v17033_v40  ;;  %v5616_v48 = vsel %vm5612_vm6, %v17033_v40, 0.0 }
 0x30a   :  { %v13005_v0 = vpop.f32.mrf.mxu0  ;;  %v5104_v59 = vadd.f32 %v21989_v56, %v21988_v36 }
 0x30b   :  { %21981 = vst [vmem:[#allocation80_spill] sm:$0xff] %v17025_v4  ;;  %v5746_v17 = vmul.f32 %v17025_v4, %v17025_v4  ;;  %v17037_v2 = vadd.f32 %v13005_v0, %v5103_v42  ;;  %v5613_v24 = vsel %vm5612_vm6, %v17025_v4, 0.0  ;;  %v21992_v0 = vld [vmem:[#allocation41_spill] sm:$0xff] }
 0x30c   :  { %v5294_v52 = vpop.f32.mrf.mxu0 }
 0x30d   :  { %v17039_v32 = vadd.f32 %v5294_v52, %v5101_v13  ;;  %v21991_v13 = vld [vmem:[#allocation36_spill] sm:$0xff]  ;;  %v5810_v56 = vsel %vm5612_vm6, %v5746_v17, 0.0  ;;  %v5749_v18 = vmul.f32 %v17037_v2, %v17037_v2  ;;  %v5813_v17 = vsel %vm5612_vm6, %v5748_v57, 0.0 }
 0x30e   :  { %v13008_v5 = vpop.f32.mrf.mxu0  ;;  %v5106_v35 = vadd.f32 %v21992_v0, %v21991_v13  ;;  %v5105_v13 = vadd.f32 %v16797_v38, %v21994_v3  ;;  %v5108_v57 = vadd.f32 %v16815_v47, %v16786_v27 }
 0x30f   :  { %21987 = vst [vmem:[#allocation37_spill] sm:$0xff] %v17039_v32  ;;  %v5614_v6 = vsel %vm5612_vm6, %v17039_v32, 0.0  ;;  %v5747_v42 = vmul.f32 %v17039_v32, %v17039_v32  ;;  %v5107_v32 = vadd.f32 %v16788_v7, %v21993_v61  ;;  %v5815_v38 = vsel %vm5612_vm6, %v5749_v18, 0.0 }
 0x310   :  { %v5615_v52 = vadd.f32 %v5614_v6, %v5613_v24  ;;  %v5307_v36 = vpop.f32.mrf.mxu0  ;;  %v17067_v24 = vpop.f32.mrf.mxu1  ;;  %v5618_v6 = vsel %vm5612_vm6, %v17037_v2, 0.0  ;;  %v17072_v58 = vadd.f32 %v13008_v5, %v5106_v35 }
 0x311   :  { %v5811_v4 = vsel %vm5612_vm6, %v5747_v42, 0.0  ;;  %v17061_v28 = vadd.f32 %v5307_v36, %v5104_v59 }
 0x312   :  { %v5617_v0 = vadd.f32 %v5616_v48, %v5615_v52  ;;  %v5812_v23 = vadd.f32 %v5811_v4, %v5810_v56  ;;  %v13009_v40 = vpop.f32.mrf.mxu0  ;;  %v17085_v36 = vpop.f32.mrf.mxu1 }
 0x313   :  { %v5750_v59 = vmul.f32 %v17061_v28, %v17061_v28  ;;  %v5620_v3 = vsel %vm5612_vm6, %v17061_v28, 0.0  ;;  %v17079_v4 = vadd.f32 %v13009_v40, %v5107_v32  ;;  %v5110_v32 = vadd.f32 %v16806_v60, %v16782_v22 }
 0x314   :  { %v5814_v42 = vadd.f32 %v5813_v17, %v5812_v23  ;;  %v5619_v7 = vadd.f32 %v5618_v6, %v5617_v0  ;;  %v5310_v61 = vpop.f32.mrf.mxu0  ;;  %v5752_v23 = vmul.f32 %v17072_v58, %v17072_v58  ;;  %v5624_v0 = vsel %vm5612_vm6, %v17072_v58, 0.0 }
 0x315   :  { %v17081_v48 = vadd.f32 %v5310_v61, %v5105_v13  ;;  %v5817_v18 = vsel %vm5612_vm6, %v5750_v59, 0.0  ;;  %v5753_v17 = vmul.f32 %v17079_v4, %v17079_v4 }
 0x316   :  { %v5621_v5 = vadd.f32 %v5620_v3, %v5619_v7  ;;  %v5816_v35 = vadd.f32 %v5815_v38, %v5814_v42  ;;  %v13012_v52 = vpop.f32.mrf.mxu0  ;;  %v5111_v42 = vadd.f32 %v16824_v37, %v16791_v15  ;;  %v21995_v7 = vld [vmem:[#allocation46_spill] sm:$0xff]  ;;  %v17107_v3 = vpop.f32.mrf.mxu1 }
 0x317   :  { %v5622_v56 = vsel %vm5612_vm6, %v17081_v48, 0.0  ;;  %v5751_v40 = vmul.f32 %v17081_v48, %v17081_v48  ;;  %v5109_v61 = vadd.f32 %v16832_v53, %v21995_v7  ;;  %v5823_v53 = vsel %vm5612_vm6, %v5753_v17, 0.0 }
 0x318   :  { %v5818_v27 = vadd.f32 %v5817_v18, %v5816_v35  ;;  %v5623_v47 = vadd.f32 %v5622_v56, %v5621_v5  ;;  %v5323_v13 = vpop.f32.mrf.mxu0  ;;  %v5821_v5 = vsel %vm5612_vm6, %v5752_v23, 0.0  ;;  %v5626_v35 = vsel %vm5612_vm6, %v17079_v4, 0.0 }
 0x319   :  { %v5819_v6 = vsel %vm5612_vm6, %v5751_v40, 0.0  ;;  %v17101_v59 = vadd.f32 %v5323_v13, %v5108_v57  ;;  %v17112_v18 = vadd.f32 %v13012_v52, %v5110_v32  ;;  %v5112_v23 = vadd.f32 %v16858_v39, %v16804_v44 }
 0x31a   :  { %v5625_v22 = vadd.f32 %v5624_v0, %v5623_v47  ;;  %v5820_v60 = vadd.f32 %v5819_v6, %v5818_v27  ;;  %v13013_v38 = vpop.f32.mrf.mxu0  ;;  %v17125_v0 = vpop.f32.mrf.mxu1 }
 0x31b   :  { %v5754_v57 = vmul.f32 %v17101_v59, %v17101_v59  ;;  %v5628_v40 = vsel %vm5612_vm6, %v17101_v59, 0.0  ;;  %v17119_v27 = vadd.f32 %v13013_v38, %v5111_v42  ;;  %v5756_v6 = vmul.f32 %v17112_v18, %v17112_v18 }
 0x31c   :  { %v5822_v56 = vadd.f32 %v5821_v5, %v5820_v60  ;;  %v5627_v15 = vadd.f32 %v5626_v35, %v5625_v22  ;;  %v5326_v37 = vpop.f32.mrf.mxu0  ;;  %v5632_v60 = vsel %vm5612_vm6, %v17112_v18, 0.0 }
 0x31d   :  { %v17121_v47 = vadd.f32 %v5326_v37, %v5109_v61  ;;  %v5825_v17 = vsel %vm5612_vm6, %v5754_v57, 0.0  ;;  %v5114_v61 = vadd.f32 %v16847_v12, %v16800_v1  ;;  %v5757_v38 = vmul.f32 %v17119_v27, %v17119_v27 }
 0x31e   :  { %v5629_v52 = vadd.f32 %v5628_v40, %v5627_v15  ;;  %v5824_v32 = vadd.f32 %v5823_v53, %v5822_v56  ;;  %v13016_v13 = vpop.f32.mrf.mxu0  ;;  %v5115_v57 = vadd.f32 %v16871_v8, %v16809_v20  ;;  %v21996_v56 = vld [vmem:[#allocation47_spill] sm:$0xff]  ;;  %v17147_v53 = vpop.f32.mrf.mxu1  ;;  %v5829_v40 = vsel %vm5612_vm6, %v5756_v6, 0.0  ;;  %v21998_v20 = vld [vmem:[#allocation54_spill] sm:$0xff] }
 0x31f   :  { %v5630_v7 = vsel %vm5612_vm6, %v17121_v47, 0.0  ;;  %v5755_v42 = vmul.f32 %v17121_v47, %v17121_v47  ;;  %v5113_v15 = vadd.f32 %v16878_v51, %v21996_v56 }
 0x320   :  { %v5826_v44 = vadd.f32 %v5825_v17, %v5824_v32  ;;  %v5631_v39 = vadd.f32 %v5630_v7, %v5629_v52  ;;  %v5339_v22 = vpop.f32.mrf.mxu0  ;;  %v5634_v52 = vsel %vm5612_vm6, %v17119_v27, 0.0  ;;  %v17152_v32 = vadd.f32 %v13016_v13, %v5114_v61  ;;  %v21997_v17 = vld [vmem:[#allocation14_spill] sm:$0xff] }
 0x321   :  { %v5827_v5 = vsel %vm5612_vm6, %v5755_v42, 0.0  ;;  %v17141_v35 = vadd.f32 %v5339_v22, %v5112_v23  ;;  %v3766_v8 = vadd.f32 %v21998_v20, %v21997_v17  ;;  %v5116_v13 = vadd.f32 %v16893_v49, %v16822_v29 }
 0x322   :  { %v5633_v1 = vadd.f32 %v5632_v60, %v5631_v39  ;;  %v5828_v12 = vadd.f32 %v5827_v5, %v5826_v44  ;;  %v13017_v37 = vpop.f32.mrf.mxu0  ;;  %v5831_v44 = vsel %vm5612_vm6, %v5757_v38, 0.0  ;;  %v5760_v38 = vmul.f32 %v17152_v32, %v17152_v32 }
 0x323   :  { %v5758_v23 = vmul.f32 %v17141_v35, %v17141_v35  ;;  %v5636_v39 = vsel %vm5612_vm6, %v17141_v35, 0.0  ;;  %v17161_v6 = vadd.f32 %v13017_v37, %v5115_v57  ;;  %v4671_v61 = vadd.f32 %v16829_v50, %v3766_v8  ;;  %v22000_v37 = vld [vmem:[#allocation45_spill] sm:$0xff]  ;;  %v22001_v8 = vld [vmem:[#allocation48_spill] sm:$0xff] }
 0x324   :  { %v5830_v7 = vadd.f32 %v5829_v40, %v5828_v12  ;;  %v5635_v51 = vadd.f32 %v5634_v52, %v5633_v1  ;;  %v5342_v42 = vpop.f32.mrf.mxu0  ;;  %v17168_v12 = vpop.f32.mrf.mxu1  ;;  %v5118_v29 = vadd.f32 %v16886_v62, %v22000_v37  ;;  %v5640_v52 = vsel %vm5612_vm6, %v17152_v32, 0.0 }
 0x325   :  { %21999 = vst [vmem:[#allocation44_spill] sm:$0xff] %v17161_v6  ;;  %v17163_v22 = vadd.f32 %v5342_v42, %v5113_v15  ;;  %v5833_v1 = vsel %vm5612_vm6, %v5758_v23, 0.0  ;;  %v5761_v17 = vmul.f32 %v17161_v6, %v17161_v6 }
 0x326   :  { %v5637_v60 = vadd.f32 %v5636_v39, %v5635_v51  ;;  %v5832_v5 = vadd.f32 %v5831_v44, %v5830_v7  ;;  %v13020_v56 = vpop.f32.mrf.mxu0  ;;  %v5119_v7 = vadd.f32 %v16901_v63, %v22001_v8  ;;  %v5117_v51 = vadd.f32 %v16911_v11, %v4671_v61  ;;  %v17189_v39 = vpop.f32.mrf.mxu1 }
 0x327   :  { %v5638_v57 = vsel %vm5612_vm6, %v17163_v22, 0.0  ;;  %v5759_v15 = vmul.f32 %v17163_v22, %v17163_v22 }
 0x328   :  { %v5834_v50 = vadd.f32 %v5833_v1, %v5832_v5  ;;  %v5639_v49 = vadd.f32 %v5638_v57, %v5637_v60  ;;  %v5355_v40 = vpop.f32.mrf.mxu0  ;;  %v5837_v60 = vsel %vm5612_vm6, %v5760_v38, 0.0  ;;  %v5642_v5 = vsel %vm5612_vm6, %v17161_v6, 0.0  ;;  %v22002_v57 = vld [vmem:[#allocation55_spill] sm:$0xff] }
 0x329   :  { %v5835_v23 = vsel %vm5612_vm6, %v5759_v15, 0.0  ;;  %v17184_v20 = vadd.f32 %v5355_v40, %v5116_v13  ;;  %v17194_v1 = vadd.f32 %v13020_v56, %v5118_v29  ;;  %v22003_v15 = vld [vmem:[#allocation56_spill] sm:$0xff]  ;;  %v22004_v56 = vld [vmem:[#allocation38_spill] sm:$0xff] }
 0x32a   :  { %v5641_v42 = vadd.f32 %v5640_v52, %v5639_v49  ;;  %v5836_v62 = vadd.f32 %v5835_v23, %v5834_v50  ;;  %v13021_v44 = vpop.f32.mrf.mxu0  ;;  %v3770_v63 = vadd.f32 %v22003_v15, %v22002_v57  ;;  %v5839_v50 = vsel %vm5612_vm6, %v5761_v17, 0.0  ;;  %v22005_v52 = vld [vmem:[#allocation3_spill] sm:$0xff] }
 0x32b   :  { %v5762_v13 = vmul.f32 %v17184_v20, %v17184_v20  ;;  %v5644_v49 = vsel %vm5612_vm6, %v17184_v20, 0.0  ;;  %v17203_v38 = vadd.f32 %v13021_v44, %v5119_v7  ;;  %v5120_v29 = vadd.f32 %v16926_v26, %v22004_v56  ;;  %v22006_v44 = vld [vmem:[#allocation49_spill] sm:$0xff] }
 0x32c   :  { %v5838_v37 = vadd.f32 %v5837_v60, %v5836_v62  ;;  %v5643_v11 = vadd.f32 %v5642_v5, %v5641_v42  ;;  %v5358_v61 = vpop.f32.mrf.mxu0  ;;  %v4675_v23 = vadd.f32 %v22005_v52, %v3770_v63  ;;  %v17210_v62 = vpop.f32.mrf.mxu1  ;;  %v5764_v17 = vmul.f32 %v17194_v1, %v17194_v1 }
 0x32d   :  { %v17205_v40 = vadd.f32 %v5358_v61, %v5117_v51  ;;  %v5841_v42 = vsel %vm5612_vm6, %v5762_v13, 0.0  ;;  %v5122_v26 = vadd.f32 %v16919_v34, %v22006_v44  ;;  %v5648_v63 = vsel %vm5612_vm6, %v17194_v1, 0.0  ;;  %v22007_v61 = vld [vmem:[#allocation39_spill] sm:$0xff]  ;;  %v22009_v44 = vld [vmem:[#allocation58_spill] sm:$0xff] }
 0x32e   :  { %v5645_v8 = vadd.f32 %v5644_v49, %v5643_v11  ;;  %v5840_v6 = vadd.f32 %v5839_v50, %v5838_v37  ;;  %v13024_v57 = vpop.f32.mrf.mxu0  ;;  %v5765_v37 = vmul.f32 %v17203_v38, %v17203_v38  ;;  %v5123_v50 = vadd.f32 %v16934_v43, %v22007_v61  ;;  %v17231_v52 = vpop.f32.mrf.mxu1 }
 0x32f   :  { %v5646_v7 = vsel %vm5612_vm6, %v17205_v40, 0.0  ;;  %v5763_v51 = vmul.f32 %v17205_v40, %v17205_v40  ;;  %v5121_v49 = vadd.f32 %v16941_v46, %v4675_v23 }
 0x330   :  { %v5842_v60 = vadd.f32 %v5841_v42, %v5840_v6  ;;  %v5647_v5 = vadd.f32 %v5646_v7, %v5645_v8  ;;  %v5371_v15 = vpop.f32.mrf.mxu0  ;;  %v5845_v8 = vsel %vm5612_vm6, %v5764_v17, 0.0  ;;  %v5650_v42 = vsel %vm5612_vm6, %v17203_v38, 0.0 }
 0x331   :  { %v5843_v13 = vsel %vm5612_vm6, %v5763_v51, 0.0  ;;  %v17226_v11 = vadd.f32 %v5371_v15, %v5120_v29  ;;  %v17236_v7 = vadd.f32 %v13024_v57, %v5122_v26  ;;  %v22008_v51 = vld [vmem:[#allocation57_spill] sm:$0xff]  ;;  %v5124_v57 = vadd.f32 %v16956_v33, %v16869_v9 }
 0x332   :  { %v5649_v56 = vadd.f32 %v5648_v63, %v5647_v5  ;;  %v5844_v34 = vadd.f32 %v5843_v13, %v5842_v60  ;;  %v13025_v6 = vpop.f32.mrf.mxu0  ;;  %v3774_v43 = vadd.f32 %v22009_v44, %v22008_v51  ;;  %v5847_v60 = vsel %vm5612_vm6, %v5765_v37, 0.0 }
 0x333   :  { %v5766_v29 = vmul.f32 %v17226_v11, %v17226_v11  ;;  %v5652_v5 = vsel %vm5612_vm6, %v17226_v11, 0.0  ;;  %v17245_v17 = vadd.f32 %v13025_v6, %v5123_v50  ;;  %v5768_v37 = vmul.f32 %v17236_v7, %v17236_v7 }
 0x334   :  { %v5846_v15 = vadd.f32 %v5845_v8, %v5844_v34  ;;  %v5651_v46 = vadd.f32 %v5650_v42, %v5649_v56  ;;  %v5374_v23 = vpop.f32.mrf.mxu0  ;;  %v4679_v26 = vadd.f32 %v16876_v30, %v3774_v43  ;;  %v17252_v34 = vpop.f32.mrf.mxu1  ;;  %v5126_v9 = vadd.f32 %v16949_v16, %v16861_v45 }
 0x335   :  { %v17247_v63 = vadd.f32 %v5374_v23, %v5121_v49  ;;  %v5849_v56 = vsel %vm5612_vm6, %v5766_v29, 0.0  ;;  %v5656_v8 = vsel %vm5612_vm6, %v17236_v7, 0.0  ;;  %v5769_v42 = vmul.f32 %v17245_v17, %v17245_v17 }
 0x336   :  { %v5653_v13 = vadd.f32 %v5652_v5, %v5651_v46  ;;  %v5848_v61 = vadd.f32 %v5847_v60, %v5846_v15  ;;  %v13028_v51 = vpop.f32.mrf.mxu0  ;;  %v5127_v43 = vadd.f32 %v16964_v41, %v16874_v55  ;;  %v5125_v15 = vadd.f32 %v16974_v19, %v4679_v26  ;;  %v17273_v23 = vpop.f32.mrf.mxu1 }
 0x337   :  { %v5654_v50 = vsel %vm5612_vm6, %v17247_v63, 0.0  ;;  %v5767_v49 = vmul.f32 %v17247_v63, %v17247_v63  ;;  %v5853_v60 = vsel %vm5612_vm6, %v5768_v37, 0.0  ;;  %v5658_v5 = vsel %vm5612_vm6, %v17245_v17, 0.0 }
 0x338   :  { %v5850_v30 = vadd.f32 %v5849_v56, %v5848_v61  ;;  %v5655_v33 = vadd.f32 %v5654_v50, %v5653_v13  ;;  %v5387_v6 = vpop.f32.mrf.mxu0  ;;  %v17278_v13 = vadd.f32 %v13028_v51, %v5126_v9  ;;  %v22011_v61 = vld [vmem:[#allocation59_spill] sm:$0xff]  ;;  %v22012_v56 = vld [vmem:[#allocation60_spill] sm:$0xff]  ;;  %v5855_v50 = vsel %vm5612_vm6, %v5769_v42, 0.0 }
 0x339   :  { %v5851_v29 = vsel %vm5612_vm6, %v5767_v49, 0.0  ;;  %v17268_v44 = vadd.f32 %v5387_v6, %v5124_v57  ;;  %v3778_v55 = vadd.f32 %v22012_v56, %v22011_v61  ;;  %v5128_v51 = vadd.f32 %v16989_v14, %v16884_v21  ;;  %v22015_v61 = vld [vmem:[#allocation50_spill] sm:$0xff] }
 0x33a   :  { %v5657_v46 = vadd.f32 %v5656_v8, %v5655_v33  ;;  %v5852_v45 = vadd.f32 %v5851_v29, %v5850_v30  ;;  %v13029_v16 = vpop.f32.mrf.mxu0  ;;  %22010 = vst [vmem:[#allocation36_spill] sm:$0xff] %v17278_v13  ;;  %v17294_v29 = vpop.f32.mrf.mxu1  ;;  %v5772_v42 = vmul.f32 %v17278_v13, %v17278_v13  ;;  %v5130_v21 = vadd.f32 %v16982_v25, %v16881_v54 }
 0x33b   :  { %v5770_v57 = vmul.f32 %v17268_v44, %v17268_v44  ;;  %v5660_v49 = vsel %vm5612_vm6, %v17268_v44, 0.0  ;;  %v17287_v37 = vadd.f32 %v13029_v16, %v5127_v43  ;;  %v4683_v9 = vadd.f32 %v16891_v31, %v3778_v55  ;;  %v22016_v55 = vld [vmem:[#allocation73_spill] sm:$0xff] }
 0x33c   :  { %v5854_v41 = vadd.f32 %v5853_v60, %v5852_v45  ;;  %v5659_v19 = vadd.f32 %v5658_v5, %v5657_v46  ;;  %v5390_v26 = vpop.f32.mrf.mxu0  ;;  %v5664_v16 = vsel %vm5612_vm6, %v17278_v13, 0.0  ;;  %v5131_v56 = vadd.f32 %v16997_v10, %v22015_v61 }
 0x33d   :  { %22013 = vst [vmem:[#allocation41_spill] sm:$0xff] %v17287_v37  ;;  %v17289_v30 = vadd.f32 %v5390_v26, %v5125_v15  ;;  %v5857_v46 = vsel %vm5612_vm6, %v5770_v57, 0.0  ;;  %v5773_v60 = vmul.f32 %v17287_v37, %v17287_v37  ;;  %v17315_v26 = vpop.f32.mrf.mxu1 }
 0x33e   :  { %v5661_v33 = vadd.f32 %v5660_v49, %v5659_v19  ;;  %v5856_v6 = vadd.f32 %v5855_v50, %v5854_v41  ;;  %v13032_v8 = vpop.f32.mrf.mxu0  ;;  %v5129_v41 = vadd.f32 %v22016_v55, %v4683_v9  ;;  %v5861_v50 = vsel %vm5612_vm6, %v5772_v42, 0.0 }
 0x33f   :  { %v5662_v43 = vsel %vm5612_vm6, %v17289_v30, 0.0  ;;  %v5771_v15 = vmul.f32 %v17289_v30, %v17289_v30  ;;  %v5666_v49 = vsel %vm5612_vm6, %v17287_v37, 0.0 }
 0x340   :  { %v5858_v31 = vadd.f32 %v5857_v46, %v5856_v6  ;;  %v5663_v14 = vadd.f32 %v5662_v43, %v5661_v33  ;;  %v5403_v45 = vpop.f32.mrf.mxu0  ;;  %v17320_v33 = vadd.f32 %v13032_v8, %v5130_v21  ;;  %v22018_v6 = vld [vmem:[#allocation15_spill] sm:$0xff]  ;;  %v22019_v46 = vld [vmem:[#allocation16_spill] sm:$0xff] }
 0x341   :  { %v5859_v5 = vsel %vm5612_vm6, %v5771_v15, 0.0  ;;  %v17310_v57 = vadd.f32 %v5403_v45, %v5128_v51  ;;  %v3782_v10 = vadd.f32 %v22019_v46, %v22018_v6  ;;  %v22022_v8 = vld [vmem:[#allocation51_spill] sm:$0xff] }
 0x342   :  { %v5665_v19 = vadd.f32 %v5664_v16, %v5663_v14  ;;  %v5860_v54 = vadd.f32 %v5859_v5, %v5858_v31  ;;  %v13033_v25 = vpop.f32.mrf.mxu0  ;;  %22017 = vst [vmem:[#allocation43_spill] sm:$0xff] %v17320_v33  ;;  %v5863_v31 = vsel %vm5612_vm6, %v5773_v60, 0.0  ;;  %v22023_v21 = vld [vmem:[#allocation79_spill] sm:$0xff]  ;;  %v22024_v5 = vld [vmem:[#allocation6_spill] sm:$0xff]  ;;  %v5776_v60 = vmul.f32 %v17320_v33, %v17320_v33 }
 0x343   :  { %22014 = vst [vmem:[#allocation42_spill] sm:$0xff] %v17310_v57  ;;  %v5774_v51 = vmul.f32 %v17310_v57, %v17310_v57  ;;  %v5668_v14 = vsel %vm5612_vm6, %v17310_v57, 0.0  ;;  %v17329_v42 = vadd.f32 %v13033_v25, %v5131_v56  ;;  %v5132_v16 = vadd.f32 %v22023_v21, %v22022_v8  ;;  %v22025_v25 = vld [vmem:[#allocation4_spill] sm:$0xff] }
 0x344   :  { %v5862_v43 = vadd.f32 %v5861_v50, %v5860_v54  ;;  %v5667_v9 = vadd.f32 %v5666_v49, %v5665_v19  ;;  %v5406_v15 = vpop.f32.mrf.mxu0  ;;  %v4687_v61 = vadd.f32 %v22024_v5, %v3782_v10  ;;  %v17336_v54 = vpop.f32.mrf.mxu1  ;;  %v22026_v50 = vld [vmem:[#allocation76_spill] sm:$0xff] }
 0x345   :  { %22020 = vst [vmem:[#allocation46_spill] sm:$0xff] %v17329_v42  ;;  %v17331_v45 = vadd.f32 %v5406_v15, %v5129_v41  ;;  %v5865_v19 = vsel %vm5612_vm6, %v5774_v51, 0.0  ;;  %v5134_v49 = vadd.f32 %v22026_v50, %v22025_v25  ;;  %v5777_v15 = vmul.f32 %v17329_v42, %v17329_v42  ;;  %v22028_v8 = vld [vmem:[#allocation32_spill] sm:$0xff] }
 0x346   :  { %v5669_v55 = vadd.f32 %v5668_v14, %v5667_v9  ;;  %v5864_v37 = vadd.f32 %v5863_v31, %v5862_v43  ;;  %v13036_v6 = vpop.f32.mrf.mxu0  ;;  %v5672_v9 = vsel %vm5612_vm6, %v17320_v33, 0.0  ;;  %v22027_v14 = vld [vmem:[#allocation5_spill] sm:$0xff]  ;;  %v22029_v5 = vld [vmem:[#allocation40_spill] sm:$0xff] }
 0x347   :  { %22021 = vst [vmem:[#allocation47_spill] sm:$0xff] %v17331_v45  ;;  %v5670_v56 = vsel %vm5612_vm6, %v17331_v45, 0.0  ;;  %v5775_v41 = vmul.f32 %v17331_v45, %v17331_v45  ;;  %v5135_v21 = vadd.f32 %v22028_v8, %v22027_v14  ;;  %v5133_v45 = vadd.f32 %v22029_v5, %v4687_v61  ;;  %v22035_v5 = vld [vmem:[#allocation53_spill] sm:$0xff] }
 0x348   :  { %v5866_v46 = vadd.f32 %v5865_v19, %v5864_v37  ;;  %v5671_v10 = vadd.f32 %v5670_v56, %v5669_v55  ;;  %v5419_v43 = vpop.f32.mrf.mxu0  ;;  %v17357_v55 = vpop.f32.mrf.mxu1  ;;  %v5869_v19 = vsel %vm5612_vm6, %v5776_v60, 0.0  ;;  %v5674_v56 = vsel %vm5612_vm6, %v17329_v42, 0.0 }
 0x349   :  { %v5867_v51 = vsel %vm5612_vm6, %v5775_v41, 0.0  ;;  %v17352_v31 = vadd.f32 %v5419_v43, %v5132_v16  ;;  %v17362_v50 = vadd.f32 %v13036_v6, %v5134_v49  ;;  %v22031_v41 = vld [vmem:[#allocation18_spill] sm:$0xff]  ;;  %v22032_v43 = vld [vmem:[#allocation17_spill] sm:$0xff]  ;;  %v22034_v6 = vld [vmem:[#allocation52_spill] sm:$0xff] }
 0x34a   :  { %v5673_v57 = vadd.f32 %v5672_v9, %v5671_v10  ;;  %v5868_v25 = vadd.f32 %v5867_v51, %v5866_v46  ;;  %v13037_v37 = vpop.f32.mrf.mxu0  ;;  %v3786_v14 = vadd.f32 %v22032_v43, %v22031_v41  ;;  %v5871_v46 = vsel %vm5612_vm6, %v5777_v15, 0.0 }
 0x34b   :  { %22030 = vst [vmem:[#allocation14_spill] sm:$0xff] %v17362_v50  ;;  %v5778_v16 = vmul.f32 %v17352_v31, %v17352_v31  ;;  %v5676_v9 = vsel %vm5612_vm6, %v17352_v31, 0.0  ;;  %v17371_v60 = vadd.f32 %v13037_v37, %v5135_v21  ;;  %v5136_v49 = vadd.f32 %v17085_v36, %v22034_v6  ;;  %v22036_v37 = vld [vmem:[#allocation7_spill] sm:$0xff] }
 0x34c   :  { %v5870_v8 = vadd.f32 %v5869_v19, %v5868_v25  ;;  %v5675_v61 = vadd.f32 %v5674_v56, %v5673_v57  ;;  %v5422_v10 = vpop.f32.mrf.mxu0  ;;  %v4691_v42 = vadd.f32 %v22035_v5, %v3786_v14  ;;  %v17378_v25 = vpop.f32.mrf.mxu1  ;;  %v5780_v57 = vmul.f32 %v17362_v50, %v17362_v50 }
 0x34d   :  { %22033 = vst [vmem:[#allocation54_spill] sm:$0xff] %v17371_v60  ;;  %v17373_v51 = vadd.f32 %v5422_v10, %v5133_v45  ;;  %v5873_v15 = vsel %vm5612_vm6, %v5778_v16, 0.0  ;;  %v5138_v36 = vadd.f32 %v17067_v24, %v22036_v37  ;;  %v5680_v14 = vsel %vm5612_vm6, %v17362_v50, 0.0  ;;  %v22037_v10 = vld [vmem:[#allocation8_spill] sm:$0xff]  ;;  %v22040_v37 = vld [vmem:[#allocation19_spill] sm:$0xff] }
 0x34e   :  { %v5677_v33 = vadd.f32 %v5676_v9, %v5675_v61  ;;  %v5872_v13 = vadd.f32 %v5871_v46, %v5870_v8  ;;  %v13040_v41 = vpop.f32.mrf.mxu0  ;;  %v5781_v8 = vmul.f32 %v17371_v60, %v17371_v60  ;;  %v5139_v46 = vadd.f32 %v17107_v3, %v22037_v10 }
 0x34f   :  { %v5678_v21 = vsel %vm5612_vm6, %v17373_v51, 0.0  ;;  %v5779_v45 = vmul.f32 %v17373_v51, %v17373_v51  ;;  %v5137_v9 = vadd.f32 %v17125_v0, %v4691_v42  ;;  %v5877_v5 = vsel %vm5612_vm6, %v5780_v57, 0.0 }
 0x350   :  { %v5874_v19 = vadd.f32 %v5873_v15, %v5872_v13  ;;  %v5679_v56 = vadd.f32 %v5678_v21, %v5677_v33  ;;  %v5435_v43 = vpop.f32.mrf.mxu0  ;;  %v17399_v33 = vpop.f32.mrf.mxu1  ;;  %v5682_v15 = vsel %vm5612_vm6, %v17371_v60, 0.0  ;;  %v17404_v21 = vadd.f32 %v13040_v41, %v5138_v36  ;;  %v22042_v41 = vld [vmem:[#allocation9_spill] sm:$0xff] }
 0x351   :  { %v5875_v16 = vsel %vm5612_vm6, %v5779_v45, 0.0  ;;  %v17394_v61 = vadd.f32 %v5435_v43, %v5136_v49  ;;  %v22039_v45 = vld [vmem:[#allocation33_spill] sm:$0xff]  ;;  %v5140_v36 = vadd.f32 %v17168_v12, %v22042_v41 }
 0x352   :  { %v5681_v6 = vadd.f32 %v5680_v14, %v5679_v56  ;;  %v5876_v24 = vadd.f32 %v5875_v16, %v5874_v19  ;;  %v13041_v13 = vpop.f32.mrf.mxu0  ;;  %22038 = vst [vmem:[#allocation45_spill] sm:$0xff] %v17404_v21  ;;  %v3790_v3 = vadd.f32 %v22040_v37, %v22039_v45  ;;  %v5879_v19 = vsel %vm5612_vm6, %v5781_v8, 0.0  ;;  %v22043_v16 = vld [vmem:[#allocation12_spill] sm:$0xff] }
 0x353   :  { %v5782_v49 = vmul.f32 %v17394_v61, %v17394_v61  ;;  %v5684_v56 = vsel %vm5612_vm6, %v17394_v61, 0.0  ;;  %v17413_v57 = vadd.f32 %v13041_v13, %v5139_v46  ;;  %v5784_v8 = vmul.f32 %v17404_v21, %v17404_v21  ;;  %v22044_v13 = vld [vmem:[#allocation10_spill] sm:$0xff] }
 0x354   :  { %v5878_v43 = vadd.f32 %v5877_v5, %v5876_v24  ;;  %v5683_v0 = vadd.f32 %v5682_v15, %v5681_v6  ;;  %v5438_v42 = vpop.f32.mrf.mxu0  ;;  %v4695_v10 = vadd.f32 %v22043_v16, %v3790_v3  ;;  %v17420_v24 = vpop.f32.mrf.mxu1  ;;  %v5142_v12 = vadd.f32 %v17147_v53, %v22044_v13  ;;  %v22049_v13 = vld [vmem:[#allocation23_spill] sm:$0xff] }
 0x355   :  { %22041 = vst [vmem:[#allocation48_spill] sm:$0xff] %v17413_v57  ;;  %v17415_v14 = vadd.f32 %v5438_v42, %v5137_v9  ;;  %v5881_v6 = vsel %vm5612_vm6, %v5782_v49, 0.0  ;;  %v5688_v3 = vsel %vm5612_vm6, %v17404_v21, 0.0  ;;  %v22046_v42 = vld [vmem:[#allocation11_spill] sm:$0xff]  ;;  %v5885_v16 = vsel %vm5612_vm6, %v5784_v8, 0.0 }
 0x356   :  { %v5685_v60 = vadd.f32 %v5684_v56, %v5683_v0  ;;  %v5880_v50 = vadd.f32 %v5879_v19, %v5878_v43  ;;  %v13044_v45 = vpop.f32.mrf.mxu0  ;;  %v5785_v43 = vmul.f32 %v17413_v57, %v17413_v57  ;;  %v5143_v19 = vadd.f32 %v17189_v39, %v22046_v42  ;;  %v22053_v42 = vld [vmem:[#allocation62_spill] sm:$0xff] }
 0x357   :  { %v5686_v46 = vsel %vm5612_vm6, %v17415_v14, 0.0  ;;  %v5783_v9 = vmul.f32 %v17415_v14, %v17415_v14  ;;  %v5141_v56 = vadd.f32 %v17210_v62, %v4695_v10 }
 0x358   :  { %v5882_v5 = vadd.f32 %v5881_v6, %v5880_v50  ;;  %v5687_v15 = vadd.f32 %v5686_v46, %v5685_v60  ;;  %v5451_v37 = vpop.f32.mrf.mxu0  ;;  %v17441_v60 = vpop.f32.mrf.mxu1  ;;  %v5690_v6 = vsel %vm5612_vm6, %v17413_v57, 0.0  ;;  %v17446_v46 = vadd.f32 %v13044_v45, %v5142_v12  ;;  %v13827_v45 = vld [vmem:[%s21576_s4 + $0x18] sm:$0xff]   ;;  %v22052_v12 = vld [vmem:[#allocation20_spill] sm:$0xff] }
 0x359   :  { %v5883_v49 = vsel %vm5612_vm6, %v5783_v9, 0.0  ;;  %v17436_v0 = vadd.f32 %v5451_v37, %v5140_v36  ;;  %v22048_v9 = vld [vmem:[#allocation21_spill] sm:$0xff]  ;;  %13138 = vmatprep.subr.bf16.mxu0 %v13827_v45 }
 0x35a   :  { %v5689_v41 = vadd.f32 %v5688_v3, %v5687_v15  ;;  %v5884_v53 = vadd.f32 %v5883_v49, %v5882_v5  ;;  %v13045_v50 = vpop.f32.mrf.mxu0  ;;  %22047 = vst [vmem:[#allocation56_spill] sm:$0xff] %v17446_v46  ;;  %v3794_v39 = vadd.f32 %v22049_v13, %v22048_v9  ;;  %v5887_v5 = vsel %vm5612_vm6, %v5785_v43, 0.0  ;;  %v17465_v43 = vpop.f32.mrf.mxu1  ;;  %13139 = vmatpush3.bf16.msra.mxu0 %v13827_v45 }
 0x35b   :  { %22045 = vst [vmem:[#allocation55_spill] sm:$0xff] %v17436_v0  ;;  %v5786_v36 = vmul.f32 %v17436_v0, %v17436_v0  ;;  %v5692_v15 = vsel %vm5612_vm6, %v17436_v0, 0.0  ;;  %v17455_v8 = vadd.f32 %v13045_v50, %v5143_v19  ;;  %v5144_v49 = vadd.f32 %v17252_v34, %v22052_v12  ;;  %v22054_v34 = vld [vmem:[#allocation13_spill] sm:$0xff] }
 0x35c   :  { %v5886_v37 = vadd.f32 %v5885_v16, %v5884_v53  ;;  %v5691_v62 = vadd.f32 %v5690_v6, %v5689_v41  ;;  %v5454_v10 = vpop.f32.mrf.mxu0  ;;  %v4699_v53 = vadd.f32 %v22053_v42, %v3794_v39  ;;  %v5788_v19 = vmul.f32 %v17446_v46, %v17446_v46  ;;  %v13828_v12 = vld [vmem:[%s21576_s4 + $0x10] sm:$0xff]  }
 0x35d   :  { %22050 = vst [vmem:[#allocation38_spill] sm:$0xff] %v17455_v8  ;;  %v17457_v3 = vadd.f32 %v5454_v10, %v5141_v56  ;;  %v5889_v56 = vsel %vm5612_vm6, %v5786_v36, 0.0  ;;  %v5146_v13 = vadd.f32 %v17231_v52, %v22054_v34  ;;  %v5696_v10 = vsel %vm5612_vm6, %v17446_v46, 0.0  ;;  %v22056_v42 = vld [vmem:[#allocation61_spill] sm:$0xff]  ;;  %13140 = vmatprep.subr.bf16.mxu0 %v13828_v12  ;;  %v22058_v46 = vld [vmem:[#allocation24_spill] sm:$0xff] }
 0x35e   :  { %v5693_v41 = vadd.f32 %v5692_v15, %v5691_v62  ;;  %v5888_v16 = vadd.f32 %v5887_v5, %v5886_v37  ;;  %v13048_v6 = vpop.f32.mrf.mxu0  ;;  %v5789_v36 = vmul.f32 %v17455_v8, %v17455_v8  ;;  %v5147_v52 = vadd.f32 %v17273_v23, %v22056_v42  ;;  %v22059_v23 = vld [vmem:[#allocation26_spill] sm:$0xff]  ;;  %13141 = vmatpush3.bf16.msra.mxu0 %v13828_v12  ;;  %v13829_v12 = vld [vmem:[%s21576_s4 + $0x8] sm:$0xff]  }
 0x35f   :  { %22051 = vst [vmem:[#allocation3_spill] sm:$0xff] %v17457_v3  ;;  %v5694_v50 = vsel %vm5612_vm6, %v17457_v3, 0.0  ;;  %v5787_v9 = vmul.f32 %v17457_v3, %v17457_v3  ;;  %v5893_v34 = vsel %vm5612_vm6, %v5788_v19, 0.0  ;;  %v3798_v42 = vadd.f32 %v22059_v23, %v22058_v46  ;;  %v13825_v46 = vld [vmem:[%s21576_s4 + $0x68] sm:$0xff]   ;;  %v6390_v23 = vld [vmem:[#allocation2] sm:$0xff]  ;;  %13142 = vmatprep.subr.bf16.mxu0 %v13829_v12 }
 0x360   :  { %v5890_v39 = vadd.f32 %v5889_v56, %v5888_v16  ;;  %v5695_v37 = vadd.f32 %v5694_v50, %v5693_v41  ;;  %v5467_v62 = vpop.f32.mrf.mxu0  ;;  %v5145_v41 = vadd.f32 %v17294_v29, %v4699_v53  ;;  %v17489_v50 = vpop.f32.mrf.mxu1  ;;  %v22060_v29 = vld [vmem:[#allocation63_spill] sm:$0xff]  ;;  %v5895_v19 = vsel %vm5612_vm6, %v5789_v36, 0.0  ;;  %v22063_v36 = vld [vmem:[#allocation22_spill] sm:$0xff]  ;;  %13070 = vmatprep.subr.bf16.mxu1 %v13825_v46 }
 0x361   :  { %v5891_v5 = vsel %vm5612_vm6, %v5787_v9, 0.0  ;;  %v17481_v15 = vadd.f32 %v5467_v62, %v5144_v49  ;;  %v5698_v49 = vsel %vm5612_vm6, %v17455_v8, 0.0  ;;  %v17494_v9 = vadd.f32 %v13048_v6, %v5146_v13  ;;  %13071 = vmatpush3.bf16.msra.mxu1 %v13825_v46 }
 0x362   :  { %v5697_v45 = vadd.f32 %v5696_v10, %v5695_v37  ;;  %v5892_v16 = vadd.f32 %v5891_v5, %v5890_v39  ;;  %v13049_v56 = vpop.f32.mrf.mxu0  ;;  %v5150_v53 = vadd.f32 %v17315_v26, %v22060_v29  ;;  %v13826_v26 = vld [vmem:[%s21576_s4 + $0x60] sm:$0xff]   ;;  %v6391_v29 = vld [vmem:[#allocation2 + $0x8] sm:$0xff]  ;;  %13143 = vmatpush3.bf16.msra.mxu0 %v13829_v12 }
 0x363   :  { %22055 = vst [vmem:[#allocation49_spill] sm:$0xff] %v17481_v15  ;;  %22057 = vst [vmem:[#allocation39_spill] sm:$0xff] %v17494_v9  ;;  %v5790_v62 = vmul.f32 %v17481_v15, %v17481_v15  ;;  %v5700_v6 = vsel %vm5612_vm6, %v17481_v15, 0.0  ;;  %v17505_v13 = vadd.f32 %v13049_v56, %v5147_v52  ;;  %v5792_v15 = vmul.f32 %v17494_v9, %v17494_v9 }
 0x364   :  { %v5894_v39 = vadd.f32 %v5893_v34, %v5892_v16  ;;  %v5699_v37 = vadd.f32 %v5698_v49, %v5697_v45  ;;  %v5470_v10 = vpop.f32.mrf.mxu0  ;;  %v5148_v45 = vadd.f32 %v17336_v54, %v22063_v36  ;;  %v22064_v16 = vld [vmem:[#allocation64_spill] sm:$0xff]  ;;  %v13830_v49 = vld [vmem:[%s21576_s4] sm:$0xff]   ;;  %v5704_v36 = vsel %vm5612_vm6, %v17494_v9, 0.0  ;;  %13072 = vmatprep.subr.bf16.mxu1 %v13826_v26 }
 0x365   :  { %22061 = vst [vmem:[#allocation57_spill] sm:$0xff] %v17505_v13  ;;  %v17507_v5 = vadd.f32 %v5470_v10, %v5145_v41  ;;  %v4703_v52 = vadd.f32 %v22064_v16, %v3798_v42  ;;  %v17524_v10 = vpop.f32.mrf.mxu1  ;;  %v5897_v8 = vsel %vm5612_vm6, %v5790_v62, 0.0  ;;  %v5793_v62 = vmul.f32 %v17505_v13, %v17505_v13  ;;  %13144 = vmatprep.subr.bf16.mxu0 %v13830_v49 }
 0x366   :  { %v5701_v56 = vadd.f32 %v5700_v6, %v5699_v37  ;;  %v5896_v41 = vadd.f32 %v5895_v19, %v5894_v39  ;;  %v13052_v34 = vpop.f32.mrf.mxu0  ;;  %v6462_v6 = vpack.c.bf16 %v6391_v29, %v6390_v23  ;;  %13073 = vmatpush3.bf16.msra.mxu1 %v13826_v26  ;;  %13145 = vmatpush3.bf16.msra.mxu0 %v13830_v49 }
 0x367   :  { %22062 = vst [vmem:[#allocation58_spill] sm:$0xff] %v17507_v5  ;;  %v5702_v54 = vsel %vm5612_vm6, %v17507_v5, 0.0  ;;  %v5791_v42 = vmul.f32 %v17507_v5, %v17507_v5  ;;  %v5149_v12 = vadd.f32 %v17378_v25, %v4703_v52 }
 0x368   :  { %v5898_v39 = vadd.f32 %v5897_v8, %v5896_v41  ;;  %v5703_v37 = vadd.f32 %v5702_v54, %v5701_v56  ;;  %v5483_v19 = vpop.f32.mrf.mxu0  ;;  %v13831_v8 = vld [vmem:[%s21576_s4 + $0xd8] sm:$0xff]   ;;  %v22065_v56 = vld [vmem:[#allocation25_spill] sm:$0xff]  ;;  %13146 = vmatprep.mubr.msk.bf16.mxu0 %vm5612_vm6, %v6462_v6  ;;  %v17547_v54 = vpop.f32.mrf.mxu1  ;;  %v5903_v6 = vsel %vm5612_vm6, %v5793_v62, 0.0 }
 0x369   :  { %v5899_v16 = vsel %vm5612_vm6, %v5791_v42, 0.0  ;;  %v17538_v3 = vadd.f32 %v5483_v19, %v5148_v45  ;;  %v5151_v46 = vadd.f32 %v17357_v55, %v22065_v56  ;;  %v5901_v45 = vsel %vm5612_vm6, %v5792_v15, 0.0  ;;  %v22067_v55 = vld [vmem:[#allocation28_spill] sm:$0xff]  ;;  %v22068_v56 = vld [vmem:[#allocation27_spill] sm:$0xff]  ;;  %13210 = vmatprep.subr.bf16.mxu1 %v13831_v8 }
 0x36a   :  { %v5705_v41 = vadd.f32 %v5704_v36, %v5703_v37  ;;  %v5900_v23 = vadd.f32 %v5899_v16, %v5898_v39  ;;  %v13053_v29 = vpop.f32.mrf.mxu0  ;;  %v5706_v42 = vsel %vm5612_vm6, %v17505_v13, 0.0  ;;  %v17552_v19 = vadd.f32 %v13052_v34, %v5150_v53  ;;  %v22069_v34 = vld [vmem:[#allocation66_spill] sm:$0xff]  ;;  %v22070_v13 = vld [vmem:[#allocation68_spill] sm:$0xff]  ;;  %v5072_v26 = vpop.f32.mrf.mxu1 }
 0x36b   :  { %v5794_v9 = vmul.f32 %v17538_v3, %v17538_v3  ;;  %v3802_v25 = vadd.f32 %v22068_v56, %v22067_v55  ;;  %v5708_v15 = vsel %vm5612_vm6, %v17538_v3, 0.0  ;;  %v17561_v36 = vadd.f32 %v13053_v29, %v5151_v46 }
 0x36c   :  { %22066 = vst [vmem:[#allocation59_spill] sm:$0xff] %v17552_v19  ;;  %v5902_v52 = vadd.f32 %v5901_v45, %v5900_v23  ;;  %v5707_v39 = vadd.f32 %v5706_v42, %v5705_v41  ;;  %v5486_v37 = vpop.f32.mrf.mxu0  ;;  %v5152_v16 = vadd.f32 %v17420_v24, %v22069_v34  ;;  %v5796_v49 = vmul.f32 %v17552_v19, %v17552_v19 }
 0x36d   :  { %v17563_v53 = vadd.f32 %v5486_v37, %v5149_v12  ;;  %v4707_v55 = vadd.f32 %v22070_v13, %v3802_v25  ;;  %v5905_v62 = vsel %vm5612_vm6, %v5794_v9, 0.0  ;;  %v22071_v12 = vld [vmem:[#allocation65_spill] sm:$0xff]  ;;  %v5712_v56 = vsel %vm5612_vm6, %v17552_v19, 0.0 }
 0x36e   :  { %v5709_v23 = vadd.f32 %v5708_v15, %v5707_v39  ;;  %v5904_v41 = vadd.f32 %v5903_v6, %v5902_v52  ;;  %v13056_v45 = vpop.f32.mrf.mxu0  ;;  %v5154_v24 = vadd.f32 %v17399_v33, %v22071_v12  ;;  %v5797_v25 = vmul.f32 %v17561_v36, %v17561_v36  ;;  %v22073_v39 = vld [vmem:[#allocation67_spill] sm:$0xff]  ;;  %v22076_v12 = vld [vmem:[#allocation30_spill] sm:$0xff] }
 0x36f   :  { %v5710_v46 = vsel %vm5612_vm6, %v17563_v53, 0.0  ;;  %v5795_v8 = vmul.f32 %v17563_v53, %v17563_v53  ;;  %v5155_v37 = vadd.f32 %v17441_v60, %v22073_v39  ;;  %v5153_v6 = vadd.f32 %v17465_v43, %v4707_v55 }
 0x370   :  { %v5906_v29 = vadd.f32 %v5905_v62, %v5904_v41  ;;  %v5711_v13 = vadd.f32 %v5710_v46, %v5709_v23  ;;  %v5499_v42 = vpop.f32.mrf.mxu0  ;;  %v12984_v23 = vpop.f32.mrf.mxu1  ;;  %v5909_v41 = vsel %vm5612_vm6, %v5796_v49, 0.0  ;;  %v5714_v62 = vsel %vm5612_vm6, %v17561_v36, 0.0 }
 0x371   :  { %v5907_v9 = vsel %vm5612_vm6, %v5795_v8, 0.0  ;;  %v17582_v52 = vadd.f32 %v5499_v42, %v5152_v16  ;;  %v17590_v46 = vadd.f32 %v13056_v45, %v5154_v24  ;;  %v22075_v8 = vld [vmem:[#allocation29_spill] sm:$0xff]  ;;  %v5911_v55 = vsel %vm5612_vm6, %v5797_v25, 0.0  ;;  %v22079_v45 = vld [vmem:[#allocation70_spill] sm:$0xff] }
 0x372   :  { %v5713_v15 = vadd.f32 %v5712_v56, %v5711_v13  ;;  %v5908_v33 = vadd.f32 %v5907_v9, %v5906_v29  ;;  %v13057_v34 = vpop.f32.mrf.mxu0  ;;  %v3806_v42 = vadd.f32 %v22076_v12, %v22075_v8  ;;  %v5156_v24 = vadd.f32 %v17524_v10, %v22079_v45  ;;  %v22080_v56 = vld [vmem:[#allocation72_spill] sm:$0xff] }
 0x373   :  { %22072 = vst [vmem:[#allocation60_spill] sm:$0xff] %v17582_v52  ;;  %22074 = vst [vmem:[#allocation50_spill] sm:$0xff] %v17590_v46  ;;  %v5798_v16 = vmul.f32 %v17582_v52, %v17582_v52  ;;  %v5716_v29 = vsel %vm5612_vm6, %v17582_v52, 0.0  ;;  %v17599_v49 = vadd.f32 %v13057_v34, %v5155_v37  ;;  %v22081_v34 = vld [vmem:[#allocation69_spill] sm:$0xff] }
 0x374   :  { %v5910_v60 = vadd.f32 %v5909_v41, %v5908_v33  ;;  %v5715_v39 = vadd.f32 %v5714_v62, %v5713_v15  ;;  %v5502_v43 = vpop.f32.mrf.mxu0  ;;  %v4711_v9 = vadd.f32 %v22080_v56, %v3806_v42  ;;  %v5085_v33 = vpop.f32.mrf.mxu1  ;;  %v5800_v15 = vmul.f32 %v17590_v46, %v17590_v46 }
 0x375   :  { %22077 = vst [vmem:[#allocation73_spill] sm:$0xff] %v17599_v49  ;;  %v17601_v13 = vadd.f32 %v5502_v43, %v5153_v6  ;;  %v5913_v25 = vsel %vm5612_vm6, %v5798_v16, 0.0  ;;  %v5158_v10 = vadd.f32 %v17489_v50, %v22081_v34  ;;  %v5720_v42 = vsel %vm5612_vm6, %v17590_v46, 0.0  ;;  %v22083_v43 = vld [vmem:[#allocation71_spill] sm:$0xff]  ;;  %v22086_v34 = vld [vmem:[#allocation34_spill] sm:$0xff] }
 0x376   :  { %v5717_v19 = vadd.f32 %v5716_v29, %v5715_v39  ;;  %v5912_v5 = vadd.f32 %v5911_v55, %v5910_v60  ;;  %v13060_v8 = vpop.f32.mrf.mxu0  ;;  %v5801_v60 = vmul.f32 %v17599_v49, %v17599_v49  ;;  %v5159_v55 = vadd.f32 %v17547_v54, %v22083_v43 }
 0x377   :  { %22078 = vst [vmem:[#allocation15_spill] sm:$0xff] %v17601_v13  ;;  %v5718_v37 = vsel %vm5612_vm6, %v17601_v13, 0.0  ;;  %v5799_v6 = vmul.f32 %v17601_v13, %v17601_v13  ;;  %v5157_v29 = vadd.f32 %v5072_v26, %v4711_v9 }
 0x378   :  { %v5914_v41 = vadd.f32 %v5913_v25, %v5912_v5  ;;  %v5719_v62 = vadd.f32 %v5718_v37, %v5717_v19  ;;  %v5515_v12 = vpop.f32.mrf.mxu0  ;;  %v12985_v5 = vpop.f32.mrf.mxu1  ;;  %v5917_v19 = vsel %vm5612_vm6, %v5800_v15, 0.0  ;;  %v5722_v25 = vsel %vm5612_vm6, %v17599_v49, 0.0  ;;  %v22120_v49 = vld [vmem:[#allocation59_spill] sm:$0xff] }
 0x379   :  { %v5915_v16 = vsel %vm5612_vm6, %v5799_v6, 0.0  ;;  %v17620_v39 = vadd.f32 %v5515_v12, %v5156_v24  ;;  %v17627_v37 = vadd.f32 %v13060_v8, %v5158_v10  ;;  %v22085_v24 = vld [vmem:[#allocation31_spill] sm:$0xff]  ;;  %v5919_v9 = vsel %vm5612_vm6, %v5801_v60, 0.0 }
 0x37a   :  { %v5721_v45 = vadd.f32 %v5720_v42, %v5719_v62  ;;  %v5916_v56 = vadd.f32 %v5915_v16, %v5914_v41  ;;  %v13061_v50 = vpop.f32.mrf.mxu0  ;;  %v3810_v12 = vadd.f32 %v22086_v34, %v22085_v24  ;;  %v22089_v8 = vld [vmem:[#allocation75_spill] sm:$0xff]  ;;  %v22090_v42 = vld [vmem:[#allocation78_spill] sm:$0xff]  ;;  %v5088_v24 = vpop.f32.mrf.mxu1 }
 0x37b   :  { %22082 = vst [vmem:[#allocation16_spill] sm:$0xff] %v17620_v39  ;;  %22084 = vst [vmem:[#allocation51_spill] sm:$0xff] %v17627_v37  ;;  %v5802_v6 = vmul.f32 %v17620_v39, %v17620_v39  ;;  %v5724_v41 = vsel %vm5612_vm6, %v17620_v39, 0.0  ;;  %v17636_v15 = vadd.f32 %v13061_v50, %v5159_v55  ;;  %v5160_v10 = vadd.f32 %v5085_v33, %v22089_v8 }
 0x37c   :  { %v5918_v0 = vadd.f32 %v5917_v19, %v5916_v56  ;;  %v5723_v54 = vadd.f32 %v5722_v25, %v5721_v45  ;;  %v5518_v26 = vpop.f32.mrf.mxu0  ;;  %v4715_v16 = vadd.f32 %v22090_v42, %v3810_v12  ;;  %v5804_v45 = vmul.f32 %v17627_v37, %v17627_v37 }
 0x37d   :  { %22087 = vst [vmem:[#allocation79_spill] sm:$0xff] %v17636_v15  ;;  %v17638_v62 = vadd.f32 %v5518_v26, %v5157_v29  ;;  %v5921_v60 = vsel %vm5612_vm6, %v5802_v6, 0.0  ;;  %v22091_v29 = vld [vmem:[#allocation74_spill] sm:$0xff]  ;;  %v5805_v34 = vmul.f32 %v17636_v15, %v17636_v15 }
 0x37e   :  { %v5725_v43 = vadd.f32 %v5724_v41, %v5723_v54  ;;  %v5920_v57 = vadd.f32 %v5919_v9, %v5918_v0  ;;  %v13064_v21 = vpop.f32.mrf.mxu0  ;;  %v5162_v50 = vadd.f32 %v12984_v23, %v22091_v29  ;;  %v5728_v0 = vsel %vm5612_vm6, %v17627_v37, 0.0  ;;  %v22093_v54 = vld [vmem:[#allocation77_spill] sm:$0xff] }
 0x37f   :  { %22088 = vst [vmem:[#allocation6_spill] sm:$0xff] %v17638_v62  ;;  %v5726_v56 = vsel %vm5612_vm6, %v17638_v62, 0.0  ;;  %v5803_v55 = vmul.f32 %v17638_v62, %v17638_v62  ;;  %v5163_v26 = vadd.f32 %v12985_v5, %v22093_v54  ;;  %v5161_v9 = vadd.f32 %v5088_v24, %v4715_v16 }
 0x380   :  { %v5922_v33 = vadd.f32 %v5921_v60, %v5920_v57  ;;  %v5727_v19 = vadd.f32 %v5726_v56, %v5725_v43  ;;  %v5531_v25 = vpop.f32.mrf.mxu0  ;;  %v5925_v57 = vsel %vm5612_vm6, %v5804_v45, 0.0  ;;  %v5730_v23 = vsel %vm5612_vm6, %v17636_v15, 0.0 }
 0x381   :  { %v5923_v12 = vsel %vm5612_vm6, %v5803_v55, 0.0  ;;  %v17655_v6 = vadd.f32 %v5531_v25, %v5160_v10  ;;  %v17661_v43 = vadd.f32 %v13064_v21, %v5162_v50  ;;  %v5927_v29 = vsel %vm5612_vm6, %v5805_v34, 0.0 }
 0x382   :  { %v5729_v41 = vadd.f32 %v5728_v0, %v5727_v19  ;;  %v5924_v8 = vadd.f32 %v5923_v12, %v5922_v33  ;;  %v13065_v42 = vpop.f32.mrf.mxu0 }
 0x383   :  { %22092 = vst [vmem:[#allocation4_spill] sm:$0xff] %v17655_v6  ;;  %22094 = vst [vmem:[#allocation76_spill] sm:$0xff] %v17661_v43  ;;  %v5806_v60 = vmul.f32 %v17655_v6, %v17655_v6  ;;  %v5732_v5 = vsel %vm5612_vm6, %v17655_v6, 0.0  ;;  %v17668_v16 = vadd.f32 %v13065_v42, %v5163_v26  ;;  %v5808_v21 = vmul.f32 %v17661_v43, %v17661_v43 }
 0x384   :  { %v5926_v56 = vadd.f32 %v5925_v57, %v5924_v8  ;;  %v5731_v55 = vadd.f32 %v5730_v23, %v5729_v41  ;;  %v5534_v10 = vpop.f32.mrf.mxu0  ;;  %v5736_v12 = vsel %vm5612_vm6, %v17661_v43, 0.0 }
 0x385   :  { %22095 = vst [vmem:[#allocation5_spill] sm:$0xff] %v17668_v16  ;;  %v17670_v24 = vadd.f32 %v5534_v10, %v5161_v9  ;;  %v5929_v50 = vsel %vm5612_vm6, %v5806_v60, 0.0  ;;  %v5809_v54 = vmul.f32 %v17668_v16, %v17668_v16  ;;  %v5933_v8 = vsel %vm5612_vm6, %v5808_v21, 0.0 }
 0x386   :  { %v5733_v45 = vadd.f32 %v5732_v5, %v5731_v55  ;;  %v5928_v33 = vadd.f32 %v5927_v29, %v5926_v56  ;;  %v5738_v42 = vsel %vm5612_vm6, %v17668_v16, 0.0 }
 0x387   :  { %v5734_v19 = vsel %vm5612_vm6, %v17670_v24, 0.0  ;;  %v5807_v25 = vmul.f32 %v17670_v24, %v17670_v24  ;;  %v5935_v60 = vsel %vm5612_vm6, %v5809_v54, 0.0 }
 0x388   :  { %v5930_v0 = vadd.f32 %v5929_v50, %v5928_v33  ;;  %v5735_v34 = vadd.f32 %v5734_v19, %v5733_v45 }
 0x389   :  { %v5931_v26 = vsel %vm5612_vm6, %v5807_v25, 0.0 }
 0x38a   :  { %v5737_v9 = vadd.f32 %v5736_v12, %v5735_v34  ;;  %v5932_v41 = vadd.f32 %v5931_v26, %v5930_v0  ;;  %v6014_v26 = vlaneseq }
 0x38c   :  { %v5739_v57 = vadd.f32 %v5738_v42, %v5737_v9  ;;  %v5934_v23 = vadd.f32 %v5933_v8, %v5932_v41  ;;  %v17694_v42 = vshrl.u32 %v6014_v26, 7 }
 0x38e   :  { %v5740_v56 = vrot.slane %v5739_v57, 4  ;;  %v5936_v55 = vadd.f32 %v5935_v60, %v5934_v23  ;;  %22096 = vst [vmem:[#allocation32_spill] sm:$0xff] %v17694_v42  ;;  %v22097_v60 = vld [vmem:[#allocation80_spill] sm:$0xff]  ;;  %v22108_v23 = vld [vmem:[#allocation54_spill] sm:$0xff] }
 0x390   :  { %v5741_v10 = vadd.f32 %v5740_v56, %v5739_v57  ;;  %v5937_v29 = vrot.slane %v5936_v55, 4 }
 0x392   :  { %v5742_v5 = vrot.slane %v5741_v10, 2  ;;  %v5938_v45 = vadd.f32 %v5937_v29, %v5936_v55  ;;  %v22098_v55 = vld [vmem:[#allocation37_spill] sm:$0xff]  ;;  %v22099_v29 = vld [vmem:[#allocation35_spill] sm:$0xff] }
 0x394   :  { %v5743_v33 = vadd.f32 %v5742_v5, %v5741_v10  ;;  %v5939_v50 = vrot.slane %v5938_v45, 2 }
 0x396   :  { %v5744_v19 = vrot.slane %v5743_v33, 1  ;;  %v5940_v25 = vadd.f32 %v5939_v50, %v5938_v45 }
 0x398   :  { %v5745_v0 = vadd.f32 %v5744_v19, %v5743_v33  ;;  %v5941_v34 = vrot.slane %v5940_v25, 1  ;;  %v22104_v33 = vld [vmem:[#allocation47_spill] sm:$0xff] }
 0x39a   :  { %v5942_v21 = vadd.f32 %v5941_v34, %v5940_v25  ;;  %v17688_v12 = vmul.f32 0.001953125, %v5745_v0  ;;  %v5610_v34 = vld [vmem:[%s21577_s2] sm:$0x1]  ;;  %v22103_v0 = vld [vmem:[#allocation42_spill] sm:$0xff] }
 0x39c   :  { %v5944_v9 = vmul.f32 0.001953125, %v5942_v21  ;;  %v5945_v54 = vmul.f32 %v17688_v12, %v17688_v12  ;;  %v5973_v21 = vsub.f32 %v17268_v44, %v17688_v12  ;;  %v5974_v26 = vsub.f32 %v17289_v30, %v17688_v12  ;;  %v22105_v44 = vld [vmem:[#allocation43_spill] sm:$0xff]  ;;  %v22106_v30 = vld [vmem:[#allocation46_spill] sm:$0xff] }
 0x39d   :  { %v5977_v50 = vsub.f32 %v22103_v0, %v17688_v12  ;;  %v5978_v45 = vsub.f32 %v22104_v33, %v17688_v12  ;;  %v5979_v5 = vsub.f32 %v22105_v44, %v17688_v12  ;;  %v5980_v56 = vsub.f32 %v22106_v30, %v17688_v12  ;;  %v22109_v30 = vld [vmem:[#allocation45_spill] sm:$0xff] }
 0x39e   :  { %v5946_v8 = vsub.f32 %v5944_v9, %v5945_v54  ;;  %v22101_v9 = vld [vmem:[#allocation36_spill] sm:$0xff]  ;;  %v5982_v54 = vsub.f32 %v17373_v51, %v17688_v12  ;;  %v5984_v33 = vsub.f32 %v22108_v23, %v17688_v12  ;;  %v5985_v44 = vsub.f32 %v17394_v61, %v17688_v12  ;;  %v22111_v51 = vld [vmem:[#allocation55_spill] sm:$0xff] }
 0x39f   :  { %v5975_v25 = vsub.f32 %v22101_v9, %v17688_v12  ;;  %v5981_v9 = vsub.f32 %v17352_v31, %v17688_v12  ;;  %v5986_v16 = vsub.f32 %v17415_v14, %v17688_v12  ;;  %v5987_v43 = vsub.f32 %v22109_v30, %v17688_v12  ;;  %v22110_v31 = vld [vmem:[#allocation48_spill] sm:$0xff]  ;;  %v22115_v14 = vld [vmem:[#allocation38_spill] sm:$0xff]  ;;  %v22116_v30 = vld [vmem:[#allocation49_spill] sm:$0xff] }
 0x3a0   :  { %v5947_v57 = vadd.f32 1e-05, %v5946_v8  ;;  %v22102_v8 = vld [vmem:[#allocation41_spill] sm:$0xff]  ;;  %v5988_v6 = vsub.f32 %v22110_v31, %v17688_v12  ;;  %v5989_v15 = vsub.f32 %v22111_v51, %v17688_v12  ;;  %v22113_v23 = vsub.s32 0, %v17694_v42  ;;  %v22114_v61 = vld [vmem:[#allocation56_spill] sm:$0xff]  ;;  %v22117_v51 = vld [vmem:[#allocation58_spill] sm:$0xff] }
 0x3a1   :  { %v5976_v19 = vsub.f32 %v22102_v8, %v17688_v12  ;;  %v22107_v8 = vld [vmem:[#allocation14_spill] sm:$0xff]  ;;  %v5991_v37 = vsub.f32 %v22114_v61, %v17688_v12  ;;  %v5992_v62 = vsub.f32 %v22115_v14, %v17688_v12  ;;  %v5993_v39 = vsub.f32 %v22116_v30, %v17688_v12  ;;  %v17825_v31 = vld [vmem:[%s21578_s3] ss:$0 sm:$0xff]  ;;  %v22119_v42 = vld [vmem:[#allocation57_spill] sm:$0xff] }
 0x3a2   :  { %13859 = vrsqrt.f32 %v5947_v57  ;;  %v22100_v57 = vld [vmem:[#allocation44_spill] sm:$0xff]  ;;  %v5983_v41 = vsub.f32 %v22107_v8, %v17688_v12  ;;  %v5996_v61 = vsub.f32 %v22119_v42, %v17688_v12  ;;  %v5999_v14 = vsub.f32 %v22120_v49, %v17688_v12 }
 0x3a3   :  { %v22121_v30 = vsub.f32 %v17670_v24, %v17688_v12  ;;  %v22122_v13 = vsub.f32 %v22097_v60, %v17688_v12  ;;  %v22124_v49 = vsub.f32 %v22099_v29, %v17688_v12  ;;  %v22125_v24 = vsub.f32 %v17037_v2, %v17688_v12 }
 0x3af   :  { %v13860_v10 = vpop.eup %13859 }
 0x3b0   :  { %v6013_v0 = vmul.f32 %v13860_v10, %v5610_v34  ;;  %v22112_v10 = vld [vmem:[#allocation3_spill] sm:$0xff] }
 0x3b1   :  { %v5990_v34 = vsub.f32 %v22112_v10, %v17688_v12  ;;  %v5994_v10 = vsub.f32 %v22117_v51, %v17688_v12  ;;  %v22123_v51 = vsub.f32 %v22098_v55, %v17688_v12 }
 0x3b2   :  { %v17814_v8 = vrot.slane %v6013_v0, %v22113_v23  ;;  %v22118_v0 = vld [vmem:[#allocation39_spill] sm:$0xff] }
 0x3b3   :  { %v5995_v23 = vsub.f32 %v22118_v0, %v17688_v12 }
 0x3b4   :  { %v6079_v46 = vmul.f32 %v17814_v8, %v22121_v30  ;;  %v17843_v52 = vmul.f32 %v17814_v8, %v22122_v13  ;;  %v17849_v0 = vmul.f32 %v17814_v8, %v22123_v51  ;;  %v17855_v42 = vmul.f32 %v17814_v8, %v22124_v49 }
 0x3b5   :  { %v17861_v60 = vmul.f32 %v17814_v8, %v22125_v24  ;;  %v22126_v13 = vsub.f32 %v17061_v28, %v17688_v12  ;;  %v22127_v30 = vsub.f32 %v17081_v48, %v17688_v12  ;;  %v22128_v51 = vsub.f32 %v17072_v58, %v17688_v12 }
 0x3b6   :  { %v6149_v49 = vadd.f32 %v17825_v31, %v6079_v46  ;;  %v22129_v28 = vsub.f32 %v17079_v4, %v17688_v12  ;;  %v22130_v48 = vsub.f32 %v17101_v59, %v17688_v12  ;;  %v22131_v58 = vsub.f32 %v17121_v47, %v17688_v12 }
 0x3b7   :  { %v17867_v55 = vmul.f32 %v17814_v8, %v22126_v13  ;;  %v17873_v29 = vmul.f32 %v17814_v8, %v22127_v30  ;;  %v17879_v2 = vmul.f32 %v17814_v8, %v22128_v51  ;;  %v22132_v46 = vsub.f32 %v17112_v18, %v17688_v12 }
 0x3b8   :  { %v17886_v24 = vmul.f32 %v17814_v8, %v22129_v28  ;;  %v17892_v13 = vmul.f32 %v17814_v8, %v22130_v48  ;;  %v17898_v30 = vmul.f32 %v17814_v8, %v22131_v58  ;;  %v22133_v51 = vsub.f32 %v17119_v27, %v17688_v12 }
 0x3b9   :  { %v17904_v4 = vmul.f32 %v17814_v8, %v22132_v46  ;;  %v22134_v28 = vsub.f32 %v17141_v35, %v17688_v12  ;;  %v22135_v48 = vsub.f32 %v17163_v22, %v17688_v12  ;;  %v6213_v58 = vmax.f32 %v6149_v49, 0.0 }
 0x3ba   :  { %v17910_v59 = vmul.f32 %v17814_v8, %v22133_v51  ;;  %v22136_v46 = vsub.f32 %v17152_v32, %v17688_v12  ;;  %v22137_v51 = vsub.f32 %v22100_v57, %v17688_v12  ;;  %v22139_v49 = vsub.f32 %v17205_v40, %v17688_v12 }
 0x3bb   :  { %v17916_v47 = vmul.f32 %v17814_v8, %v22134_v28  ;;  %v17922_v18 = vmul.f32 %v17814_v8, %v22135_v48  ;;  %v22138_v28 = vsub.f32 %v17184_v20, %v17688_v12  ;;  %v22140_v48 = vsub.f32 %v17194_v1, %v17688_v12  ;;  %6387 = vst.msk [vmem:[#allocation2 + $0x321] sm:$0xff] %vm5612_vm6, %v6213_v58 }
 0x3bc   :  { %v17928_v27 = vmul.f32 %v17814_v8, %v22136_v46  ;;  %v17934_v35 = vmul.f32 %v17814_v8, %v22137_v51  ;;  %v17946_v32 = vmul.f32 %v17814_v8, %v22139_v49  ;;  %v22141_v46 = vsub.f32 %v17203_v38, %v17688_v12 }
 0x3bd   :  { %v17940_v22 = vmul.f32 %v17814_v8, %v22138_v28  ;;  %v17952_v57 = vmul.f32 %v17814_v8, %v22140_v48  ;;  %v22142_v51 = vsub.f32 %v17226_v11, %v17688_v12  ;;  %v22143_v1 = vsub.f32 %v17247_v63, %v17688_v12 }
 0x3be   :  { %v17958_v20 = vmul.f32 %v17814_v8, %v22141_v46  ;;  %v22144_v38 = vsub.f32 %v17236_v7, %v17688_v12  ;;  %v22145_v11 = vsub.f32 %v17245_v17, %v17688_v12  ;;  %v17986_v58 = vmul.f32 %v17814_v8, %v5973_v21 }
 0x3bf   :  { %v17964_v40 = vmul.f32 %v17814_v8, %v22142_v51  ;;  %v17971_v28 = vmul.f32 %v17814_v8, %v22143_v1  ;;  %v17989_v63 = vmul.f32 %v17814_v8, %v5974_v26  ;;  %v17992_v46 = vmul.f32 %v17814_v8, %v5975_v25 }
 0x3c0   :  { %v17977_v49 = vmul.f32 %v17814_v8, %v22144_v38  ;;  %v17983_v48 = vmul.f32 %v17814_v8, %v22145_v11  ;;  %v17995_v7 = vmul.f32 %v17814_v8, %v5976_v19  ;;  %v17998_v51 = vmul.f32 %v17814_v8, %v5977_v50  ;;  %v22151_v38 = vld [vmem:[#allocation60_spill] sm:$0xff] }
 0x3c1   :  { %v18001_v17 = vmul.f32 %v17814_v8, %v5978_v45  ;;  %v18004_v1 = vmul.f32 %v17814_v8, %v5979_v5  ;;  %v18007_v21 = vmul.f32 %v17814_v8, %v5980_v56  ;;  %v18010_v26 = vmul.f32 %v17814_v8, %v5981_v9 }
 0x3c2   :  { %v18013_v25 = vmul.f32 %v17814_v8, %v5982_v54  ;;  %v18016_v19 = vmul.f32 %v17814_v8, %v5983_v41  ;;  %v18019_v50 = vmul.f32 %v17814_v8, %v5984_v33  ;;  %v18022_v45 = vmul.f32 %v17814_v8, %v5985_v44 }
 0x3c3   :  { %v18025_v5 = vmul.f32 %v17814_v8, %v5986_v16  ;;  %v18028_v56 = vmul.f32 %v17814_v8, %v5987_v43  ;;  %v18031_v9 = vmul.f32 %v17814_v8, %v5988_v6  ;;  %v18034_v54 = vmul.f32 %v17814_v8, %v5989_v15 }
 0x3c4   :  { %v18037_v41 = vmul.f32 %v17814_v8, %v5990_v34  ;;  %v18040_v33 = vmul.f32 %v17814_v8, %v5991_v37  ;;  %v18043_v44 = vmul.f32 %v17814_v8, %v5992_v62  ;;  %v18046_v16 = vmul.f32 %v17814_v8, %v5993_v39 }
 0x3c5   :  { %v18049_v43 = vmul.f32 %v17814_v8, %v5994_v10  ;;  %v18052_v6 = vmul.f32 %v17814_v8, %v5995_v23  ;;  %v18055_v15 = vmul.f32 %v17814_v8, %v5996_v61  ;;  %v22146_v34 = vsub.f32 %v17538_v3, %v17688_v12 }
 0x3c6   :  { %v22147_v62 = vsub.f32 %v17563_v53, %v17688_v12  ;;  %v18070_v10 = vmul.f32 %v17814_v8, %v5999_v14  ;;  %v22149_v23 = vsub.f32 %v17561_v36, %v17688_v12  ;;  %v22152_v3 = vsub.f32 %v22151_v38, %v17688_v12  ;;  %v22157_v14 = vld [vmem:[#allocation50_spill] sm:$0xff] }
 0x3c7   :  { %v18061_v37 = vmul.f32 %v17814_v8, %v22146_v34  ;;  %v22154_v34 = vld [vmem:[#allocation15_spill] sm:$0xff] }
 0x3c8   :  { %v18067_v39 = vmul.f32 %v17814_v8, %v22147_v62  ;;  %22148 = vst [vmem:[#allocation40_spill] sm:$0xff] %v18070_v10  ;;  %v18076_v61 = vmul.f32 %v17814_v8, %v22149_v23  ;;  %v18082_v11 = vmul.f32 %v17814_v8, %v22152_v3  ;;  %v22155_v53 = vsub.f32 %v22154_v34, %v17688_v12  ;;  %v22160_v23 = vld [vmem:[#allocation73_spill] sm:$0xff]  ;;  %v22163_v3 = vld [vmem:[#allocation16_spill] sm:$0xff] }
 0x3c9   :  { %v22158_v10 = vsub.f32 %v22157_v14, %v17688_v12 }
 0x3ca   :  { %22150 = vst [vmem:[#allocation18_spill] sm:$0xff] %v18076_v61  ;;  %22153 = vst [vmem:[#allocation17_spill] sm:$0xff] %v18082_v11  ;;  %v18088_v62 = vmul.f32 %v17814_v8, %v22155_v53  ;;  %v22161_v61 = vsub.f32 %v22160_v23, %v17688_v12  ;;  %v22164_v11 = vsub.f32 %v22163_v3, %v17688_v12  ;;  %v22166_v53 = vld [vmem:[#allocation6_spill] sm:$0xff] }
 0x3cb   :  { %v18094_v36 = vmul.f32 %v17814_v8, %v22158_v10  ;;  %v22169_v10 = vld [vmem:[#allocation51_spill] sm:$0xff] }
 0x3cc   :  { %22156 = vst [vmem:[#allocation52_spill] sm:$0xff] %v18088_v62  ;;  %v18100_v38 = vmul.f32 %v17814_v8, %v22161_v61  ;;  %v18106_v34 = vmul.f32 %v17814_v8, %v22164_v11  ;;  %v22167_v62 = vsub.f32 %v22166_v53, %v17688_v12  ;;  %v22172_v61 = vld [vmem:[#allocation79_spill] sm:$0xff]  ;;  %v22174_v11 = vld [vmem:[#allocation4_spill] sm:$0xff] }
 0x3cd   :  { %22159 = vst [vmem:[#allocation53_spill] sm:$0xff] %v18094_v36  ;;  %v22170_v36 = vsub.f32 %v22169_v10, %v17688_v12 }
 0x3ce   :  { %22162 = vst [vmem:[#allocation7_spill] sm:$0xff] %v18100_v38  ;;  %22165 = vst [vmem:[#allocation8_spill] sm:$0xff] %v18106_v34  ;;  %v18112_v14 = vmul.f32 %v17814_v8, %v22167_v62  ;;  %v22173_v38 = vsub.f32 %v22172_v61, %v17688_v12  ;;  %v22175_v34 = vsub.f32 %v22174_v11, %v17688_v12  ;;  %v22176_v62 = vld [vmem:[#allocation76_spill] sm:$0xff] }
 0x3cf   :  { %v18118_v23 = vmul.f32 %v17814_v8, %v22170_v36  ;;  %v22178_v36 = vld [vmem:[#allocation5_spill] sm:$0xff]  ;;  %v18154_v11 = vadd.f32 %v17825_v31, %v17855_v42  ;;  %v18178_v42 = vadd.f32 %v17825_v31, %v17892_v13  ;;  %v18202_v13 = vadd.f32 %v17825_v31, %v17928_v27 }
 0x3d0   :  { %22168 = vst [vmem:[#allocation33_spill] sm:$0xff] %v18112_v14  ;;  %v18124_v3 = vmul.f32 %v17814_v8, %v22173_v38  ;;  %v18130_v53 = vmul.f32 %v17814_v8, %v22175_v34  ;;  %v22177_v14 = vsub.f32 %v22176_v62, %v17688_v12  ;;  %v18146_v38 = vadd.f32 %v17825_v31, %v17843_v52 }
 0x3d1   :  { %22171 = vst [vmem:[#allocation19_spill] sm:$0xff] %v18118_v23  ;;  %v22179_v23 = vsub.f32 %v22178_v36, %v17688_v12  ;;  %v18150_v34 = vadd.f32 %v17825_v31, %v17849_v0  ;;  %v18162_v12 = vadd.f32 %v17825_v31, %v17867_v55  ;;  %v18166_v52 = vadd.f32 %v17825_v31, %v17873_v29  ;;  %v22186_v62 = vld [vmem:[#allocation17_spill] sm:$0xff] }
 0x3d2   :  { %v18136_v10 = vmul.f32 %v17814_v8, %v22177_v14  ;;  %v18158_v14 = vadd.f32 %v17825_v31, %v17861_v60  ;;  %v18174_v0 = vadd.f32 %v17825_v31, %v17886_v24  ;;  %v18182_v60 = vadd.f32 %v17825_v31, %v17898_v30 }
 0x3d3   :  { %v18142_v61 = vmul.f32 %v17814_v8, %v22179_v23  ;;  %v18170_v8 = vadd.f32 %v17825_v31, %v17879_v2  ;;  %v18186_v55 = vadd.f32 %v17825_v31, %v17904_v4  ;;  %v18190_v29 = vadd.f32 %v17825_v31, %v17910_v59  ;;  %v22184_v23 = vld [vmem:[#allocation18_spill] sm:$0xff]  ;;  %v22188_v36 = vld [vmem:[#allocation52_spill] sm:$0xff] }
 0x3d4   :  { %v18194_v2 = vadd.f32 %v17825_v31, %v17916_v47  ;;  %v18198_v24 = vadd.f32 %v17825_v31, %v17922_v18  ;;  %v18206_v30 = vadd.f32 %v17825_v31, %v17934_v35  ;;  %v18210_v4 = vadd.f32 %v17825_v31, %v17940_v22 }
 0x3d5   :  { %v18214_v59 = vadd.f32 %v17825_v31, %v17946_v32  ;;  %v18218_v47 = vadd.f32 %v17825_v31, %v17952_v57  ;;  %v18222_v18 = vadd.f32 %v17825_v31, %v17958_v20  ;;  %v18226_v27 = vadd.f32 %v17825_v31, %v17964_v40 }
 0x3d6   :  { %v18230_v35 = vadd.f32 %v17825_v31, %v17971_v28  ;;  %v18234_v22 = vadd.f32 %v17825_v31, %v17977_v49  ;;  %v18238_v32 = vadd.f32 %v17825_v31, %v17983_v48  ;;  %v18242_v57 = vadd.f32 %v17825_v31, %v17986_v58 }
 0x3d7   :  { %v18246_v20 = vadd.f32 %v17825_v31, %v17989_v63  ;;  %v18250_v40 = vadd.f32 %v17825_v31, %v17992_v46  ;;  %v18254_v28 = vadd.f32 %v17825_v31, %v17995_v7  ;;  %v18258_v49 = vadd.f32 %v17825_v31, %v17998_v51 }
 0x3d8   :  { %v18262_v48 = vadd.f32 %v17825_v31, %v18001_v17  ;;  %v18266_v58 = vadd.f32 %v17825_v31, %v18004_v1  ;;  %v18270_v63 = vadd.f32 %v17825_v31, %v18007_v21  ;;  %v18274_v46 = vadd.f32 %v17825_v31, %v18010_v26 }
 0x3d9   :  { %v18278_v7 = vadd.f32 %v17825_v31, %v18013_v25  ;;  %v18282_v51 = vadd.f32 %v17825_v31, %v18016_v19  ;;  %v18286_v17 = vadd.f32 %v17825_v31, %v18019_v50  ;;  %v18290_v1 = vadd.f32 %v17825_v31, %v18022_v45 }
 0x3da   :  { %v18294_v21 = vadd.f32 %v17825_v31, %v18025_v5  ;;  %v18298_v26 = vadd.f32 %v17825_v31, %v18028_v56  ;;  %v18302_v25 = vadd.f32 %v17825_v31, %v18031_v9  ;;  %v18306_v19 = vadd.f32 %v17825_v31, %v18034_v54 }
 0x3db   :  { %v18310_v50 = vadd.f32 %v17825_v31, %v18037_v41  ;;  %v18314_v45 = vadd.f32 %v17825_v31, %v18040_v33  ;;  %v18318_v5 = vadd.f32 %v17825_v31, %v18043_v44  ;;  %v18322_v56 = vadd.f32 %v17825_v31, %v18046_v16  ;;  %v22182_v16 = vld [vmem:[#allocation40_spill] sm:$0xff] }
 0x3dc   :  { %v18326_v9 = vadd.f32 %v17825_v31, %v18049_v43  ;;  %v18330_v54 = vadd.f32 %v17825_v31, %v18052_v6  ;;  %v18334_v41 = vadd.f32 %v17825_v31, %v18055_v15  ;;  %v18338_v33 = vadd.f32 %v17825_v31, %v18061_v37 }
 0x3dd   :  { %v18342_v44 = vadd.f32 %v17825_v31, %v18067_v39  ;;  %v18346_v43 = vadd.f32 %v17825_v31, %v22182_v16  ;;  %v18350_v6 = vadd.f32 %v17825_v31, %v22184_v23  ;;  %v18354_v15 = vadd.f32 %v17825_v31, %v22186_v62 }
 0x3de   :  { %22180 = vst [vmem:[#allocation9_spill] sm:$0xff] %v18338_v33  ;;  %v18358_v37 = vadd.f32 %v17825_v31, %v22188_v36  ;;  %v22189_v33 = vld [vmem:[#allocation53_spill] sm:$0xff] }
 0x3df   :  { %22181 = vst [vmem:[#allocation12_spill] sm:$0xff] %v18342_v44  ;;  %22183 = vst [vmem:[#allocation10_spill] sm:$0xff] %v18346_v43  ;;  %v18362_v39 = vadd.f32 %v17825_v31, %v22189_v33  ;;  %v22190_v44 = vld [vmem:[#allocation7_spill] sm:$0xff]  ;;  %v22191_v43 = vld [vmem:[#allocation8_spill] sm:$0xff]  ;;  %v18382_v33 = vadd.f32 %v17825_v31, %v18124_v3  ;;  %v6155_v3 = vmax.f32 %v18158_v14, 0.0  ;;  %v6165_v14 = vmax.f32 %v18198_v24, 0.0 }
 0x3e0   :  { %22185 = vst [vmem:[#allocation11_spill] sm:$0xff] %v18350_v6  ;;  %22187 = vst [vmem:[#allocation21_spill] sm:$0xff] %v18354_v15  ;;  %v18366_v16 = vadd.f32 %v17825_v31, %v22190_v44  ;;  %v18370_v23 = vadd.f32 %v17825_v31, %v22191_v43  ;;  %v22192_v6 = vld [vmem:[#allocation33_spill] sm:$0xff]  ;;  %v22194_v15 = vld [vmem:[#allocation19_spill] sm:$0xff]  ;;  %v18386_v44 = vadd.f32 %v17825_v31, %v18130_v53  ;;  %v6157_v53 = vmax.f32 %v18166_v52, 0.0 }
 0x3e1   :  { %v18374_v62 = vadd.f32 %v17825_v31, %v22192_v6  ;;  %v18378_v36 = vadd.f32 %v17825_v31, %v22194_v15  ;;  %22196 = vst [vmem:[#allocation62_spill] sm:$0xff] %v18382_v33  ;;  %v18390_v43 = vadd.f32 %v17825_v31, %v18136_v10  ;;  %v18394_v6 = vadd.f32 %v17825_v31, %v18142_v61 }
 0x3e2   :  { %22197 = vst [vmem:[#allocation13_spill] sm:$0xff] %v18386_v44  ;;  %v6153_v15 = vmax.f32 %v18150_v34, 0.0  ;;  %v6156_v33 = vmax.f32 %v18162_v12, 0.0  ;;  %v6158_v44 = vmax.f32 %v18170_v8, 0.0  ;;  %v6159_v10 = vmax.f32 %v18174_v0, 0.0  ;;  %6329 = vst.msk [vmem:[#allocation2 + $0x39] sm:$0xff] %vm5612_vm6, %v6155_v3 }
 0x3e3   :  { %22193 = vst [vmem:[#allocation23_spill] sm:$0xff] %v18374_v62  ;;  %22195 = vst [vmem:[#allocation20_spill] sm:$0xff] %v18378_v36  ;;  %v6152_v62 = vmax.f32 %v18146_v38, 0.0  ;;  %v6154_v36 = vmax.f32 %v18154_v11, 0.0  ;;  %v6161_v31 = vmax.f32 %v18182_v60, 0.0  ;;  %v6162_v61 = vmax.f32 %v18186_v55, 0.0 }
 0x3e4   :  { %22198 = vst [vmem:[#allocation61_spill] sm:$0xff] %v18390_v43  ;;  %v6160_v43 = vmax.f32 %v18178_v42, 0.0  ;;  %6327 = vst.msk [vmem:[#allocation2 + $0x21] sm:$0xff] %vm5612_vm6, %v6153_v15  ;;  %v18413_v38 = vld [vmem:[%s21576_s4 + $0x38] sm:$0xff]   ;;  %v6163_v34 = vmax.f32 %v18190_v29, 0.0  ;;  %v6164_v11 = vmax.f32 %v18194_v2, 0.0 }
 0x3e5   :  { %6326 = vst.msk [vmem:[#allocation2 + $0x19] sm:$0xff] %vm5612_vm6, %v6152_v62  ;;  %6328 = vst.msk [vmem:[#allocation2 + $0x31] sm:$0xff] %vm5612_vm6, %v6154_v36  ;;  %v6166_v12 = vmax.f32 %v18202_v13, 0.0  ;;  %v6167_v52 = vmax.f32 %v18206_v30, 0.0  ;;  %v6168_v8 = vmax.f32 %v18210_v4, 0.0  ;;  %v6169_v0 = vmax.f32 %v18214_v59, 0.0  ;;  %13282 = vmatprep.subr.bf16.mxu0 %v18413_v38 }
 0x3e6   :  { %6330 = vst.msk [vmem:[#allocation2 + $0x49] sm:$0xff] %vm5612_vm6, %v6156_v33  ;;  %6331 = vst.msk [vmem:[#allocation2 + $0x51] sm:$0xff] %vm5612_vm6, %v6157_v53  ;;  %v6170_v42 = vmax.f32 %v18218_v47, 0.0  ;;  %v6171_v60 = vmax.f32 %v18222_v18, 0.0  ;;  %v6172_v55 = vmax.f32 %v18226_v27, 0.0  ;;  %v6173_v29 = vmax.f32 %v18230_v35, 0.0 }
 0x3e7   :  { %6332 = vst.msk [vmem:[#allocation2 + $0x61] sm:$0xff] %vm5612_vm6, %v6158_v44  ;;  %6333 = vst.msk [vmem:[#allocation2 + $0x69] sm:$0xff] %vm5612_vm6, %v6159_v10  ;;  %v6174_v2 = vmax.f32 %v18234_v22, 0.0  ;;  %v6175_v24 = vmax.f32 %v18238_v32, 0.0  ;;  %v6176_v13 = vmax.f32 %v18242_v57, 0.0  ;;  %v6177_v30 = vmax.f32 %v18246_v20, 0.0 }
 0x3e8   :  { %6334 = vst.msk [vmem:[#allocation2 + $0x79] sm:$0xff] %vm5612_vm6, %v6160_v43  ;;  %6335 = vst.msk [vmem:[#allocation2 + $0x81] sm:$0xff] %vm5612_vm6, %v6161_v31  ;;  %v6178_v4 = vmax.f32 %v18250_v40, 0.0  ;;  %v6179_v59 = vmax.f32 %v18254_v28, 0.0  ;;  %v6180_v47 = vmax.f32 %v18258_v49, 0.0  ;;  %v6181_v18 = vmax.f32 %v18262_v48, 0.0 }
 0x3e9   :  { %6336 = vst.msk [vmem:[#allocation2 + $0x91] sm:$0xff] %vm5612_vm6, %v6162_v61  ;;  %6337 = vst.msk [vmem:[#allocation2 + $0x99] sm:$0xff] %vm5612_vm6, %v6163_v34  ;;  %v6182_v27 = vmax.f32 %v18266_v58, 0.0  ;;  %v6183_v35 = vmax.f32 %v18270_v63, 0.0  ;;  %v6184_v22 = vmax.f32 %v18274_v46, 0.0  ;;  %v6185_v32 = vmax.f32 %v18278_v7, 0.0 }
 0x3ea   :  { %6338 = vst.msk [vmem:[#allocation2 + $0xa9] sm:$0xff] %vm5612_vm6, %v6164_v11  ;;  %6339 = vst.msk [vmem:[#allocation2 + $0xb1] sm:$0xff] %vm5612_vm6, %v6165_v14  ;;  %v6186_v57 = vmax.f32 %v18282_v51, 0.0  ;;  %v6187_v20 = vmax.f32 %v18286_v17, 0.0  ;;  %v6188_v40 = vmax.f32 %v18290_v1, 0.0  ;;  %v6189_v28 = vmax.f32 %v18294_v21, 0.0 }
 0x3eb   :  { %6340 = vst.msk [vmem:[#allocation2 + $0xc1] sm:$0xff] %vm5612_vm6, %v6166_v12  ;;  %6341 = vst.msk [vmem:[#allocation2 + $0xc9] sm:$0xff] %vm5612_vm6, %v6167_v52  ;;  %v6190_v49 = vmax.f32 %v18298_v26, 0.0  ;;  %v6191_v48 = vmax.f32 %v18302_v25, 0.0  ;;  %v6192_v58 = vmax.f32 %v18306_v19, 0.0  ;;  %v6193_v63 = vmax.f32 %v18310_v50, 0.0 }
 0x3ec   :  { %6342 = vst.msk [vmem:[#allocation2 + $0xd9] sm:$0xff] %vm5612_vm6, %v6168_v8  ;;  %6343 = vst.msk [vmem:[#allocation2 + $0xe1] sm:$0xff] %vm5612_vm6, %v6169_v0  ;;  %v6194_v46 = vmax.f32 %v18314_v45, 0.0  ;;  %v6195_v7 = vmax.f32 %v18318_v5, 0.0  ;;  %v6196_v51 = vmax.f32 %v18322_v56, 0.0  ;;  %v6197_v17 = vmax.f32 %v18326_v9, 0.0 }
 0x3ed   :  { %6344 = vst.msk [vmem:[#allocation2 + $0xf1] sm:$0xff] %vm5612_vm6, %v6170_v42  ;;  %6345 = vst.msk [vmem:[#allocation2 + $0xf9] sm:$0xff] %vm5612_vm6, %v6171_v60  ;;  %v6198_v1 = vmax.f32 %v18330_v54, 0.0  ;;  %v6199_v21 = vmax.f32 %v18334_v41, 0.0  ;;  %v22199_v26 = vld [vmem:[#allocation9_spill] sm:$0xff]  ;;  %v22200_v19 = vld [vmem:[#allocation12_spill] sm:$0xff] }
 0x3ee   :  { %6346 = vst.msk [vmem:[#allocation2 + $0x109] sm:$0xff] %vm5612_vm6, %v6172_v55  ;;  %6347 = vst.msk [vmem:[#allocation2 + $0x111] sm:$0xff] %vm5612_vm6, %v6173_v29  ;;  %v6200_v25 = vmax.f32 %v22199_v26, 0.0  ;;  %v6201_v50 = vmax.f32 %v22200_v19, 0.0  ;;  %v22201_v45 = vld [vmem:[#allocation10_spill] sm:$0xff]  ;;  %v6393_v9 = vld [vmem:[#allocation2 + $0x20] sm:$0xff] }
 0x3ef   :  { %6348 = vst.msk [vmem:[#allocation2 + $0x121] sm:$0xff] %vm5612_vm6, %v6174_v2  ;;  %6349 = vst.msk [vmem:[#allocation2 + $0x129] sm:$0xff] %vm5612_vm6, %v6175_v24  ;;  %v6202_v5 = vmax.f32 %v22201_v45, 0.0  ;;  %v6392_v56 = vld [vmem:[#allocation2 + $0x18] sm:$0xff]  ;;  %v22202_v54 = vld [vmem:[#allocation11_spill] sm:$0xff]  ;;  %v6205_v33 = vmax.f32 %v18358_v37, 0.0 }
 0x3f0   :  { %6350 = vst.msk [vmem:[#allocation2 + $0x139] sm:$0xff] %vm5612_vm6, %v6176_v13  ;;  %6351 = vst.msk [vmem:[#allocation2 + $0x141] sm:$0xff] %vm5612_vm6, %v6177_v30  ;;  %v6203_v62 = vmax.f32 %v22202_v54, 0.0  ;;  %v22203_v36 = vld [vmem:[#allocation21_spill] sm:$0xff]  ;;  %v6206_v44 = vmax.f32 %v18362_v39, 0.0  ;;  %v6395_v15 = vld [vmem:[#allocation2 + $0x38] sm:$0xff]  ;;  %v6463_v0 = vpack.c.bf16 %v6393_v9, %v6392_v56 }
 0x3f1   :  { %6352 = vst.msk [vmem:[#allocation2 + $0x151] sm:$0xff] %vm5612_vm6, %v6178_v4  ;;  %6353 = vst.msk [vmem:[#allocation2 + $0x159] sm:$0xff] %vm5612_vm6, %v6179_v59  ;;  %v6204_v41 = vmax.f32 %v22203_v36, 0.0  ;;  %v6394_v43 = vld [vmem:[#allocation2 + $0x30] sm:$0xff]  ;;  %v6207_v3 = vmax.f32 %v18366_v16, 0.0  ;;  %v6208_v53 = vmax.f32 %v18370_v23, 0.0 }
 0x3f2   :  { %6354 = vst.msk [vmem:[#allocation2 + $0x169] sm:$0xff] %vm5612_vm6, %v6180_v47  ;;  %6355 = vst.msk [vmem:[#allocation2 + $0x171] sm:$0xff] %vm5612_vm6, %v6181_v18  ;;  %v22204_v10 = vld [vmem:[#allocation23_spill] sm:$0xff]  ;;  %v22205_v61 = vld [vmem:[#allocation20_spill] sm:$0xff]  ;;  %v6215_v23 = vmax.f32 %v18394_v6, 0.0  ;;  %v18524_v6 = vpack.c.bf16 %v6395_v15, %v6394_v43  ;;  %13074 = vmatprep.mubr.msk.bf16.mxu1 %vm5612_vm6, %v6463_v0  ;;  %13147 = vmatmul.mubr.msk.bf16.vlgmr.msra.gmra.mxu0 %vm5612_vm6, %v6463_v0 }
 0x3f3   :  { %6356 = vst.msk [vmem:[#allocation2 + $0x181] sm:$0xff] %vm5612_vm6, %v6182_v27  ;;  %6357 = vst.msk [vmem:[#allocation2 + $0x189] sm:$0xff] %vm5612_vm6, %v6183_v35  ;;  %v6209_v31 = vmax.f32 %v22204_v10, 0.0  ;;  %v6210_v37 = vmax.f32 %v22205_v61, 0.0  ;;  %v22206_v39 = vld [vmem:[#allocation62_spill] sm:$0xff]  ;;  %v22207_v11 = vld [vmem:[#allocation13_spill] sm:$0xff]  ;;  %13283 = vmatpush3.bf16.msra.mxu0 %v18413_v38 }
 0x3f4   :  { %6358 = vst.msk [vmem:[#allocation2 + $0x1c9] sm:$0xff] %vm5612_vm6, %v6184_v22  ;;  %6359 = vst.msk [vmem:[#allocation2 + $0x1d1] sm:$0xff] %vm5612_vm6, %v6185_v32  ;;  %v6211_v34 = vmax.f32 %v22206_v39, 0.0  ;;  %v6212_v14 = vmax.f32 %v22207_v11, 0.0  ;;  %v22208_v12 = vld [vmem:[#allocation61_spill] sm:$0xff]  ;;  %v6396_v52 = vld [vmem:[#allocation2 + $0x48] sm:$0xff]  ;;  %13075 = vmatmul.mubr.msk.bf16.vlgmr.msra.gmra.mxu1 %vm5612_vm6, %v18524_v6  ;;  %13150 = vmatprep.mubr.msk.bf16.mxu0 %vm5612_vm6, %v18524_v6 }
 0x3f5   :  { %6360 = vst.msk [vmem:[#allocation2 + $0x1e1] sm:$0xff] %vm5612_vm6, %v6186_v57  ;;  %6361 = vst.msk [vmem:[#allocation2 + $0x1e9] sm:$0xff] %vm5612_vm6, %v6187_v20  ;;  %v6214_v16 = vmax.f32 %v22208_v12, 0.0  ;;  %v6397_v8 = vld [vmem:[#allocation2 + $0x50] sm:$0xff]  ;;  %v13957_v29 = vld [vmem:[%s21576_s4 + $0xd8] sm:$0xff]  }
 0x3f6   :  { %6362 = vst.msk [vmem:[#allocation2 + $0x1f9] sm:$0xff] %vm5612_vm6, %v6188_v40  ;;  %6363 = vst.msk [vmem:[#allocation2 + $0x201] sm:$0xff] %vm5612_vm6, %v6189_v28  ;;  %v13832_v42 = vld [vmem:[%s21576_s4 + $0xd0] sm:$0xff]   ;;  %v18535_v60 = vpack.c.bf16 %v6397_v8, %v6396_v52  ;;  %13211 = vmatpush3.bf16.msra.mxu1 %v13957_v29  ;;  %v13833_v2 = vld [vmem:[%s21576_s4 + $0xc8] sm:$0xff]  }
 0x3f7   :  { %6364 = vst.msk [vmem:[#allocation2 + $0x211] sm:$0xff] %vm5612_vm6, %v6190_v49  ;;  %6365 = vst.msk [vmem:[#allocation2 + $0x219] sm:$0xff] %vm5612_vm6, %v6191_v48  ;;  %v13836_v55 = vld [vmem:[%s21576_s4 + $0x30] sm:$0xff]   ;;  %13212 = vmatprep.subr.bf16.mxu1 %v13832_v42  ;;  %v6398_v24 = vld [vmem:[#allocation2 + $0x60] sm:$0xff] }
 0x3f8   :  { %6366 = vst.msk [vmem:[#allocation2 + $0x229] sm:$0xff] %vm5612_vm6, %v6192_v58  ;;  %6367 = vst.msk [vmem:[#allocation2 + $0x231] sm:$0xff] %vm5612_vm6, %v6193_v63  ;;  %13078 = vmatprep.mubr.msk.bf16.mxu1 %vm5612_vm6, %v18535_v60  ;;  %v6399_v13 = vld [vmem:[#allocation2 + $0x68] sm:$0xff]  ;;  %13284 = vmatprep.subr.bf16.mxu0 %v13836_v55  ;;  %v6400_v30 = vld [vmem:[#allocation2 + $0x78] sm:$0xff] }
 0x3f9   :  { %6368 = vst.msk [vmem:[#allocation2 + $0x241] sm:$0xff] %vm5612_vm6, %v6194_v46  ;;  %6369 = vst.msk [vmem:[#allocation2 + $0x249] sm:$0xff] %vm5612_vm6, %v6195_v7  ;;  %v6401_v4 = vld [vmem:[#allocation2 + $0x80] sm:$0xff]  ;;  %v18553_v59 = vpack.c.bf16 %v6399_v13, %v6398_v24  ;;  %13285 = vmatpush3.bf16.msra.mxu0 %v13836_v55  ;;  %v6402_v38 = vld [vmem:[#allocation2 + $0x90] sm:$0xff] }
 0x3fa   :  { %6370 = vst.msk [vmem:[#allocation2 + $0x259] sm:$0xff] %vm5612_vm6, %v6196_v51  ;;  %6371 = vst.msk [vmem:[#allocation2 + $0x261] sm:$0xff] %vm5612_vm6, %v6197_v17  ;;  %13213 = vmatpush3.bf16.msra.mxu1 %v13832_v42  ;;  %v13834_v47 = vld [vmem:[%s21576_s4 + $0xc0] sm:$0xff]   ;;  %13151 = vmatmul.mubr.msk.bf16.gmra.mxu0 %vm5612_vm6, %v18535_v60  ;;  %v18560_v18 = vpack.c.bf16 %v6401_v4, %v6400_v30  ;;  %v6403_v27 = vld [vmem:[#allocation2 + $0x98] sm:$0xff] }
 0x3fb   :  { %6372 = vst.msk [vmem:[#allocation2 + $0x271] sm:$0xff] %vm5612_vm6, %v6198_v1  ;;  %6373 = vst.msk [vmem:[#allocation2 + $0x279] sm:$0xff] %vm5612_vm6, %v6199_v21  ;;  %13214 = vmatprep.subr.bf16.mxu1 %v13833_v2  ;;  %13154 = vmatprep.mubr.msk.bf16.mxu0 %vm5612_vm6, %v18553_v59  ;;  %v6404_v35 = vld [vmem:[#allocation2 + $0xa8] sm:$0xff]  ;;  %v6405_v22 = vld [vmem:[#allocation2 + $0xb0] sm:$0xff]  ;;  %v18571_v57 = vpack.c.bf16 %v6403_v27, %v6402_v38 }
 0x3fc   :  { %6374 = vst.msk [vmem:[#allocation2 + $0x289] sm:$0xff] %vm5612_vm6, %v6200_v25  ;;  %6375 = vst.msk [vmem:[#allocation2 + $0x291] sm:$0xff] %vm5612_vm6, %v6201_v50  ;;  %13079 = vmatmul.mubr.msk.bf16.gmra.mxu1 %vm5612_vm6, %v18553_v59  ;;  %v13837_v32 = vld [vmem:[%s21576_s4 + $0x28] sm:$0xff]   ;;  %v13838_v20 = vld [vmem:[%s21576_s4 + $0x20] sm:$0xff]   ;;  %v18578_v40 = vpack.c.bf16 %v6405_v22, %v6404_v35 }
 0x3fd   :  { %6376 = vst.msk [vmem:[#allocation2 + $0x2a1] sm:$0xff] %vm5612_vm6, %v6202_v5  ;;  %6377 = vst.msk [vmem:[#allocation2 + $0x2a9] sm:$0xff] %vm5612_vm6, %v6203_v62  ;;  %13082 = vmatprep.mubr.msk.bf16.mxu1 %vm5612_vm6, %v18560_v18  ;;  %13286 = vmatprep.subr.bf16.mxu0 %v13837_v32  ;;  %v18587_v28 = vld [vmem:[%s21576_s4 + $0x98] sm:$0xff]   ;;  %v6406_v49 = vld [vmem:[#allocation2 + $0xc0] sm:$0xff] }
 0x3fe   :  { %6378 = vst.msk [vmem:[#allocation2 + $0x2b9] sm:$0xff] %vm5612_vm6, %v6204_v41  ;;  %6379 = vst.msk [vmem:[#allocation2 + $0x2c1] sm:$0xff] %vm5612_vm6, %v6205_v33  ;;  %13215 = vmatpush3.bf16.msra.mxu1 %v13833_v2  ;;  %13287 = vmatpush3.bf16.msra.mxu0 %v13837_v32  ;;  %v6407_v48 = vld [vmem:[#allocation2 + $0xc8] sm:$0xff]  ;;  %v6408_v58 = vld [vmem:[#allocation2 + $0xd8] sm:$0xff] }
 0x3ff   :  { %6380 = vst.msk [vmem:[#allocation2 + $0x2d1] sm:$0xff] %vm5612_vm6, %v6206_v44  ;;  %6381 = vst.msk [vmem:[#allocation2 + $0x2d9] sm:$0xff] %vm5612_vm6, %v6207_v3  ;;  %13216 = vmatprep.subr.bf16.mxu1 %v13834_v47  ;;  %13288 = vmatprep.subr.bf16.mxu0 %v13838_v20  ;;  %v6409_v63 = vld [vmem:[#allocation2 + $0xe0] sm:$0xff]  ;;  %v18592_v46 = vpack.c.bf16 %v6407_v48, %v6406_v49  ;;  %v6410_v51 = vld [vmem:[#allocation2 + $0xf0] sm:$0xff] }
 0x400   :  { %6382 = vst.msk [vmem:[#allocation2 + $0x2e9] sm:$0xff] %vm5612_vm6, %v6208_v53  ;;  %6383 = vst.msk [vmem:[#allocation2 + $0x2f1] sm:$0xff] %vm5612_vm6, %v6209_v31  ;;  %v18596_v7 = vpack.c.bf16 %v6409_v63, %v6408_v58  ;;  %v6411_v17 = vld [vmem:[#allocation2 + $0xf8] sm:$0xff]  ;;  %v6412_v1 = vld [vmem:[#allocation2 + $0x108] sm:$0xff] }
 0x401   :  { %6384 = vst.msk [vmem:[#allocation2 + $0x301] sm:$0xff] %vm5612_vm6, %v6210_v37  ;;  %6385 = vst.msk [vmem:[#allocation2 + $0x309] sm:$0xff] %vm5612_vm6, %v6211_v34  ;;  %v6413_v21 = vld [vmem:[#allocation2 + $0x110] sm:$0xff]  ;;  %v18604_v26 = vpack.c.bf16 %v6411_v17, %v6410_v51  ;;  %v6414_v19 = vld [vmem:[#allocation2 + $0x120] sm:$0xff] }
 0x402   :  { %6386 = vst.msk [vmem:[#allocation2 + $0x319] sm:$0xff] %vm5612_vm6, %v6212_v14  ;;  %6388 = vst.msk [vmem:[#allocation2 + $0x331] sm:$0xff] %vm5612_vm6, %v6214_v16  ;;  %13217 = vmatpush3.bf16.msra.mxu1 %v13834_v47  ;;  %13155 = vmatmul.mubr.msk.bf16.gmra.mxu0 %vm5612_vm6, %v18560_v18  ;;  %v18608_v25 = vpack.c.bf16 %v6413_v21, %v6412_v1  ;;  %v6415_v50 = vld [vmem:[#allocation2 + $0x128] sm:$0xff]  ;;  %v6416_v45 = vld [vmem:[#allocation2 + $0x138] sm:$0xff] }
 0x403   :  { %6389 = vst.msk [vmem:[#allocation2 + $0x339] sm:$0xff] %vm5612_vm6, %v6215_v23  ;;  %13158 = vmatprep.mubr.msk.bf16.mxu0 %vm5612_vm6, %v18571_v57  ;;  %13354 = vmatprep.subr.bf16.mxu1 %v18587_v28  ;;  %v6417_v5 = vld [vmem:[#allocation2 + $0x140] sm:$0xff]  ;;  %v18616_v56 = vpack.c.bf16 %v6415_v50, %v6414_v19  ;;  %v6418_v54 = vld [vmem:[#allocation2 + $0x150] sm:$0xff]  ;;  %v6419_v62 = vld [vmem:[#allocation2 + $0x158] sm:$0xff] }
 0x404   :  { %13083 = vmatmul.mubr.msk.bf16.gmra.mxu1 %vm5612_vm6, %v18571_v57  ;;  %13289 = vmatpush3.bf16.msra.mxu0 %v13838_v20  ;;  %v18620_v9 = vpack.c.bf16 %v6417_v5, %v6416_v45  ;;  %v6420_v36 = vld [vmem:[#allocation2 + $0x168] sm:$0xff]  ;;  %v6421_v41 = vld [vmem:[#allocation2 + $0x170] sm:$0xff]  ;;  %v18628_v33 = vpack.c.bf16 %v6419_v62, %v6418_v54  ;;  %v6427_v15 = vld [vmem:[#allocation2 + $0x1b8] sm:$0xff] }
 0x405   :  { %13086 = vmatprep.mubr.msk.bf16.mxu1 %vm5612_vm6, %v18578_v40  ;;  %v18632_v44 = vpack.c.bf16 %v6421_v41, %v6420_v36  ;;  %v6426_v43 = vld [vmem:[#allocation2 + $0x1b0] sm:$0xff]  ;;  %v6422_v3 = vld [vmem:[#allocation2 + $0x180] sm:$0xff]  ;;  %v6423_v53 = vld [vmem:[#allocation2 + $0x188] sm:$0xff] }
 0x406   :  { %v6428_v10 = vld [vmem:[#allocation2 + $0x1c8] sm:$0xff]  ;;  %v6429_v31 = vld [vmem:[#allocation2 + $0x1d0] sm:$0xff]  ;;  %v6478_v61 = vpack.c.bf16 %v6427_v15, %v6426_v43  ;;  %v18640_v37 = vpack.c.bf16 %v6423_v53, %v6422_v3  ;;  %v6430_v34 = vld [vmem:[#allocation2 + $0x1e0] sm:$0xff] }
 0x407   :  { %v6479_v39 = vpack.c.bf16 %v6429_v31, %v6428_v10  ;;  %v6431_v11 = vld [vmem:[#allocation2 + $0x1e8] sm:$0xff]  ;;  %v6432_v14 = vld [vmem:[#allocation2 + $0x1f8] sm:$0xff]  ;;  %v6433_v12 = vld [vmem:[#allocation2 + $0x200] sm:$0xff] }
 0x408   :  { %v18648_v16 = vpack.c.bf16 %v6431_v11, %v6430_v34  ;;  %v18651_v23 = vpack.c.bf16 %v6433_v12, %v6432_v14  ;;  %v6434_v52 = vld [vmem:[#allocation2 + $0x210] sm:$0xff]  ;;  %v6435_v8 = vld [vmem:[#allocation2 + $0x218] sm:$0xff]  ;;  %v6436_v0 = vld [vmem:[#allocation2 + $0x228] sm:$0xff] }
 0x409   :  { %v6437_v42 = vld [vmem:[#allocation2 + $0x230] sm:$0xff]  ;;  %v18659_v55 = vpack.c.bf16 %v6435_v8, %v6434_v52  ;;  %v6438_v2 = vld [vmem:[#allocation2 + $0x240] sm:$0xff]  ;;  %v6439_v24 = vld [vmem:[#allocation2 + $0x248] sm:$0xff] }
 0x40a   :  { %13159 = vmatmul.mubr.msk.bf16.gmra.mxu0 %vm5612_vm6, %v18578_v40  ;;  %v18663_v29 = vpack.c.bf16 %v6437_v42, %v6436_v0  ;;  %v6440_v13 = vld [vmem:[#allocation2 + $0x258] sm:$0xff]  ;;  %v6441_v30 = vld [vmem:[#allocation2 + $0x260] sm:$0xff]  ;;  %v18671_v4 = vpack.c.bf16 %v6439_v24, %v6438_v2  ;;  %v6442_v38 = vld [vmem:[#allocation2 + $0x270] sm:$0xff] }
 0x40b   :  { %13162 = vmatprep.mubr.msk.bf16.mxu0 %vm5612_vm6, %v18592_v46  ;;  %v18675_v47 = vpack.c.bf16 %v6441_v30, %v6440_v13  ;;  %v6443_v27 = vld [vmem:[#allocation2 + $0x278] sm:$0xff]  ;;  %v6444_v35 = vld [vmem:[#allocation2 + $0x288] sm:$0xff]  ;;  %v6445_v22 = vld [vmem:[#allocation2 + $0x290] sm:$0xff] }
 0x40c   :  { %13087 = vmatmul.mubr.msk.bf16.gmra.mxu1 %vm5612_vm6, %v18592_v46  ;;  %v18683_v32 = vpack.c.bf16 %v6443_v27, %v6442_v38  ;;  %v18687_v20 = vpack.c.bf16 %v6445_v22, %v6444_v35  ;;  %v6446_v49 = vld [vmem:[#allocation2 + $0x2a0] sm:$0xff]  ;;  %v6447_v48 = vld [vmem:[#allocation2 + $0x2a8] sm:$0xff]  ;;  %v6448_v58 = vld [vmem:[#allocation2 + $0x2b8] sm:$0xff] }
 0x40d   :  { %13090 = vmatprep.mubr.msk.bf16.mxu1 %vm5612_vm6, %v18596_v7  ;;  %v6449_v63 = vld [vmem:[#allocation2 + $0x2c0] sm:$0xff]  ;;  %v18695_v51 = vpack.c.bf16 %v6447_v48, %v6446_v49  ;;  %v6450_v1 = vld [vmem:[#allocation2 + $0x2d0] sm:$0xff]  ;;  %v6451_v21 = vld [vmem:[#allocation2 + $0x2d8] sm:$0xff] }
 0x40e   :  { %v18699_v17 = vpack.c.bf16 %v6449_v63, %v6448_v58  ;;  %v6452_v19 = vld [vmem:[#allocation2 + $0x2e8] sm:$0xff]  ;;  %v6453_v50 = vld [vmem:[#allocation2 + $0x2f0] sm:$0xff]  ;;  %v18707_v45 = vpack.c.bf16 %v6451_v21, %v6450_v1  ;;  %v6454_v54 = vld [vmem:[#allocation2 + $0x300] sm:$0xff] }
 0x40f   :  { %v18711_v5 = vpack.c.bf16 %v6453_v50, %v6452_v19  ;;  %v6455_v62 = vld [vmem:[#allocation2 + $0x308] sm:$0xff]  ;;  %v6456_v36 = vld [vmem:[#allocation2 + $0x318] sm:$0xff]  ;;  %v6457_v41 = vld [vmem:[#allocation2 + $0x320] sm:$0xff] }
 0x410   :  { %v18719_v43 = vpack.c.bf16 %v6455_v62, %v6454_v54  ;;  %v18723_v15 = vpack.c.bf16 %v6457_v41, %v6456_v36  ;;  %v13843_v3 = vld [vmem:[%s21576_s4 + $0xf8] sm:$0xff]   ;;  %v7635_v53 = vld [vmem:[#allocation2 + $0x1] sm:$0xff]  ;;  %v7636_v10 = vld [vmem:[#allocation2 + $0x9] sm:$0xff] }
 0x411   :  { %13426 = vmatprep.subr.bf16.mxu0 %v13843_v3  ;;  %v6458_v31 = vld [vmem:[#allocation2 + $0x330] sm:$0xff]  ;;  %v7637_v11 = vld [vmem:[#allocation2 + $0x19] sm:$0xff]  ;;  %v7638_v14 = vld [vmem:[#allocation2 + $0x21] sm:$0xff] }
 0x412   :  { %13163 = vmatmul.mubr.msk.bf16.gmra.mxu0 %vm5612_vm6, %v18596_v7  ;;  %v7639_v12 = vld [vmem:[#allocation2 + $0x31] sm:$0xff]  ;;  %v7640_v52 = vld [vmem:[#allocation2 + $0x39] sm:$0xff]  ;;  %v18743_v8 = vpack.c.bf16 %v7638_v14, %v7637_v11  ;;  %v13841_v13 = vld [vmem:[%s21576_s4 + $0x88] sm:$0xff]  }
 0x413   :  { %13166 = vmatprep.mubr.msk.bf16.mxu0 %vm5612_vm6, %v18604_v26  ;;  %v18745_v0 = vpack.c.bf16 %v7640_v52, %v7639_v12  ;;  %v13840_v42 = vld [vmem:[%s21576_s4 + $0x90] sm:$0xff]   ;;  %v7643_v30 = vld [vmem:[#allocation2 + $0x61] sm:$0xff]  ;;  %v7645_v22 = vld [vmem:[#allocation2 + $0x79] sm:$0xff] }
 0x414   :  { %13091 = vmatmul.mubr.msk.bf16.gmra.mxu1 %vm5612_vm6, %v18604_v26  ;;  %v13844_v2 = vld [vmem:[%s21576_s4 + $0xf0] sm:$0xff]   ;;  %v13846_v35 = vld [vmem:[%s21576_s4 + $0xe0] sm:$0xff]   ;;  %v18789_v48 = vld [vmem:[%s21576_s4 + $0x58] sm:$0xff]  }
 0x415   :  { %13094 = vmatprep.mubr.msk.bf16.mxu1 %vm5612_vm6, %v18608_v25  ;;  %v7642_v24 = vld [vmem:[#allocation2 + $0x51] sm:$0xff]  ;;  %v7644_v38 = vld [vmem:[#allocation2 + $0x69] sm:$0xff]  ;;  %v7646_v49 = vld [vmem:[#allocation2 + $0x81] sm:$0xff] }
 0x416   :  { %v7647_v58 = vld [vmem:[#allocation2 + $0x91] sm:$0xff]  ;;  %v7648_v63 = vld [vmem:[#allocation2 + $0x99] sm:$0xff]  ;;  %v7651_v19 = vld [vmem:[#allocation2 + $0xc1] sm:$0xff] }
 0x417   :  { %v18793_v1 = vpack.c.bf16 %v7648_v63, %v7647_v58  ;;  %v7650_v21 = vld [vmem:[#allocation2 + $0xb1] sm:$0xff]  ;;  %v7652_v50 = vld [vmem:[#allocation2 + $0xc9] sm:$0xff]  ;;  %v7656_v41 = vld [vmem:[#allocation2 + $0xf9] sm:$0xff] }
 0x418   :  { %v18806_v62 = vpack.c.bf16 %v7652_v50, %v7651_v19  ;;  %v7655_v36 = vld [vmem:[#allocation2 + $0xf1] sm:$0xff]  ;;  %v7664_v14 = vld [vmem:[#allocation2 + $0x159] sm:$0xff]  ;;  %v7678_v19 = vld [vmem:[#allocation2 + $0x201] sm:$0xff] }
 0x419   :  { %v7663_v11 = vld [vmem:[#allocation2 + $0x151] sm:$0xff] }
 0x41a   :  { %13167 = vmatmul.mubr.msk.bf16.gmra.mxu0 %vm5612_vm6, %v18608_v25  ;;  %v18842_v52 = vpack.c.bf16 %v7664_v14, %v7663_v11 }
 0x41b   :  { %13170 = vmatprep.mubr.msk.bf16.mxu0 %vm5612_vm6, %v18616_v56 }
 0x41c   :  { %13095 = vmatmul.mubr.msk.bf16.gmra.mxu1 %vm5612_vm6, %v18616_v56 }
 0x41d   :  { %13098 = vmatprep.mubr.msk.bf16.mxu1 %vm5612_vm6, %v18620_v9 }
 0x422   :  { %13171 = vmatmul.mubr.msk.bf16.gmra.mxu0 %vm5612_vm6, %v18620_v9 }
 0x423   :  { %13174 = vmatprep.mubr.msk.bf16.mxu0 %vm5612_vm6, %v18628_v33 }
 0x424   :  { %13099 = vmatmul.mubr.msk.bf16.gmra.mxu1 %vm5612_vm6, %v18628_v33 }
 0x425   :  { %13102 = vmatprep.mubr.msk.bf16.mxu1 %vm5612_vm6, %v18632_v44 }
 0x42a   :  { %13175 = vmatmul.mubr.msk.bf16.gmra.mxu0 %vm5612_vm6, %v18632_v44 }
 0x42b   :  { %13178 = vmatprep.mubr.msk.bf16.mxu0 %vm5612_vm6, %v6478_v61  ;;  %v6459_v61 = vld [vmem:[#allocation2 + $0x338] sm:$0xff] }
 0x42c   :  { %13103 = vmatmul.mubr.msk.bf16.gmra.mxu1 %vm5612_vm6, %v18640_v37  ;;  %v18734_v34 = vpack.c.bf16 %v6459_v61, %v6458_v31  ;;  %v7660_v31 = vld [vmem:[#allocation2 + $0x129] sm:$0xff] }
 0x42d   :  { %13106 = vmatprep.mubr.msk.bf16.mxu1 %vm5612_vm6, %v6479_v39 }
 0x432   :  { %13179 = vmatmul.mubr.msk.bf16.gmra.mxu0 %vm5612_vm6, %v6479_v39  ;;  %v7707_v39 = vpack.c.bf16 %v7636_v10, %v7635_v53  ;;  %v18818_v53 = vpack.c.bf16 %v7656_v41, %v7655_v36  ;;  %v7659_v10 = vld [vmem:[#allocation2 + $0x121] sm:$0xff]  ;;  %v7680_v36 = vld [vmem:[#allocation2 + $0x219] sm:$0xff] }
 0x433   :  { %13182 = vmatprep.mubr.msk.bf16.mxu0 %vm5612_vm6, %v18648_v16 }
 0x434   :  { %13107 = vmatmul.mubr.msk.bf16.gmra.mxu1 %vm5612_vm6, %v18648_v16 }
 0x435   :  { %13110 = vmatprep.mubr.msk.bf16.mxu1 %vm5612_vm6, %v18651_v23 }
 0x43a   :  { %13183 = vmatmul.mubr.msk.bf16.gmra.mxu0 %vm5612_vm6, %v18651_v23 }
 0x43b   :  { %13186 = vmatprep.mubr.msk.bf16.mxu0 %vm5612_vm6, %v18659_v55 }
 0x43c   :  { %13111 = vmatmul.mubr.msk.bf16.gmra.mxu1 %vm5612_vm6, %v18659_v55 }
 0x43d   :  { %13114 = vmatprep.mubr.msk.bf16.mxu1 %vm5612_vm6, %v18663_v29 }
 0x442   :  { %13187 = vmatmul.mubr.msk.bf16.gmra.mxu0 %vm5612_vm6, %v18663_v29 }
 0x443   :  { %13190 = vmatprep.mubr.msk.bf16.mxu0 %vm5612_vm6, %v18671_v4 }
 0x444   :  { %13115 = vmatmul.mubr.msk.bf16.gmra.mxu1 %vm5612_vm6, %v18671_v4 }
 0x445   :  { %13118 = vmatprep.mubr.msk.bf16.mxu1 %vm5612_vm6, %v18675_v47 }
 0x44a   :  { %13191 = vmatmul.mubr.msk.bf16.gmra.mxu0 %vm5612_vm6, %v18675_v47 }
 0x44b   :  { %13194 = vmatprep.mubr.msk.bf16.mxu0 %vm5612_vm6, %v18683_v32 }
 0x44c   :  { %13119 = vmatmul.mubr.msk.bf16.gmra.mxu1 %vm5612_vm6, %v18683_v32 }
 0x44d   :  { %13122 = vmatprep.mubr.msk.bf16.mxu1 %vm5612_vm6, %v18687_v20 }
 0x452   :  { %13195 = vmatmul.mubr.msk.bf16.gmra.mxu0 %vm5612_vm6, %v18687_v20 }
 0x453   :  { %13198 = vmatprep.mubr.msk.bf16.mxu0 %vm5612_vm6, %v18695_v51 }
 0x454   :  { %13123 = vmatmul.mubr.msk.bf16.gmra.mxu1 %vm5612_vm6, %v18695_v51 }
 0x455   :  { %13126 = vmatprep.mubr.msk.bf16.mxu1 %vm5612_vm6, %v18699_v17 }
 0x45a   :  { %13199 = vmatmul.mubr.msk.bf16.gmra.mxu0 %vm5612_vm6, %v18699_v17 }
 0x45b   :  { %13202 = vmatprep.mubr.msk.bf16.mxu0 %vm5612_vm6, %v18707_v45 }
 0x45c   :  { %13127 = vmatmul.mubr.msk.bf16.gmra.mxu1 %vm5612_vm6, %v18707_v45 }
 0x45d   :  { %13130 = vmatprep.mubr.msk.bf16.mxu1 %vm5612_vm6, %v18711_v5 }
 0x462   :  { %13203 = vmatmul.mubr.msk.bf16.gmra.mxu0 %vm5612_vm6, %v18711_v5 }
 0x463   :  { %13206 = vmatprep.mubr.msk.bf16.mxu0 %vm5612_vm6, %v18719_v43 }
 0x464   :  { %13131 = vmatmul.mubr.msk.bf16.gmra.mxu1 %vm5612_vm6, %v18719_v43 }
 0x465   :  { %13134 = vmatprep.mubr.msk.bf16.mxu1 %vm5612_vm6, %v18723_v15 }
 0x46a   :  { %13207 = vmatmul.mubr.msk.bf16.gmra.mxu0 %vm5612_vm6, %v18723_v15 }
 0x46b   :  { %13290 = vmatprep.mubr.msk.bf16.mxu0 %vm5612_vm6, %v7707_v39  ;;  %v18830_v39 = vpack.c.bf16 %v7660_v31, %v7659_v10 }
 0x46c   :  { %13135 = vmatmul.mubr.msk.bf16.gmra.mxu1 %vm5612_vm6, %v18734_v34 }
 0x46d   :  { %13218 = vmatprep.mubr.msk.bf16.mxu1 %vm5612_vm6, %v18524_v6  ;;  %v7641_v6 = vld [vmem:[#allocation2 + $0x49] sm:$0xff] }
 0x46e   :  { %v18768_v27 = vpack.c.bf16 %v7642_v24, %v7641_v6  ;;  %v7665_v6 = vld [vmem:[#allocation2 + $0x169] sm:$0xff]  ;;  %v7666_v24 = vld [vmem:[#allocation2 + $0x171] sm:$0xff] }
 0x472   :  { %13291 = vmatmul.mubr.msk.bf16.vlgmr.msra.gmra.mxu0 %vm5612_vm6, %v18743_v8 }
 0x473   :  { %13294 = vmatprep.mubr.msk.bf16.mxu0 %vm5612_vm6, %v18745_v0  ;;  %13427 = vmatpush3.bf16.msra.mxu0 %v13843_v3 }
 0x474   :  { %13219 = vmatmul.mubr.msk.bf16.vlgmr.msra.gmra.mxu1 %vm5612_vm6, %v18535_v60  ;;  %13428 = vmatprep.subr.bf16.mxu0 %v13844_v2  ;;  %v13845_v60 = vld [vmem:[%s21576_s4 + $0xe8] sm:$0xff]  }
 0x475   :  { %13222 = vmatprep.mubr.msk.bf16.mxu1 %vm5612_vm6, %v18553_v59  ;;  %13355 = vmatpush3.bf16.msra.mxu1 %v18587_v28  ;;  %v18770_v59 = vpack.c.bf16 %v7644_v38, %v7643_v30  ;;  %v13842_v28 = vld [vmem:[%s21576_s4 + $0x80] sm:$0xff]   ;;  %v18852_v38 = vpack.c.bf16 %v7666_v24, %v7665_v6 }
 0x476   :  { %13356 = vmatprep.subr.bf16.mxu1 %v13840_v42  ;;  %v7683_v24 = vld [vmem:[#allocation2 + $0x241] sm:$0xff] }
 0x477   :  { %13429 = vmatpush3.bf16.msra.mxu0 %v13844_v2  ;;  %v7672_v2 = vld [vmem:[#allocation2 + $0x1b9] sm:$0xff] }
 0x478   :  { %13430 = vmatprep.subr.bf16.mxu0 %v13845_v60 }
 0x479   :  { %13357 = vmatpush3.bf16.msra.mxu1 %v13840_v42  ;;  %v7671_v42 = vld [vmem:[#allocation2 + $0x1b1] sm:$0xff] }
 0x47a   :  { %13358 = vmatprep.subr.bf16.mxu1 %v13841_v13  ;;  %13295 = vmatmul.mubr.msk.bf16.gmra.mxu0 %vm5612_vm6, %v18768_v27  ;;  %v7723_v30 = vpack.c.bf16 %v7672_v2, %v7671_v42  ;;  %v7682_v42 = vld [vmem:[#allocation2 + $0x231] sm:$0xff] }
 0x47b   :  { %13298 = vmatprep.mubr.msk.bf16.mxu0 %vm5612_vm6, %v18770_v59  ;;  %13431 = vmatpush3.bf16.msra.mxu0 %v13845_v60  ;;  %v7675_v60 = vld [vmem:[#allocation2 + $0x1e1] sm:$0xff] }
 0x47c   :  { %13223 = vmatmul.mubr.msk.bf16.gmra.mxu1 %vm5612_vm6, %v18560_v18  ;;  %13432 = vmatprep.subr.bf16.mxu0 %v13846_v35  ;;  %v18791_v18 = vpack.c.bf16 %v7646_v49, %v7645_v22 }
 0x47d   :  { %13226 = vmatprep.mubr.msk.bf16.mxu1 %vm5612_vm6, %v18571_v57  ;;  %13359 = vmatpush3.bf16.msra.mxu1 %v13841_v13  ;;  %v7649_v57 = vld [vmem:[#allocation2 + $0xa9] sm:$0xff] }
 0x47e   :  { %13360 = vmatprep.subr.bf16.mxu1 %v13842_v28  ;;  %v18804_v54 = vpack.c.bf16 %v7650_v21, %v7649_v57  ;;  %v7677_v21 = vld [vmem:[#allocation2 + $0x1f9] sm:$0xff] }
 0x47f   :  { %13433 = vmatpush3.bf16.msra.mxu0 %v13846_v35 }
 0x481   :  { %13361 = vmatpush3.bf16.msra.mxu1 %v13842_v28  ;;  %v7676_v28 = vld [vmem:[#allocation2 + $0x1e9] sm:$0xff] }
 0x482   :  { %13498 = vmatprep.subr.bf16.mxu1 %v18789_v48  ;;  %13299 = vmatmul.mubr.msk.bf16.gmra.mxu0 %vm5612_vm6, %v18791_v18  ;;  %v18862_v22 = vpack.c.bf16 %v7676_v28, %v7675_v60 }
 0x483   :  { %13302 = vmatprep.mubr.msk.bf16.mxu0 %vm5612_vm6, %v18793_v1 }
 0x484   :  { %13227 = vmatmul.mubr.msk.bf16.gmra.mxu1 %vm5612_vm6, %v18578_v40  ;;  %v7653_v40 = vld [vmem:[#allocation2 + $0xd9] sm:$0xff] }
 0x485   :  { %13230 = vmatprep.mubr.msk.bf16.mxu1 %vm5612_vm6, %v18592_v46  ;;  %v7654_v46 = vld [vmem:[#allocation2 + $0xe1] sm:$0xff] }
 0x486   :  { %v18816_v3 = vpack.c.bf16 %v7654_v46, %v7653_v40  ;;  %v7679_v46 = vld [vmem:[#allocation2 + $0x211] sm:$0xff] }
 0x487   :  { %v18880_v31 = vpack.c.bf16 %v7680_v36, %v7679_v46 }
 0x48a   :  { %13303 = vmatmul.mubr.msk.bf16.gmra.mxu0 %vm5612_vm6, %v18804_v54 }
 0x48b   :  { %13306 = vmatprep.mubr.msk.bf16.mxu0 %vm5612_vm6, %v18806_v62 }
 0x48c   :  { %13231 = vmatmul.mubr.msk.bf16.gmra.mxu1 %vm5612_vm6, %v18596_v7  ;;  %v7657_v7 = vld [vmem:[#allocation2 + $0x109] sm:$0xff] }
 0x48d   :  { %13234 = vmatprep.mubr.msk.bf16.mxu1 %vm5612_vm6, %v18604_v26  ;;  %v7658_v26 = vld [vmem:[#allocation2 + $0x111] sm:$0xff] }
 0x48e   :  { %v18828_v61 = vpack.c.bf16 %v7658_v26, %v7657_v7  ;;  %v18878_v26 = vpack.c.bf16 %v7678_v19, %v7677_v21  ;;  %v7685_v19 = vld [vmem:[#allocation2 + $0x259] sm:$0xff] }
 0x492   :  { %13307 = vmatmul.mubr.msk.bf16.gmra.mxu0 %vm5612_vm6, %v18816_v3 }
 0x493   :  { %13310 = vmatprep.mubr.msk.bf16.mxu0 %vm5612_vm6, %v18818_v53 }
 0x494   :  { %13235 = vmatmul.mubr.msk.bf16.gmra.mxu1 %vm5612_vm6, %v18608_v25  ;;  %v7661_v25 = vld [vmem:[#allocation2 + $0x139] sm:$0xff] }
 0x495   :  { %13238 = vmatprep.mubr.msk.bf16.mxu1 %vm5612_vm6, %v18616_v56  ;;  %v7662_v56 = vld [vmem:[#allocation2 + $0x141] sm:$0xff] }
 0x496   :  { %v18840_v12 = vpack.c.bf16 %v7662_v56, %v7661_v25 }
 0x49a   :  { %13311 = vmatmul.mubr.msk.bf16.gmra.mxu0 %vm5612_vm6, %v18828_v61 }
 0x49b   :  { %13314 = vmatprep.mubr.msk.bf16.mxu0 %vm5612_vm6, %v18830_v39 }
 0x49c   :  { %13239 = vmatmul.mubr.msk.bf16.gmra.mxu1 %vm5612_vm6, %v18620_v9  ;;  %v6424_v9 = vld [vmem:[#allocation2 + $0x198] sm:$0xff] }
 0x49d   :  { %13242 = vmatprep.mubr.msk.bf16.mxu1 %vm5612_vm6, %v18628_v33  ;;  %v6425_v33 = vld [vmem:[#allocation2 + $0x1a0] sm:$0xff] }
 0x49e   :  { %v7241_v13 = vpack.c.bf16 %v6425_v33, %v6424_v9  ;;  %v7681_v33 = vld [vmem:[#allocation2 + $0x229] sm:$0xff] }
 0x4a2   :  { %13315 = vmatmul.mubr.msk.bf16.gmra.mxu0 %vm5612_vm6, %v18840_v12 }
 0x4a3   :  { %13318 = vmatprep.mubr.msk.bf16.mxu0 %vm5612_vm6, %v18842_v52 }
 0x4a4   :  { %13243 = vmatmul.mubr.msk.bf16.gmra.mxu1 %vm5612_vm6, %v18632_v44  ;;  %v7673_v44 = vld [vmem:[#allocation2 + $0x1c9] sm:$0xff] }
 0x4a5   :  { %13246 = vmatprep.mubr.msk.bf16.mxu1 %vm5612_vm6, %v18640_v37  ;;  %v7674_v37 = vld [vmem:[#allocation2 + $0x1d1] sm:$0xff] }
 0x4a6   :  { %v18860_v35 = vpack.c.bf16 %v7674_v37, %v7673_v44  ;;  %v18898_v37 = vpack.c.bf16 %v7682_v42, %v7681_v33 }
 0x4aa   :  { %13319 = vmatmul.mubr.msk.bf16.gmra.mxu0 %vm5612_vm6, %v18852_v38 }
 0x4ab   :  { %13322 = vmatprep.mubr.msk.bf16.mxu0 %vm5612_vm6, %v7723_v30 }
 0x4ac   :  { %13247 = vmatmul.mubr.msk.bf16.gmra.mxu1 %vm5612_vm6, %v7241_v13  ;;  %v7684_v13 = vld [vmem:[#allocation2 + $0x249] sm:$0xff] }
 0x4ad   :  { %13250 = vmatprep.mubr.msk.bf16.mxu1 %vm5612_vm6, %v18648_v16  ;;  %v18900_v28 = vpack.c.bf16 %v7684_v13, %v7683_v24 }
 0x4b2   :  { %v13148_v49 = vpop.f32.mrf.mxu0  ;;  %13323 = vmatmul.mubr.msk.bf16.gmra.mxu0 %vm5612_vm6, %v18860_v35 }
 0x4b3   :  { %13326 = vmatprep.mubr.msk.bf16.mxu0 %vm5612_vm6, %v18862_v22 }
 0x4b4   :  { %v13076_v58 = vpop.f32.mrf.mxu1  ;;  %13251 = vmatmul.mubr.msk.bf16.gmra.mxu1 %vm5612_vm6, %v18651_v23  ;;  %v6986_v63 = vpop.f32.mrf.mxu0 }
 0x4b5   :  { %v18870_v16 = vadd.f32 %v13148_v49, %v13076_v58  ;;  %13254 = vmatprep.mubr.msk.bf16.mxu1 %vm5612_vm6, %v18659_v55 }
 0x4b6   :  { %v6667_v57 = vpop.f32.mrf.mxu1  ;;  %v13149_v40 = vpop.f32.mrf.mxu0 }
 0x4b7   :  { %v18874_v50 = vadd.f32 %v6986_v63, %v6667_v57 }
 0x4b8   :  { %v13077_v41 = vpop.f32.mrf.mxu1  ;;  %v6989_v23 = vpop.f32.mrf.mxu0 }
 0x4b9   :  { %v18876_v7 = vadd.f32 %v13149_v40, %v13077_v41  ;;  %v7686_v40 = vld [vmem:[#allocation2 + $0x261] sm:$0xff]  ;;  %v7687_v41 = vld [vmem:[#allocation2 + $0x271] sm:$0xff] }
 0x4ba   :  { %v6670_v10 = vpop.f32.mrf.mxu1  ;;  %v13152_v55 = vpop.f32.mrf.mxu0  ;;  %13327 = vmatmul.mubr.msk.bf16.gmra.mxu0 %vm5612_vm6, %v18878_v26 }
 0x4bb   :  { %v18882_v25 = vadd.f32 %v6989_v23, %v6670_v10  ;;  %13330 = vmatprep.mubr.msk.bf16.mxu0 %vm5612_vm6, %v18880_v31  ;;  %v7688_v23 = vld [vmem:[#allocation2 + $0x279] sm:$0xff] }
 0x4bc   :  { %v13080_v56 = vpop.f32.mrf.mxu1  ;;  %13255 = vmatmul.mubr.msk.bf16.gmra.mxu1 %vm5612_vm6, %v18663_v29  ;;  %v7002_v14 = vpop.f32.mrf.mxu0 }
 0x4bd   :  { %v18890_v11 = vadd.f32 %v13152_v55, %v13080_v56  ;;  %13258 = vmatprep.mubr.msk.bf16.mxu1 %vm5612_vm6, %v18671_v4  ;;  %v18918_v56 = vpack.c.bf16 %v7686_v40, %v7685_v19 }
 0x4be   :  { %v6683_v9 = vpop.f32.mrf.mxu1  ;;  %v13153_v6 = vpop.f32.mrf.mxu0 }
 0x4bf   :  { %v18894_v2 = vadd.f32 %v7002_v14, %v6683_v9  ;;  %v18920_v9 = vpack.c.bf16 %v7688_v23, %v7687_v41 }
 0x4c0   :  { %v13081_v30 = vpop.f32.mrf.mxu1  ;;  %v7005_v29 = vpop.f32.mrf.mxu0 }
 0x4c1   :  { %v18896_v44 = vadd.f32 %v13153_v6, %v13081_v30  ;;  %v7689_v30 = vld [vmem:[#allocation2 + $0x289] sm:$0xff] }
 0x4c2   :  { %v6686_v60 = vpop.f32.mrf.mxu1  ;;  %v13156_v4 = vpop.f32.mrf.mxu0  ;;  %13331 = vmatmul.mubr.msk.bf16.gmra.mxu0 %vm5612_vm6, %v18898_v37 }
 0x4c3   :  { %v18902_v49 = vadd.f32 %v7005_v29, %v6686_v60  ;;  %13334 = vmatprep.mubr.msk.bf16.mxu0 %vm5612_vm6, %v18900_v28  ;;  %v7690_v29 = vld [vmem:[#allocation2 + $0x291] sm:$0xff] }
 0x4c4   :  { %v13084_v58 = vpop.f32.mrf.mxu1  ;;  %13259 = vmatmul.mubr.msk.bf16.gmra.mxu1 %vm5612_vm6, %v18675_v47  ;;  %v7018_v57 = vpop.f32.mrf.mxu0  ;;  %v18938_v40 = vpack.c.bf16 %v7690_v29, %v7689_v30  ;;  %v7695_v29 = vld [vmem:[#allocation2 + $0x2d1] sm:$0xff] }
 0x4c5   :  { %v18910_v63 = vadd.f32 %v13156_v4, %v13084_v58  ;;  %13262 = vmatprep.mubr.msk.bf16.mxu1 %vm5612_vm6, %v18683_v32  ;;  %v7691_v58 = vld [vmem:[#allocation2 + $0x2a1] sm:$0xff] }
 0x4c6   :  { %v6699_v21 = vpop.f32.mrf.mxu1  ;;  %v13157_v36 = vpop.f32.mrf.mxu0 }
 0x4c7   :  { %v18914_v46 = vadd.f32 %v7018_v57, %v6699_v21  ;;  %v7692_v57 = vld [vmem:[#allocation2 + $0x2a9] sm:$0xff] }
 0x4c8   :  { %v13085_v10 = vpop.f32.mrf.mxu1  ;;  %v7021_v47 = vpop.f32.mrf.mxu0  ;;  %v18940_v41 = vpack.c.bf16 %v7692_v57, %v7691_v58 }
 0x4c9   :  { %v18916_v55 = vadd.f32 %v13157_v36, %v13085_v10 }
 0x4ca   :  { %v6702_v14 = vpop.f32.mrf.mxu1  ;;  %v13160_v32 = vpop.f32.mrf.mxu0  ;;  %13335 = vmatmul.mubr.msk.bf16.gmra.mxu0 %vm5612_vm6, %v18918_v56 }
 0x4cb   :  { %v18922_v33 = vadd.f32 %v7021_v47, %v6702_v14  ;;  %13338 = vmatprep.mubr.msk.bf16.mxu0 %vm5612_vm6, %v18920_v9 }
 0x4cc   :  { %v13088_v42 = vpop.f32.mrf.mxu1  ;;  %13263 = vmatmul.mubr.msk.bf16.gmra.mxu1 %vm5612_vm6, %v18687_v20  ;;  %v7034_v24 = vpop.f32.mrf.mxu0 }
 0x4cd   :  { %v18930_v6 = vadd.f32 %v13160_v32, %v13088_v42  ;;  %13266 = vmatprep.mubr.msk.bf16.mxu1 %vm5612_vm6, %v18695_v51  ;;  %v7693_v42 = vld [vmem:[#allocation2 + $0x2b9] sm:$0xff] }
 0x4ce   :  { %v6715_v13 = vpop.f32.mrf.mxu1  ;;  %v13161_v4 = vpop.f32.mrf.mxu0 }
 0x4cf   :  { %v18934_v60 = vadd.f32 %v7034_v24, %v6715_v13  ;;  %v7694_v24 = vld [vmem:[#allocation2 + $0x2c1] sm:$0xff] }
 0x4d0   :  { %v13089_v21 = vpop.f32.mrf.mxu1  ;;  %v7037_v20 = vpop.f32.mrf.mxu0 }
 0x4d1   :  { %v18936_v19 = vadd.f32 %v13161_v4, %v13089_v21  ;;  %v7696_v4 = vld [vmem:[#allocation2 + $0x2d9] sm:$0xff]  ;;  %v18958_v21 = vpack.c.bf16 %v7694_v24, %v7693_v42  ;;  %v7697_v24 = vld [vmem:[#allocation2 + $0x2e9] sm:$0xff] }
 0x4d2   :  { %v6718_v36 = vpop.f32.mrf.mxu1  ;;  %v13164_v51 = vpop.f32.mrf.mxu0  ;;  %13339 = vmatmul.mubr.msk.bf16.gmra.mxu0 %vm5612_vm6, %v18938_v40 }
 0x4d3   :  { %v18942_v23 = vadd.f32 %v7037_v20, %v6718_v36  ;;  %13342 = vmatprep.mubr.msk.bf16.mxu0 %vm5612_vm6, %v18940_v41  ;;  %v18960_v36 = vpack.c.bf16 %v7696_v4, %v7695_v29 }
 0x4d4   :  { %v13092_v10 = vpop.f32.mrf.mxu1  ;;  %13267 = vmatmul.mubr.msk.bf16.gmra.mxu1 %vm5612_vm6, %v18699_v17  ;;  %v7050_v14 = vpop.f32.mrf.mxu0 }
 0x4d5   :  { %v18950_v47 = vadd.f32 %v13164_v51, %v13092_v10  ;;  %13270 = vmatprep.mubr.msk.bf16.mxu1 %vm5612_vm6, %v18707_v45 }
 0x4d6   :  { %v6731_v32 = vpop.f32.mrf.mxu1  ;;  %v13165_v30 = vpop.f32.mrf.mxu0 }
 0x4d7   :  { %v18954_v13 = vadd.f32 %v7050_v14, %v6731_v32 }
 0x4d8   :  { %v13093_v58 = vpop.f32.mrf.mxu1  ;;  %v7053_v17 = vpop.f32.mrf.mxu0 }
 0x4d9   :  { %v18956_v57 = vadd.f32 %v13165_v30, %v13093_v58  ;;  %v7698_v30 = vld [vmem:[#allocation2 + $0x2f1] sm:$0xff]  ;;  %v7699_v58 = vld [vmem:[#allocation2 + $0x301] sm:$0xff] }
 0x4da   :  { %v6734_v20 = vpop.f32.mrf.mxu1  ;;  %v13168_v45 = vpop.f32.mrf.mxu0  ;;  %13343 = vmatmul.mubr.msk.bf16.gmra.mxu0 %vm5612_vm6, %v18958_v21 }
 0x4db   :  { %22209 = vst [vmem:[#allocation24_spill] sm:$0xff] %v18956_v57  ;;  %v18962_v51 = vadd.f32 %v7053_v17, %v6734_v20  ;;  %13346 = vmatprep.mubr.msk.bf16.mxu0 %vm5612_vm6, %v18960_v36  ;;  %v7700_v17 = vld [vmem:[#allocation2 + $0x309] sm:$0xff]  ;;  %v18978_v57 = vpack.c.bf16 %v7698_v30, %v7697_v24 }
 0x4dc   :  { %v13096_v10 = vpop.f32.mrf.mxu1  ;;  %13271 = vmatmul.mubr.msk.bf16.gmra.mxu1 %vm5612_vm6, %v18711_v5  ;;  %v7066_v32 = vpop.f32.mrf.mxu0 }
 0x4dd   :  { %22210 = vst [vmem:[#allocation26_spill] sm:$0xff] %v18962_v51  ;;  %v18970_v14 = vadd.f32 %v13168_v45, %v13096_v10  ;;  %13274 = vmatprep.mubr.msk.bf16.mxu1 %vm5612_vm6, %v18719_v43  ;;  %22214 = vst [vmem:[#allocation25_spill] sm:$0xff] %v18978_v57  ;;  %v18980_v10 = vpack.c.bf16 %v7700_v17, %v7699_v58  ;;  %v6461_v58 = vld [vmem:[#allocation2 + $0x350] sm:$0xff] }
 0x4de   :  { %v6747_v42 = vpop.f32.mrf.mxu1  ;;  %v13169_v4 = vpop.f32.mrf.mxu0 }
 0x4df   :  { %22211 = vst [vmem:[#allocation63_spill] sm:$0xff] %v18970_v14  ;;  %v18974_v29 = vadd.f32 %v7066_v32, %v6747_v42  ;;  %22215 = vst [vmem:[#allocation28_spill] sm:$0xff] %v18980_v10  ;;  %v13851_v32 = vld [vmem:[%s21576_s4 + $0xb8] sm:$0xff]  }
 0x4e0   :  { %v13097_v20 = vpop.f32.mrf.mxu1  ;;  %v7069_v5 = vpop.f32.mrf.mxu0  ;;  %13570 = vmatprep.subr.bf16.mxu0 %v13851_v32 }
 0x4e1   :  { %22212 = vst [vmem:[#allocation22_spill] sm:$0xff] %v18974_v29  ;;  %v18976_v51 = vadd.f32 %v13169_v4, %v13097_v20  ;;  %v6460_v4 = vld [vmem:[#allocation2 + $0x348] sm:$0xff]  ;;  %v7701_v20 = vld [vmem:[#allocation2 + $0x319] sm:$0xff] }
 0x4e2   :  { %v6750_v45 = vpop.f32.mrf.mxu1  ;;  %v13172_v43 = vpop.f32.mrf.mxu0  ;;  %13347 = vmatmul.mubr.msk.bf16.gmra.mxu0 %vm5612_vm6, %v18978_v57 }
 0x4e3   :  { %22213 = vst [vmem:[#allocation64_spill] sm:$0xff] %v18976_v51  ;;  %v18982_v14 = vadd.f32 %v7069_v5, %v6750_v45  ;;  %13350 = vmatprep.mubr.msk.bf16.mxu0 %vm5612_vm6, %v18980_v10  ;;  %v7702_v5 = vld [vmem:[#allocation2 + $0x321] sm:$0xff] }
 0x4e4   :  { %v13100_v42 = vpop.f32.mrf.mxu1  ;;  %13275 = vmatmul.mubr.msk.bf16.gmra.mxu1 %vm5612_vm6, %v18723_v15  ;;  %v7082_v30 = vpop.f32.mrf.mxu0  ;;  %v7242_v15 = vpack.c.bf16 %v6461_v58, %v6460_v4 }
 0x4e5   :  { %22216 = vst [vmem:[#allocation27_spill] sm:$0xff] %v18982_v14  ;;  %v18993_v24 = vadd.f32 %v13172_v43, %v13100_v42  ;;  %13278 = vmatprep.mubr.msk.bf16.mxu1 %vm5612_vm6, %v18734_v34  ;;  %v19001_v43 = vpack.c.bf16 %v7702_v5, %v7701_v20 }
 0x4e6   :  { %v6763_v17 = vpop.f32.mrf.mxu1  ;;  %v13173_v14 = vpop.f32.mrf.mxu0 }
 0x4e7   :  { %22217 = vst [vmem:[#allocation66_spill] sm:$0xff] %v18993_v24  ;;  %v18997_v45 = vadd.f32 %v7082_v30, %v6763_v17 }
 0x4e8   :  { %v13101_v51 = vpop.f32.mrf.mxu1  ;;  %v7085_v10 = vpop.f32.mrf.mxu0 }
 0x4e9   :  { %v18999_v29 = vadd.f32 %v13173_v14, %v13101_v51 }
 0x4ea   :  { %v6766_v42 = vpop.f32.mrf.mxu1  ;;  %v13176_v34 = vpop.f32.mrf.mxu0  ;;  %13351 = vmatmul.mubr.msk.bf16.gmra.mxu0 %vm5612_vm6, %v19001_v43 }
 0x4eb   :  { %v19003_v24 = vadd.f32 %v7085_v10, %v6766_v42  ;;  %13434 = vmatprep.mubr.msk.bf16.mxu0 %vm5612_vm6, %v18745_v0 }
 0x4ec   :  { %v13104_v57 = vpop.f32.mrf.mxu1  ;;  %13279 = vmatmul.mubr.msk.bf16.gmra.mxu1 %vm5612_vm6, %v7242_v15  ;;  %v7098_v51 = vpop.f32.mrf.mxu0  ;;  %v13848_v15 = vld [vmem:[%s21576_s4 + $0x50] sm:$0xff]  }
 0x4ed   :  { %v19010_v30 = vadd.f32 %v13176_v34, %v13104_v57  ;;  %13362 = vmatprep.mubr.msk.bf16.mxu1 %vm5612_vm6, %v18743_v8  ;;  %v13852_v8 = vld [vmem:[%s21576_s4 + $0xb0] sm:$0xff]  }
 0x4ee   :  { %v6779_v14 = vpop.f32.mrf.mxu1  ;;  %v13177_v10 = vpop.f32.mrf.mxu0 }
 0x4ef   :  { %v19014_v4 = vadd.f32 %v7098_v51, %v6779_v14 }
 0x4f0   :  { %v13105_v58 = vpop.f32.mrf.mxu1  ;;  %v7101_v20 = vpop.f32.mrf.mxu0 }
 0x4f1   :  { %v19016_v17 = vadd.f32 %v13177_v10, %v13105_v58  ;;  %v13849_v58 = vld [vmem:[%s21576_s4 + $0x48] sm:$0xff]  }
 0x4f2   :  { %v6782_v5 = vpop.f32.mrf.mxu1  ;;  %v13180_v57 = vpop.f32.mrf.mxu0  ;;  %13435 = vmatmul.mubr.msk.bf16.vlgmr.msra.gmra.mxu0 %vm5612_vm6, %v18768_v27 }
 0x4f3   :  { %v19021_v42 = vadd.f32 %v7101_v20, %v6782_v5  ;;  %13438 = vmatprep.mubr.msk.bf16.mxu0 %vm5612_vm6, %v18770_v59  ;;  %13571 = vmatpush3.bf16.msra.mxu0 %v13851_v32  ;;  %v13853_v5 = vld [vmem:[%s21576_s4 + $0xa8] sm:$0xff]  }
 0x4f4   :  { %v13108_v34 = vpop.f32.mrf.mxu1  ;;  %13363 = vmatmul.mubr.msk.bf16.vlgmr.msra.gmra.mxu1 %vm5612_vm6, %v18745_v0  ;;  %v7114_v14 = vpop.f32.mrf.mxu0  ;;  %13572 = vmatprep.subr.bf16.mxu0 %v13852_v8 }
 0x4f5   :  { %v19032_v51 = vadd.f32 %v13180_v57, %v13108_v34  ;;  %13366 = vmatprep.mubr.msk.bf16.mxu1 %vm5612_vm6, %v18768_v27  ;;  %13499 = vmatpush3.bf16.msra.mxu1 %v18789_v48 }
 0x4f6   :  { %v6795_v10 = vpop.f32.mrf.mxu1  ;;  %13500 = vmatprep.subr.bf16.mxu1 %v13848_v15  ;;  %v13181_v0 = vpop.f32.mrf.mxu0 }
 0x4f7   :  { %22218 = vst [vmem:[#allocation68_spill] sm:$0xff] %v19032_v51  ;;  %v19040_v20 = vadd.f32 %v7114_v14, %v6795_v10  ;;  %v13850_v51 = vld [vmem:[%s21576_s4 + $0x40] sm:$0xff]   ;;  %13573 = vmatpush3.bf16.msra.mxu0 %v13852_v8 }
 0x4f8   :  { %v13109_v57 = vpop.f32.mrf.mxu1  ;;  %v7117_v27 = vpop.f32.mrf.mxu0  ;;  %13574 = vmatprep.subr.bf16.mxu0 %v13853_v5  ;;  %v13854_v10 = vld [vmem:[%s21576_s4 + $0xa0] sm:$0xff]  }
 0x4f9   :  { %v19045_v34 = vadd.f32 %v13181_v0, %v13109_v57  ;;  %13501 = vmatpush3.bf16.msra.mxu1 %v13848_v15 }
 0x4fa   :  { %v6798_v48 = vpop.f32.mrf.mxu1  ;;  %13502 = vmatprep.subr.bf16.mxu1 %v13849_v58  ;;  %v13184_v14 = vpop.f32.mrf.mxu0  ;;  %13439 = vmatmul.mubr.msk.bf16.gmra.mxu0 %vm5612_vm6, %v18791_v18 }
 0x4fb   :  { %v19050_v32 = vadd.f32 %v7117_v27, %v6798_v48  ;;  %13442 = vmatprep.mubr.msk.bf16.mxu0 %vm5612_vm6, %v18793_v1  ;;  %13575 = vmatpush3.bf16.msra.mxu0 %v13853_v5  ;;  %v19068_v27 = vld [vmem:[%s21576_s4 + $0x118] sm:$0xff]  }
 0x4fc   :  { %v13112_v0 = vpop.f32.mrf.mxu1  ;;  %13367 = vmatmul.mubr.msk.bf16.gmra.mxu1 %vm5612_vm6, %v18770_v59  ;;  %v7130_v8 = vpop.f32.mrf.mxu0  ;;  %13576 = vmatprep.subr.bf16.mxu0 %v13854_v10 }
 0x4fd   :  { %22219 = vst [vmem:[#allocation65_spill] sm:$0xff] %v19050_v32  ;;  %v19061_v15 = vadd.f32 %v13184_v14, %v13112_v0  ;;  %13370 = vmatprep.mubr.msk.bf16.mxu1 %vm5612_vm6, %v18791_v18  ;;  %13503 = vmatpush3.bf16.msra.mxu1 %v13849_v58 }
 0x4fe   :  { %v6811_v57 = vpop.f32.mrf.mxu1  ;;  %13504 = vmatprep.subr.bf16.mxu1 %v13850_v51  ;;  %v13185_v59 = vpop.f32.mrf.mxu0 }
 0x4ff   :  { %22220 = vst [vmem:[#allocation67_spill] sm:$0xff] %v19061_v15  ;;  %v19070_v48 = vadd.f32 %v7130_v8, %v6811_v57  ;;  %13577 = vmatpush3.bf16.msra.mxu0 %v13854_v10 }
 0x500   :  { %v13113_v32 = vpop.f32.mrf.mxu1  ;;  %v7133_v0 = vpop.f32.mrf.mxu0 }
 0x501   :  { %v19072_v14 = vadd.f32 %v13185_v59, %v13113_v32  ;;  %13505 = vmatpush3.bf16.msra.mxu1 %v13850_v51 }
 0x502   :  { %v6814_v15 = vpop.f32.mrf.mxu1  ;;  %13642 = vmatprep.subr.bf16.mxu1 %v19068_v27  ;;  %v13188_v58 = vpop.f32.mrf.mxu0  ;;  %13443 = vmatmul.mubr.msk.bf16.gmra.mxu0 %vm5612_vm6, %v18804_v54 }
 0x503   :  { %22221 = vst [vmem:[#allocation29_spill] sm:$0xff] %v19072_v14  ;;  %v19075_v18 = vadd.f32 %v7133_v0, %v6814_v15  ;;  %13446 = vmatprep.mubr.msk.bf16.mxu0 %vm5612_vm6, %v18806_v62 }
 0x504   :  { %v13116_v5 = vpop.f32.mrf.mxu1  ;;  %13371 = vmatmul.mubr.msk.bf16.gmra.mxu1 %vm5612_vm6, %v18793_v1  ;;  %v7146_v51 = vpop.f32.mrf.mxu0 }
 0x505   :  { %22222 = vst [vmem:[#allocation30_spill] sm:$0xff] %v19075_v18  ;;  %v19083_v32 = vadd.f32 %v13188_v58, %v13116_v5  ;;  %13374 = vmatprep.mubr.msk.bf16.mxu1 %vm5612_vm6, %v18804_v54 }
 0x506   :  { %v6827_v10 = vpop.f32.mrf.mxu1  ;;  %v13189_v8 = vpop.f32.mrf.mxu0 }
 0x507   :  { %v19087_v15 = vadd.f32 %v7146_v51, %v6827_v10 }
 0x508   :  { %v13117_v57 = vpop.f32.mrf.mxu1  ;;  %v7149_v0 = vpop.f32.mrf.mxu0 }
 0x509   :  { %v19089_v59 = vadd.f32 %v13189_v8, %v13117_v57 }
 0x50a   :  { %v6830_v18 = vpop.f32.mrf.mxu1  ;;  %v13192_v1 = vpop.f32.mrf.mxu0  ;;  %13447 = vmatmul.mubr.msk.bf16.gmra.mxu0 %vm5612_vm6, %v18816_v3 }
 0x50b   :  { %22223 = vst [vmem:[#allocation70_spill] sm:$0xff] %v19089_v59  ;;  %v19091_v14 = vadd.f32 %v7149_v0, %v6830_v18  ;;  %13450 = vmatprep.mubr.msk.bf16.mxu0 %vm5612_vm6, %v18818_v53 }
 0x50c   :  { %v13120_v58 = vpop.f32.mrf.mxu1  ;;  %13375 = vmatmul.mubr.msk.bf16.gmra.mxu1 %vm5612_vm6, %v18806_v62  ;;  %v7162_v5 = vpop.f32.mrf.mxu0 }
 0x50d   :  { %22224 = vst [vmem:[#allocation72_spill] sm:$0xff] %v19091_v14  ;;  %v19099_v54 = vadd.f32 %v13192_v1, %v13120_v58  ;;  %13378 = vmatprep.mubr.msk.bf16.mxu1 %vm5612_vm6, %v18816_v3 }
 0x50e   :  { %v6843_v51 = vpop.f32.mrf.mxu1  ;;  %v13193_v10 = vpop.f32.mrf.mxu0 }
 0x50f   :  { %v19103_v18 = vadd.f32 %v7162_v5, %v6843_v51 }
 0x510   :  { %v13121_v8 = vpop.f32.mrf.mxu1  ;;  %v7165_v0 = vpop.f32.mrf.mxu0 }
 0x511   :  { %v19105_v57 = vadd.f32 %v13193_v10, %v13121_v8 }
 0x512   :  { %v6846_v14 = vpop.f32.mrf.mxu1  ;;  %v13196_v62 = vpop.f32.mrf.mxu0  ;;  %13451 = vmatmul.mubr.msk.bf16.gmra.mxu0 %vm5612_vm6, %v18828_v61 }
 0x513   :  { %22225 = vst [vmem:[#allocation69_spill] sm:$0xff] %v19105_v57  ;;  %v19107_v59 = vadd.f32 %v7165_v0, %v6846_v14  ;;  %13454 = vmatprep.mubr.msk.bf16.mxu0 %vm5612_vm6, %v18830_v39 }
 0x514   :  { %v13124_v1 = vpop.f32.mrf.mxu1  ;;  %13379 = vmatmul.mubr.msk.bf16.gmra.mxu1 %vm5612_vm6, %v18818_v53  ;;  %v7178_v58 = vpop.f32.mrf.mxu0 }
 0x515   :  { %22226 = vst [vmem:[#allocation71_spill] sm:$0xff] %v19107_v59  ;;  %v19115_v3 = vadd.f32 %v13196_v62, %v13124_v1  ;;  %13382 = vmatprep.mubr.msk.bf16.mxu1 %vm5612_vm6, %v18828_v61 }
 0x516   :  { %v6859_v5 = vpop.f32.mrf.mxu1  ;;  %v13197_v51 = vpop.f32.mrf.mxu0 }
 0x517   :  { %22227 = vst [vmem:[#allocation31_spill] sm:$0xff] %v19115_v3  ;;  %v19119_v14 = vadd.f32 %v7178_v58, %v6859_v5 }
 0x518   :  { %v13125_v10 = vpop.f32.mrf.mxu1  ;;  %v7181_v0 = vpop.f32.mrf.mxu0 }
 0x519   :  { %22228 = vst [vmem:[#allocation34_spill] sm:$0xff] %v19119_v14  ;;  %v19121_v8 = vadd.f32 %v13197_v51, %v13125_v10  ;;  %v7667_v51 = vld [vmem:[#allocation2 + $0x181] sm:$0xff]  ;;  %v7668_v10 = vld [vmem:[#allocation2 + $0x189] sm:$0xff] }
 0x51a   :  { %v6862_v59 = vpop.f32.mrf.mxu1  ;;  %v13200_v53 = vpop.f32.mrf.mxu0  ;;  %13455 = vmatmul.mubr.msk.bf16.gmra.mxu0 %vm5612_vm6, %v18840_v12  ;;  %v8221_v14 = vpack.c.bf16 %v7668_v10, %v7667_v51 }
 0x51b   :  { %22229 = vst [vmem:[#allocation75_spill] sm:$0xff] %v19121_v8  ;;  %v19123_v57 = vadd.f32 %v7181_v0, %v6862_v59  ;;  %13458 = vmatprep.mubr.msk.bf16.mxu0 %vm5612_vm6, %v18842_v52 }
 0x51c   :  { %v13128_v62 = vpop.f32.mrf.mxu1  ;;  %13383 = vmatmul.mubr.msk.bf16.gmra.mxu1 %vm5612_vm6, %v18830_v39  ;;  %v7194_v1 = vpop.f32.mrf.mxu0 }
 0x51d   :  { %22230 = vst [vmem:[#allocation78_spill] sm:$0xff] %v19123_v57  ;;  %v19131_v61 = vadd.f32 %v13200_v53, %v13128_v62  ;;  %13386 = vmatprep.mubr.msk.bf16.mxu1 %vm5612_vm6, %v18840_v12  ;;  %v7669_v12 = vld [vmem:[#allocation2 + $0x199] sm:$0xff] }
 0x51e   :  { %v6875_v58 = vpop.f32.mrf.mxu1  ;;  %v13201_v5 = vpop.f32.mrf.mxu0 }
 0x51f   :  { %22231 = vst [vmem:[#allocation74_spill] sm:$0xff] %v19131_v61  ;;  %v19135_v59 = vadd.f32 %v7194_v1, %v6875_v58  ;;  %v7670_v1 = vld [vmem:[#allocation2 + $0x1a1] sm:$0xff] }
 0x520   :  { %v13129_v0 = vpop.f32.mrf.mxu1  ;;  %v7197_v8 = vpop.f32.mrf.mxu0 }
 0x521   :  { %22232 = vst [vmem:[#allocation77_spill] sm:$0xff] %v19135_v59  ;;  %v19137_v57 = vadd.f32 %v13201_v5, %v13129_v0  ;;  %v8615_v0 = vpack.c.bf16 %v7670_v1, %v7669_v12 }
 0x522   :  { %v6878_v39 = vpop.f32.mrf.mxu1  ;;  %v13204_v53 = vpop.f32.mrf.mxu0  ;;  %13459 = vmatmul.mubr.msk.bf16.gmra.mxu0 %vm5612_vm6, %v18852_v38 }
 0x523   :  { %22233 = vst [vmem:[#allocation80_spill] sm:$0xff] %v19137_v57  ;;  %v19139_v3 = vadd.f32 %v7197_v8, %v6878_v39  ;;  %13462 = vmatprep.mubr.msk.bf16.mxu0 %vm5612_vm6, %v8221_v14 }
 0x524   :  { %v13132_v62 = vpop.f32.mrf.mxu1  ;;  %13387 = vmatmul.mubr.msk.bf16.gmra.mxu1 %vm5612_vm6, %v18842_v52  ;;  %v7210_v5 = vpop.f32.mrf.mxu0 }
 0x525   :  { %22234 = vst [vmem:[#allocation37_spill] sm:$0xff] %v19139_v3  ;;  %v19146_v58 = vadd.f32 %v13204_v53, %v13132_v62  ;;  %13390 = vmatprep.mubr.msk.bf16.mxu1 %vm5612_vm6, %v18852_v38 }
 0x526   :  { %v6891_v8 = vpop.f32.mrf.mxu1  ;;  %v13205_v10 = vpop.f32.mrf.mxu0 }
 0x527   :  { %v19150_v51 = vadd.f32 %v7210_v5, %v6891_v8 }
 0x528   :  { %v13133_v39 = vpop.f32.mrf.mxu1  ;;  %v7213_v57 = vpop.f32.mrf.mxu0 }
 0x529   :  { %v19152_v3 = vadd.f32 %v13205_v10, %v13133_v39 }
 0x52a   :  { %v6894_v52 = vpop.f32.mrf.mxu1  ;;  %v13208_v61 = vpop.f32.mrf.mxu0  ;;  %13463 = vmatmul.mubr.msk.bf16.gmra.mxu0 %vm5612_vm6, %v8615_v0 }
 0x52b   :  { %v19154_v59 = vadd.f32 %v7213_v57, %v6894_v52  ;;  %13466 = vmatprep.mubr.msk.bf16.mxu0 %vm5612_vm6, %v18862_v22 }
 0x52c   :  { %v13136_v53 = vpop.f32.mrf.mxu1  ;;  %13391 = vmatmul.mubr.msk.bf16.gmra.mxu1 %vm5612_vm6, %v8221_v14  ;;  %v7226_v62 = vpop.f32.mrf.mxu0 }
 0x52d   :  { %v19160_v38 = vadd.f32 %v13208_v61, %v13136_v53  ;;  %13394 = vmatprep.mubr.msk.bf16.mxu1 %vm5612_vm6, %v18860_v35 }
 0x52e   :  { %v6907_v12 = vpop.f32.mrf.mxu1  ;;  %v13209_v57 = vpop.f32.mrf.mxu0 }
 0x52f   :  { %v19164_v1 = vadd.f32 %v7226_v62, %v6907_v12 }
 0x530   :  { %v13137_v5 = vpop.f32.mrf.mxu1  ;;  %v7229_v10 = vpop.f32.mrf.mxu0 }
 0x531   :  { %v19166_v8 = vadd.f32 %v13209_v57, %v13137_v5 }
 0x532   :  { %v6910_v0 = vpop.f32.mrf.mxu1  ;;  %v13292_v14 = vpop.f32.mrf.mxu0  ;;  %13467 = vmatmul.mubr.msk.bf16.gmra.mxu0 %vm5612_vm6, %v18878_v26 }
 0x533   :  { %22235 = vst [vmem:[#allocation35_spill] sm:$0xff] %v19166_v8  ;;  %v19168_v39 = vadd.f32 %v7229_v10, %v6910_v0  ;;  %13470 = vmatprep.mubr.msk.bf16.mxu0 %vm5612_vm6, %v18880_v31 }
 0x534   :  { %v13220_v61 = vpop.f32.mrf.mxu1  ;;  %13395 = vmatmul.mubr.msk.bf16.gmra.mxu1 %vm5612_vm6, %v18862_v22  ;;  %v7902_v52 = vpop.f32.mrf.mxu0 }
 0x535   :  { %22236 = vst [vmem:[#allocation44_spill] sm:$0xff] %v19168_v39  ;;  %v7573_v35 = vadd.f32 %v13220_v61, %v18870_v16  ;;  %13398 = vmatprep.mubr.msk.bf16.mxu1 %vm5612_vm6, %v18878_v26 }
 0x536   :  { %v7316_v53 = vpop.f32.mrf.mxu1  ;;  %v13293_v12 = vpop.f32.mrf.mxu0 }
 0x537   :  { %v7571_v62 = vadd.f32 %v7316_v53, %v18874_v50  ;;  %v19180_v57 = vadd.f32 %v13292_v14, %v7573_v35 }
 0x538   :  { %v13221_v5 = vpop.f32.mrf.mxu1  ;;  %v7905_v0 = vpop.f32.mrf.mxu0 }
 0x539   :  { %v7574_v10 = vadd.f32 %v13221_v5, %v18876_v7  ;;  %v19183_v22 = vadd.f32 %v7902_v52, %v7571_v62 }
 0x53a   :  { %v7319_v39 = vpop.f32.mrf.mxu1  ;;  %v13296_v16 = vpop.f32.mrf.mxu0  ;;  %13471 = vmatmul.mubr.msk.bf16.gmra.mxu0 %vm5612_vm6, %v18898_v37 }
 0x53b   :  { %v7572_v8 = vadd.f32 %v7319_v39, %v18882_v25  ;;  %v19188_v26 = vadd.f32 %v13293_v12, %v7574_v10  ;;  %13474 = vmatprep.mubr.msk.bf16.mxu0 %vm5612_vm6, %v18900_v28 }
 0x53c   :  { %v13224_v61 = vpop.f32.mrf.mxu1  ;;  %13399 = vmatmul.mubr.msk.bf16.gmra.mxu1 %vm5612_vm6, %v18880_v31  ;;  %v7918_v7 = vpop.f32.mrf.mxu0 }
 0x53d   :  { %v7577_v50 = vadd.f32 %v13224_v61, %v18890_v11  ;;  %13402 = vmatprep.mubr.msk.bf16.mxu1 %vm5612_vm6, %v18898_v37  ;;  %v19197_v25 = vadd.f32 %v7905_v0, %v7572_v8 }
 0x53e   :  { %v7332_v39 = vpop.f32.mrf.mxu1  ;;  %v13297_v35 = vpop.f32.mrf.mxu0 }
 0x53f   :  { %v7575_v14 = vadd.f32 %v7332_v39, %v18894_v2  ;;  %v19200_v52 = vadd.f32 %v13296_v16, %v7577_v50 }
 0x540   :  { %v13225_v53 = vpop.f32.mrf.mxu1  ;;  %v7921_v62 = vpop.f32.mrf.mxu0 }
 0x541   :  { %v7578_v31 = vadd.f32 %v13225_v53, %v18896_v44  ;;  %v19203_v12 = vadd.f32 %v7918_v7, %v7575_v14 }
 0x542   :  { %v7335_v5 = vpop.f32.mrf.mxu1  ;;  %v13300_v10 = vpop.f32.mrf.mxu0  ;;  %13475 = vmatmul.mubr.msk.bf16.gmra.mxu0 %vm5612_vm6, %v18918_v56 }
 0x543   :  { %v7576_v11 = vadd.f32 %v7335_v5, %v18902_v49  ;;  %v19208_v37 = vadd.f32 %v13297_v35, %v7578_v31  ;;  %13478 = vmatprep.mubr.msk.bf16.mxu0 %vm5612_vm6, %v18920_v9 }
 0x544   :  { %v13228_v8 = vpop.f32.mrf.mxu1  ;;  %13403 = vmatmul.mubr.msk.bf16.gmra.mxu1 %vm5612_vm6, %v18900_v28  ;;  %v7934_v44 = vpop.f32.mrf.mxu0 }
 0x545   :  { %v7581_v2 = vadd.f32 %v13228_v8, %v18910_v63  ;;  %13406 = vmatprep.mubr.msk.bf16.mxu1 %vm5612_vm6, %v18918_v56  ;;  %v19217_v49 = vadd.f32 %v7921_v62, %v7576_v11 }
 0x546   :  { %v7348_v0 = vpop.f32.mrf.mxu1  ;;  %v13301_v61 = vpop.f32.mrf.mxu0 }
 0x547   :  { %v7579_v16 = vadd.f32 %v7348_v0, %v18914_v46  ;;  %v19220_v50 = vadd.f32 %v13300_v10, %v7581_v2 }
 0x548   :  { %v13229_v7 = vpop.f32.mrf.mxu1  ;;  %v7937_v39 = vpop.f32.mrf.mxu0 }
 0x549   :  { %v7582_v28 = vadd.f32 %v13229_v7, %v18916_v55  ;;  %v19223_v14 = vadd.f32 %v7934_v44, %v7579_v16 }
 0x54a   :  { %v7351_v35 = vpop.f32.mrf.mxu1  ;;  %v13304_v53 = vpop.f32.mrf.mxu0  ;;  %13479 = vmatmul.mubr.msk.bf16.gmra.mxu0 %vm5612_vm6, %v18938_v40 }
 0x54b   :  { %v7580_v63 = vadd.f32 %v7351_v35, %v18922_v33  ;;  %v19228_v56 = vadd.f32 %v13301_v61, %v7582_v28  ;;  %13482 = vmatprep.mubr.msk.bf16.mxu0 %vm5612_vm6, %v18940_v41 }
 0x54c   :  { %v13232_v31 = vpop.f32.mrf.mxu1  ;;  %13407 = vmatmul.mubr.msk.bf16.gmra.mxu1 %vm5612_vm6, %v18920_v9  ;;  %v7950_v55 = vpop.f32.mrf.mxu0 }
 0x54d   :  { %v7585_v46 = vadd.f32 %v13232_v31, %v18930_v6  ;;  %13410 = vmatprep.mubr.msk.bf16.mxu1 %vm5612_vm6, %v18938_v40  ;;  %v19237_v33 = vadd.f32 %v7937_v39, %v7580_v63 }
 0x54e   :  { %v7364_v62 = vpop.f32.mrf.mxu1  ;;  %v13305_v11 = vpop.f32.mrf.mxu0 }
 0x54f   :  { %v7583_v5 = vadd.f32 %v7364_v62, %v18934_v60  ;;  %v19240_v10 = vadd.f32 %v13304_v53, %v7585_v46  ;;  %v22237_v53 = vld [vmem:[#allocation24_spill] sm:$0xff] }
 0x550   :  { %v13233_v8 = vpop.f32.mrf.mxu1  ;;  %v7953_v2 = vpop.f32.mrf.mxu0 }
 0x551   :  { %v7586_v9 = vadd.f32 %v13233_v8, %v18936_v19  ;;  %v19243_v44 = vadd.f32 %v7950_v55, %v7583_v5 }
 0x552   :  { %v7367_v0 = vpop.f32.mrf.mxu1  ;;  %v13308_v16 = vpop.f32.mrf.mxu0  ;;  %13483 = vmatmul.mubr.msk.bf16.gmra.mxu0 %vm5612_vm6, %v18958_v21 }
 0x553   :  { %v7584_v6 = vadd.f32 %v7367_v0, %v18942_v23  ;;  %v19248_v40 = vadd.f32 %v13305_v11, %v7586_v9  ;;  %13486 = vmatprep.mubr.msk.bf16.mxu0 %vm5612_vm6, %v18960_v36  ;;  %v22239_v11 = vld [vmem:[#allocation25_spill] sm:$0xff]  ;;  %v22241_v9 = vld [vmem:[#allocation63_spill] sm:$0xff] }
 0x554   :  { %v13236_v61 = vpop.f32.mrf.mxu1  ;;  %13411 = vmatmul.mubr.msk.bf16.gmra.mxu1 %vm5612_vm6, %v18940_v41  ;;  %v7966_v19 = vpop.f32.mrf.mxu0 }
 0x555   :  { %v7589_v60 = vadd.f32 %v13236_v61, %v18950_v47  ;;  %13414 = vmatprep.mubr.msk.bf16.mxu1 %vm5612_vm6, %v18958_v21  ;;  %v19257_v23 = vadd.f32 %v7953_v2, %v7584_v6  ;;  %v22238_v47 = vld [vmem:[#allocation26_spill] sm:$0xff] }
 0x556   :  { %v7380_v7 = vpop.f32.mrf.mxu1  ;;  %v13309_v39 = vpop.f32.mrf.mxu0  ;;  %v22243_v61 = vld [vmem:[#allocation22_spill] sm:$0xff] }
 0x557   :  { %v7587_v28 = vadd.f32 %v7380_v7, %v18954_v13  ;;  %v19260_v35 = vadd.f32 %v13308_v16, %v7589_v60  ;;  %v22240_v13 = vld [vmem:[#allocation28_spill] sm:$0xff]  ;;  %v7703_v7 = vld [vmem:[#allocation2 + $0x331] sm:$0xff] }
 0x558   :  { %v13237_v63 = vpop.f32.mrf.mxu1  ;;  %v7969_v31 = vpop.f32.mrf.mxu0 }
 0x559   :  { %v7590_v41 = vadd.f32 %v13237_v63, %v22237_v53  ;;  %v19263_v46 = vadd.f32 %v7966_v19, %v7587_v28  ;;  %v7704_v28 = vld [vmem:[#allocation2 + $0x339] sm:$0xff]  ;;  %v22245_v63 = vld [vmem:[#allocation64_spill] sm:$0xff] }
 0x55a   :  { %v7383_v55 = vpop.f32.mrf.mxu1  ;;  %v13312_v5 = vpop.f32.mrf.mxu0  ;;  %13487 = vmatmul.mubr.msk.bf16.gmra.mxu0 %vm5612_vm6, %v22239_v11 }
 0x55b   :  { %v7588_v62 = vadd.f32 %v7383_v55, %v22238_v47  ;;  %v19268_v21 = vadd.f32 %v13309_v39, %v7590_v41  ;;  %13490 = vmatprep.mubr.msk.bf16.mxu0 %vm5612_vm6, %v22240_v13 }
 0x55c   :  { %v13240_v8 = vpop.f32.mrf.mxu1  ;;  %13415 = vmatmul.mubr.msk.bf16.gmra.mxu1 %vm5612_vm6, %v18960_v36  ;;  %v7982_v0 = vpop.f32.mrf.mxu0 }
 0x55d   :  { %v7593_v2 = vadd.f32 %v13240_v8, %v22241_v9  ;;  %13418 = vmatprep.mubr.msk.bf16.mxu1 %vm5612_vm6, %v22239_v11  ;;  %v19277_v6 = vadd.f32 %v7969_v31, %v7588_v62  ;;  %v8222_v8 = vpack.c.bf16 %v7704_v28, %v7703_v7  ;;  %v22247_v9 = vld [vmem:[#allocation27_spill] sm:$0xff] }
 0x55e   :  { %v7396_v16 = vpop.f32.mrf.mxu1  ;;  %v13313_v19 = vpop.f32.mrf.mxu0 }
 0x55f   :  { %22242 = vst [vmem:[#allocation36_spill] sm:$0xff] %v19277_v6  ;;  %v7591_v60 = vadd.f32 %v7396_v16, %v22243_v61  ;;  %v19280_v39 = vadd.f32 %v13312_v5, %v7593_v2  ;;  %v7705_v5 = vld [vmem:[#allocation2 + $0x349] sm:$0xff]  ;;  %v7706_v2 = vld [vmem:[#allocation2 + $0x351] sm:$0xff] }
 0x560   :  { %v13241_v36 = vpop.f32.mrf.mxu1  ;;  %v7985_v41 = vpop.f32.mrf.mxu0 }
 0x561   :  { %22244 = vst [vmem:[#allocation41_spill] sm:$0xff] %v19280_v39  ;;  %v7594_v53 = vadd.f32 %v13241_v36, %v22245_v63  ;;  %v19283_v55 = vadd.f32 %v7982_v0, %v7591_v60  ;;  %v22249_v0 = vld [vmem:[#allocation66_spill] sm:$0xff]  ;;  %v9009_v36 = vld [vmem:[#allocation2 + $0x2] sm:$0xff] }
 0x562   :  { %v7399_v47 = vpop.f32.mrf.mxu1  ;;  %v13316_v31 = vpop.f32.mrf.mxu0  ;;  %13491 = vmatmul.mubr.msk.bf16.gmra.mxu0 %vm5612_vm6, %v19001_v43 }
 0x563   :  { %22246 = vst [vmem:[#allocation42_spill] sm:$0xff] %v19283_v55  ;;  %v7592_v11 = vadd.f32 %v7399_v47, %v22247_v9  ;;  %v19288_v62 = vadd.f32 %v13313_v19, %v7594_v53  ;;  %13494 = vmatprep.mubr.msk.bf16.mxu0 %vm5612_vm6, %v8222_v8  ;;  %v9010_v19 = vld [vmem:[#allocation2 + $0xa] sm:$0xff]  ;;  %v8616_v47 = vpack.c.bf16 %v7706_v2, %v7705_v5  ;;  %v9012_v9 = vld [vmem:[#allocation2 + $0x22] sm:$0xff] }
 0x564   :  { %v13244_v16 = vpop.f32.mrf.mxu1  ;;  %13419 = vmatmul.mubr.msk.bf16.gmra.mxu1 %vm5612_vm6, %v22240_v13  ;;  %v7998_v60 = vpop.f32.mrf.mxu0  ;;  %v9011_v13 = vld [vmem:[#allocation2 + $0x1a] sm:$0xff]  ;;  %v9081_v39 = vpack.c.bf16 %v9010_v19, %v9009_v36  ;;  %v9015_v36 = vld [vmem:[#allocation2 + $0x4a] sm:$0xff]  ;;  %v9016_v19 = vld [vmem:[#allocation2 + $0x52] sm:$0xff] }
 0x565   :  { %22248 = vst [vmem:[#allocation47_spill] sm:$0xff] %v19288_v62  ;;  %v7597_v61 = vadd.f32 %v13244_v16, %v22249_v0  ;;  %13422 = vmatprep.mubr.msk.bf16.mxu1 %vm5612_vm6, %v19001_v43  ;;  %v19296_v7 = vadd.f32 %v7985_v41, %v7592_v11  ;;  %v9082_v41 = vpack.c.bf16 %v9012_v9, %v9011_v13 }
 0x566   :  { %v7412_v28 = vpop.f32.mrf.mxu1  ;;  %v13317_v53 = vpop.f32.mrf.mxu0  ;;  %v19322_v9 = vpack.c.bf16 %v9016_v19, %v9015_v36 }
 0x567   :  { %22250 = vst [vmem:[#allocation43_spill] sm:$0xff] %v19296_v7  ;;  %v7595_v63 = vadd.f32 %v7412_v28, %v18997_v45  ;;  %v19299_v62 = vadd.f32 %v13316_v31, %v7597_v61  ;;  %v9013_v61 = vld [vmem:[#allocation2 + $0x32] sm:$0xff] }
 0x568   :  { %v13245_v55 = vpop.f32.mrf.mxu1  ;;  %v8001_v0 = vpop.f32.mrf.mxu0 }
 0x569   :  { %v7598_v16 = vadd.f32 %v13245_v55, %v18999_v29  ;;  %v19302_v6 = vadd.f32 %v7998_v60, %v7595_v63 }
 0x56a   :  { %v7415_v43 = vpop.f32.mrf.mxu1  ;;  %v13320_v7 = vpop.f32.mrf.mxu0  ;;  %13495 = vmatmul.mubr.msk.bf16.gmra.mxu0 %vm5612_vm6, %v8616_v47 }
 0x56b   :  { %v7596_v11 = vadd.f32 %v7415_v43, %v19003_v24  ;;  %v19306_v45 = vadd.f32 %v13317_v53, %v7598_v16  ;;  %13578 = vmatprep.mubr.msk.bf16.mxu0 %vm5612_vm6, %v9082_v41  ;;  %v9014_v24 = vld [vmem:[#allocation2 + $0x3a] sm:$0xff]  ;;  %v22251_v43 = vld [vmem:[#allocation68_spill] sm:$0xff] }
 0x56c   :  { %v13248_v5 = vpop.f32.mrf.mxu1  ;;  %13423 = vmatmul.mubr.msk.bf16.gmra.mxu1 %vm5612_vm6, %v8222_v8  ;;  %v8014_v55 = vpop.f32.mrf.mxu0 }
 0x56d   :  { %v7601_v29 = vadd.f32 %v13248_v5, %v19010_v30  ;;  %13506 = vmatprep.mubr.msk.bf16.mxu1 %vm5612_vm6, %v9081_v39  ;;  %v19312_v31 = vadd.f32 %v8001_v0, %v7596_v11  ;;  %v19318_v30 = vpack.c.bf16 %v9014_v24, %v9013_v61 }
 0x56e   :  { %v7428_v2 = vpop.f32.mrf.mxu1  ;;  %v13321_v28 = vpop.f32.mrf.mxu0 }
 0x56f   :  { %v7599_v60 = vadd.f32 %v7428_v2, %v19014_v4  ;;  %v19315_v63 = vadd.f32 %v13320_v7, %v7601_v29  ;;  %v13856_v4 = vld [vmem:[%s21576_s4 + $0x110] sm:$0xff]  }
 0x570   :  { %v13249_v8 = vpop.f32.mrf.mxu1  ;;  %v8017_v47 = vpop.f32.mrf.mxu0  ;;  %v9018_v2 = vld [vmem:[#allocation2 + $0x6a] sm:$0xff] }
 0x571   :  { %v7602_v53 = vadd.f32 %v13249_v8, %v19016_v17  ;;  %v19320_v13 = vadd.f32 %v8014_v55, %v7599_v60  ;;  %v9017_v55 = vld [vmem:[#allocation2 + $0x62] sm:$0xff]  ;;  %v9019_v60 = vld [vmem:[#allocation2 + $0x7a] sm:$0xff] }
 0x572   :  { %v7431_v39 = vpop.f32.mrf.mxu1  ;;  %v13324_v0 = vpop.f32.mrf.mxu0  ;;  %13579 = vmatmul.mubr.msk.bf16.vlgmr.msra.gmra.mxu0 %vm5612_vm6, %v19318_v30 }
 0x573   :  { %v7600_v16 = vadd.f32 %v7431_v39, %v19021_v42  ;;  %v19330_v7 = vadd.f32 %v13321_v28, %v7602_v53  ;;  %13582 = vmatprep.mubr.msk.bf16.mxu0 %vm5612_vm6, %v19322_v9  ;;  %v9020_v28 = vld [vmem:[#allocation2 + $0x82] sm:$0xff]  ;;  %v19348_v53 = vpack.c.bf16 %v9018_v2, %v9017_v55 }
 0x574   :  { %v13252_v17 = vpop.f32.mrf.mxu1  ;;  %13507 = vmatmul.mubr.msk.bf16.vlgmr.msra.gmra.mxu1 %vm5612_vm6, %v9082_v41  ;;  %v8030_v5 = vpop.f32.mrf.mxu0  ;;  %v13857_v41 = vld [vmem:[%s21576_s4 + $0x108] sm:$0xff]  }
 0x575   :  { %v7605_v11 = vadd.f32 %v13252_v17, %v22251_v43  ;;  %13510 = vmatprep.mubr.msk.bf16.mxu1 %vm5612_vm6, %v19318_v30  ;;  %13643 = vmatpush3.bf16.msra.mxu1 %v19068_v27  ;;  %v19339_v42 = vadd.f32 %v8017_v47, %v7600_v16  ;;  %22252 = vst [vmem:[#allocation46_spill] sm:$0xff] %v19348_v53  ;;  %v22254_v17 = vld [vmem:[#allocation65_spill] sm:$0xff] }
 0x576   :  { %v7444_v29 = vpop.f32.mrf.mxu1  ;;  %13644 = vmatprep.subr.bf16.mxu1 %v13856_v4  ;;  %v13325_v24 = vpop.f32.mrf.mxu0  ;;  %v19352_v16 = vpack.c.bf16 %v9020_v28, %v9019_v60 }
 0x577   :  { %v7603_v61 = vadd.f32 %v7444_v29, %v19040_v20  ;;  %v19345_v36 = vadd.f32 %v13324_v0, %v7605_v11  ;;  %v13858_v20 = vld [vmem:[%s21576_s4 + $0x100] sm:$0xff]  }
 0x578   :  { %v13253_v19 = vpop.f32.mrf.mxu1  ;;  %v8033_v8 = vpop.f32.mrf.mxu0 }
 0x579   :  { %v7606_v27 = vadd.f32 %v13253_v19, %v19045_v34  ;;  %13645 = vmatpush3.bf16.msra.mxu1 %v13856_v4  ;;  %v19350_v47 = vadd.f32 %v8030_v5, %v7603_v61  ;;  %v22256_v4 = vld [vmem:[#allocation67_spill] sm:$0xff]  ;;  %v9021_v61 = vld [vmem:[#allocation2 + $0x92] sm:$0xff]  ;;  %v9023_v19 = vld [vmem:[#allocation2 + $0xaa] sm:$0xff] }
 0x57a   :  { %v7447_v39 = vpop.f32.mrf.mxu1  ;;  %13646 = vmatprep.subr.bf16.mxu1 %v13857_v41  ;;  %v13328_v43 = vpop.f32.mrf.mxu0  ;;  %13583 = vmatmul.mubr.msk.bf16.gmra.mxu0 %vm5612_vm6, %v19348_v53 }
 0x57b   :  { %22253 = vst [vmem:[#allocation14_spill] sm:$0xff] %v19350_v47  ;;  %v7604_v0 = vadd.f32 %v7447_v39, %v22254_v17  ;;  %v19360_v34 = vadd.f32 %v13325_v24, %v7606_v27  ;;  %13586 = vmatprep.mubr.msk.bf16.mxu0 %vm5612_vm6, %v19352_v16  ;;  %v9022_v24 = vld [vmem:[#allocation2 + $0x9a] sm:$0xff]  ;;  %v9024_v27 = vld [vmem:[#allocation2 + $0xb2] sm:$0xff] }
 0x57c   :  { %v13256_v11 = vpop.f32.mrf.mxu1  ;;  %13511 = vmatmul.mubr.msk.bf16.gmra.mxu1 %vm5612_vm6, %v19322_v9  ;;  %v8046_v29 = vpop.f32.mrf.mxu0  ;;  %v19375_v47 = vpack.c.bf16 %v9022_v24, %v9021_v61  ;;  %v9025_v61 = vld [vmem:[#allocation2 + $0xc2] sm:$0xff]  ;;  %v9026_v24 = vld [vmem:[#allocation2 + $0xca] sm:$0xff] }
 0x57d   :  { %22255 = vst [vmem:[#allocation54_spill] sm:$0xff] %v19360_v34  ;;  %v7609_v5 = vadd.f32 %v13256_v11, %v22256_v4  ;;  %13514 = vmatprep.mubr.msk.bf16.mxu1 %vm5612_vm6, %v19348_v53  ;;  %13647 = vmatpush3.bf16.msra.mxu1 %v13857_v41  ;;  %v19369_v55 = vadd.f32 %v8033_v8, %v7604_v0  ;;  %v22258_v11 = vld [vmem:[#allocation29_spill] sm:$0xff] }
 0x57e   :  { %v7460_v2 = vpop.f32.mrf.mxu1  ;;  %13648 = vmatprep.subr.bf16.mxu1 %v13858_v20  ;;  %v13329_v28 = vpop.f32.mrf.mxu0  ;;  %22259 = vst [vmem:[#allocation48_spill] sm:$0xff] %v19375_v47  ;;  %v19379_v0 = vpack.c.bf16 %v9024_v27, %v9023_v19  ;;  %v9027_v19 = vld [vmem:[#allocation2 + $0xda] sm:$0xff]  ;;  %v9028_v27 = vld [vmem:[#allocation2 + $0xe2] sm:$0xff] }
 0x57f   :  { %22257 = vst [vmem:[#allocation45_spill] sm:$0xff] %v19369_v55  ;;  %v7607_v60 = vadd.f32 %v7460_v2, %v19070_v48  ;;  %v19372_v39 = vadd.f32 %v13328_v43, %v7609_v5  ;;  %v22261_v55 = vld [vmem:[#allocation30_spill] sm:$0xff] }
 0x580   :  { %v13257_v17 = vpop.f32.mrf.mxu1  ;;  %v8049_v34 = vpop.f32.mrf.mxu0 }
 0x581   :  { %v7610_v4 = vadd.f32 %v13257_v17, %v22258_v11  ;;  %13649 = vmatpush3.bf16.msra.mxu1 %v13858_v20  ;;  %v19377_v41 = vadd.f32 %v8046_v29, %v7607_v60 }
 0x582   :  { %v7463_v8 = vpop.f32.mrf.mxu1  ;;  %v13332_v48 = vpop.f32.mrf.mxu0  ;;  %13587 = vmatmul.mubr.msk.bf16.gmra.mxu0 %vm5612_vm6, %v19375_v47 }
 0x583   :  { %22260 = vst [vmem:[#allocation55_spill] sm:$0xff] %v19377_v41  ;;  %v7608_v53 = vadd.f32 %v7463_v8, %v22261_v55  ;;  %v19384_v43 = vadd.f32 %v13329_v28, %v7610_v4  ;;  %13590 = vmatprep.mubr.msk.bf16.mxu0 %vm5612_vm6, %v19379_v0  ;;  %v22264_v4 = vld [vmem:[#allocation70_spill] sm:$0xff] }
 0x584   :  { %v13260_v5 = vpop.f32.mrf.mxu1  ;;  %13515 = vmatmul.mubr.msk.bf16.gmra.mxu1 %vm5612_vm6, %v19352_v16  ;;  %v8062_v29 = vpop.f32.mrf.mxu0 }
 0x585   :  { %22262 = vst [vmem:[#allocation3_spill] sm:$0xff] %v19384_v43  ;;  %v7613_v20 = vadd.f32 %v13260_v5, %v19083_v32  ;;  %13518 = vmatprep.mubr.msk.bf16.mxu1 %vm5612_vm6, %v19375_v47  ;;  %v19393_v55 = vadd.f32 %v8049_v34, %v7608_v53  ;;  %v19399_v5 = vpack.c.bf16 %v9026_v24, %v9025_v61  ;;  %v9029_v61 = vld [vmem:[#allocation2 + $0xf2] sm:$0xff]  ;;  %v9030_v24 = vld [vmem:[#allocation2 + $0xfa] sm:$0xff] }
 0x586   :  { %v7476_v2 = vpop.f32.mrf.mxu1  ;;  %v13333_v28 = vpop.f32.mrf.mxu0  ;;  %v19403_v34 = vpack.c.bf16 %v9028_v27, %v9027_v19  ;;  %v9031_v19 = vld [vmem:[#allocation2 + $0x10a] sm:$0xff]  ;;  %v9032_v27 = vld [vmem:[#allocation2 + $0x112] sm:$0xff] }
 0x587   :  { %22263 = vst [vmem:[#allocation56_spill] sm:$0xff] %v19393_v55  ;;  %v7611_v60 = vadd.f32 %v7476_v2, %v19087_v15  ;;  %v19396_v17 = vadd.f32 %v13332_v48, %v7613_v20  ;;  %22265 = vst [vmem:[#allocation38_spill] sm:$0xff] %v19399_v5  ;;  %v22268_v55 = vld [vmem:[#allocation72_spill] sm:$0xff] }
 0x588   :  { %v13261_v11 = vpop.f32.mrf.mxu1  ;;  %v8065_v32 = vpop.f32.mrf.mxu0  ;;  %22267 = vst [vmem:[#allocation58_spill] sm:$0xff] %v19403_v34 }
 0x589   :  { %v7614_v8 = vadd.f32 %v13261_v11, %v22264_v4  ;;  %v19401_v43 = vadd.f32 %v8062_v29, %v7611_v60 }
 0x58a   :  { %v7479_v53 = vpop.f32.mrf.mxu1  ;;  %v13336_v47 = vpop.f32.mrf.mxu0  ;;  %13591 = vmatmul.mubr.msk.bf16.gmra.mxu0 %vm5612_vm6, %v19399_v5 }
 0x58b   :  { %22266 = vst [vmem:[#allocation49_spill] sm:$0xff] %v19401_v43  ;;  %v7612_v41 = vadd.f32 %v7479_v53, %v22268_v55  ;;  %v19408_v15 = vadd.f32 %v13333_v28, %v7614_v8  ;;  %13594 = vmatprep.mubr.msk.bf16.mxu0 %vm5612_vm6, %v19403_v34  ;;  %v22272_v8 = vld [vmem:[#allocation69_spill] sm:$0xff] }
 0x58c   :  { %v13264_v48 = vpop.f32.mrf.mxu1  ;;  %13519 = vmatmul.mubr.msk.bf16.gmra.mxu1 %vm5612_vm6, %v19379_v0  ;;  %v8078_v29 = vpop.f32.mrf.mxu0 }
 0x58d   :  { %22269 = vst [vmem:[#allocation39_spill] sm:$0xff] %v19408_v15  ;;  %v7617_v20 = vadd.f32 %v13264_v48, %v19099_v54  ;;  %13522 = vmatprep.mubr.msk.bf16.mxu1 %vm5612_vm6, %v19399_v5  ;;  %v19417_v55 = vadd.f32 %v8065_v32, %v7612_v41  ;;  %v19423_v48 = vpack.c.bf16 %v9030_v24, %v9029_v61  ;;  %v9033_v24 = vld [vmem:[#allocation2 + $0x122] sm:$0xff] }
 0x58e   :  { %v7492_v2 = vpop.f32.mrf.mxu1  ;;  %v13337_v28 = vpop.f32.mrf.mxu0  ;;  %v19427_v32 = vpack.c.bf16 %v9032_v27, %v9031_v19 }
 0x58f   :  { %22270 = vst [vmem:[#allocation57_spill] sm:$0xff] %v19417_v55  ;;  %v7615_v60 = vadd.f32 %v7492_v2, %v19103_v18  ;;  %v19420_v11 = vadd.f32 %v13336_v47, %v7617_v20  ;;  %22273 = vst [vmem:[#allocation60_spill] sm:$0xff] %v19423_v48  ;;  %v22276_v55 = vld [vmem:[#allocation71_spill] sm:$0xff] }
 0x590   :  { %v13265_v4 = vpop.f32.mrf.mxu1  ;;  %v8081_v54 = vpop.f32.mrf.mxu0  ;;  %22275 = vst [vmem:[#allocation50_spill] sm:$0xff] %v19427_v32  ;;  %v22278_v20 = vld [vmem:[#allocation31_spill] sm:$0xff] }
 0x591   :  { %22271 = vst [vmem:[#allocation59_spill] sm:$0xff] %v19420_v11  ;;  %v7618_v53 = vadd.f32 %v13265_v4, %v22272_v8  ;;  %v19425_v15 = vadd.f32 %v8078_v29, %v7615_v60  ;;  %v9034_v60 = vld [vmem:[#allocation2 + $0x12a] sm:$0xff]  ;;  %v9035_v4 = vld [vmem:[#allocation2 + $0x13a] sm:$0xff]  ;;  %v9036_v8 = vld [vmem:[#allocation2 + $0x142] sm:$0xff] }
 0x592   :  { %v7495_v41 = vpop.f32.mrf.mxu1  ;;  %v13340_v5 = vpop.f32.mrf.mxu0  ;;  %13595 = vmatmul.mubr.msk.bf16.gmra.mxu0 %vm5612_vm6, %v19423_v48 }
 0x593   :  { %22274 = vst [vmem:[#allocation15_spill] sm:$0xff] %v19425_v15  ;;  %v7616_v43 = vadd.f32 %v7495_v41, %v22276_v55  ;;  %v19432_v18 = vadd.f32 %v13337_v28, %v7618_v53  ;;  %13598 = vmatprep.mubr.msk.bf16.mxu0 %vm5612_vm6, %v19427_v32  ;;  %v22280_v28 = vld [vmem:[#allocation34_spill] sm:$0xff] }
 0x594   :  { %v13268_v47 = vpop.f32.mrf.mxu1  ;;  %13523 = vmatmul.mubr.msk.bf16.gmra.mxu1 %vm5612_vm6, %v19403_v34  ;;  %v8094_v2 = vpop.f32.mrf.mxu0 }
 0x595   :  { %22277 = vst [vmem:[#allocation73_spill] sm:$0xff] %v19432_v18  ;;  %v7621_v29 = vadd.f32 %v13268_v47, %v22278_v20  ;;  %13526 = vmatprep.mubr.msk.bf16.mxu1 %vm5612_vm6, %v19423_v48  ;;  %v19441_v55 = vadd.f32 %v8081_v54, %v7616_v43  ;;  %v22282_v18 = vld [vmem:[#allocation75_spill] sm:$0xff]  ;;  %v19447_v20 = vpack.c.bf16 %v9034_v60, %v9033_v24  ;;  %v9037_v60 = vld [vmem:[#allocation2 + $0x152] sm:$0xff] }
 0x596   :  { %v7508_v61 = vpop.f32.mrf.mxu1  ;;  %v13341_v27 = vpop.f32.mrf.mxu0  ;;  %v19451_v54 = vpack.c.bf16 %v9036_v8, %v9035_v4  ;;  %v9039_v4 = vld [vmem:[#allocation2 + $0x16a] sm:$0xff]  ;;  %v9040_v8 = vld [vmem:[#allocation2 + $0x172] sm:$0xff] }
 0x597   :  { %22279 = vst [vmem:[#allocation16_spill] sm:$0xff] %v19441_v55  ;;  %v7619_v19 = vadd.f32 %v7508_v61, %v22280_v28  ;;  %v19444_v53 = vadd.f32 %v13340_v5, %v7621_v29  ;;  %22283 = vst [vmem:[#allocation51_spill] sm:$0xff] %v19447_v20  ;;  %v22285_v55 = vld [vmem:[#allocation78_spill] sm:$0xff] }
 0x598   :  { %v13269_v41 = vpop.f32.mrf.mxu1  ;;  %v8097_v47 = vpop.f32.mrf.mxu0  ;;  %v9038_v28 = vld [vmem:[#allocation2 + $0x15a] sm:$0xff] }
 0x599   :  { %22281 = vst [vmem:[#allocation6_spill] sm:$0xff] %v19444_v53  ;;  %v7622_v15 = vadd.f32 %v13269_v41, %v22282_v18  ;;  %v19449_v11 = vadd.f32 %v8094_v2, %v7619_v19  ;;  %v22287_v18 = vld [vmem:[#allocation74_spill] sm:$0xff] }
 0x59a   :  { %v7511_v43 = vpop.f32.mrf.mxu1  ;;  %v13344_v34 = vpop.f32.mrf.mxu0  ;;  %13599 = vmatmul.mubr.msk.bf16.gmra.mxu0 %vm5612_vm6, %v19447_v20 }
 0x59b   :  { %22284 = vst [vmem:[#allocation79_spill] sm:$0xff] %v19449_v11  ;;  %v7620_v48 = vadd.f32 %v7511_v43, %v22285_v55  ;;  %v19456_v61 = vadd.f32 %v13341_v27, %v7622_v15  ;;  %13602 = vmatprep.mubr.msk.bf16.mxu0 %vm5612_vm6, %v19451_v54  ;;  %v22289_v15 = vld [vmem:[#allocation77_spill] sm:$0xff] }
 0x59c   :  { %v13272_v5 = vpop.f32.mrf.mxu1  ;;  %13527 = vmatmul.mubr.msk.bf16.gmra.mxu1 %vm5612_vm6, %v19427_v32  ;;  %v8110_v2 = vpop.f32.mrf.mxu0 }
 0x59d   :  { %22286 = vst [vmem:[#allocation4_spill] sm:$0xff] %v19456_v61  ;;  %v7625_v29 = vadd.f32 %v13272_v5, %v22287_v18  ;;  %13530 = vmatprep.mubr.msk.bf16.mxu1 %vm5612_vm6, %v19447_v20  ;;  %v19465_v55 = vadd.f32 %v8097_v47, %v7620_v48  ;;  %v22291_v61 = vld [vmem:[#allocation80_spill] sm:$0xff]  ;;  %v19471_v18 = vpack.c.bf16 %v9038_v28, %v9037_v60 }
 0x59e   :  { %v7524_v24 = vpop.f32.mrf.mxu1  ;;  %v13345_v27 = vpop.f32.mrf.mxu0  ;;  %v19475_v47 = vpack.c.bf16 %v9040_v8, %v9039_v4  ;;  %v9042_v28 = vld [vmem:[#allocation2 + $0x18a] sm:$0xff]  ;;  %v9048_v8 = vld [vmem:[#allocation2 + $0x1d2] sm:$0xff] }
 0x59f   :  { %22288 = vst [vmem:[#allocation76_spill] sm:$0xff] %v19465_v55  ;;  %v7623_v19 = vadd.f32 %v7524_v24, %v22289_v15  ;;  %v19468_v41 = vadd.f32 %v13344_v34, %v7625_v29  ;;  %22292 = vst [vmem:[#allocation40_spill] sm:$0xff] %v19471_v18  ;;  %v22294_v55 = vld [vmem:[#allocation37_spill] sm:$0xff]  ;;  %v9046_v15 = vld [vmem:[#allocation2 + $0x1ba] sm:$0xff] }
 0x5a0   :  { %v13273_v43 = vpop.f32.mrf.mxu1  ;;  %v8113_v5 = vpop.f32.mrf.mxu0  ;;  %v9047_v4 = vld [vmem:[#allocation2 + $0x1ca] sm:$0xff] }
 0x5a1   :  { %22290 = vst [vmem:[#allocation5_spill] sm:$0xff] %v19468_v41  ;;  %v7626_v11 = vadd.f32 %v13273_v43, %v22291_v61  ;;  %v19473_v53 = vadd.f32 %v8110_v2, %v7623_v19  ;;  %v9041_v2 = vld [vmem:[#allocation2 + $0x182] sm:$0xff] }
 0x5a2   :  { %v7527_v48 = vpop.f32.mrf.mxu1  ;;  %v13348_v32 = vpop.f32.mrf.mxu0  ;;  %13603 = vmatmul.mubr.msk.bf16.gmra.mxu0 %vm5612_vm6, %v19471_v18 }
 0x5a3   :  { %22293 = vst [vmem:[#allocation18_spill] sm:$0xff] %v19473_v53  ;;  %v7624_v20 = vadd.f32 %v7527_v48, %v22294_v55  ;;  %v19480_v24 = vadd.f32 %v13345_v27, %v7626_v11  ;;  %13606 = vmatprep.mubr.msk.bf16.mxu0 %vm5612_vm6, %v19475_v47  ;;  %v9045_v11 = vld [vmem:[#allocation2 + $0x1b2] sm:$0xff] }
 0x5a4   :  { %v13276_v34 = vpop.f32.mrf.mxu1  ;;  %13531 = vmatmul.mubr.msk.bf16.gmra.mxu1 %vm5612_vm6, %v19451_v54  ;;  %v8126_v29 = vpop.f32.mrf.mxu0  ;;  %v9097_v53 = vpack.c.bf16 %v9046_v15, %v9045_v11  ;;  %v9051_v15 = vld [vmem:[#allocation2 + $0x1fa] sm:$0xff] }
 0x5a5   :  { %22295 = vst [vmem:[#allocation17_spill] sm:$0xff] %v19480_v24  ;;  %v7629_v61 = vadd.f32 %v13276_v34, %v19146_v58  ;;  %13534 = vmatprep.mubr.msk.bf16.mxu1 %vm5612_vm6, %v19471_v18  ;;  %v19489_v55 = vadd.f32 %v8113_v5, %v7624_v20  ;;  %v19495_v24 = vpack.c.bf16 %v9042_v28, %v9041_v2  ;;  %v9049_v2 = vld [vmem:[#allocation2 + $0x1e2] sm:$0xff] }
 0x5a6   :  { %v7540_v60 = vpop.f32.mrf.mxu1  ;;  %v13349_v27 = vpop.f32.mrf.mxu0 }
 0x5a7   :  { %22296 = vst [vmem:[#allocation52_spill] sm:$0xff] %v19489_v55  ;;  %v7627_v19 = vadd.f32 %v7540_v60, %v19150_v51  ;;  %v19492_v43 = vadd.f32 %v13348_v32, %v7629_v61  ;;  %v9098_v55 = vpack.c.bf16 %v9048_v8, %v9047_v4  ;;  %v9050_v60 = vld [vmem:[#allocation2 + $0x1ea] sm:$0xff]  ;;  %v22298_v8 = vld [vmem:[#allocation35_spill] sm:$0xff] }
 0x5a8   :  { %v13277_v48 = vpop.f32.mrf.mxu1  ;;  %v8129_v34 = vpop.f32.mrf.mxu0 }
 0x5a9   :  { %v7630_v58 = vadd.f32 %v13277_v48, %v19152_v3  ;;  %v19497_v20 = vadd.f32 %v8126_v29, %v7627_v19  ;;  %v9052_v19 = vld [vmem:[#allocation2 + $0x202] sm:$0xff] }
 0x5aa   :  { %v7543_v5 = vpop.f32.mrf.mxu1  ;;  %v13352_v41 = vpop.f32.mrf.mxu0  ;;  %13607 = vmatmul.mubr.msk.bf16.gmra.mxu0 %vm5612_vm6, %v19495_v24 }
 0x5ab   :  { %v7628_v18 = vadd.f32 %v7543_v5, %v19154_v59  ;;  %v19502_v51 = vadd.f32 %v13349_v27, %v7630_v58  ;;  %13610 = vmatprep.mubr.msk.bf16.mxu0 %vm5612_vm6, %v9098_v55 }
 0x5ac   :  { %v13280_v32 = vpop.f32.mrf.mxu1  ;;  %13535 = vmatmul.mubr.msk.bf16.gmra.mxu1 %vm5612_vm6, %v19475_v47  ;;  %v8142_v61 = vpop.f32.mrf.mxu0 }
 0x5ad   :  { %v7633_v3 = vadd.f32 %v13280_v32, %v19160_v38  ;;  %13538 = vmatprep.mubr.msk.bf16.mxu1 %vm5612_vm6, %v9097_v53  ;;  %v19509_v29 = vadd.f32 %v8129_v34, %v7628_v18  ;;  %v19515_v38 = vpack.c.bf16 %v9050_v60, %v9049_v2  ;;  %v19519_v18 = vpack.c.bf16 %v9052_v19, %v9051_v15  ;;  %v22299_v34 = vld [vmem:[#allocation44_spill] sm:$0xff]  ;;  %v9053_v60 = vld [vmem:[#allocation2 + $0x212] sm:$0xff] }
 0x5ae   :  { %v7556_v59 = vpop.f32.mrf.mxu1  ;;  %v13353_v11 = vpop.f32.mrf.mxu0  ;;  %v9055_v19 = vld [vmem:[#allocation2 + $0x22a] sm:$0xff] }
 0x5af   :  { %22297 = vst [vmem:[#allocation53_spill] sm:$0xff] %v19509_v29  ;;  %v7631_v28 = vadd.f32 %v7556_v59, %v19164_v1  ;;  %v19512_v27 = vadd.f32 %v13352_v41, %v7633_v3 }
 0x5b0   :  { %v13281_v4 = vpop.f32.mrf.mxu1  ;;  %v8145_v58 = vpop.f32.mrf.mxu0 }
 0x5b1   :  { %v7634_v48 = vadd.f32 %v13281_v4, %v22298_v8  ;;  %v19517_v5 = vadd.f32 %v8142_v61, %v7631_v28  ;;  %v9054_v28 = vld [vmem:[#allocation2 + $0x21a] sm:$0xff]  ;;  %v9056_v4 = vld [vmem:[#allocation2 + $0x232] sm:$0xff] }
 0x5b2   :  { %v7559_v53 = vpop.f32.mrf.mxu1  ;;  %v13436_v29 = vpop.f32.mrf.mxu0  ;;  %13611 = vmatmul.mubr.msk.bf16.gmra.mxu0 %vm5612_vm6, %v19515_v38 }
 0x5b3   :  { %v7632_v32 = vadd.f32 %v7559_v53, %v22299_v34  ;;  %v19524_v1 = vadd.f32 %v13353_v11, %v7634_v48  ;;  %13614 = vmatprep.mubr.msk.bf16.mxu0 %vm5612_vm6, %v19519_v18  ;;  %v19538_v53 = vpack.c.bf16 %v9054_v28, %v9053_v60  ;;  %v9058_v60 = vld [vmem:[#allocation2 + $0x24a] sm:$0xff] }
 0x5b4   :  { %v13364_v41 = vpop.f32.mrf.mxu1  ;;  %13539 = vmatmul.mubr.msk.bf16.gmra.mxu1 %vm5612_vm6, %v9098_v55  ;;  %v8690_v61 = vpop.f32.mrf.mxu0 }
 0x5b5   :  { %v8553_v3 = vadd.f32 %v13364_v41, %v19180_v57  ;;  %13542 = vmatprep.mubr.msk.bf16.mxu1 %vm5612_vm6, %v19515_v38  ;;  %v19532_v59 = vadd.f32 %v8145_v58, %v7632_v32  ;;  %v19542_v32 = vpack.c.bf16 %v9056_v4, %v9055_v19  ;;  %v9060_v19 = vld [vmem:[#allocation2 + $0x262] sm:$0xff] }
 0x5b6   :  { %v8296_v2 = vpop.f32.mrf.mxu1  ;;  %v13437_v15 = vpop.f32.mrf.mxu0 }
 0x5b7   :  { %22300 = vst [vmem:[#allocation7_spill] sm:$0xff] %v19532_v59  ;;  %v8551_v11 = vadd.f32 %v8296_v2, %v19183_v22  ;;  %v19535_v55 = vadd.f32 %v13436_v29, %v8553_v3  ;;  %v9057_v2 = vld [vmem:[#allocation2 + $0x242] sm:$0xff] }
 0x5b8   :  { %v13365_v8 = vpop.f32.mrf.mxu1  ;;  %v8693_v57 = vpop.f32.mrf.mxu0 }
 0x5b9   :  { %v8554_v48 = vadd.f32 %v13365_v8, %v19188_v26  ;;  %v19540_v34 = vadd.f32 %v8690_v61, %v8551_v11 }
 0x5ba   :  { %v8299_v58 = vpop.f32.mrf.mxu1  ;;  %v13440_v59 = vpop.f32.mrf.mxu0  ;;  %13615 = vmatmul.mubr.msk.bf16.gmra.mxu0 %vm5612_vm6, %v19538_v53 }
 0x5bb   :  { %v8552_v41 = vadd.f32 %v8299_v58, %v19197_v25  ;;  %v19547_v22 = vadd.f32 %v13437_v15, %v8554_v48  ;;  %13618 = vmatprep.mubr.msk.bf16.mxu0 %vm5612_vm6, %v19542_v32  ;;  %v9059_v15 = vld [vmem:[#allocation2 + $0x25a] sm:$0xff]  ;;  %v19562_v58 = vpack.c.bf16 %v9058_v60, %v9057_v2 }
 0x5bc   :  { %v13368_v29 = vpop.f32.mrf.mxu1  ;;  %13543 = vmatmul.mubr.msk.bf16.gmra.mxu1 %vm5612_vm6, %v19519_v18  ;;  %v8706_v3 = vpop.f32.mrf.mxu0  ;;  %v9062_v2 = vld [vmem:[#allocation2 + $0x27a] sm:$0xff] }
 0x5bd   :  { %22301 = vst [vmem:[#allocation8_spill] sm:$0xff] %v19547_v22  ;;  %v8557_v26 = vadd.f32 %v13368_v29, %v19200_v52  ;;  %13546 = vmatprep.mubr.msk.bf16.mxu1 %vm5612_vm6, %v19538_v53  ;;  %v19556_v25 = vadd.f32 %v8693_v57, %v8552_v41  ;;  %v19566_v41 = vpack.c.bf16 %v9060_v19, %v9059_v15  ;;  %v9064_v15 = vld [vmem:[#allocation2 + $0x292] sm:$0xff] }
 0x5be   :  { %v8312_v61 = vpop.f32.mrf.mxu1  ;;  %v13441_v11 = vpop.f32.mrf.mxu0 }
 0x5bf   :  { %22302 = vst [vmem:[#allocation33_spill] sm:$0xff] %v19556_v25  ;;  %v8555_v28 = vadd.f32 %v8312_v61, %v19203_v12  ;;  %v19559_v4 = vadd.f32 %v13440_v59, %v8557_v26  ;;  %v9061_v61 = vld [vmem:[#allocation2 + $0x272] sm:$0xff] }
 0x5c0   :  { %v13369_v8 = vpop.f32.mrf.mxu1  ;;  %v8709_v52 = vpop.f32.mrf.mxu0 }
 0x5c1   :  { %v8558_v48 = vadd.f32 %v13369_v8, %v19208_v37  ;;  %v19564_v29 = vadd.f32 %v8706_v3, %v8555_v28 }
 0x5c2   :  { %v8315_v57 = vpop.f32.mrf.mxu1  ;;  %v13444_v22 = vpop.f32.mrf.mxu0  ;;  %13619 = vmatmul.mubr.msk.bf16.gmra.mxu0 %vm5612_vm6, %v19562_v58 }
 0x5c3   :  { %v8556_v25 = vadd.f32 %v8315_v57, %v19217_v49  ;;  %v19571_v12 = vadd.f32 %v13441_v11, %v8558_v48  ;;  %13622 = vmatprep.mubr.msk.bf16.mxu0 %vm5612_vm6, %v19566_v41  ;;  %v9063_v11 = vld [vmem:[#allocation2 + $0x28a] sm:$0xff]  ;;  %v19586_v57 = vpack.c.bf16 %v9062_v2, %v9061_v61 }
 0x5c4   :  { %v13372_v59 = vpop.f32.mrf.mxu1  ;;  %13547 = vmatmul.mubr.msk.bf16.gmra.mxu1 %vm5612_vm6, %v19542_v32  ;;  %v8722_v26 = vpop.f32.mrf.mxu0  ;;  %v9066_v61 = vld [vmem:[#allocation2 + $0x2aa] sm:$0xff] }
 0x5c5   :  { %22303 = vst [vmem:[#allocation19_spill] sm:$0xff] %v19571_v12  ;;  %v8561_v37 = vadd.f32 %v13372_v59, %v19220_v50  ;;  %13550 = vmatprep.mubr.msk.bf16.mxu1 %vm5612_vm6, %v19562_v58  ;;  %v19580_v49 = vadd.f32 %v8709_v52, %v8556_v25  ;;  %v19590_v52 = vpack.c.bf16 %v9064_v15, %v9063_v11  ;;  %v9068_v11 = vld [vmem:[#allocation2 + $0x2c2] sm:$0xff] }
 0x5c6   :  { %v8328_v3 = vpop.f32.mrf.mxu1  ;;  %v13445_v28 = vpop.f32.mrf.mxu0 }
 0x5c7   :  { %22304 = vst [vmem:[#allocation9_spill] sm:$0xff] %v19580_v49  ;;  %v8559_v60 = vadd.f32 %v8328_v3, %v19223_v14  ;;  %v19583_v19 = vadd.f32 %v13444_v22, %v8561_v37  ;;  %v9065_v3 = vld [vmem:[#allocation2 + $0x2a2] sm:$0xff] }
 0x5c8   :  { %v13373_v8 = vpop.f32.mrf.mxu1  ;;  %v8725_v50 = vpop.f32.mrf.mxu0 }
 0x5c9   :  { %v8562_v48 = vadd.f32 %v13373_v8, %v19228_v56  ;;  %v19588_v59 = vadd.f32 %v8722_v26, %v8559_v60 }
 0x5ca   :  { %v8331_v25 = vpop.f32.mrf.mxu1  ;;  %v13448_v12 = vpop.f32.mrf.mxu0  ;;  %13623 = vmatmul.mubr.msk.bf16.gmra.mxu0 %vm5612_vm6, %v19586_v57 }
 0x5cb   :  { %v8560_v49 = vadd.f32 %v8331_v25, %v19237_v33  ;;  %v19595_v14 = vadd.f32 %v13445_v28, %v8562_v48  ;;  %13626 = vmatprep.mubr.msk.bf16.mxu0 %vm5612_vm6, %v19590_v52  ;;  %v9067_v28 = vld [vmem:[#allocation2 + $0x2ba] sm:$0xff]  ;;  %v19610_v25 = vpack.c.bf16 %v9066_v61, %v9065_v3 }
 0x5cc   :  { %v13376_v22 = vpop.f32.mrf.mxu1  ;;  %13551 = vmatmul.mubr.msk.bf16.gmra.mxu1 %vm5612_vm6, %v19566_v41  ;;  %v8738_v37 = vpop.f32.mrf.mxu0  ;;  %v9070_v3 = vld [vmem:[#allocation2 + $0x2da] sm:$0xff] }
 0x5cd   :  { %22305 = vst [vmem:[#allocation12_spill] sm:$0xff] %v19595_v14  ;;  %v8565_v56 = vadd.f32 %v13376_v22, %v19240_v10  ;;  %13554 = vmatprep.mubr.msk.bf16.mxu1 %vm5612_vm6, %v19586_v57  ;;  %v19604_v33 = vadd.f32 %v8725_v50, %v8560_v49  ;;  %v19614_v50 = vpack.c.bf16 %v9068_v11, %v9067_v28  ;;  %v9072_v28 = vld [vmem:[#allocation2 + $0x2f2] sm:$0xff] }
 0x5ce   :  { %v8344_v26 = vpop.f32.mrf.mxu1  ;;  %v13449_v60 = vpop.f32.mrf.mxu0 }
 0x5cf   :  { %22306 = vst [vmem:[#allocation10_spill] sm:$0xff] %v19604_v33  ;;  %v8563_v2 = vadd.f32 %v8344_v26, %v19243_v44  ;;  %v19607_v15 = vadd.f32 %v13448_v12, %v8565_v56  ;;  %22308 = vst [vmem:[#allocation21_spill] sm:$0xff] %v19614_v50  ;;  %v9069_v26 = vld [vmem:[#allocation2 + $0x2d2] sm:$0xff] }
 0x5d0   :  { %v13377_v8 = vpop.f32.mrf.mxu1  ;;  %v8741_v10 = vpop.f32.mrf.mxu0 }
 0x5d1   :  { %v8566_v48 = vadd.f32 %v13377_v8, %v19248_v40  ;;  %v19612_v22 = vadd.f32 %v8738_v37, %v8563_v2 }
 0x5d2   :  { %v8347_v49 = vpop.f32.mrf.mxu1  ;;  %v13452_v14 = vpop.f32.mrf.mxu0  ;;  %13627 = vmatmul.mubr.msk.bf16.gmra.mxu0 %vm5612_vm6, %v19610_v25 }
 0x5d3   :  { %22307 = vst [vmem:[#allocation11_spill] sm:$0xff] %v19612_v22  ;;  %v8564_v33 = vadd.f32 %v8347_v49, %v19257_v23  ;;  %v19619_v44 = vadd.f32 %v13449_v60, %v8566_v48  ;;  %13630 = vmatprep.mubr.msk.bf16.mxu0 %vm5612_vm6, %v19614_v50  ;;  %v9071_v60 = vld [vmem:[#allocation2 + $0x2ea] sm:$0xff]  ;;  %v19634_v49 = vpack.c.bf16 %v9070_v3, %v9069_v26  ;;  %v9073_v26 = vld [vmem:[#allocation2 + $0x302] sm:$0xff] }
 0x5d4   :  { %v13380_v12 = vpop.f32.mrf.mxu1  ;;  %13555 = vmatmul.mubr.msk.bf16.gmra.mxu1 %vm5612_vm6, %v19590_v52  ;;  %v8754_v56 = vpop.f32.mrf.mxu0  ;;  %v9074_v3 = vld [vmem:[#allocation2 + $0x30a] sm:$0xff] }
 0x5d5   :  { %22309 = vst [vmem:[#allocation23_spill] sm:$0xff] %v19619_v44  ;;  %v8569_v40 = vadd.f32 %v13380_v12, %v19260_v35  ;;  %13558 = vmatprep.mubr.msk.bf16.mxu1 %vm5612_vm6, %v19610_v25  ;;  %v19628_v23 = vadd.f32 %v8741_v10, %v8564_v33  ;;  %22312 = vst [vmem:[#allocation13_spill] sm:$0xff] %v19634_v49  ;;  %v19638_v10 = vpack.c.bf16 %v9072_v28, %v9071_v60  ;;  %v9075_v28 = vld [vmem:[#allocation2 + $0x31a] sm:$0xff] }
 0x5d6   :  { %v8360_v37 = vpop.f32.mrf.mxu1  ;;  %v13453_v2 = vpop.f32.mrf.mxu0 }
 0x5d7   :  { %22310 = vst [vmem:[#allocation20_spill] sm:$0xff] %v19628_v23  ;;  %v8567_v61 = vadd.f32 %v8360_v37, %v19263_v46  ;;  %v19631_v11 = vadd.f32 %v13452_v14, %v8569_v40  ;;  %v22314_v23 = vld [vmem:[#allocation36_spill] sm:$0xff] }
 0x5d8   :  { %v13381_v8 = vpop.f32.mrf.mxu1  ;;  %v8757_v35 = vpop.f32.mrf.mxu0 }
 0x5d9   :  { %22311 = vst [vmem:[#allocation62_spill] sm:$0xff] %v19631_v11  ;;  %v8570_v48 = vadd.f32 %v13381_v8, %v19268_v21  ;;  %v19636_v12 = vadd.f32 %v8754_v56, %v8567_v61  ;;  %v22316_v21 = vld [vmem:[#allocation41_spill] sm:$0xff]  ;;  %v22318_v61 = vld [vmem:[#allocation42_spill] sm:$0xff]  ;;  %v9076_v8 = vld [vmem:[#allocation2 + $0x322] sm:$0xff] }
 0x5da   :  { %v8363_v33 = vpop.f32.mrf.mxu1  ;;  %v13456_v22 = vpop.f32.mrf.mxu0  ;;  %13631 = vmatmul.mubr.msk.bf16.gmra.mxu0 %vm5612_vm6, %v19634_v49 }
 0x5db   :  { %22313 = vst [vmem:[#allocation61_spill] sm:$0xff] %v19636_v12  ;;  %v8568_v44 = vadd.f32 %v8363_v33, %v22314_v23  ;;  %v19643_v46 = vadd.f32 %v13453_v2, %v8570_v48  ;;  %13634 = vmatprep.mubr.msk.bf16.mxu0 %vm5612_vm6, %v19638_v10 }
 0x5dc   :  { %v13384_v14 = vpop.f32.mrf.mxu1  ;;  %13559 = vmatmul.mubr.msk.bf16.gmra.mxu1 %vm5612_vm6, %v19614_v50  ;;  %v8770_v56 = vpop.f32.mrf.mxu0 }
 0x5dd   :  { %22315 = vst [vmem:[#allocation24_spill] sm:$0xff] %v19643_v46  ;;  %v8573_v40 = vadd.f32 %v13384_v14, %v22316_v21  ;;  %13562 = vmatprep.mubr.msk.bf16.mxu1 %vm5612_vm6, %v19634_v49  ;;  %v19652_v23 = vadd.f32 %v8757_v35, %v8568_v44  ;;  %v22319_v46 = vld [vmem:[#allocation47_spill] sm:$0xff]  ;;  %v19658_v21 = vpack.c.bf16 %v9074_v3, %v9073_v26  ;;  %v9077_v26 = vld [vmem:[#allocation2 + $0x332] sm:$0xff] }
 0x5de   :  { %v8376_v37 = vpop.f32.mrf.mxu1  ;;  %v13457_v60 = vpop.f32.mrf.mxu0  ;;  %v19662_v35 = vpack.c.bf16 %v9076_v8, %v9075_v28  ;;  %v9078_v3 = vld [vmem:[#allocation2 + $0x33a] sm:$0xff] }
 0x5df   :  { %22317 = vst [vmem:[#allocation26_spill] sm:$0xff] %v19652_v23  ;;  %v8571_v2 = vadd.f32 %v8376_v37, %v22318_v61  ;;  %v19655_v48 = vadd.f32 %v13456_v22, %v8573_v40  ;;  %v22320_v23 = vld [vmem:[#allocation43_spill] sm:$0xff] }
 0x5e0   :  { %v13385_v33 = vpop.f32.mrf.mxu1  ;;  %v8773_v14 = vpop.f32.mrf.mxu0 }
 0x5e1   :  { %v8574_v12 = vadd.f32 %v13385_v33, %v22319_v46  ;;  %v19660_v11 = vadd.f32 %v8770_v56, %v8571_v2  ;;  %v19682_v33 = vpack.c.bf16 %v9078_v3, %v9077_v26 }
 0x5e2   :  { %v8379_v44 = vpop.f32.mrf.mxu1  ;;  %v13460_v50 = vpop.f32.mrf.mxu0  ;;  %13635 = vmatmul.mubr.msk.bf16.gmra.mxu0 %vm5612_vm6, %v19658_v21 }
 0x5e3   :  { %v8572_v49 = vadd.f32 %v8379_v44, %v22320_v23  ;;  %v19667_v37 = vadd.f32 %v13457_v60, %v8574_v12  ;;  %13638 = vmatprep.mubr.msk.bf16.mxu0 %vm5612_vm6, %v19662_v35 }
 0x5e4   :  { %v13388_v22 = vpop.f32.mrf.mxu1  ;;  %13563 = vmatmul.mubr.msk.bf16.gmra.mxu1 %vm5612_vm6, %v19638_v10  ;;  %v8786_v40 = vpop.f32.mrf.mxu0 }
 0x5e5   :  { %v8577_v46 = vadd.f32 %v13388_v22, %v19299_v62  ;;  %13566 = vmatprep.mubr.msk.bf16.mxu1 %vm5612_vm6, %v19658_v21  ;;  %v19676_v56 = vadd.f32 %v8773_v14, %v8572_v49 }
 0x5e6   :  { %v8392_v23 = vpop.f32.mrf.mxu1  ;;  %v13461_v61 = vpop.f32.mrf.mxu0 }
 0x5e7   :  { %v8575_v12 = vadd.f32 %v8392_v23, %v19302_v6  ;;  %v19679_v2 = vadd.f32 %v13460_v50, %v8577_v46 }
 0x5e8   :  { %v13389_v60 = vpop.f32.mrf.mxu1  ;;  %v8789_v8 = vpop.f32.mrf.mxu0 }
 0x5e9   :  { %v8578_v28 = vadd.f32 %v13389_v60, %v19306_v45  ;;  %v19684_v62 = vadd.f32 %v8786_v40, %v8575_v12 }
 0x5ea   :  { %v8395_v44 = vpop.f32.mrf.mxu1  ;;  %v13464_v14 = vpop.f32.mrf.mxu0  ;;  %13639 = vmatmul.mubr.msk.bf16.gmra.mxu0 %vm5612_vm6, %v19682_v33 }
 0x5eb   :  { %v8576_v49 = vadd.f32 %v8395_v44, %v19312_v31  ;;  %v19689_v22 = vadd.f32 %v13461_v61, %v8578_v28 }
 0x5ec   :  { %v13392_v6 = vpop.f32.mrf.mxu1  ;;  %13567 = vmatmul.mubr.msk.bf16.gmra.mxu1 %vm5612_vm6, %v19662_v35  ;;  %v8802_v50 = vpop.f32.mrf.mxu0 }
 0x5ed   :  { %v8581_v45 = vadd.f32 %v13392_v6, %v19315_v63  ;;  %13650 = vmatprep.mubr.msk.bf16.mxu1 %vm5612_vm6, %v19318_v30  ;;  %v19696_v46 = vadd.f32 %v8789_v8, %v8576_v49  ;;  %v22323_v49 = vld [vmem:[#allocation46_spill] sm:$0xff] }
 0x5ee   :  { %v8408_v40 = vpop.f32.mrf.mxu1  ;;  %v13465_v23 = vpop.f32.mrf.mxu0 }
 0x5ef   :  { %v8579_v31 = vadd.f32 %v8408_v40, %v19320_v13  ;;  %v19699_v26 = vadd.f32 %v13464_v14, %v8581_v45  ;;  %v22324_v45 = vld [vmem:[#allocation14_spill] sm:$0xff] }
 0x5f0   :  { %v13393_v3 = vpop.f32.mrf.mxu1  ;;  %v8805_v61 = vpop.f32.mrf.mxu0 }
 0x5f1   :  { %v8582_v12 = vadd.f32 %v13393_v3, %v19330_v7  ;;  %v19702_v60 = vadd.f32 %v8802_v50, %v8579_v31 }
 0x5f2   :  { %v8411_v28 = vpop.f32.mrf.mxu1  ;;  %v13468_v44 = vpop.f32.mrf.mxu0 }
 0x5f3   :  { %22321 = vst [vmem:[#allocation25_spill] sm:$0xff] %v19702_v60  ;;  %v8580_v63 = vadd.f32 %v8411_v28, %v19339_v42  ;;  %v19705_v6 = vadd.f32 %v13465_v23, %v8582_v12  ;;  %v22325_v23 = vld [vmem:[#allocation54_spill] sm:$0xff] }
 0x5f4   :  { %v13396_v30 = vpop.f32.mrf.mxu1  ;;  %13651 = vmatmul.mubr.msk.bf16.vlgmr.msra.gmra.mxu1 %vm5612_vm6, %v19322_v9  ;;  %v8818_v8 = vpop.f32.mrf.mxu0 }
 0x5f5   :  { %22322 = vst [vmem:[#allocation28_spill] sm:$0xff] %v19705_v6  ;;  %v8585_v13 = vadd.f32 %v13396_v30, %v19345_v36  ;;  %13654 = vmatprep.mubr.msk.bf16.mxu1 %vm5612_vm6, %v22323_v49  ;;  %v19712_v7 = vadd.f32 %v8805_v61, %v8580_v63  ;;  %v22327_v36 = vld [vmem:[#allocation45_spill] sm:$0xff] }
 0x5f6   :  { %v8424_v14 = vpop.f32.mrf.mxu1  ;;  %v13469_v40 = vpop.f32.mrf.mxu0 }
 0x5f7   :  { %v8583_v50 = vadd.f32 %v8424_v14, %v22324_v45  ;;  %v19715_v42 = vadd.f32 %v13468_v44, %v8585_v13  ;;  %v22329_v13 = vld [vmem:[#allocation48_spill] sm:$0xff]  ;;  %v22330_v14 = vld [vmem:[#allocation55_spill] sm:$0xff] }
 0x5f8   :  { %v13397_v31 = vpop.f32.mrf.mxu1  ;;  %v8821_v12 = vpop.f32.mrf.mxu0 }
 0x5f9   :  { %v8586_v3 = vadd.f32 %v13397_v31, %v22325_v23  ;;  %v19718_v28 = vadd.f32 %v8818_v8, %v8583_v50  ;;  %v22331_v23 = vld [vmem:[#allocation3_spill] sm:$0xff] }
 0x5fa   :  { %v8427_v9 = vpop.f32.mrf.mxu1  ;;  %v13472_v6 = vpop.f32.mrf.mxu0 }
 0x5fb   :  { %22326 = vst [vmem:[#allocation63_spill] sm:$0xff] %v19718_v28  ;;  %v8584_v30 = vadd.f32 %v8427_v9, %v22327_v36  ;;  %v19721_v60 = vadd.f32 %v13469_v40, %v8586_v3 }
 0x5fc   :  { %v13400_v61 = vpop.f32.mrf.mxu1  ;;  %13655 = vmatmul.mubr.msk.bf16.gmra.mxu1 %vm5612_vm6, %v19352_v16  ;;  %v8834_v44 = vpop.f32.mrf.mxu0 }
 0x5fd   :  { %22328 = vst [vmem:[#allocation22_spill] sm:$0xff] %v19721_v60  ;;  %v8589_v63 = vadd.f32 %v13400_v61, %v19372_v39  ;;  %13658 = vmatprep.mubr.msk.bf16.mxu1 %vm5612_vm6, %v22329_v13  ;;  %v19728_v49 = vadd.f32 %v8821_v12, %v8584_v30  ;;  %v22333_v39 = vld [vmem:[#allocation56_spill] sm:$0xff] }
 0x5fe   :  { %v8440_v8 = vpop.f32.mrf.mxu1  ;;  %v13473_v50 = vpop.f32.mrf.mxu0 }
 0x5ff   :  { %v8587_v45 = vadd.f32 %v8440_v8, %v22330_v14  ;;  %v19731_v31 = vadd.f32 %v13472_v6, %v8589_v63  ;;  %v22335_v63 = vld [vmem:[#allocation38_spill] sm:$0xff]  ;;  %v22337_v8 = vld [vmem:[#allocation49_spill] sm:$0xff] }
 0x600   :  { %v13401_v40 = vpop.f32.mrf.mxu1  ;;  %v8837_v9 = vpop.f32.mrf.mxu0 }
 0x601   :  { %v8590_v3 = vadd.f32 %v13401_v40, %v22331_v23  ;;  %v19734_v36 = vadd.f32 %v8834_v44, %v8587_v45  ;;  %v22339_v23 = vld [vmem:[#allocation39_spill] sm:$0xff] }
 0x602   :  { %v8443_v16 = vpop.f32.mrf.mxu1  ;;  %v13476_v60 = vpop.f32.mrf.mxu0 }
 0x603   :  { %22332 = vst [vmem:[#allocation64_spill] sm:$0xff] %v19734_v36  ;;  %v8588_v61 = vadd.f32 %v8443_v16, %v22333_v39  ;;  %v19737_v28 = vadd.f32 %v13473_v50, %v8590_v3 }
 0x604   :  { %v13404_v12 = vpop.f32.mrf.mxu1  ;;  %13659 = vmatmul.mubr.msk.bf16.gmra.mxu1 %vm5612_vm6, %v19379_v0  ;;  %v8850_v6 = vpop.f32.mrf.mxu0 }
 0x605   :  { %22334 = vst [vmem:[#allocation27_spill] sm:$0xff] %v19737_v28  ;;  %v8593_v30 = vadd.f32 %v13404_v12, %v19396_v17  ;;  %13662 = vmatprep.mubr.msk.bf16.mxu1 %vm5612_vm6, %v22335_v63  ;;  %v19744_v13 = vadd.f32 %v8837_v9, %v8588_v61  ;;  %v22341_v17 = vld [vmem:[#allocation57_spill] sm:$0xff]  ;;  %v22343_v61 = vld [vmem:[#allocation58_spill] sm:$0xff]  ;;  %v22344_v63 = vld [vmem:[#allocation59_spill] sm:$0xff] }
 0x606   :  { %v8456_v44 = vpop.f32.mrf.mxu1  ;;  %v13477_v45 = vpop.f32.mrf.mxu0 }
 0x607   :  { %22336 = vst [vmem:[#allocation66_spill] sm:$0xff] %v19744_v13  ;;  %v8591_v14 = vadd.f32 %v8456_v44, %v22337_v8  ;;  %v19747_v40 = vadd.f32 %v13476_v60, %v8593_v30  ;;  %v22345_v30 = vld [vmem:[#allocation60_spill] sm:$0xff] }
 0x608   :  { %v13405_v50 = vpop.f32.mrf.mxu1  ;;  %v8853_v16 = vpop.f32.mrf.mxu0 }
 0x609   :  { %22338 = vst [vmem:[#allocation68_spill] sm:$0xff] %v19747_v40  ;;  %v8594_v3 = vadd.f32 %v13405_v50, %v22339_v23  ;;  %v19750_v39 = vadd.f32 %v8850_v6, %v8591_v14  ;;  %v22347_v14 = vld [vmem:[#allocation15_spill] sm:$0xff] }
 0x60a   :  { %v8459_v0 = vpop.f32.mrf.mxu1  ;;  %v13480_v28 = vpop.f32.mrf.mxu0 }
 0x60b   :  { %22340 = vst [vmem:[#allocation65_spill] sm:$0xff] %v19750_v39  ;;  %v8592_v12 = vadd.f32 %v8459_v0, %v22341_v17  ;;  %v19753_v36 = vadd.f32 %v13477_v45, %v8594_v3  ;;  %v22349_v3 = vld [vmem:[#allocation73_spill] sm:$0xff] }
 0x60c   :  { %v13408_v9 = vpop.f32.mrf.mxu1  ;;  %13663 = vmatmul.mubr.msk.bf16.gmra.mxu1 %vm5612_vm6, %v22343_v61  ;;  %v8866_v60 = vpop.f32.mrf.mxu0 }
 0x60d   :  { %22342 = vst [vmem:[#allocation67_spill] sm:$0xff] %v19753_v36  ;;  %v8597_v44 = vadd.f32 %v13408_v9, %v22344_v63  ;;  %13666 = vmatprep.mubr.msk.bf16.mxu1 %vm5612_vm6, %v22345_v30  ;;  %v19760_v8 = vadd.f32 %v8853_v16, %v8592_v12  ;;  %v22351_v9 = vld [vmem:[#allocation16_spill] sm:$0xff]  ;;  %v22353_v12 = vld [vmem:[#allocation50_spill] sm:$0xff] }
 0x60e   :  { %v8472_v6 = vpop.f32.mrf.mxu1  ;;  %v13481_v23 = vpop.f32.mrf.mxu0  ;;  %v22354_v30 = vld [vmem:[#allocation6_spill] sm:$0xff] }
 0x60f   :  { %22346 = vst [vmem:[#allocation29_spill] sm:$0xff] %v19760_v8  ;;  %v8595_v50 = vadd.f32 %v8472_v6, %v22347_v14  ;;  %v19763_v0 = vadd.f32 %v13480_v28, %v8597_v44  ;;  %v22355_v44 = vld [vmem:[#allocation51_spill] sm:$0xff] }
 0x610   :  { %v13409_v45 = vpop.f32.mrf.mxu1  ;;  %v8869_v36 = vpop.f32.mrf.mxu0 }
 0x611   :  { %22348 = vst [vmem:[#allocation30_spill] sm:$0xff] %v19763_v0  ;;  %v8598_v17 = vadd.f32 %v13409_v45, %v22349_v3  ;;  %v19766_v39 = vadd.f32 %v8866_v60, %v8595_v50  ;;  %v22356_v50 = vld [vmem:[#allocation79_spill] sm:$0xff] }
 0x612   :  { %v8475_v61 = vpop.f32.mrf.mxu1  ;;  %v13484_v40 = vpop.f32.mrf.mxu0 }
 0x613   :  { %22350 = vst [vmem:[#allocation70_spill] sm:$0xff] %v19766_v39  ;;  %v8596_v63 = vadd.f32 %v8475_v61, %v22351_v9  ;;  %v19769_v13 = vadd.f32 %v13481_v23, %v8598_v17  ;;  %v22358_v17 = vld [vmem:[#allocation4_spill] sm:$0xff] }
 0x614   :  { %v13412_v16 = vpop.f32.mrf.mxu1  ;;  %13667 = vmatmul.mubr.msk.bf16.gmra.mxu1 %vm5612_vm6, %v22353_v12  ;;  %v8882_v28 = vpop.f32.mrf.mxu0 }
 0x615   :  { %22352 = vst [vmem:[#allocation72_spill] sm:$0xff] %v19769_v13  ;;  %v8601_v6 = vadd.f32 %v13412_v16, %v22354_v30  ;;  %13670 = vmatprep.mubr.msk.bf16.mxu1 %vm5612_vm6, %v22355_v44  ;;  %v19776_v14 = vadd.f32 %v8869_v36, %v8596_v63  ;;  %v22360_v16 = vld [vmem:[#allocation76_spill] sm:$0xff]  ;;  %v22362_v63 = vld [vmem:[#allocation5_spill] sm:$0xff] }
 0x616   :  { %v8488_v60 = vpop.f32.mrf.mxu1  ;;  %v13485_v3 = vpop.f32.mrf.mxu0 }
 0x617   :  { %v8599_v45 = vadd.f32 %v8488_v60, %v22356_v50  ;;  %v19779_v61 = vadd.f32 %v13484_v40, %v8601_v6  ;;  %v22363_v6 = vld [vmem:[#allocation40_spill] sm:$0xff]  ;;  %v22364_v50 = vld [vmem:[#allocation18_spill] sm:$0xff] }
 0x618   :  { %v13413_v23 = vpop.f32.mrf.mxu1  ;;  %v8885_v13 = vpop.f32.mrf.mxu0 }
 0x619   :  { %22357 = vst [vmem:[#allocation69_spill] sm:$0xff] %v19779_v61  ;;  %v8602_v9 = vadd.f32 %v13413_v23, %v22358_v17  ;;  %v19782_v39 = vadd.f32 %v8882_v28, %v8599_v45 }
 0x61a   :  { %v8491_v12 = vpop.f32.mrf.mxu1  ;;  %v13488_v0 = vpop.f32.mrf.mxu0 }
 0x61b   :  { %22359 = vst [vmem:[#allocation71_spill] sm:$0xff] %v19782_v39  ;;  %v8600_v30 = vadd.f32 %v8491_v12, %v22360_v16  ;;  %v19785_v8 = vadd.f32 %v13485_v3, %v8602_v9  ;;  %v22365_v9 = vld [vmem:[#allocation17_spill] sm:$0xff] }
 0x61c   :  { %v13416_v36 = vpop.f32.mrf.mxu1  ;;  %13671 = vmatmul.mubr.msk.bf16.gmra.mxu1 %vm5612_vm6, %v19451_v54  ;;  %v8898_v40 = vpop.f32.mrf.mxu0 }
 0x61d   :  { %22361 = vst [vmem:[#allocation31_spill] sm:$0xff] %v19785_v8  ;;  %v8605_v44 = vadd.f32 %v13416_v36, %v22362_v63  ;;  %13674 = vmatprep.mubr.msk.bf16.mxu1 %vm5612_vm6, %v22363_v6  ;;  %v19792_v60 = vadd.f32 %v8885_v13, %v8600_v30  ;;  %v22366_v36 = vld [vmem:[#allocation52_spill] sm:$0xff] }
 0x61e   :  { %v8504_v28 = vpop.f32.mrf.mxu1  ;;  %v13489_v23 = vpop.f32.mrf.mxu0  ;;  %v9044_v6 = vld [vmem:[#allocation2 + $0x1a2] sm:$0xff] }
 0x61f   :  { %v8603_v45 = vadd.f32 %v8504_v28, %v22364_v50  ;;  %v19795_v17 = vadd.f32 %v13488_v0, %v8605_v44  ;;  %v9043_v44 = vld [vmem:[#allocation2 + $0x19a] sm:$0xff] }
 0x620   :  { %v13417_v3 = vpop.f32.mrf.mxu1  ;;  %v8901_v16 = vpop.f32.mrf.mxu0 }
 0x621   :  { %v8606_v12 = vadd.f32 %v13417_v3, %v22365_v9  ;;  %v19798_v8 = vadd.f32 %v8898_v40, %v8603_v45  ;;  %v9989_v9 = vpack.c.bf16 %v9044_v6, %v9043_v44 }
 0x622   :  { %v8507_v54 = vpop.f32.mrf.mxu1  ;;  %v13492_v39 = vpop.f32.mrf.mxu0 }
 0x623   :  { %v8604_v63 = vadd.f32 %v8507_v54, %v22366_v36  ;;  %v19801_v61 = vadd.f32 %v13489_v23, %v8606_v12  ;;  %v22368_v36 = vld [vmem:[#allocation53_spill] sm:$0xff] }
 0x624   :  { %v13420_v13 = vpop.f32.mrf.mxu1  ;;  %13675 = vmatmul.mubr.msk.bf16.gmra.mxu1 %vm5612_vm6, %v19475_v47  ;;  %v8914_v0 = vpop.f32.mrf.mxu0 }
 0x625   :  { %22367 = vst [vmem:[#allocation34_spill] sm:$0xff] %v19801_v61  ;;  %v8609_v30 = vadd.f32 %v13420_v13, %v19492_v43  ;;  %13678 = vmatprep.mubr.msk.bf16.mxu1 %vm5612_vm6, %v19495_v24  ;;  %v19808_v40 = vadd.f32 %v8901_v16, %v8604_v63 }
 0x626   :  { %v8520_v28 = vpop.f32.mrf.mxu1  ;;  %v13493_v45 = vpop.f32.mrf.mxu0 }
 0x627   :  { %v8607_v50 = vadd.f32 %v8520_v28, %v19497_v20  ;;  %v19811_v23 = vadd.f32 %v13492_v39, %v8609_v30 }
 0x628   :  { %v13421_v3 = vpop.f32.mrf.mxu1  ;;  %v8917_v12 = vpop.f32.mrf.mxu0 }
 0x629   :  { %v8610_v47 = vadd.f32 %v13421_v3, %v19502_v51  ;;  %v19814_v43 = vadd.f32 %v8914_v0, %v8607_v50 }
 0x62a   :  { %v8523_v54 = vpop.f32.mrf.mxu1  ;;  %v13496_v13 = vpop.f32.mrf.mxu0 }
 0x62b   :  { %v8608_v24 = vadd.f32 %v8523_v54, %v22368_v36  ;;  %v19817_v61 = vadd.f32 %v13493_v45, %v8610_v47 }
 0x62c   :  { %v13424_v16 = vpop.f32.mrf.mxu1  ;;  %13679 = vmatmul.mubr.msk.bf16.gmra.mxu1 %vm5612_vm6, %v9989_v9  ;;  %v8930_v39 = vpop.f32.mrf.mxu0 }
 0x62d   :  { %v8613_v20 = vadd.f32 %v13424_v16, %v19512_v27  ;;  %13682 = vmatprep.mubr.msk.bf16.mxu1 %vm5612_vm6, %v19515_v38  ;;  %v19823_v63 = vadd.f32 %v8917_v12, %v8608_v24  ;;  %v22369_v27 = vld [vmem:[#allocation7_spill] sm:$0xff]  ;;  %v22370_v16 = vld [vmem:[#allocation8_spill] sm:$0xff] }
 0x62e   :  { %v8536_v51 = vpop.f32.mrf.mxu1  ;;  %v13497_v0 = vpop.f32.mrf.mxu0 }
 0x62f   :  { %v8611_v30 = vadd.f32 %v8536_v51, %v19517_v5  ;;  %v19826_v44 = vadd.f32 %v13496_v13, %v8613_v20 }
 0x630   :  { %v13425_v6 = vpop.f32.mrf.mxu1  ;;  %v8933_v50 = vpop.f32.mrf.mxu0 }
 0x631   :  { %v8614_v28 = vadd.f32 %v13425_v6, %v19524_v1  ;;  %v19829_v45 = vadd.f32 %v8930_v39, %v8611_v30 }
 0x632   :  { %v8539_v3 = vpop.f32.mrf.mxu1  ;;  %v19834_v38 = vpop.f32.mrf.mxu0 }
 0x633   :  { %v8612_v9 = vadd.f32 %v8539_v3, %v22369_v27  ;;  %v19832_v47 = vadd.f32 %v13497_v0, %v8614_v28 }
 0x634   :  { %v13508_v12 = vpop.f32.mrf.mxu1  ;;  %13683 = vmatmul.mubr.msk.bf16.gmra.mxu1 %vm5612_vm6, %v19519_v18  ;;  %v19848_v24 = vpop.f32.mrf.mxu0  ;;  %v22371_v18 = vld [vmem:[#allocation33_spill] sm:$0xff] }
 0x635   :  { %v19839_v5 = vadd.f32 %v13508_v12, %v19535_v55  ;;  %13686 = vmatprep.mubr.msk.bf16.mxu1 %vm5612_vm6, %v19538_v53  ;;  %v19843_v1 = vadd.f32 %v8933_v50, %v8612_v9  ;;  %v22372_v50 = vld [vmem:[#allocation19_spill] sm:$0xff]  ;;  %v22373_v9 = vld [vmem:[#allocation9_spill] sm:$0xff] }
 0x636   :  { %v9276_v54 = vpop.f32.mrf.mxu1  ;;  %v19856_v55 = vpop.f32.mrf.mxu0 }
 0x637   :  { %v19846_v36 = vadd.f32 %v9276_v54, %v19540_v34 }
 0x638   :  { %v13509_v13 = vpop.f32.mrf.mxu1  ;;  %v19868_v6 = vpop.f32.mrf.mxu0 }
 0x639   :  { %v19851_v20 = vadd.f32 %v13509_v13, %v22370_v16 }
 0x63a   :  { %v9279_v39 = vpop.f32.mrf.mxu1 }
 0x63b   :  { %v19854_v51 = vadd.f32 %v9279_v39, %v22371_v18  ;;  %v22374_v39 = vld [vmem:[#allocation12_spill] sm:$0xff] }
 0x63c   :  { %v13512_v30 = vpop.f32.mrf.mxu1  ;;  %13687 = vmatmul.mubr.msk.bf16.gmra.mxu1 %vm5612_vm6, %v19542_v32  ;;  %v19876_v32 = vpop.f32.mrf.mxu0 }
 0x63d   :  { %v19861_v53 = vadd.f32 %v13512_v30, %v19559_v4  ;;  %13690 = vmatprep.mubr.msk.bf16.mxu1 %vm5612_vm6, %v19562_v58 }
 0x63e   :  { %v9292_v34 = vpop.f32.mrf.mxu1  ;;  %v19888_v13 = vpop.f32.mrf.mxu0 }
 0x63f   :  { %v19866_v0 = vadd.f32 %v9292_v34, %v19564_v29  ;;  %v22376_v34 = vld [vmem:[#allocation10_spill] sm:$0xff] }
 0x640   :  { %v13513_v28 = vpop.f32.mrf.mxu1 }
 0x641   :  { %v19871_v3 = vadd.f32 %v13513_v28, %v22372_v50  ;;  %v22379_v50 = vld [vmem:[#allocation11_spill] sm:$0xff] }
 0x642   :  { %v9295_v27 = vpop.f32.mrf.mxu1 }
 0x643   :  { %v19874_v12 = vadd.f32 %v9295_v27, %v22373_v9 }
 0x644   :  { %v13516_v4 = vpop.f32.mrf.mxu1  ;;  %13691 = vmatmul.mubr.msk.bf16.gmra.mxu1 %vm5612_vm6, %v19566_v41  ;;  %v19896_v41 = vpop.f32.mrf.mxu0 }
 0x645   :  { %v19881_v58 = vadd.f32 %v13516_v4, %v19583_v19  ;;  %13694 = vmatprep.mubr.msk.bf16.mxu1 %vm5612_vm6, %v19586_v57 }
 0x646   :  { %v9308_v29 = vpop.f32.mrf.mxu1  ;;  %v19908_v9 = vpop.f32.mrf.mxu0 }
 0x647   :  { %v19886_v54 = vadd.f32 %v9308_v29, %v19588_v59  ;;  %v22381_v29 = vld [vmem:[#allocation23_spill] sm:$0xff] }
 0x648   :  { %v13517_v16 = vpop.f32.mrf.mxu1 }
 0x649   :  { %v19891_v18 = vadd.f32 %v13517_v16, %v22374_v39 }
 0x64a   :  { %v9311_v30 = vpop.f32.mrf.mxu1 }
 0x64b   :  { %22375 = vst [vmem:[#allocation75_spill] sm:$0xff] %v19891_v18  ;;  %v19894_v28 = vadd.f32 %v9311_v30, %v22376_v34  ;;  %v22383_v30 = vld [vmem:[#allocation20_spill] sm:$0xff]  ;;  %v22390_v18 = vld [vmem:[#allocation26_spill] sm:$0xff] }
 0x64c   :  { %v13520_v19 = vpop.f32.mrf.mxu1  ;;  %13695 = vmatmul.mubr.msk.bf16.gmra.mxu1 %vm5612_vm6, %v19590_v52  ;;  %v19916_v52 = vpop.f32.mrf.mxu0 }
 0x64d   :  { %22377 = vst [vmem:[#allocation78_spill] sm:$0xff] %v19894_v28  ;;  %v19901_v57 = vadd.f32 %v13520_v19, %v19607_v15  ;;  %13698 = vmatprep.mubr.msk.bf16.mxu1 %vm5612_vm6, %v19610_v25  ;;  %v22385_v19 = vld [vmem:[#allocation21_spill] sm:$0xff]  ;;  %v22386_v25 = vld [vmem:[#allocation62_spill] sm:$0xff] }
 0x64e   :  { %v9324_v59 = vpop.f32.mrf.mxu1 }
 0x64f   :  { %22378 = vst [vmem:[#allocation74_spill] sm:$0xff] %v19901_v57  ;;  %v19906_v27 = vadd.f32 %v9324_v59, %v22379_v50  ;;  %v22387_v59 = vld [vmem:[#allocation13_spill] sm:$0xff] }
 0x650   :  { %v13521_v4 = vpop.f32.mrf.mxu1 }
 0x651   :  { %22380 = vst [vmem:[#allocation77_spill] sm:$0xff] %v19906_v27  ;;  %v19911_v16 = vadd.f32 %v13521_v4, %v22381_v29  ;;  %v22388_v27 = vld [vmem:[#allocation61_spill] sm:$0xff]  ;;  %v19928_v29 = vpop.f32.mrf.mxu0 }
 0x652   :  { %v9327_v39 = vpop.f32.mrf.mxu1 }
 0x653   :  { %22382 = vst [vmem:[#allocation80_spill] sm:$0xff] %v19911_v16  ;;  %v19914_v34 = vadd.f32 %v9327_v39, %v22383_v30  ;;  %v22389_v30 = vld [vmem:[#allocation24_spill] sm:$0xff] }
 0x654   :  { %v13524_v15 = vpop.f32.mrf.mxu1  ;;  %13699 = vmatmul.mubr.msk.bf16.gmra.mxu1 %vm5612_vm6, %v22385_v19  ;;  %v19936_v19 = vpop.f32.mrf.mxu0 }
 0x655   :  { %22384 = vst [vmem:[#allocation37_spill] sm:$0xff] %v19914_v34  ;;  %v19921_v57 = vadd.f32 %v13524_v15, %v22386_v25  ;;  %13702 = vmatprep.mubr.msk.bf16.mxu1 %vm5612_vm6, %v22387_v59 }
 0x656   :  { %v9340_v50 = vpop.f32.mrf.mxu1 }
 0x657   :  { %v19926_v4 = vadd.f32 %v9340_v50, %v22388_v27  ;;  %v19948_v50 = vpop.f32.mrf.mxu0 }
 0x658   :  { %v13525_v39 = vpop.f32.mrf.mxu1 }
 0x659   :  { %v19931_v16 = vadd.f32 %v13525_v39, %v22389_v30 }
 0x65a   :  { %v9343_v34 = vpop.f32.mrf.mxu1 }
 0x65b   :  { %v19934_v28 = vadd.f32 %v9343_v34, %v22390_v18 }
 0x65c   :  { %v13528_v15 = vpop.f32.mrf.mxu1  ;;  %13703 = vmatmul.mubr.msk.bf16.gmra.mxu1 %vm5612_vm6, %v19638_v10  ;;  %v19956_v10 = vpop.f32.mrf.mxu0 }
 0x65d   :  { %v19941_v25 = vadd.f32 %v13528_v15, %v19655_v48  ;;  %13706 = vmatprep.mubr.msk.bf16.mxu1 %vm5612_vm6, %v19658_v21  ;;  %v9080_v15 = vld [vmem:[#allocation2 + $0x352] sm:$0xff] }
 0x65e   :  { %v9356_v27 = vpop.f32.mrf.mxu1 }
 0x65f   :  { %22391 = vst [vmem:[#allocation35_spill] sm:$0xff] %v19941_v25  ;;  %v19946_v59 = vadd.f32 %v9356_v27, %v19660_v11  ;;  %v9079_v11 = vld [vmem:[#allocation2 + $0x34a] sm:$0xff]  ;;  %v22423_v25 = vld [vmem:[#allocation67_spill] sm:$0xff] }
 0x660   :  { %v13529_v18 = vpop.f32.mrf.mxu1 }
 0x661   :  { %v19951_v34 = vadd.f32 %v13529_v18, %v19667_v37 }
 0x662   :  { %v9359_v39 = vpop.f32.mrf.mxu1 }
 0x663   :  { %22392 = vst [vmem:[#allocation44_spill] sm:$0xff] %v19951_v34  ;;  %v19954_v30 = vadd.f32 %v9359_v39, %v19676_v56  ;;  %v19968_v56 = vpop.f32.mrf.mxu0  ;;  %v9990_v39 = vpack.c.bf16 %v9080_v15, %v9079_v11  ;;  %v22401_v15 = vld [vmem:[#allocation28_spill] sm:$0xff] }
 0x664   :  { %v13532_v48 = vpop.f32.mrf.mxu1  ;;  %13707 = vmatmul.mubr.msk.bf16.gmra.mxu1 %vm5612_vm6, %v19662_v35 }
 0x665   :  { %22393 = vst [vmem:[#allocation36_spill] sm:$0xff] %v19954_v30  ;;  %v19961_v21 = vadd.f32 %v13532_v48, %v19679_v2  ;;  %13710 = vmatprep.mubr.msk.bf16.mxu1 %vm5612_vm6, %v19682_v33  ;;  %v19976_v48 = vpop.f32.mrf.mxu0  ;;  %v22418_v30 = vld [vmem:[#allocation68_spill] sm:$0xff] }
 0x666   :  { %v9372_v37 = vpop.f32.mrf.mxu1 }
 0x667   :  { %22394 = vst [vmem:[#allocation41_spill] sm:$0xff] %v19961_v21  ;;  %v19966_v27 = vadd.f32 %v9372_v37, %v19684_v62  ;;  %v22399_v37 = vld [vmem:[#allocation25_spill] sm:$0xff]  ;;  %v19985_v11 = vpop.f32.mrf.mxu0 }
 0x668   :  { %v13533_v18 = vpop.f32.mrf.mxu1 }
 0x669   :  { %22395 = vst [vmem:[#allocation42_spill] sm:$0xff] %v19966_v27  ;;  %v19971_v34 = vadd.f32 %v13533_v18, %v19689_v22 }
 0x66a   :  { %v9375_v35 = vpop.f32.mrf.mxu1 }
 0x66b   :  { %22396 = vst [vmem:[#allocation47_spill] sm:$0xff] %v19971_v34  ;;  %v19974_v2 = vadd.f32 %v9375_v35, %v19696_v46  ;;  %v19993_v34 = vpop.f32.mrf.mxu0 }
 0x66c   :  { %v13536_v33 = vpop.f32.mrf.mxu1  ;;  %13711 = vmatmul.mubr.msk.bf16.gmra.mxu1 %vm5612_vm6, %v9990_v39 }
 0x66d   :  { %22397 = vst [vmem:[#allocation43_spill] sm:$0xff] %v19974_v2  ;;  %v19980_v21 = vadd.f32 %v13536_v33, %v19699_v26  ;;  %v22407_v2 = vld [vmem:[#allocation22_spill] sm:$0xff] }
 0x66e   :  { %v9388_v62 = vpop.f32.mrf.mxu1 }
 0x66f   :  { %22398 = vst [vmem:[#allocation46_spill] sm:$0xff] %v19980_v21  ;;  %v19983_v27 = vadd.f32 %v9388_v62, %v22399_v37  ;;  %v22405_v21 = vld [vmem:[#allocation63_spill] sm:$0xff]  ;;  %v20001_v37 = vpop.f32.mrf.mxu0 }
 0x670   :  { %v13537_v22 = vpop.f32.mrf.mxu1 }
 0x671   :  { %22400 = vst [vmem:[#allocation14_spill] sm:$0xff] %v19983_v27  ;;  %v19988_v18 = vadd.f32 %v13537_v22, %v22401_v15 }
 0x672   :  { %v9391_v46 = vpop.f32.mrf.mxu1 }
 0x673   :  { %22402 = vst [vmem:[#allocation54_spill] sm:$0xff] %v19988_v18  ;;  %v19991_v35 = vadd.f32 %v9391_v46, %v19712_v7  ;;  %v20009_v46 = vpop.f32.mrf.mxu0 }
 0x674   :  { %v13540_v39 = vpop.f32.mrf.mxu1 }
 0x675   :  { %22403 = vst [vmem:[#allocation45_spill] sm:$0xff] %v19991_v35  ;;  %v19996_v26 = vadd.f32 %v13540_v39, %v19715_v42  ;;  %v22413_v35 = vld [vmem:[#allocation27_spill] sm:$0xff] }
 0x676   :  { %v9404_v33 = vpop.f32.mrf.mxu1 }
 0x677   :  { %22404 = vst [vmem:[#allocation48_spill] sm:$0xff] %v19996_v26  ;;  %v19999_v62 = vadd.f32 %v9404_v33, %v22405_v21  ;;  %v22411_v26 = vld [vmem:[#allocation64_spill] sm:$0xff]  ;;  %v20017_v33 = vpop.f32.mrf.mxu0 }
 0x678   :  { %v13541_v27 = vpop.f32.mrf.mxu1 }
 0x679   :  { %22406 = vst [vmem:[#allocation55_spill] sm:$0xff] %v19999_v62  ;;  %v20004_v22 = vadd.f32 %v13541_v27, %v22407_v2 }
 0x67a   :  { %v9407_v15 = vpop.f32.mrf.mxu1 }
 0x67b   :  { %22408 = vst [vmem:[#allocation3_spill] sm:$0xff] %v20004_v22  ;;  %v20007_v7 = vadd.f32 %v9407_v15, %v19728_v49  ;;  %v22415_v22 = vld [vmem:[#allocation66_spill] sm:$0xff]  ;;  %v20025_v15 = vpop.f32.mrf.mxu0 }
 0x67c   :  { %v13544_v18 = vpop.f32.mrf.mxu1  ;;  %22417 = vst [vmem:[#allocation58_spill] sm:$0xff] %v20025_v15  ;;  %v22428_v15 = vld [vmem:[#allocation30_spill] sm:$0xff] }
 0x67d   :  { %22409 = vst [vmem:[#allocation56_spill] sm:$0xff] %v20007_v7  ;;  %v20012_v42 = vadd.f32 %v13544_v18, %v19731_v31 }
 0x67e   :  { %v9420_v39 = vpop.f32.mrf.mxu1 }
 0x67f   :  { %22410 = vst [vmem:[#allocation38_spill] sm:$0xff] %v20012_v42  ;;  %v20015_v21 = vadd.f32 %v9420_v39, %v22411_v26  ;;  %v22420_v42 = vld [vmem:[#allocation65_spill] sm:$0xff]  ;;  %v20033_v39 = vpop.f32.mrf.mxu0 }
 0x680   :  { %v13545_v62 = vpop.f32.mrf.mxu1  ;;  %22422 = vst [vmem:[#allocation15_spill] sm:$0xff] %v20033_v39  ;;  %v22432_v39 = vld [vmem:[#allocation72_spill] sm:$0xff] }
 0x681   :  { %22412 = vst [vmem:[#allocation49_spill] sm:$0xff] %v20015_v21  ;;  %v20020_v27 = vadd.f32 %v13545_v62, %v22413_v35 }
 0x682   :  { %v9423_v2 = vpop.f32.mrf.mxu1 }
 0x683   :  { %22414 = vst [vmem:[#allocation39_spill] sm:$0xff] %v20020_v27  ;;  %v20023_v49 = vadd.f32 %v9423_v2, %v22415_v22  ;;  %v22425_v27 = vld [vmem:[#allocation29_spill] sm:$0xff]  ;;  %v20041_v2 = vpop.f32.mrf.mxu0 }
 0x684   :  { %v13548_v7 = vpop.f32.mrf.mxu1  ;;  %22427 = vst [vmem:[#allocation50_spill] sm:$0xff] %v20041_v2  ;;  %v22438_v2 = vld [vmem:[#allocation31_spill] sm:$0xff] }
 0x685   :  { %22416 = vst [vmem:[#allocation57_spill] sm:$0xff] %v20023_v49  ;;  %v20028_v31 = vadd.f32 %v13548_v7, %v22418_v30 }
 0x686   :  { %v9436_v18 = vpop.f32.mrf.mxu1 }
 0x687   :  { %22419 = vst [vmem:[#allocation59_spill] sm:$0xff] %v20028_v31  ;;  %v20031_v26 = vadd.f32 %v9436_v18, %v22420_v42  ;;  %v22430_v31 = vld [vmem:[#allocation70_spill] sm:$0xff]  ;;  %v20049_v18 = vpop.f32.mrf.mxu0 }
 0x688   :  { %v13549_v21 = vpop.f32.mrf.mxu1 }
 0x689   :  { %22421 = vst [vmem:[#allocation60_spill] sm:$0xff] %v20031_v26  ;;  %v20036_v35 = vadd.f32 %v13549_v21, %v22423_v25 }
 0x68a   :  { %v9439_v62 = vpop.f32.mrf.mxu1 }
 0x68b   :  { %22424 = vst [vmem:[#allocation73_spill] sm:$0xff] %v20036_v35  ;;  %v20039_v22 = vadd.f32 %v9439_v62, %v22425_v27  ;;  %v20057_v62 = vpop.f32.mrf.mxu0 }
 0x68c   :  { %v13552_v49 = vpop.f32.mrf.mxu1 }
 0x68d   :  { %22426 = vst [vmem:[#allocation16_spill] sm:$0xff] %v20039_v22  ;;  %v20044_v30 = vadd.f32 %v13552_v49, %v22428_v15  ;;  %v22434_v22 = vld [vmem:[#allocation69_spill] sm:$0xff] }
 0x68e   :  { %v9452_v7 = vpop.f32.mrf.mxu1 }
 0x68f   :  { %22429 = vst [vmem:[#allocation6_spill] sm:$0xff] %v20044_v30  ;;  %v20047_v42 = vadd.f32 %v9452_v7, %v22430_v31  ;;  %v22436_v30 = vld [vmem:[#allocation71_spill] sm:$0xff]  ;;  %v20065_v7 = vpop.f32.mrf.mxu0 }
 0x690   :  { %v13553_v26 = vpop.f32.mrf.mxu1 }
 0x691   :  { %22431 = vst [vmem:[#allocation51_spill] sm:$0xff] %v20047_v42  ;;  %v20052_v25 = vadd.f32 %v13553_v26, %v22432_v39 }
 0x692   :  { %v9455_v21 = vpop.f32.mrf.mxu1 }
 0x693   :  { %22433 = vst [vmem:[#allocation79_spill] sm:$0xff] %v20052_v25  ;;  %v20055_v27 = vadd.f32 %v9455_v21, %v19776_v14  ;;  %v20073_v21 = vpop.f32.mrf.mxu0 }
 0x694   :  { %v13556_v35 = vpop.f32.mrf.mxu1 }
 0x695   :  { %v20060_v49 = vadd.f32 %v13556_v35, %v22434_v22 }
 0x696   :  { %v9468_v15 = vpop.f32.mrf.mxu1 }
 0x697   :  { %22435 = vst [vmem:[#allocation4_spill] sm:$0xff] %v20060_v49  ;;  %v20063_v31 = vadd.f32 %v9468_v15, %v22436_v30  ;;  %v20081_v15 = vpop.f32.mrf.mxu0 }
 0x698   :  { %v13557_v42 = vpop.f32.mrf.mxu1 }
 0x699   :  { %22437 = vst [vmem:[#allocation76_spill] sm:$0xff] %v20063_v31  ;;  %v20068_v26 = vadd.f32 %v13557_v42, %v22438_v2  ;;  %v22441_v31 = vld [vmem:[#allocation34_spill] sm:$0xff] }
 0x69a   :  { %v9471_v39 = vpop.f32.mrf.mxu1 }
 0x69b   :  { %22439 = vst [vmem:[#allocation5_spill] sm:$0xff] %v20068_v26  ;;  %v20071_v14 = vadd.f32 %v9471_v39, %v19792_v60  ;;  %v20089_v39 = vpop.f32.mrf.mxu0 }
 0x69c   :  { %v13560_v25 = vpop.f32.mrf.mxu1 }
 0x69d   :  { %v20076_v35 = vadd.f32 %v13560_v25, %v19795_v17 }
 0x69e   :  { %v9484_v22 = vpop.f32.mrf.mxu1 }
 0x69f   :  { %22440 = vst [vmem:[#allocation40_spill] sm:$0xff] %v20076_v35  ;;  %v20079_v30 = vadd.f32 %v9484_v22, %v19798_v8  ;;  %v20097_v22 = vpop.f32.mrf.mxu0 }
 0x6a0   :  { %v13561_v49 = vpop.f32.mrf.mxu1 }
 0x6a1   :  { %v20084_v2 = vadd.f32 %v13561_v49, %v22441_v31 }
 0x6a2   :  { %v9487_v42 = vpop.f32.mrf.mxu1 }
 0x6a3   :  { %22442 = vst [vmem:[#allocation18_spill] sm:$0xff] %v20084_v2  ;;  %v20087_v60 = vadd.f32 %v9487_v42, %v19808_v40  ;;  %v20105_v42 = vpop.f32.mrf.mxu0 }
 0x6a4   :  { %v13564_v26 = vpop.f32.mrf.mxu1 }
 0x6a5   :  { %v20092_v17 = vadd.f32 %v13564_v26, %v19811_v23 }
 0x6a6   :  { %v9500_v25 = vpop.f32.mrf.mxu1 }
 0x6a7   :  { %22443 = vst [vmem:[#allocation17_spill] sm:$0xff] %v20092_v17  ;;  %v20095_v8 = vadd.f32 %v9500_v25, %v19814_v43  ;;  %v20113_v25 = vpop.f32.mrf.mxu0 }
 0x6a8   :  { %v13565_v35 = vpop.f32.mrf.mxu1 }
 0x6a9   :  { %v20100_v49 = vadd.f32 %v13565_v35, %v19817_v61 }
 0x6aa   :  { %v9503_v31 = vpop.f32.mrf.mxu1 }
 0x6ab   :  { %22444 = vst [vmem:[#allocation52_spill] sm:$0xff] %v20100_v49  ;;  %v20103_v40 = vadd.f32 %v9503_v31, %v19823_v63  ;;  %v20121_v31 = vpop.f32.mrf.mxu0 }
 0x6ac   :  { %v13568_v2 = vpop.f32.mrf.mxu1 }
 0x6ad   :  { %22445 = vst [vmem:[#allocation53_spill] sm:$0xff] %v20103_v40  ;;  %v20108_v23 = vadd.f32 %v13568_v2, %v19826_v44  ;;  %v9925_v44 = vadd.f32 %v19848_v24, %v19846_v36  ;;  %v20125_v2 = vpop.f32.mrf.mxu0 }
 0x6ae   :  { %v9516_v26 = vpop.f32.mrf.mxu1 }
 0x6af   :  { %22446 = vst [vmem:[#allocation7_spill] sm:$0xff] %v20108_v23  ;;  %v20111_v43 = vadd.f32 %v9516_v26, %v19829_v45  ;;  %v9927_v26 = vadd.f32 %v19834_v38, %v19839_v5  ;;  %v20139_v36 = vpop.f32.mrf.mxu0 }
 0x6b0   :  { %v13569_v17 = vpop.f32.mrf.mxu1 }
 0x6b1   :  { %v20116_v61 = vadd.f32 %v13569_v17, %v19832_v47  ;;  %v9926_v47 = vadd.f32 %v19868_v6, %v19854_v51 }
 0x6b2   :  { %v9519_v35 = vpop.f32.mrf.mxu1 }
 0x6b3   :  { %22447 = vst [vmem:[#allocation8_spill] sm:$0xff] %v20116_v61  ;;  %v20119_v63 = vadd.f32 %v9519_v35, %v19843_v1  ;;  %v9928_v35 = vadd.f32 %v19856_v55, %v19851_v20 }
 0x6b4   :  { %v13652_v49 = vpop.f32.mrf.mxu1 }
 0x6b5   :  { %22448 = vst [vmem:[#allocation33_spill] sm:$0xff] %v20119_v63  ;;  %v20133_v17 = vadd.f32 %v13652_v49, %v9927_v26  ;;  %v9929_v63 = vadd.f32 %v19888_v13, %v19866_v0  ;;  %v20156_v0 = vpop.f32.mrf.mxu0  ;;  %v9931_v13 = vadd.f32 %v19876_v32, %v19861_v53 }
 0x6b6   :  { %v10064_v40 = vpop.f32.mrf.mxu1 }
 0x6b7   :  { %v20129_v23 = vadd.f32 %v10064_v40, %v9925_v44  ;;  %v10456_v55 = vmul.f32 %v20133_v17, %v20133_v17 }
 0x6b8   :  { %v13653_v45 = vpop.f32.mrf.mxu1 }
 0x6b9   :  { %v10454_v38 = vmul.f32 %v20129_v23, %v20129_v23  ;;  %v20145_v5 = vadd.f32 %v13653_v45, %v9928_v35  ;;  %v9930_v35 = vadd.f32 %v19908_v9, %v19874_v12  ;;  %v9933_v12 = vadd.f32 %v19928_v29, %v19886_v54 }
 0x6ba   :  { %v10067_v1 = vpop.f32.mrf.mxu1  ;;  %v9935_v54 = vadd.f32 %v19916_v52, %v19881_v58 }
 0x6bb   :  { %v20137_v61 = vadd.f32 %v10067_v1, %v9926_v47  ;;  %v10457_v26 = vmul.f32 %v20145_v5, %v20145_v5 }
 0x6bc   :  { %v13656_v24 = vpop.f32.mrf.mxu1 }
 0x6bd   :  { %22449 = vst [vmem:[#allocation19_spill] sm:$0xff] %v20137_v61  ;;  %v10385_v51 = vadd.f32 %v20137_v61, %v20129_v23  ;;  %v10455_v6 = vmul.f32 %v20137_v61, %v20137_v61  ;;  %v20165_v61 = vadd.f32 %v13656_v24, %v9931_v13 }
 0x6be   :  { %v10080_v20 = vpop.f32.mrf.mxu1 }
 0x6bf   :  { %v10386_v49 = vadd.f32 %v10385_v51, %v20133_v17  ;;  %v10518_v40 = vadd.f32 %v10455_v6, %v10454_v38  ;;  %v20154_v44 = vadd.f32 %v10080_v20, %v9929_v63  ;;  %v9932_v63 = vadd.f32 %v19896_v41, %v19871_v3  ;;  %v20174_v20 = vpop.f32.mrf.mxu0 }
 0x6c0   :  { %v13657_v45 = vpop.f32.mrf.mxu1 }
 0x6c1   :  { %v10519_v47 = vadd.f32 %v10518_v40, %v10456_v55  ;;  %v10387_v1 = vadd.f32 %v10386_v49, %v20145_v5  ;;  %v10458_v53 = vmul.f32 %v20154_v44, %v20154_v44  ;;  %v20178_v24 = vadd.f32 %v13657_v45, %v9932_v63 }
 0x6c2   :  { %v10083_v38 = vpop.f32.mrf.mxu1  ;;  %v10460_v40 = vmul.f32 %v20165_v61, %v20165_v61 }
 0x6c3   :  { %v10388_v51 = vadd.f32 %v10387_v1, %v20154_v44  ;;  %v10520_v32 = vadd.f32 %v10519_v47, %v10457_v26  ;;  %v20172_v6 = vadd.f32 %v10083_v38, %v9930_v35  ;;  %v20188_v1 = vpop.f32.mrf.mxu0  ;;  %v10461_v45 = vmul.f32 %v20178_v24, %v20178_v24  ;;  %v22450_v38 = vld [vmem:[#allocation78_spill] sm:$0xff] }
 0x6c4   :  { %v13660_v55 = vpop.f32.mrf.mxu1 }
 0x6c5   :  { %v10521_v9 = vadd.f32 %v10520_v32, %v10458_v53  ;;  %v10389_v3 = vadd.f32 %v10388_v51, %v20172_v6  ;;  %v10459_v41 = vmul.f32 %v20172_v6, %v20172_v6  ;;  %v9934_v51 = vadd.f32 %v19948_v50, %v22450_v38  ;;  %v22451_v32 = vld [vmem:[#allocation75_spill] sm:$0xff] }
 0x6c6   :  { %v10096_v49 = vpop.f32.mrf.mxu1  ;;  %v20197_v53 = vadd.f32 %v13660_v55, %v9935_v54 }
 0x6c7   :  { %v10390_v13 = vadd.f32 %v10389_v3, %v20165_v61  ;;  %v10522_v26 = vadd.f32 %v10521_v9, %v10459_v41  ;;  %v20186_v47 = vadd.f32 %v10096_v49, %v9933_v12  ;;  %v9936_v12 = vadd.f32 %v19936_v19, %v22451_v32  ;;  %v20206_v49 = vpop.f32.mrf.mxu0 }
 0x6c8   :  { %v13661_v29 = vpop.f32.mrf.mxu1 }
 0x6c9   :  { %v10523_v35 = vadd.f32 %v10522_v26, %v10460_v40  ;;  %v10391_v63 = vadd.f32 %v10390_v13, %v20178_v24  ;;  %v10462_v58 = vmul.f32 %v20186_v47, %v20186_v47  ;;  %v22453_v13 = vld [vmem:[#allocation77_spill] sm:$0xff]  ;;  %v20210_v26 = vadd.f32 %v13661_v29, %v9936_v12  ;;  %v20220_v32 = vpop.f32.mrf.mxu0 }
 0x6ca   :  { %v10099_v9 = vpop.f32.mrf.mxu1  ;;  %v9937_v50 = vadd.f32 %v19968_v56, %v22453_v13  ;;  %v22454_v56 = vld [vmem:[#allocation74_spill] sm:$0xff] }
 0x6cb   :  { %v10392_v3 = vadd.f32 %v10391_v63, %v20186_v47  ;;  %v10524_v52 = vadd.f32 %v10523_v35, %v10461_v45  ;;  %v20204_v41 = vadd.f32 %v10099_v9, %v9934_v51  ;;  %v10464_v45 = vmul.f32 %v20197_v53, %v20197_v53 }
 0x6cc   :  { %v13664_v40 = vpop.f32.mrf.mxu1  ;;  %v9939_v29 = vadd.f32 %v19956_v10, %v22454_v56  ;;  %v10465_v9 = vmul.f32 %v20210_v26, %v20210_v26 }
 0x6cd   :  { %22452 = vst [vmem:[#allocation9_spill] sm:$0xff] %v20204_v41  ;;  %v10525_v55 = vadd.f32 %v10524_v52, %v10462_v58  ;;  %v10393_v19 = vadd.f32 %v10392_v3, %v20204_v41  ;;  %v10463_v54 = vmul.f32 %v20204_v41, %v20204_v41  ;;  %v22455_v52 = vld [vmem:[#allocation37_spill] sm:$0xff] }
 0x6ce   :  { %v10112_v63 = vpop.f32.mrf.mxu1  ;;  %v9938_v13 = vadd.f32 %v19985_v11, %v22455_v52  ;;  %v20229_v41 = vadd.f32 %v13664_v40, %v9939_v29  ;;  %v9941_v11 = vadd.f32 %v20001_v37, %v19926_v4  ;;  %v9943_v4 = vadd.f32 %v19993_v34, %v19921_v57 }
 0x6cf   :  { %v10394_v35 = vadd.f32 %v10393_v19, %v20197_v53  ;;  %v10526_v38 = vadd.f32 %v10525_v55, %v10463_v54  ;;  %v20218_v51 = vadd.f32 %v10112_v63, %v9937_v50  ;;  %v22456_v55 = vld [vmem:[#allocation80_spill] sm:$0xff] }
 0x6d0   :  { %v13665_v12 = vpop.f32.mrf.mxu1  ;;  %v9940_v50 = vadd.f32 %v19976_v48, %v22456_v55 }
 0x6d1   :  { %v10527_v3 = vadd.f32 %v10526_v38, %v10464_v45  ;;  %v10395_v58 = vadd.f32 %v10394_v35, %v20210_v26  ;;  %v10466_v10 = vmul.f32 %v20218_v51, %v20218_v51  ;;  %v20238_v45 = vpop.f32.mrf.mxu0 }
 0x6d2   :  { %v10115_v19 = vpop.f32.mrf.mxu1  ;;  %v20242_v38 = vadd.f32 %v13665_v12, %v9940_v50 }
 0x6d3   :  { %v10396_v54 = vadd.f32 %v10395_v58, %v20218_v51  ;;  %v10528_v63 = vadd.f32 %v10527_v3, %v10465_v9  ;;  %v20236_v56 = vadd.f32 %v10115_v19, %v9938_v13  ;;  %v10468_v9 = vmul.f32 %v20229_v41, %v20229_v41  ;;  %v20252_v55 = vpop.f32.mrf.mxu0 }
 0x6d4   :  { %v13668_v35 = vpop.f32.mrf.mxu1  ;;  %v10469_v12 = vmul.f32 %v20242_v38, %v20242_v38 }
 0x6d5   :  { %v10529_v40 = vadd.f32 %v10528_v63, %v10466_v10  ;;  %v10397_v48 = vadd.f32 %v10396_v54, %v20236_v56  ;;  %v10467_v29 = vmul.f32 %v20236_v56, %v20236_v56  ;;  %v9942_v54 = vadd.f32 %v20017_v33, %v19934_v28 }
 0x6d6   :  { %v10128_v58 = vpop.f32.mrf.mxu1  ;;  %v20261_v10 = vadd.f32 %v13668_v35, %v9943_v4  ;;  %v9944_v63 = vadd.f32 %v20009_v46, %v19931_v16 }
 0x6d7   :  { %v10398_v3 = vadd.f32 %v10397_v48, %v20229_v41  ;;  %v10530_v52 = vadd.f32 %v10529_v40, %v10467_v29  ;;  %v20250_v13 = vadd.f32 %v10128_v58, %v9941_v11  ;;  %v20270_v29 = vpop.f32.mrf.mxu0 }
 0x6d8   :  { %v13669_v37 = vpop.f32.mrf.mxu1  ;;  %22457 = vst [vmem:[#allocation12_spill] sm:$0xff] %v20261_v10 }
 0x6d9   :  { %v10531_v50 = vadd.f32 %v10530_v52, %v10468_v9  ;;  %v10399_v19 = vadd.f32 %v10398_v3, %v20242_v38  ;;  %v10470_v57 = vmul.f32 %v20250_v13, %v20250_v13  ;;  %v22459_v9 = vld [vmem:[#allocation15_spill] sm:$0xff]  ;;  %v20274_v35 = vadd.f32 %v13669_v37, %v9944_v63 }
 0x6da   :  { %v10131_v11 = vpop.f32.mrf.mxu1  ;;  %v9945_v28 = vadd.f32 %v22459_v9, %v19946_v59  ;;  %v10472_v52 = vmul.f32 %v20261_v10, %v20261_v10  ;;  %v22461_v59 = vld [vmem:[#allocation35_spill] sm:$0xff] }
 0x6db   :  { %v10400_v40 = vadd.f32 %v10399_v19, %v20250_v13  ;;  %v10532_v34 = vadd.f32 %v10531_v50, %v10469_v12  ;;  %v20268_v48 = vadd.f32 %v10131_v11, %v9942_v54  ;;  %v20284_v19 = vpop.f32.mrf.mxu0  ;;  %v22462_v54 = vld [vmem:[#allocation58_spill] sm:$0xff]  ;;  %v10473_v11 = vmul.f32 %v20274_v35, %v20274_v35 }
 0x6dc   :  { %v13672_v58 = vpop.f32.mrf.mxu1  ;;  %v9947_v37 = vadd.f32 %v22462_v54, %v22461_v59 }
 0x6dd   :  { %22458 = vst [vmem:[#allocation10_spill] sm:$0xff] %v20268_v48  ;;  %v10533_v33 = vadd.f32 %v10532_v34, %v10470_v57  ;;  %v10401_v16 = vadd.f32 %v10400_v40, %v20268_v48  ;;  %v10471_v46 = vmul.f32 %v20268_v48, %v20268_v48  ;;  %v22463_v34 = vld [vmem:[#allocation36_spill] sm:$0xff] }
 0x6de   :  { %v10144_v3 = vpop.f32.mrf.mxu1  ;;  %v9946_v9 = vadd.f32 %v20049_v18, %v22463_v34  ;;  %v20293_v48 = vadd.f32 %v13672_v58, %v9947_v37 }
 0x6df   :  { %v10402_v4 = vadd.f32 %v10401_v16, %v20261_v10  ;;  %v10534_v12 = vadd.f32 %v10533_v33, %v10471_v46  ;;  %v20282_v50 = vadd.f32 %v10144_v3, %v9945_v28  ;;  %v22464_v33 = vld [vmem:[#allocation44_spill] sm:$0xff]  ;;  %v22465_v28 = vld [vmem:[#allocation50_spill] sm:$0xff] }
 0x6e0   :  { %v13673_v63 = vpop.f32.mrf.mxu1  ;;  %v9948_v16 = vadd.f32 %v22465_v28, %v22464_v33 }
 0x6e1   :  { %22460 = vst [vmem:[#allocation11_spill] sm:$0xff] %v20282_v50  ;;  %v10535_v40 = vadd.f32 %v10534_v12, %v10472_v52  ;;  %v10403_v57 = vadd.f32 %v10402_v4, %v20274_v35  ;;  %v10474_v59 = vmul.f32 %v20282_v50, %v20282_v50  ;;  %v20302_v52 = vpop.f32.mrf.mxu0  ;;  %v22467_v12 = vld [vmem:[#allocation42_spill] sm:$0xff] }
 0x6e2   :  { %v10147_v46 = vpop.f32.mrf.mxu1  ;;  %v9949_v18 = vadd.f32 %v20065_v7, %v22467_v12  ;;  %v20306_v37 = vadd.f32 %v13673_v63, %v9948_v16  ;;  %v22469_v7 = vld [vmem:[#allocation41_spill] sm:$0xff]  ;;  %v22470_v12 = vld [vmem:[#allocation43_spill] sm:$0xff] }
 0x6e3   :  { %v10404_v3 = vadd.f32 %v10403_v57, %v20282_v50  ;;  %v10536_v54 = vadd.f32 %v10535_v40, %v10473_v11  ;;  %v20300_v10 = vadd.f32 %v10147_v46, %v9946_v9  ;;  %v10476_v11 = vmul.f32 %v20293_v48, %v20293_v48  ;;  %v20316_v46 = vpop.f32.mrf.mxu0 }
 0x6e4   :  { %v13676_v4 = vpop.f32.mrf.mxu1  ;;  %v9951_v63 = vadd.f32 %v20057_v62, %v22469_v7 }
 0x6e5   :  { %22466 = vst [vmem:[#allocation23_spill] sm:$0xff] %v20300_v10  ;;  %v10537_v58 = vadd.f32 %v10536_v54, %v10474_v59  ;;  %v10405_v34 = vadd.f32 %v10404_v3, %v20300_v10  ;;  %v10475_v57 = vmul.f32 %v20300_v10, %v20300_v10  ;;  %v10477_v3 = vmul.f32 %v20306_v37, %v20306_v37 }
 0x6e6   :  { %v10160_v33 = vpop.f32.mrf.mxu1  ;;  %v9950_v10 = vadd.f32 %v20081_v15, %v22470_v12  ;;  %v20325_v50 = vadd.f32 %v13676_v4, %v9951_v63 }
 0x6e7   :  { %v10406_v40 = vadd.f32 %v10405_v34, %v20293_v48  ;;  %v10538_v9 = vadd.f32 %v10537_v58, %v10475_v57  ;;  %v20314_v28 = vadd.f32 %v10160_v33, %v9949_v18  ;;  %v22471_v58 = vld [vmem:[#allocation47_spill] sm:$0xff] }
 0x6e8   :  { %v13677_v16 = vpop.f32.mrf.mxu1  ;;  %v9952_v18 = vadd.f32 %v20073_v21, %v22471_v58 }
 0x6e9   :  { %22468 = vst [vmem:[#allocation20_spill] sm:$0xff] %v20314_v28  ;;  %v10539_v59 = vadd.f32 %v10538_v9, %v10476_v11  ;;  %v10407_v54 = vadd.f32 %v10406_v40, %v20306_v37  ;;  %v10478_v62 = vmul.f32 %v20314_v28, %v20314_v28  ;;  %v20334_v11 = vpop.f32.mrf.mxu0  ;;  %v22473_v9 = vld [vmem:[#allocation14_spill] sm:$0xff] }
 0x6ea   :  { %v10163_v34 = vpop.f32.mrf.mxu1  ;;  %v9953_v15 = vadd.f32 %v20097_v22, %v22473_v9  ;;  %v20338_v63 = vadd.f32 %v13677_v16, %v9952_v18  ;;  %v22475_v22 = vld [vmem:[#allocation46_spill] sm:$0xff]  ;;  %v22476_v9 = vld [vmem:[#allocation45_spill] sm:$0xff] }
 0x6eb   :  { %v10408_v57 = vadd.f32 %v10407_v54, %v20314_v28  ;;  %v10540_v33 = vadd.f32 %v10539_v59, %v10477_v3  ;;  %v20332_v7 = vadd.f32 %v10163_v34, %v9950_v10  ;;  %v10480_v3 = vmul.f32 %v20325_v50, %v20325_v50  ;;  %v20348_v34 = vpop.f32.mrf.mxu0 }
 0x6ec   :  { %v13680_v40 = vpop.f32.mrf.mxu1  ;;  %v9955_v16 = vadd.f32 %v20089_v39, %v22475_v22 }
 0x6ed   :  { %22472 = vst [vmem:[#allocation21_spill] sm:$0xff] %v20332_v7  ;;  %v10541_v4 = vadd.f32 %v10540_v33, %v10478_v62  ;;  %v10409_v21 = vadd.f32 %v10408_v57, %v20332_v7  ;;  %v10479_v54 = vmul.f32 %v20332_v7, %v20332_v7  ;;  %v10481_v57 = vmul.f32 %v20338_v63, %v20338_v63 }
 0x6ee   :  { %v10176_v12 = vpop.f32.mrf.mxu1  ;;  %v9954_v7 = vadd.f32 %v20113_v25, %v22476_v9  ;;  %v20357_v28 = vadd.f32 %v13680_v40, %v9955_v16 }
 0x6ef   :  { %v10410_v10 = vadd.f32 %v10409_v21, %v20325_v50  ;;  %v10542_v59 = vadd.f32 %v10541_v4, %v10479_v54  ;;  %v20346_v58 = vadd.f32 %v10176_v12, %v9953_v15  ;;  %v22477_v4 = vld [vmem:[#allocation54_spill] sm:$0xff] }
 0x6f0   :  { %v13681_v18 = vpop.f32.mrf.mxu1  ;;  %v9956_v15 = vadd.f32 %v20105_v42, %v22477_v4 }
 0x6f1   :  { %22474 = vst [vmem:[#allocation62_spill] sm:$0xff] %v20346_v58  ;;  %v10543_v62 = vadd.f32 %v10542_v59, %v10480_v3  ;;  %v10411_v33 = vadd.f32 %v10410_v10, %v20338_v63  ;;  %v10482_v39 = vmul.f32 %v20346_v58, %v20346_v58  ;;  %v20366_v3 = vpop.f32.mrf.mxu0  ;;  %v22479_v59 = vld [vmem:[#allocation55_spill] sm:$0xff] }
 0x6f2   :  { %v10179_v21 = vpop.f32.mrf.mxu1  ;;  %v9957_v25 = vadd.f32 %v20125_v2, %v22479_v59  ;;  %v20370_v16 = vadd.f32 %v13681_v18, %v9956_v15  ;;  %v22481_v2 = vld [vmem:[#allocation48_spill] sm:$0xff] }
 0x6f3   :  { %v10412_v54 = vadd.f32 %v10411_v33, %v20346_v58  ;;  %v10544_v12 = vadd.f32 %v10543_v62, %v10481_v57  ;;  %v20364_v22 = vadd.f32 %v10179_v21, %v9954_v7  ;;  %v10484_v57 = vmul.f32 %v20357_v28, %v20357_v28  ;;  %v20380_v21 = vpop.f32.mrf.mxu0  ;;  %v22482_v59 = vld [vmem:[#allocation56_spill] sm:$0xff] }
 0x6f4   :  { %v13684_v10 = vpop.f32.mrf.mxu1  ;;  %v9959_v18 = vadd.f32 %v20121_v31, %v22481_v2 }
 0x6f5   :  { %22478 = vst [vmem:[#allocation13_spill] sm:$0xff] %v20364_v22  ;;  %v10545_v40 = vadd.f32 %v10544_v12, %v10482_v39  ;;  %v10413_v42 = vadd.f32 %v10412_v54, %v20364_v22  ;;  %v10483_v33 = vmul.f32 %v20364_v22, %v20364_v22  ;;  %v10485_v54 = vmul.f32 %v20370_v16, %v20370_v16 }
 0x6f6   :  { %v10192_v9 = vpop.f32.mrf.mxu1  ;;  %v9958_v22 = vadd.f32 %v20156_v0, %v22482_v59  ;;  %v20389_v58 = vadd.f32 %v13684_v10, %v9959_v18 }
 0x6f7   :  { %v10414_v7 = vadd.f32 %v10413_v42, %v20357_v28  ;;  %v10546_v62 = vadd.f32 %v10545_v40, %v10483_v33  ;;  %v20378_v4 = vadd.f32 %v10192_v9, %v9957_v25  ;;  %v22483_v40 = vld [vmem:[#allocation3_spill] sm:$0xff] }
 0x6f8   :  { %v13685_v15 = vpop.f32.mrf.mxu1  ;;  %v9960_v25 = vadd.f32 %v20139_v36, %v22483_v40 }
 0x6f9   :  { %22480 = vst [vmem:[#allocation61_spill] sm:$0xff] %v20378_v4  ;;  %v10547_v39 = vadd.f32 %v10546_v62, %v10484_v57  ;;  %v10415_v12 = vadd.f32 %v10414_v7, %v20370_v16  ;;  %v10486_v31 = vmul.f32 %v20378_v4, %v20378_v4  ;;  %v20398_v57 = vpop.f32.mrf.mxu0  ;;  %v22485_v62 = vld [vmem:[#allocation49_spill] sm:$0xff] }
 0x6fa   :  { %v10195_v42 = vpop.f32.mrf.mxu1  ;;  %v9961_v0 = vadd.f32 %v20188_v1, %v22485_v62  ;;  %v20402_v18 = vadd.f32 %v13685_v15, %v9960_v25  ;;  %v22487_v1 = vld [vmem:[#allocation38_spill] sm:$0xff]  ;;  %v22488_v62 = vld [vmem:[#allocation57_spill] sm:$0xff] }
 0x6fb   :  { %v10416_v33 = vadd.f32 %v10415_v12, %v20378_v4  ;;  %v10548_v9 = vadd.f32 %v10547_v39, %v10485_v54  ;;  %v20396_v2 = vadd.f32 %v10195_v42, %v9958_v22  ;;  %v10488_v54 = vmul.f32 %v20389_v58, %v20389_v58  ;;  %v20412_v42 = vpop.f32.mrf.mxu0 }
 0x6fc   :  { %v13688_v7 = vpop.f32.mrf.mxu1  ;;  %v9963_v15 = vadd.f32 %v20174_v20, %v22487_v1 }
 0x6fd   :  { %22484 = vst [vmem:[#allocation24_spill] sm:$0xff] %v20396_v2  ;;  %v10549_v10 = vadd.f32 %v10548_v9, %v10486_v31  ;;  %v10417_v36 = vadd.f32 %v10416_v33, %v20396_v2  ;;  %v10487_v12 = vmul.f32 %v20396_v2, %v20396_v2  ;;  %v10489_v33 = vmul.f32 %v20402_v18, %v20402_v18 }
 0x6fe   :  { %v10208_v59 = vpop.f32.mrf.mxu1  ;;  %v9962_v2 = vadd.f32 %v20220_v32, %v22488_v62  ;;  %v20421_v4 = vadd.f32 %v13688_v7, %v9963_v15 }
 0x6ff   :  { %v10418_v22 = vadd.f32 %v10417_v36, %v20389_v58  ;;  %v10550_v39 = vadd.f32 %v10549_v10, %v10487_v12  ;;  %v20410_v40 = vadd.f32 %v10208_v59, %v9961_v0  ;;  %v22489_v10 = vld [vmem:[#allocation39_spill] sm:$0xff] }
 0x700   :  { %v13689_v25 = vpop.f32.mrf.mxu1  ;;  %v9964_v0 = vadd.f32 %v20206_v49, %v22489_v10 }
 0x701   :  { %22486 = vst [vmem:[#allocation26_spill] sm:$0xff] %v20410_v40  ;;  %v10551_v31 = vadd.f32 %v10550_v39, %v10488_v54  ;;  %v10419_v9 = vadd.f32 %v10418_v22, %v20402_v18  ;;  %v10490_v20 = vmul.f32 %v20410_v40, %v20410_v40  ;;  %v20430_v54 = vpop.f32.mrf.mxu0  ;;  %v22491_v39 = vld [vmem:[#allocation60_spill] sm:$0xff] }
 0x702   :  { %v10211_v36 = vpop.f32.mrf.mxu1  ;;  %v9965_v32 = vadd.f32 %v20252_v55, %v22491_v39  ;;  %v20434_v15 = vadd.f32 %v13689_v25, %v9964_v0  ;;  %v22493_v55 = vld [vmem:[#allocation59_spill] sm:$0xff]  ;;  %v22494_v39 = vld [vmem:[#allocation16_spill] sm:$0xff] }
 0x703   :  { %v10420_v12 = vadd.f32 %v10419_v9, %v20410_v40  ;;  %v10552_v59 = vadd.f32 %v10551_v31, %v10489_v33  ;;  %v20428_v1 = vadd.f32 %v10211_v36, %v9962_v2  ;;  %v10492_v33 = vmul.f32 %v20421_v4, %v20421_v4  ;;  %v20444_v36 = vpop.f32.mrf.mxu0 }
 0x704   :  { %v13692_v22 = vpop.f32.mrf.mxu1  ;;  %v9967_v25 = vadd.f32 %v20238_v45, %v22493_v55 }
 0x705   :  { %22490 = vst [vmem:[#allocation25_spill] sm:$0xff] %v20428_v1  ;;  %v10553_v7 = vadd.f32 %v10552_v59, %v10490_v20  ;;  %v10421_v49 = vadd.f32 %v10420_v12, %v20428_v1  ;;  %v10491_v9 = vmul.f32 %v20428_v1, %v20428_v1  ;;  %v10493_v12 = vmul.f32 %v20434_v15, %v20434_v15 }
 0x706   :  { %v10224_v62 = vpop.f32.mrf.mxu1  ;;  %v9966_v1 = vadd.f32 %v20284_v19, %v22494_v39  ;;  %v20453_v40 = vadd.f32 %v13692_v22, %v9967_v25 }
 0x707   :  { %v10422_v2 = vadd.f32 %v10421_v49, %v20421_v4  ;;  %v10554_v31 = vadd.f32 %v10553_v7, %v10491_v9  ;;  %v20442_v10 = vadd.f32 %v10224_v62, %v9965_v32  ;;  %v22496_v7 = vld [vmem:[#allocation73_spill] sm:$0xff] }
 0x708   :  { %v13693_v0 = vpop.f32.mrf.mxu1  ;;  %22495 = vst [vmem:[#allocation63_spill] sm:$0xff] %v20453_v40  ;;  %v9968_v32 = vadd.f32 %v20270_v29, %v22496_v7 }
 0x709   :  { %22492 = vst [vmem:[#allocation28_spill] sm:$0xff] %v20442_v10  ;;  %v10555_v20 = vadd.f32 %v10554_v31, %v10492_v33  ;;  %v10423_v59 = vadd.f32 %v10422_v2, %v20434_v15  ;;  %v10494_v45 = vmul.f32 %v20442_v10, %v20442_v10  ;;  %v20462_v33 = vpop.f32.mrf.mxu0  ;;  %v22498_v31 = vld [vmem:[#allocation51_spill] sm:$0xff] }
 0x70a   :  { %v10227_v49 = vpop.f32.mrf.mxu1  ;;  %v9969_v19 = vadd.f32 %v20316_v46, %v22498_v31  ;;  %v20466_v25 = vadd.f32 %v13693_v0, %v9968_v32 }
 0x70b   :  { %v10424_v9 = vadd.f32 %v10423_v59, %v20442_v10  ;;  %v10556_v62 = vadd.f32 %v10555_v20, %v10493_v12  ;;  %v20460_v55 = vadd.f32 %v10227_v49, %v9966_v1  ;;  %v10496_v12 = vmul.f32 %v20453_v40, %v20453_v40  ;;  %v9881_v49 = vpop.f32.mrf.mxu0  ;;  %v22501_v10 = vld [vmem:[#allocation6_spill] sm:$0xff] }
 0x70c   :  { %v13696_v2 = vpop.f32.mrf.mxu1  ;;  %22499 = vst [vmem:[#allocation64_spill] sm:$0xff] %v20466_v25  ;;  %v9971_v46 = vadd.f32 %v20302_v52, %v22501_v10  ;;  %v10497_v32 = vmul.f32 %v20466_v25, %v20466_v25 }
 0x70d   :  { %22497 = vst [vmem:[#allocation22_spill] sm:$0xff] %v20460_v55  ;;  %v10557_v22 = vadd.f32 %v10556_v62, %v10494_v45  ;;  %v10425_v29 = vadd.f32 %v10424_v9, %v20460_v55  ;;  %v10495_v59 = vmul.f32 %v20460_v55, %v20460_v55  ;;  %v9970_v62 = vadd.f32 %v20348_v34, %v20055_v27 }
 0x70e   :  { %v10240_v39 = vpop.f32.mrf.mxu1  ;;  %v20483_v31 = vadd.f32 %v13696_v2, %v9971_v46 }
 0x70f   :  { %v10426_v1 = vadd.f32 %v10425_v29, %v20453_v40  ;;  %v10558_v20 = vadd.f32 %v10557_v22, %v10495_v59  ;;  %v20474_v7 = vadd.f32 %v10240_v39, %v9969_v19  ;;  %v22503_v29 = vld [vmem:[#allocation79_spill] sm:$0xff] }
 0x710   :  { %v13697_v0 = vpop.f32.mrf.mxu1  ;;  %22502 = vst [vmem:[#allocation66_spill] sm:$0xff] %v20483_v31  ;;  %v9972_v19 = vadd.f32 %v20334_v11, %v22503_v29 }
 0x711   :  { %22500 = vst [vmem:[#allocation27_spill] sm:$0xff] %v20474_v7  ;;  %v10559_v9 = vadd.f32 %v10558_v20, %v10496_v12  ;;  %v10427_v45 = vadd.f32 %v10426_v1, %v20466_v25  ;;  %v10498_v52 = vmul.f32 %v20474_v7, %v20474_v7  ;;  %v20492_v12 = vpop.f32.mrf.mxu0  ;;  %v22504_v20 = vld [vmem:[#allocation76_spill] sm:$0xff] }
 0x712   :  { %v10243_v22 = vpop.f32.mrf.mxu1  ;;  %v9973_v27 = vadd.f32 %v20380_v21, %v22504_v20  ;;  %v20496_v2 = vadd.f32 %v13697_v0, %v9972_v19 }
 0x713   :  { %v10428_v59 = vadd.f32 %v10427_v45, %v20474_v7  ;;  %v10560_v10 = vadd.f32 %v10559_v9, %v10497_v32  ;;  %v20490_v39 = vadd.f32 %v10243_v22, %v9970_v62  ;;  %v10500_v32 = vmul.f32 %v20483_v31, %v20483_v31  ;;  %v9894_v22 = vpop.f32.mrf.mxu0  ;;  %v22506_v7 = vld [vmem:[#allocation4_spill] sm:$0xff] }
 0x714   :  { %v13700_v1 = vpop.f32.mrf.mxu1  ;;  %22505 = vst [vmem:[#allocation68_spill] sm:$0xff] %v20496_v2  ;;  %v9975_v21 = vadd.f32 %v20366_v3, %v22506_v7  ;;  %v10501_v19 = vmul.f32 %v20496_v2, %v20496_v2 }
 0x715   :  { %v10561_v34 = vadd.f32 %v10560_v10, %v10498_v52  ;;  %v10429_v11 = vadd.f32 %v10428_v59, %v20490_v39  ;;  %v10499_v46 = vmul.f32 %v20490_v39, %v20490_v39  ;;  %v9974_v10 = vadd.f32 %v20412_v42, %v20071_v14 }
 0x716   :  { %v10256_v45 = vpop.f32.mrf.mxu1  ;;  %v20513_v20 = vadd.f32 %v13700_v1, %v9975_v21 }
 0x717   :  { %v10430_v9 = vadd.f32 %v10429_v11, %v20483_v31  ;;  %v10562_v62 = vadd.f32 %v10561_v34, %v10499_v46  ;;  %v20504_v29 = vadd.f32 %v10256_v45, %v9973_v27  ;;  %v22507_v11 = vld [vmem:[#allocation5_spill] sm:$0xff]  ;;  %v22517_v31 = vld [vmem:[#allocation52_spill] sm:$0xff] }
 0x718   :  { %v13701_v0 = vpop.f32.mrf.mxu1  ;;  %v9976_v27 = vadd.f32 %v20398_v57, %v22507_v11 }
 0x719   :  { %v10563_v59 = vadd.f32 %v10562_v62, %v10500_v32  ;;  %v10431_v52 = vadd.f32 %v10430_v9, %v20496_v2  ;;  %v10502_v3 = vmul.f32 %v20504_v29, %v20504_v29  ;;  %v13637_v32 = vpop.f32.mrf.mxu0  ;;  %v9977_v9 = vadd.f32 %v20444_v36, %v20079_v30  ;;  %v22510_v2 = vld [vmem:[#allocation18_spill] sm:$0xff] }
 0x71a   :  { %v10259_v34 = vpop.f32.mrf.mxu1  ;;  %v20524_v42 = vadd.f32 %v13701_v0, %v9976_v27 }
 0x71b   :  { %v10432_v46 = vadd.f32 %v10431_v52, %v20504_v29  ;;  %v10564_v7 = vadd.f32 %v10563_v59, %v10501_v19  ;;  %v20520_v45 = vadd.f32 %v10259_v34, %v9974_v10  ;;  %v10504_v52 = vmul.f32 %v20513_v20, %v20513_v20  ;;  %v9897_v11 = vpop.f32.mrf.mxu0  ;;  %v22508_v34 = vld [vmem:[#allocation40_spill] sm:$0xff] }
 0x71c   :  { %v13704_v62 = vpop.f32.mrf.mxu1  ;;  %v9979_v30 = vadd.f32 %v20430_v54, %v22508_v34  ;;  %v10505_v0 = vmul.f32 %v20524_v42, %v20524_v42 }
 0x71d   :  { %v10565_v14 = vadd.f32 %v10564_v7, %v10502_v3  ;;  %v10433_v1 = vadd.f32 %v10432_v46, %v20520_v45  ;;  %v10503_v57 = vmul.f32 %v20520_v45, %v20520_v45  ;;  %v9978_v3 = vadd.f32 %v9881_v49, %v20087_v60  ;;  %v13640_v34 = vpop.f32.mrf.mxu0 }
 0x71e   :  { %v10272_v21 = vpop.f32.mrf.mxu1  ;;  %v20540_v7 = vadd.f32 %v13704_v62, %v9979_v30 }
 0x71f   :  { %v10434_v19 = vadd.f32 %v10433_v1, %v20513_v20  ;;  %v10566_v59 = vadd.f32 %v10565_v14, %v10503_v57  ;;  %v20532_v10 = vadd.f32 %v10272_v21, %v9977_v9  ;;  %v9980_v14 = vadd.f32 %v20462_v33, %v22510_v2 }
 0x720   :  { %v13705_v36 = vpop.f32.mrf.mxu1  ;;  %22509 = vst [vmem:[#allocation65_spill] sm:$0xff] %v20540_v7  ;;  %v10508_v62 = vmul.f32 %v20540_v7, %v20540_v7 }
 0x721   :  { %v10567_v27 = vadd.f32 %v10566_v59, %v10504_v52  ;;  %v10435_v46 = vadd.f32 %v10434_v19, %v20524_v42  ;;  %v10506_v54 = vmul.f32 %v20532_v10, %v20532_v10  ;;  %v9981_v19 = vadd.f32 %v9894_v22, %v20095_v8 }
 0x722   :  { %v10275_v9 = vpop.f32.mrf.mxu1  ;;  %v20550_v60 = vadd.f32 %v13705_v36, %v9980_v14 }
 0x723   :  { %v10436_v1 = vadd.f32 %v10435_v46, %v20532_v10  ;;  %v10568_v57 = vadd.f32 %v10567_v27, %v10505_v0  ;;  %v20547_v21 = vadd.f32 %v10275_v9, %v9978_v3  ;;  %v9910_v46 = vpop.f32.mrf.mxu0  ;;  %v22514_v3 = vld [vmem:[#allocation17_spill] sm:$0xff] }
 0x724   :  { %v13708_v52 = vpop.f32.mrf.mxu1  ;;  %22512 = vst [vmem:[#allocation29_spill] sm:$0xff] %v20550_v60  ;;  %v9983_v8 = vadd.f32 %v20492_v12, %v22514_v3  ;;  %v10509_v36 = vmul.f32 %v20550_v60, %v20550_v60 }
 0x725   :  { %22511 = vst [vmem:[#allocation67_spill] sm:$0xff] %v20547_v21  ;;  %v10569_v59 = vadd.f32 %v10568_v57, %v10506_v54  ;;  %v10437_v49 = vadd.f32 %v10436_v1, %v20547_v21  ;;  %v10507_v33 = vmul.f32 %v20547_v21, %v20547_v21  ;;  %v22515_v1 = vld [vmem:[#allocation53_spill] sm:$0xff]  ;;  %v13641_v3 = vpop.f32.mrf.mxu0 }
 0x726   :  { %v10288_v2 = vpop.f32.mrf.mxu1  ;;  %v9982_v54 = vadd.f32 %v9897_v11, %v22515_v1  ;;  %v20566_v57 = vadd.f32 %v13708_v52, %v9983_v8  ;;  %v22521_v1 = vld [vmem:[#allocation7_spill] sm:$0xff] }
 0x727   :  { %v10438_v30 = vadd.f32 %v10437_v49, %v20540_v7  ;;  %v10570_v0 = vadd.f32 %v10569_v59, %v10507_v33  ;;  %v20558_v27 = vadd.f32 %v10288_v2, %v9981_v19  ;;  %v9984_v49 = vadd.f32 %v13637_v32, %v22517_v31 }
 0x728   :  { %v13709_v22 = vpop.f32.mrf.mxu1  ;;  %22516 = vst [vmem:[#allocation70_spill] sm:$0xff] %v20566_v57  ;;  %v10512_v52 = vmul.f32 %v20566_v57, %v20566_v57 }
 0x729   :  { %22513 = vst [vmem:[#allocation30_spill] sm:$0xff] %v20558_v27  ;;  %v10571_v14 = vadd.f32 %v10570_v0, %v10508_v62  ;;  %v10439_v9 = vadd.f32 %v10438_v30, %v20550_v60  ;;  %v10510_v33 = vmul.f32 %v20558_v27, %v20558_v27  ;;  %v9985_v62 = vadd.f32 %v9910_v46, %v20111_v43 }
 0x72a   :  { %v10291_v59 = vpop.f32.mrf.mxu1  ;;  %v20575_v0 = vadd.f32 %v13709_v22, %v9984_v49  ;;  %v9987_v43 = vadd.f32 %v13640_v34, %v22521_v1 }
 0x72b   :  { %v10440_v19 = vadd.f32 %v10439_v9, %v20558_v27  ;;  %v10572_v12 = vadd.f32 %v10571_v14, %v10509_v36  ;;  %v20572_v2 = vadd.f32 %v10291_v59, %v9982_v54  ;;  %v9913_v9 = vpop.f32.mrf.mxu0  ;;  %v22522_v59 = vld [vmem:[#allocation33_spill] sm:$0xff] }
 0x72c   :  { %v13712_v25 = vpop.f32.mrf.mxu1  ;;  %22519 = vst [vmem:[#allocation69_spill] sm:$0xff] %v20575_v0  ;;  %v10513_v22 = vmul.f32 %v20575_v0, %v20575_v0 }
 0x72d   :  { %22518 = vst [vmem:[#allocation72_spill] sm:$0xff] %v20572_v2  ;;  %v10573_v30 = vadd.f32 %v10572_v12, %v10510_v33  ;;  %v10441_v11 = vadd.f32 %v10440_v19, %v20572_v2  ;;  %v10511_v31 = vmul.f32 %v20572_v2, %v20572_v2  ;;  %v9986_v19 = vadd.f32 %v9913_v9, %v22522_v59  ;;  %v22524_v12 = vld [vmem:[#allocation8_spill] sm:$0xff] }
 0x72e   :  { %v10304_v32 = vpop.f32.mrf.mxu1  ;;  %v20590_v33 = vadd.f32 %v13712_v25, %v9987_v43  ;;  %v9988_v40 = vadd.f32 %v13641_v3, %v22524_v12 }
 0x72f   :  { %v10442_v8 = vadd.f32 %v10441_v11, %v20566_v57  ;;  %v10574_v36 = vadd.f32 %v10573_v30, %v10511_v31  ;;  %v20583_v14 = vadd.f32 %v10304_v32, %v9985_v62 }
 0x730   :  { %v13713_v46 = vpop.f32.mrf.mxu1  ;;  %22523 = vst [vmem:[#allocation31_spill] sm:$0xff] %v20590_v33  ;;  %v10516_v3 = vmul.f32 %v20590_v33, %v20590_v33 }
 0x731   :  { %22520 = vst [vmem:[#allocation71_spill] sm:$0xff] %v20583_v14  ;;  %v10575_v54 = vadd.f32 %v10574_v36, %v10512_v52  ;;  %v10443_v49 = vadd.f32 %v10442_v8, %v20575_v0  ;;  %v10514_v30 = vmul.f32 %v20583_v14, %v20583_v14  ;;  %v20598_v1 = vadd.f32 %v13713_v46, %v9988_v40 }
 0x732   :  { %v10307_v11 = vpop.f32.mrf.mxu1 }
 0x733   :  { %v10444_v62 = vadd.f32 %v10443_v49, %v20583_v14  ;;  %v10576_v34 = vadd.f32 %v10575_v54, %v10513_v22  ;;  %v20596_v31 = vadd.f32 %v10307_v11, %v9986_v19  ;;  %22526 = vst [vmem:[#allocation78_spill] sm:$0xff] %v20598_v1  ;;  %v10517_v9 = vmul.f32 %v20598_v1, %v20598_v1 }
 0x735   :  { %22525 = vst [vmem:[#allocation34_spill] sm:$0xff] %v20596_v31  ;;  %v10577_v32 = vadd.f32 %v10576_v34, %v10514_v30  ;;  %v10445_v52 = vadd.f32 %v10444_v62, %v20596_v31  ;;  %v10515_v25 = vmul.f32 %v20596_v31, %v20596_v31 }
 0x737   :  { %v10446_v8 = vadd.f32 %v10445_v52, %v20590_v33  ;;  %v10578_v36 = vadd.f32 %v10577_v32, %v10515_v25 }
 0x739   :  { %v10447_v43 = vadd.f32 %v10446_v8, %v20598_v1  ;;  %v10579_v22 = vadd.f32 %v10578_v36, %v10516_v3 }
 0x73b   :  { %v10448_v54 = vrot.slane %v10447_v43, 4  ;;  %v10580_v40 = vadd.f32 %v10579_v22, %v10517_v9 }
 0x73d   :  { %v10449_v46 = vadd.f32 %v10448_v54, %v10447_v43  ;;  %v10581_v49 = vrot.slane %v10580_v40, 4  ;;  %v22527_v43 = vld [vmem:[#allocation19_spill] sm:$0xff] }
 0x73f   :  { %v10450_v59 = vrot.slane %v10449_v46, 2  ;;  %v10582_v19 = vadd.f32 %v10581_v49, %v10580_v40 }
 0x741   :  { %v10451_v12 = vadd.f32 %v10450_v59, %v10449_v46  ;;  %v10583_v11 = vrot.slane %v10582_v19, 2  ;;  %v22534_v59 = vld [vmem:[#allocation21_spill] sm:$0xff] }
 0x743   :  { %v10452_v62 = vrot.slane %v10451_v12, 1  ;;  %v10584_v30 = vadd.f32 %v10583_v11, %v10582_v19  ;;  %v22533_v19 = vld [vmem:[#allocation20_spill] sm:$0xff] }
 0x745   :  { %v10453_v34 = vadd.f32 %v10452_v62, %v10451_v12  ;;  %v10585_v55 = vrot.slane %v10584_v30, 1  ;;  %v22528_v12 = vld [vmem:[#allocation9_spill] sm:$0xff]  ;;  %v10383_v62 = vld [vmem:[%s21579_s5] sm:$0x1] }
 0x747   :  { %v10586_v52 = vadd.f32 %v10585_v55, %v10584_v30  ;;  %v20609_v32 = vmul.f32 0.001953125, %v10453_v34  ;;  %v22530_v30 = vld [vmem:[#allocation12_spill] sm:$0xff] }
 0x749   :  { %v10588_v25 = vmul.f32 0.001953125, %v10586_v52  ;;  %v10589_v8 = vmul.f32 %v20609_v32, %v20609_v32  ;;  %v22531_v52 = vld [vmem:[#allocation11_spill] sm:$0xff]  ;;  %v10615_v11 = vsub.f32 %v20293_v48, %v20609_v32  ;;  %v10616_v34 = vsub.f32 %v20306_v37, %v20609_v32  ;;  %v22535_v48 = vld [vmem:[#allocation62_spill] sm:$0xff]  ;;  %v22536_v37 = vld [vmem:[#allocation13_spill] sm:$0xff] }
 0x74a   :  { %v10617_v49 = vsub.f32 %v22533_v19, %v20609_v32  ;;  %v10618_v46 = vsub.f32 %v22534_v59, %v20609_v32  ;;  %v10620_v40 = vsub.f32 %v20338_v63, %v20609_v32  ;;  %v10621_v55 = vsub.f32 %v22535_v48, %v20609_v32  ;;  %v22537_v59 = vld [vmem:[#allocation61_spill] sm:$0xff] }
 0x74b   :  { %v10590_v3 = vsub.f32 %v10588_v25, %v10589_v8  ;;  %v22532_v8 = vld [vmem:[#allocation23_spill] sm:$0xff]  ;;  %v10622_v22 = vsub.f32 %v22536_v37, %v20609_v32  ;;  %v10623_v19 = vsub.f32 %v20357_v28, %v20609_v32  ;;  %v10624_v25 = vsub.f32 %v20370_v16, %v20609_v32  ;;  %v22539_v37 = vld [vmem:[#allocation26_spill] sm:$0xff]  ;;  %v22540_v28 = vld [vmem:[#allocation25_spill] sm:$0xff] }
 0x74c   :  { %v10625_v9 = vsub.f32 %v22537_v59, %v20609_v32  ;;  %v10627_v63 = vsub.f32 %v20389_v58, %v20609_v32  ;;  %v10628_v48 = vsub.f32 %v20402_v18, %v20609_v32  ;;  %v10629_v31 = vsub.f32 %v22539_v37, %v20609_v32  ;;  %v22542_v58 = vld [vmem:[#allocation22_spill] sm:$0xff]  ;;  %v22543_v18 = vld [vmem:[#allocation63_spill] sm:$0xff] }
 0x74d   :  { %v10591_v36 = vadd.f32 1e-05, %v10590_v3  ;;  %v10619_v3 = vsub.f32 %v20325_v50, %v20609_v32  ;;  %v22538_v50 = vld [vmem:[#allocation24_spill] sm:$0xff]  ;;  %v10630_v14 = vsub.f32 %v22540_v28, %v20609_v32  ;;  %v10631_v16 = vsub.f32 %v20421_v4, %v20609_v32  ;;  %v22547_v4 = vld [vmem:[#allocation27_spill] sm:$0xff] }
 0x74e   :  { %v10626_v1 = vsub.f32 %v22538_v50, %v20609_v32  ;;  %v10632_v59 = vsub.f32 %v20434_v15, %v20609_v32  ;;  %v22541_v50 = vld [vmem:[#allocation28_spill] sm:$0xff]  ;;  %v10634_v57 = vsub.f32 %v22542_v58, %v20609_v32  ;;  %v10637_v60 = vsub.f32 %v22547_v4, %v20609_v32  ;;  %v22548_v15 = vld [vmem:[#allocation66_spill] sm:$0xff] }
 0x74f   :  { %13861 = vrsqrt.f32 %v10591_v36  ;;  %v22529_v36 = vld [vmem:[#allocation10_spill] sm:$0xff]  ;;  %v10633_v0 = vsub.f32 %v22541_v50, %v20609_v32  ;;  %v22546_v28 = vld [vmem:[#allocation64_spill] sm:$0xff]  ;;  %v10639_v7 = vsub.f32 %v22548_v15, %v20609_v32  ;;  %v22550_v58 = vsub.f32 %v20129_v23, %v20609_v32 }
 0x750   :  { %v10636_v27 = vsub.f32 %v22546_v28, %v20609_v32  ;;  %v22549_v50 = vld [vmem:[#allocation68_spill] sm:$0xff]  ;;  %v22553_v4 = vsub.f32 %v20145_v5, %v20609_v32  ;;  %v22554_v15 = vsub.f32 %v20154_v44, %v20609_v32 }
 0x751   :  { %v10640_v21 = vsub.f32 %v22549_v50, %v20609_v32  ;;  %v22555_v50 = vsub.f32 %v20172_v6, %v20609_v32 }
 0x75c   :  { %v13862_v54 = vpop.eup %13861 }
 0x75d   :  { %v10657_v33 = vmul.f32 %v13862_v54, %v10383_v62  ;;  %v10635_v54 = vsub.f32 %v22543_v18, %v20609_v32  ;;  %v22544_v62 = vld [vmem:[#allocation32_spill] sm:$0xff] }
 0x75e   :  { %v22545_v37 = vsub.s32 0, %v22544_v62 }
 0x760   :  { %v20738_v2 = vrot.slane %v10657_v33, %v22545_v37  ;;  %v22551_v33 = vsub.f32 %v22527_v43, %v20609_v32  ;;  %v22552_v37 = vsub.f32 %v20133_v17, %v20609_v32 }
 0x762   :  { %v20752_v18 = vmul.f32 %v20738_v2, %v22550_v58  ;;  %v20758_v62 = vmul.f32 %v20738_v2, %v22551_v33  ;;  %v20764_v28 = vmul.f32 %v20738_v2, %v22552_v37  ;;  %v20770_v23 = vmul.f32 %v20738_v2, %v22553_v4 }
 0x763   :  { %v20776_v43 = vmul.f32 %v20738_v2, %v22554_v15  ;;  %v20782_v17 = vmul.f32 %v20738_v2, %v22555_v50  ;;  %v22556_v58 = vsub.f32 %v20165_v61, %v20609_v32  ;;  %v22557_v33 = vsub.f32 %v20178_v24, %v20609_v32 }
 0x764   :  { %v22558_v37 = vsub.f32 %v20186_v47, %v20609_v32  ;;  %v22559_v4 = vsub.f32 %v22528_v12, %v20609_v32  ;;  %v22560_v15 = vsub.f32 %v20197_v53, %v20609_v32  ;;  %v22561_v50 = vsub.f32 %v20210_v26, %v20609_v32 }
 0x765   :  { %v20788_v5 = vmul.f32 %v20738_v2, %v22556_v58  ;;  %v20794_v44 = vmul.f32 %v20738_v2, %v22557_v33  ;;  %v22562_v58 = vsub.f32 %v20218_v51, %v20609_v32  ;;  %v22563_v33 = vsub.f32 %v20236_v56, %v20609_v32 }
 0x766   :  { %v20800_v6 = vmul.f32 %v20738_v2, %v22558_v37  ;;  %v20806_v61 = vmul.f32 %v20738_v2, %v22559_v4  ;;  %v20812_v24 = vmul.f32 %v20738_v2, %v22560_v15  ;;  %v20818_v47 = vmul.f32 %v20738_v2, %v22561_v50 }
 0x767   :  { %v20824_v12 = vmul.f32 %v20738_v2, %v22562_v58  ;;  %v20830_v53 = vmul.f32 %v20738_v2, %v22563_v33  ;;  %v22564_v37 = vsub.f32 %v20229_v41, %v20609_v32  ;;  %v22565_v4 = vsub.f32 %v20242_v38, %v20609_v32 }
 0x768   :  { %v22566_v15 = vsub.f32 %v20250_v13, %v20609_v32  ;;  %v22567_v50 = vsub.f32 %v22529_v36, %v20609_v32  ;;  %v22568_v58 = vsub.f32 %v22530_v30, %v20609_v32  ;;  %v22569_v33 = vsub.f32 %v20274_v35, %v20609_v32 }
 0x769   :  { %v20836_v26 = vmul.f32 %v20738_v2, %v22564_v37  ;;  %v20842_v51 = vmul.f32 %v20738_v2, %v22565_v4  ;;  %v22570_v37 = vsub.f32 %v22531_v52, %v20609_v32  ;;  %v22571_v4 = vsub.f32 %v22532_v8, %v20609_v32 }
 0x76a   :  { %v20848_v56 = vmul.f32 %v20738_v2, %v22566_v15  ;;  %v20854_v41 = vmul.f32 %v20738_v2, %v22567_v50  ;;  %v20860_v38 = vmul.f32 %v20738_v2, %v22568_v58  ;;  %v20866_v13 = vmul.f32 %v20738_v2, %v22569_v33 }
 0x76b   :  { %v20872_v36 = vmul.f32 %v20738_v2, %v22570_v37  ;;  %v20878_v30 = vmul.f32 %v20738_v2, %v22571_v4  ;;  %v20881_v15 = vmul.f32 %v20738_v2, %v10615_v11  ;;  %v20884_v35 = vmul.f32 %v20738_v2, %v10616_v34  ;;  %v20988_v4 = vld [vmem:[%s21580_s6] ss:$0 sm:$0xff] }
 0x76c   :  { %v20887_v50 = vmul.f32 %v20738_v2, %v10617_v49  ;;  %v20890_v52 = vmul.f32 %v20738_v2, %v10618_v46  ;;  %v20893_v58 = vmul.f32 %v20738_v2, %v10619_v3  ;;  %v20896_v8 = vmul.f32 %v20738_v2, %v10620_v40 }
 0x76d   :  { %v20899_v33 = vmul.f32 %v20738_v2, %v10621_v55  ;;  %v20902_v11 = vmul.f32 %v20738_v2, %v10622_v22  ;;  %v20905_v34 = vmul.f32 %v20738_v2, %v10623_v19  ;;  %v20908_v49 = vmul.f32 %v20738_v2, %v10624_v25 }
 0x76e   :  { %v20911_v46 = vmul.f32 %v20738_v2, %v10625_v9  ;;  %v20914_v3 = vmul.f32 %v20738_v2, %v10626_v1  ;;  %v20917_v40 = vmul.f32 %v20738_v2, %v10627_v63  ;;  %v20920_v55 = vmul.f32 %v20738_v2, %v10628_v48 }
 0x76f   :  { %v20923_v22 = vmul.f32 %v20738_v2, %v10629_v31  ;;  %v20926_v19 = vmul.f32 %v20738_v2, %v10630_v14  ;;  %v20929_v25 = vmul.f32 %v20738_v2, %v10631_v16  ;;  %v20932_v9 = vmul.f32 %v20738_v2, %v10632_v59 }
 0x770   :  { %v20935_v1 = vmul.f32 %v20738_v2, %v10633_v0  ;;  %v20938_v63 = vmul.f32 %v20738_v2, %v10634_v57  ;;  %v20941_v48 = vmul.f32 %v20738_v2, %v10635_v54  ;;  %v20944_v31 = vmul.f32 %v20738_v2, %v10636_v27 }
 0x771   :  { %v20947_v14 = vmul.f32 %v20738_v2, %v10637_v60  ;;  %v22572_v16 = vsub.f32 %v20490_v39, %v20609_v32  ;;  %v20956_v0 = vmul.f32 %v20738_v2, %v10639_v7  ;;  %v20959_v57 = vmul.f32 %v20738_v2, %v10640_v21 }
 0x772   :  { %v22573_v54 = vsub.f32 %v20504_v29, %v20609_v32  ;;  %v22574_v60 = vsub.f32 %v20520_v45, %v20609_v32  ;;  %v22575_v37 = vsub.f32 %v20513_v20, %v20609_v32  ;;  %v22577_v21 = vsub.f32 %v20524_v42, %v20609_v32  ;;  %v22581_v20 = vld [vmem:[#allocation67_spill] sm:$0xff]  ;;  %v22584_v42 = vld [vmem:[#allocation65_spill] sm:$0xff] }
 0x773   :  { %v20953_v59 = vmul.f32 %v20738_v2, %v22572_v16  ;;  %v22579_v45 = vsub.f32 %v20532_v10, %v20609_v32 }
 0x774   :  { %v20965_v27 = vmul.f32 %v20738_v2, %v22573_v54  ;;  %v20971_v39 = vmul.f32 %v20738_v2, %v22574_v60  ;;  %v20977_v7 = vmul.f32 %v20738_v2, %v22575_v37  ;;  %v20983_v29 = vmul.f32 %v20738_v2, %v22577_v21 }
 0x775   :  { %v20994_v16 = vmul.f32 %v20738_v2, %v22579_v45  ;;  %v22582_v54 = vsub.f32 %v22581_v20, %v20609_v32  ;;  %v22585_v37 = vsub.f32 %v22584_v42, %v20609_v32  ;;  %v22590_v45 = vld [vmem:[#allocation30_spill] sm:$0xff] }
 0x776   :  { %22576 = vst [vmem:[#allocation75_spill] sm:$0xff] %v20977_v7  ;;  %22578 = vst [vmem:[#allocation77_spill] sm:$0xff] %v20983_v29  ;;  %v22587_v29 = vld [vmem:[#allocation29_spill] sm:$0xff] }
 0x777   :  { %22580 = vst [vmem:[#allocation74_spill] sm:$0xff] %v20994_v16  ;;  %v21000_v60 = vmul.f32 %v20738_v2, %v22582_v54  ;;  %v21006_v21 = vmul.f32 %v20738_v2, %v22585_v37  ;;  %v22588_v7 = vsub.f32 %v22587_v29, %v20609_v32  ;;  %v22591_v16 = vsub.f32 %v22590_v45, %v20609_v32  ;;  %v22593_v54 = vld [vmem:[#allocation72_spill] sm:$0xff]  ;;  %v22596_v37 = vld [vmem:[#allocation70_spill] sm:$0xff] }
 0x779   :  { %22583 = vst [vmem:[#allocation37_spill] sm:$0xff] %v21000_v60  ;;  %22586 = vst [vmem:[#allocation80_spill] sm:$0xff] %v21006_v21  ;;  %v21012_v10 = vmul.f32 %v20738_v2, %v22588_v7  ;;  %v21018_v20 = vmul.f32 %v20738_v2, %v22591_v16  ;;  %v22594_v60 = vsub.f32 %v22593_v54, %v20609_v32  ;;  %v22599_v7 = vld [vmem:[#allocation69_spill] sm:$0xff]  ;;  %v22602_v16 = vld [vmem:[#allocation71_spill] sm:$0xff] }
 0x77a   :  { %v22597_v21 = vsub.f32 %v22596_v37, %v20609_v32 }
 0x77b   :  { %22589 = vst [vmem:[#allocation15_spill] sm:$0xff] %v21012_v10  ;;  %22592 = vst [vmem:[#allocation35_spill] sm:$0xff] %v21018_v20  ;;  %v21024_v42 = vmul.f32 %v20738_v2, %v22594_v60  ;;  %v22600_v10 = vsub.f32 %v22599_v7, %v20609_v32  ;;  %v22603_v20 = vsub.f32 %v22602_v16, %v20609_v32  ;;  %v22604_v60 = vld [vmem:[#allocation34_spill] sm:$0xff] }
 0x77c   :  { %v21030_v29 = vmul.f32 %v20738_v2, %v22597_v21  ;;  %v22606_v21 = vld [vmem:[#allocation31_spill] sm:$0xff] }
 0x77d   :  { %22595 = vst [vmem:[#allocation58_spill] sm:$0xff] %v21024_v42  ;;  %v21036_v45 = vmul.f32 %v20738_v2, %v22600_v10  ;;  %v21042_v54 = vmul.f32 %v20738_v2, %v22603_v20  ;;  %v22605_v42 = vsub.f32 %v22604_v60, %v20609_v32  ;;  %v22608_v10 = vld [vmem:[#allocation78_spill] sm:$0xff]  ;;  %v21064_v20 = vadd.f32 %v20988_v4, %v20752_v18 }
 0x77e   :  { %22598 = vst [vmem:[#allocation36_spill] sm:$0xff] %v21030_v29  ;;  %v22607_v29 = vsub.f32 %v22606_v21, %v20609_v32  ;;  %v21072_v60 = vadd.f32 %v20988_v4, %v20764_v28  ;;  %v21088_v18 = vadd.f32 %v20988_v4, %v20788_v5  ;;  %v21096_v28 = vadd.f32 %v20988_v4, %v20800_v6  ;;  %v22616_v21 = vld [vmem:[#allocation74_spill] sm:$0xff] }
 0x77f   :  { %22601 = vst [vmem:[#allocation44_spill] sm:$0xff] %v21036_v45  ;;  %v21048_v37 = vmul.f32 %v20738_v2, %v22605_v42  ;;  %v22609_v45 = vsub.f32 %v22608_v10, %v20609_v32  ;;  %v21068_v42 = vadd.f32 %v20988_v4, %v20758_v62  ;;  %v21084_v32 = vadd.f32 %v20988_v4, %v20782_v17 }
 0x780   :  { %v21054_v7 = vmul.f32 %v20738_v2, %v22607_v29  ;;  %v21076_v29 = vadd.f32 %v20988_v4, %v20770_v23  ;;  %v21092_v62 = vadd.f32 %v20988_v4, %v20794_v44  ;;  %v21100_v23 = vadd.f32 %v20988_v4, %v20806_v61  ;;  %v22618_v10 = vld [vmem:[#allocation37_spill] sm:$0xff] }
 0x781   :  { %v21060_v16 = vmul.f32 %v20738_v2, %v22609_v45  ;;  %v21080_v2 = vadd.f32 %v20988_v4, %v20776_v43  ;;  %v21104_v43 = vadd.f32 %v20988_v4, %v20812_v24  ;;  %v21108_v17 = vadd.f32 %v20988_v4, %v20818_v47  ;;  %v22614_v45 = vld [vmem:[#allocation77_spill] sm:$0xff] }
 0x782   :  { %v21112_v5 = vadd.f32 %v20988_v4, %v20824_v12  ;;  %v21116_v44 = vadd.f32 %v20988_v4, %v20830_v53  ;;  %v21120_v6 = vadd.f32 %v20988_v4, %v20836_v26  ;;  %v21124_v61 = vadd.f32 %v20988_v4, %v20842_v51 }
 0x783   :  { %v21128_v24 = vadd.f32 %v20988_v4, %v20848_v56  ;;  %v21132_v47 = vadd.f32 %v20988_v4, %v20854_v41  ;;  %v21136_v12 = vadd.f32 %v20988_v4, %v20860_v38  ;;  %v21140_v53 = vadd.f32 %v20988_v4, %v20866_v13 }
 0x784   :  { %v21144_v26 = vadd.f32 %v20988_v4, %v20872_v36  ;;  %v21148_v51 = vadd.f32 %v20988_v4, %v20878_v30  ;;  %v21152_v56 = vadd.f32 %v20988_v4, %v20881_v15  ;;  %v21156_v41 = vadd.f32 %v20988_v4, %v20884_v35 }
 0x785   :  { %v21160_v38 = vadd.f32 %v20988_v4, %v20887_v50  ;;  %v21164_v13 = vadd.f32 %v20988_v4, %v20890_v52  ;;  %v21168_v36 = vadd.f32 %v20988_v4, %v20893_v58  ;;  %v21172_v30 = vadd.f32 %v20988_v4, %v20896_v8 }
 0x786   :  { %v21176_v15 = vadd.f32 %v20988_v4, %v20899_v33  ;;  %v21180_v35 = vadd.f32 %v20988_v4, %v20902_v11  ;;  %v21184_v50 = vadd.f32 %v20988_v4, %v20905_v34  ;;  %v21188_v52 = vadd.f32 %v20988_v4, %v20908_v49 }
 0x787   :  { %v21192_v58 = vadd.f32 %v20988_v4, %v20911_v46  ;;  %v21196_v8 = vadd.f32 %v20988_v4, %v20914_v3  ;;  %v21200_v33 = vadd.f32 %v20988_v4, %v20917_v40  ;;  %v21204_v11 = vadd.f32 %v20988_v4, %v20920_v55 }
 0x788   :  { %v21208_v34 = vadd.f32 %v20988_v4, %v20923_v22  ;;  %v21212_v49 = vadd.f32 %v20988_v4, %v20926_v19  ;;  %v21216_v46 = vadd.f32 %v20988_v4, %v20929_v25  ;;  %v21220_v3 = vadd.f32 %v20988_v4, %v20932_v9 }
 0x789   :  { %v21224_v40 = vadd.f32 %v20988_v4, %v20935_v1  ;;  %v21228_v55 = vadd.f32 %v20988_v4, %v20938_v63  ;;  %v21232_v22 = vadd.f32 %v20988_v4, %v20941_v48  ;;  %v21236_v19 = vadd.f32 %v20988_v4, %v20944_v31 }
 0x78a   :  { %v21240_v25 = vadd.f32 %v20988_v4, %v20947_v14  ;;  %v21244_v9 = vadd.f32 %v20988_v4, %v20953_v59  ;;  %v21248_v1 = vadd.f32 %v20988_v4, %v20956_v0  ;;  %v21252_v63 = vadd.f32 %v20988_v4, %v20959_v57  ;;  %v22612_v14 = vld [vmem:[#allocation75_spill] sm:$0xff] }
 0x78b   :  { %v21256_v48 = vadd.f32 %v20988_v4, %v20965_v27  ;;  %v21260_v31 = vadd.f32 %v20988_v4, %v20971_v39  ;;  %v21264_v59 = vadd.f32 %v20988_v4, %v22612_v14  ;;  %v21268_v0 = vadd.f32 %v20988_v4, %v22614_v45 }
 0x78c   :  { %v21272_v57 = vadd.f32 %v20988_v4, %v22616_v21  ;;  %v21276_v27 = vadd.f32 %v20988_v4, %v22618_v10 }
 0x78d   :  { %22610 = vst [vmem:[#allocation50_spill] sm:$0xff] %v21256_v48  ;;  %22611 = vst [vmem:[#allocation42_spill] sm:$0xff] %v21260_v31  ;;  %v22620_v48 = vld [vmem:[#allocation80_spill] sm:$0xff]  ;;  %v22621_v31 = vld [vmem:[#allocation15_spill] sm:$0xff] }
 0x78e   :  { %22613 = vst [vmem:[#allocation41_spill] sm:$0xff] %v21264_v59  ;;  %22615 = vst [vmem:[#allocation43_spill] sm:$0xff] %v21268_v0  ;;  %v21280_v39 = vadd.f32 %v20988_v4, %v22620_v48  ;;  %v21284_v14 = vadd.f32 %v20988_v4, %v22621_v31  ;;  %v22622_v59 = vld [vmem:[#allocation35_spill] sm:$0xff]  ;;  %v22623_v0 = vld [vmem:[#allocation58_spill] sm:$0xff]  ;;  %v21304_v31 = vadd.f32 %v20988_v4, %v21042_v54  ;;  %v10799_v54 = vmax.f32 %v21076_v29, 0.0 }
 0x78f   :  { %22617 = vst [vmem:[#allocation47_spill] sm:$0xff] %v21272_v57  ;;  %22619 = vst [vmem:[#allocation14_spill] sm:$0xff] %v21276_v27  ;;  %v21288_v45 = vadd.f32 %v20988_v4, %v22622_v59  ;;  %v21292_v21 = vadd.f32 %v20988_v4, %v22623_v0  ;;  %v22624_v57 = vld [vmem:[#allocation36_spill] sm:$0xff]  ;;  %v21308_v59 = vadd.f32 %v20988_v4, %v21048_v37  ;;  %v10801_v37 = vmax.f32 %v21084_v32, 0.0 }
 0x790   :  { %v21296_v10 = vadd.f32 %v20988_v4, %v22624_v57  ;;  %v22626_v27 = vld [vmem:[#allocation44_spill] sm:$0xff]  ;;  %22628 = vst [vmem:[#allocation54_spill] sm:$0xff] %v21304_v31  ;;  %v21312_v0 = vadd.f32 %v20988_v4, %v21054_v7  ;;  %v21316_v57 = vadd.f32 %v20988_v4, %v21060_v16  ;;  %v10800_v31 = vmax.f32 %v21080_v2, 0.0  ;;  %10863 = vst [vmem:[%s21581_s7 + $0x18] sm:$0xff] %v10799_v54 }
 0x791   :  { %v21300_v48 = vadd.f32 %v20988_v4, %v22626_v27  ;;  %22629 = vst [vmem:[#allocation55_spill] sm:$0xff] %v21308_v59  ;;  %v10797_v27 = vmax.f32 %v21068_v42, 0.0  ;;  %v10802_v59 = vmax.f32 %v21088_v18, 0.0  ;;  %v10803_v7 = vmax.f32 %v21092_v62, 0.0  ;;  %10865 = vst [vmem:[%s21581_s7 + $0x28] sm:$0xff] %v10801_v37 }
 0x792   :  { %22625 = vst [vmem:[#allocation46_spill] sm:$0xff] %v21296_v10  ;;  %22630 = vst [vmem:[#allocation48_spill] sm:$0xff] %v21312_v0  ;;  %v10796_v10 = vmax.f32 %v21064_v20, 0.0  ;;  %v10804_v0 = vmax.f32 %v21096_v28, 0.0  ;;  %v10805_v4 = vmax.f32 %v21100_v23, 0.0  ;;  %v10806_v16 = vmax.f32 %v21104_v43, 0.0 }
 0x793   :  { %22627 = vst [vmem:[#allocation45_spill] sm:$0xff] %v21300_v48  ;;  %v10798_v48 = vmax.f32 %v21072_v60, 0.0  ;;  %v10807_v20 = vmax.f32 %v21108_v17, 0.0  ;;  %10861 = vst [vmem:[%s21581_s7 + $0x8] sm:$0xff] %v10797_v27  ;;  %v10808_v42 = vmax.f32 %v21112_v5, 0.0  ;;  %v10809_v60 = vmax.f32 %v21116_v44, 0.0 }
 0x794   :  { %10860 = vst [vmem:[%s21581_s7] sm:$0xff] %v10796_v10  ;;  %v10810_v29 = vmax.f32 %v21120_v6, 0.0  ;;  %v10811_v2 = vmax.f32 %v21124_v61, 0.0  ;;  %10864 = vst [vmem:[%s21581_s7 + $0x20] sm:$0xff] %v10800_v31  ;;  %v10812_v32 = vmax.f32 %v21128_v24, 0.0  ;;  %v10813_v18 = vmax.f32 %v21132_v47, 0.0 }
 0x795   :  { %10862 = vst [vmem:[%s21581_s7 + $0x10] sm:$0xff] %v10798_v48  ;;  %10866 = vst [vmem:[%s21581_s7 + $0x30] sm:$0xff] %v10802_v59  ;;  %v10814_v62 = vmax.f32 %v21136_v12, 0.0  ;;  %v10815_v28 = vmax.f32 %v21140_v53, 0.0  ;;  %v10816_v23 = vmax.f32 %v21144_v26, 0.0  ;;  %v10817_v43 = vmax.f32 %v21148_v51, 0.0 }
 0x796   :  { %10867 = vst [vmem:[%s21581_s7 + $0x38] sm:$0xff] %v10803_v7  ;;  %10868 = vst [vmem:[%s21581_s7 + $0x40] sm:$0xff] %v10804_v0  ;;  %v10818_v17 = vmax.f32 %v21152_v56, 0.0  ;;  %v10819_v5 = vmax.f32 %v21156_v41, 0.0  ;;  %v10820_v44 = vmax.f32 %v21160_v38, 0.0  ;;  %v10821_v6 = vmax.f32 %v21164_v13, 0.0 }
 0x797   :  { %10869 = vst [vmem:[%s21581_s7 + $0x48] sm:$0xff] %v10805_v4  ;;  %10870 = vst [vmem:[%s21581_s7 + $0x50] sm:$0xff] %v10806_v16  ;;  %v10822_v61 = vmax.f32 %v21168_v36, 0.0  ;;  %v10823_v24 = vmax.f32 %v21172_v30, 0.0  ;;  %v10824_v47 = vmax.f32 %v21176_v15, 0.0  ;;  %v10825_v12 = vmax.f32 %v21180_v35, 0.0 }
 0x798   :  { %10871 = vst [vmem:[%s21581_s7 + $0x58] sm:$0xff] %v10807_v20  ;;  %10872 = vst [vmem:[%s21581_s7 + $0x60] sm:$0xff] %v10808_v42  ;;  %v10826_v53 = vmax.f32 %v21184_v50, 0.0  ;;  %v10827_v26 = vmax.f32 %v21188_v52, 0.0  ;;  %v10828_v51 = vmax.f32 %v21192_v58, 0.0  ;;  %v10829_v56 = vmax.f32 %v21196_v8, 0.0 }
 0x799   :  { %10873 = vst [vmem:[%s21581_s7 + $0x68] sm:$0xff] %v10809_v60  ;;  %10874 = vst [vmem:[%s21581_s7 + $0x70] sm:$0xff] %v10810_v29  ;;  %v10830_v41 = vmax.f32 %v21200_v33, 0.0  ;;  %v10831_v38 = vmax.f32 %v21204_v11, 0.0  ;;  %v10832_v13 = vmax.f32 %v21208_v34, 0.0  ;;  %v10833_v36 = vmax.f32 %v21212_v49, 0.0 }
 0x79a   :  { %10875 = vst [vmem:[%s21581_s7 + $0x78] sm:$0xff] %v10811_v2  ;;  %10876 = vst [vmem:[%s21581_s7 + $0x80] sm:$0xff] %v10812_v32  ;;  %v10834_v30 = vmax.f32 %v21216_v46, 0.0  ;;  %v10835_v15 = vmax.f32 %v21220_v3, 0.0  ;;  %v10836_v35 = vmax.f32 %v21224_v40, 0.0  ;;  %v10837_v50 = vmax.f32 %v21228_v55, 0.0 }
 0x79b   :  { %10877 = vst [vmem:[%s21581_s7 + $0x88] sm:$0xff] %v10813_v18  ;;  %10878 = vst [vmem:[%s21581_s7 + $0x90] sm:$0xff] %v10814_v62  ;;  %v10838_v52 = vmax.f32 %v21232_v22, 0.0  ;;  %v10839_v58 = vmax.f32 %v21236_v19, 0.0  ;;  %v10840_v8 = vmax.f32 %v21240_v25, 0.0  ;;  %v10841_v33 = vmax.f32 %v21244_v9, 0.0 }
 0x79c   :  { %10879 = vst [vmem:[%s21581_s7 + $0x98] sm:$0xff] %v10815_v28  ;;  %10880 = vst [vmem:[%s21581_s7 + $0xa0] sm:$0xff] %v10816_v23  ;;  %v10842_v11 = vmax.f32 %v21248_v1, 0.0  ;;  %v10843_v34 = vmax.f32 %v21252_v63, 0.0  ;;  %v22631_v49 = vld [vmem:[#allocation50_spill] sm:$0xff]  ;;  %v22633_v55 = vld [vmem:[#allocation41_spill] sm:$0xff] }
 0x79d   :  { %10881 = vst [vmem:[%s21581_s7 + $0xa8] sm:$0xff] %v10817_v43  ;;  %10882 = vst [vmem:[%s21581_s7 + $0xb0] sm:$0xff] %v10818_v17  ;;  %v10844_v46 = vmax.f32 %v22631_v49, 0.0  ;;  %v22632_v3 = vld [vmem:[#allocation42_spill] sm:$0xff]  ;;  %v10846_v22 = vmax.f32 %v22633_v55, 0.0  ;;  %v22634_v19 = vld [vmem:[#allocation43_spill] sm:$0xff] }
 0x79e   :  { %10883 = vst [vmem:[%s21581_s7 + $0xb8] sm:$0xff] %v10819_v5  ;;  %10884 = vst [vmem:[%s21581_s7 + $0xc0] sm:$0xff] %v10820_v44  ;;  %v10845_v40 = vmax.f32 %v22632_v3, 0.0  ;;  %v10847_v25 = vmax.f32 %v22634_v19, 0.0  ;;  %v22635_v9 = vld [vmem:[#allocation47_spill] sm:$0xff]  ;;  %v22636_v63 = vld [vmem:[#allocation14_spill] sm:$0xff] }
 0x79f   :  { %10885 = vst [vmem:[%s21581_s7 + $0xc8] sm:$0xff] %v10821_v6  ;;  %10886 = vst [vmem:[%s21581_s7 + $0xd0] sm:$0xff] %v10822_v61  ;;  %v10848_v1 = vmax.f32 %v22635_v9, 0.0  ;;  %v10849_v10 = vmax.f32 %v22636_v63, 0.0  ;;  %v10850_v48 = vmax.f32 %v21280_v39, 0.0  ;;  %v10851_v31 = vmax.f32 %v21284_v14, 0.0 }
 0x7a0   :  { %10887 = vst [vmem:[%s21581_s7 + $0xd8] sm:$0xff] %v10823_v24  ;;  %10888 = vst [vmem:[%s21581_s7 + $0xe0] sm:$0xff] %v10824_v47  ;;  %v10852_v39 = vmax.f32 %v21288_v45, 0.0  ;;  %v10853_v14 = vmax.f32 %v21292_v21, 0.0  ;;  %v22637_v59 = vld [vmem:[#allocation46_spill] sm:$0xff]  ;;  %v22638_v27 = vld [vmem:[#allocation45_spill] sm:$0xff] }
 0x7a1   :  { %10889 = vst [vmem:[%s21581_s7 + $0xe8] sm:$0xff] %v10825_v12  ;;  %10890 = vst [vmem:[%s21581_s7 + $0xf0] sm:$0xff] %v10826_v53  ;;  %v10854_v0 = vmax.f32 %v22637_v59, 0.0  ;;  %v10855_v54 = vmax.f32 %v22638_v27, 0.0  ;;  %v22639_v45 = vld [vmem:[#allocation54_spill] sm:$0xff]  ;;  %v22640_v37 = vld [vmem:[#allocation55_spill] sm:$0xff] }
 0x7a2   :  { %10891 = vst [vmem:[%s21581_s7 + $0xf8] sm:$0xff] %v10827_v26  ;;  %10892 = vst [vmem:[%s21581_s7 + $0x100] sm:$0xff] %v10828_v51  ;;  %v10856_v21 = vmax.f32 %v22639_v45, 0.0  ;;  %v10857_v7 = vmax.f32 %v22640_v37, 0.0  ;;  %v22641_v4 = vld [vmem:[#allocation48_spill] sm:$0xff]  ;;  %v10859_v20 = vmax.f32 %v21316_v57, 0.0 }
 0x7a3   :  { %10893 = vst [vmem:[%s21581_s7 + $0x108] sm:$0xff] %v10829_v56  ;;  %10894 = vst [vmem:[%s21581_s7 + $0x110] sm:$0xff] %v10830_v41  ;;  %v10858_v16 = vmax.f32 %v22641_v4, 0.0 }
 0x7a4   :  { %10895 = vst [vmem:[%s21581_s7 + $0x118] sm:$0xff] %v10831_v38  ;;  %10896 = vst [vmem:[%s21581_s7 + $0x120] sm:$0xff] %v10832_v13 }
 0x7a5   :  { %10897 = vst [vmem:[%s21581_s7 + $0x128] sm:$0xff] %v10833_v36  ;;  %10898 = vst [vmem:[%s21581_s7 + $0x130] sm:$0xff] %v10834_v30 }
 0x7a6   :  { %10899 = vst [vmem:[%s21581_s7 + $0x138] sm:$0xff] %v10835_v15  ;;  %10900 = vst [vmem:[%s21581_s7 + $0x140] sm:$0xff] %v10836_v35 }
 0x7a7   :  { %10901 = vst [vmem:[%s21581_s7 + $0x148] sm:$0xff] %v10837_v50  ;;  %10902 = vst [vmem:[%s21581_s7 + $0x150] sm:$0xff] %v10838_v52 }
 0x7a8   :  { %10903 = vst [vmem:[%s21581_s7 + $0x158] sm:$0xff] %v10839_v58  ;;  %10904 = vst [vmem:[%s21581_s7 + $0x160] sm:$0xff] %v10840_v8 }
 0x7a9   :  { %10905 = vst [vmem:[%s21581_s7 + $0x168] sm:$0xff] %v10841_v33  ;;  %10906 = vst [vmem:[%s21581_s7 + $0x170] sm:$0xff] %v10842_v11 }
 0x7aa   :  { %10907 = vst [vmem:[%s21581_s7 + $0x178] sm:$0xff] %v10843_v34  ;;  %10908 = vst [vmem:[%s21581_s7 + $0x180] sm:$0xff] %v10844_v46 }
 0x7ab   :  { %10909 = vst [vmem:[%s21581_s7 + $0x188] sm:$0xff] %v10845_v40  ;;  %10910 = vst [vmem:[%s21581_s7 + $0x190] sm:$0xff] %v10846_v22 }
 0x7ac   :  { %10911 = vst [vmem:[%s21581_s7 + $0x198] sm:$0xff] %v10847_v25  ;;  %10912 = vst [vmem:[%s21581_s7 + $0x1a0] sm:$0xff] %v10848_v1 }
 0x7ad   :  { %10913 = vst [vmem:[%s21581_s7 + $0x1a8] sm:$0xff] %v10849_v10  ;;  %10914 = vst [vmem:[%s21581_s7 + $0x1b0] sm:$0xff] %v10850_v48 }
 0x7ae   :  { %10915 = vst [vmem:[%s21581_s7 + $0x1b8] sm:$0xff] %v10851_v31  ;;  %10916 = vst [vmem:[%s21581_s7 + $0x1c0] sm:$0xff] %v10852_v39 }
 0x7af   :  { %10917 = vst [vmem:[%s21581_s7 + $0x1c8] sm:$0xff] %v10853_v14  ;;  %10918 = vst [vmem:[%s21581_s7 + $0x1d0] sm:$0xff] %v10854_v0 }
 0x7b0   :  { %10919 = vst [vmem:[%s21581_s7 + $0x1d8] sm:$0xff] %v10855_v54  ;;  %10920 = vst [vmem:[%s21581_s7 + $0x1e0] sm:$0xff] %v10856_v21 }
 0x7b1   :  { %10921 = vst [vmem:[%s21581_s7 + $0x1e8] sm:$0xff] %v10857_v7  ;;  %10922 = vst [vmem:[%s21581_s7 + $0x1f0] sm:$0xff] %v10858_v16 }
 0x7b2   :  { %10923 = vst [vmem:[%s21581_s7 + $0x1f8] sm:$0xff] %v10859_v20 }

</bundles_post_ra>
